<compile_context>
chip_gen: v5e
topology: v5e:2x2
jax: 0.10.0
libtpu: 0.0.40
codegen_flags: <defaults>
</compile_context>

<pallas_src>
import functools

import jax
import jax.numpy as jnp
from jax.experimental import pallas as pl
from jax.experimental.pallas import tpu as pltpu


# ---------------------------------------------------------------------------
# Kernel A: primary capsules + dynamic routing -> vertices, all 3 modalities.
# ---------------------------------------------------------------------------
def _route_one(x, w, n, d_c, routing):
    """x: (T, B, J) f32, w: (T, J, n*d_c) f32 -> vertex (B, n, d_c) f32."""
    # Batched projection over T: caps_flat[t, b, k] = sum_j x[t,b,j] * w[t,j,k]
    caps_flat = jax.lax.dot_general(
        x, w,
        dimension_numbers=(((2,), (1,)), ((0,), (0,))),
        preferred_element_type=jnp.float32)                    # (T, B, n*d_c)
    T, B = caps_flat.shape[0], caps_flat.shape[1]
    caps = caps_flat.reshape(T, B, n, d_c)                     # (T, B, n, d_c)

    b_log = jnp.zeros((T, B, n), jnp.float32)
    vert = jnp.zeros((B, n, d_c), jnp.float32)
    for r in range(routing + 1):                               # static unroll
        # softmax over the vertex axis n
        m = jnp.max(b_log, axis=-1, keepdims=True)
        e = jnp.exp(b_log - m)
        rc = e / jnp.sum(e, axis=-1, keepdims=True)            # (T, B, n)
        vert = jnp.tanh(jnp.sum(caps * rc[..., None], axis=0))  # (B, n, d_c)
        if r < routing:
            b_log = b_log + jnp.sum(vert[None, :, :, :] * caps, axis=-1)
    return vert


def _vertex_kernel(xt_ref, wt_ref, xa_ref, wa_ref, xv_ref, wv_ref, v_ref,
                   *, n, d_c, routing):
    v_ref[0] = _route_one(xt_ref[...], wt_ref[...], n, d_c, routing)
    v_ref[1] = _route_one(xa_ref[...], wa_ref[...], n, d_c, routing)
    v_ref[2] = _route_one(xv_ref[...], wv_ref[...], n, d_c, routing)


# ---------------------------------------------------------------------------
# Kernel B: adjacency, grid over the 3 modalities.
# ---------------------------------------------------------------------------
def _adj_kernel(v_ref, wqk_ref, adj_ref):
    v = v_ref[0]                                   # (B, n, d_c)
    w = wqk_ref[0]                                 # (d_c, 2*d_c); Q pre-scaled
    B, n, d_c = v.shape
    # Fused Q/K projection: one matmul with M = B*n, N = 2*d_c.
    qk = jnp.dot(v.reshape(B * n, d_c), w,
                 preferred_element_type=jnp.float32)           # (B*n, 2*d_c)
    q = qk[:, :d_c].reshape(B, n, d_c)
    k = qk[:, d_c:].reshape(B, n, d_c)
    # Contract on d_c directly (no explicit transpose of K).
    s = jnp.einsum('bqd,bkd->bqk', q, k,
                   preferred_element_type=jnp.float32)         # (B, n, n)
    s = jnp.maximum(s, 0.0)                                    # ReLU
    eye = (jax.lax.broadcasted_iota(jnp.int32, (n, n), 0)
           == jax.lax.broadcasted_iota(jnp.int32, (n, n), 1)).astype(jnp.float32)
    adj_ref[0] = s + eye[None, :, :]


# ---------------------------------------------------------------------------
# Module wrapper
# ---------------------------------------------------------------------------
class CapsuleSequenceToGraph:
    """JAX/Pallas port of the PyTorch CapsuleSequenceToGraph forward pass."""

    def __init__(self, MULT_d, dim_capsule, vertex_num, routing,
                 T_t, T_a, T_v, key):
        self.d_c = dim_capsule
        self.n = vertex_num
        self.routing = routing
        J = 2 * MULT_d
        self._J = J

        def xavier(k, shape):
            if len(shape) > 2:
                rf = 1
                for s in shape[2:]:
                    rf *= s
                fan_in, fan_out = shape[1] * rf, shape[0] * rf
            else:
                fan_in, fan_out = shape[1], shape[0]
            std = (2.0 / (fan_in + fan_out)) ** 0.5
            return (std * jax.random.normal(k, shape)).astype(jnp.float32)

        ks = jax.random.split(key, 9)
        # Parameters in PyTorch layout.
        self.W_tpc = xavier(ks[0], (T_t, self.n, J, self.d_c))
        self.W_apc = xavier(ks[1], (T_a, self.n, J, self.d_c))
        self.W_vpc = xavier(ks[2], (T_v, self.n, J, self.d_c))
        self.WQt = xavier(ks[3], (self.d_c, self.d_c))
        self.WKt = xavier(ks[4], (self.d_c, self.d_c))
        self.WQa = xavier(ks[5], (self.d_c, self.d_c))
        self.WKa = xavier(ks[6], (self.d_c, self.d_c))
        self.WQv = xavier(ks[7], (self.d_c, self.d_c))
        self.WKv = xavier(ks[8], (self.d_c, self.d_c))

        # One-time kernel-layout transforms.
        def to_kernel(W):  # (T, n, J, d_c) -> (T, J, n*d_c)
            T = W.shape[0]
            return jnp.transpose(W, (0, 2, 1, 3)).reshape(T, J, self.n * self.d_c)

        self._Wt_k = to_kernel(self.W_tpc)
        self._Wa_k = to_kernel(self.W_apc)
        self._Wv_k = to_kernel(self.W_vpc)

        inv_d = 1.0 / float(self.d_c)
        fuse = lambda WQ, WK: jnp.concatenate([WQ * inv_d, WK], axis=1)
        self._Wqk = jnp.stack(
            [fuse(self.WQt, self.WKt),
             fuse(self.WQa, self.WKa),
             fuse(self.WQv, self.WKv)], axis=0)        # (3, d_c, 2*d_c)

    def __call__(self, text, audio, video, batch_size=None):
        B = text.shape[1]
        n, d_c = self.n, self.d_c

        vert_kernel = functools.partial(
            _vertex_kernel, n=n, d_c=d_c, routing=self.routing)
        vertices = pl.pallas_call(
            vert_kernel,
            out_shape=jax.ShapeDtypeStruct((3, B, n, d_c), jnp.float32),
            grid_spec=pltpu.PrefetchScalarGridSpec(
                num_scalar_prefetch=0,
                grid=(1,),
                in_specs=[
                    pl.BlockSpec(text.shape, lambda i: (0, 0, 0)),
                    pl.BlockSpec(self._Wt_k.shape, lambda i: (0, 0, 0)),
                    pl.BlockSpec(audio.shape, lambda i: (0, 0, 0)),
                    pl.BlockSpec(self._Wa_k.shape, lambda i: (0, 0, 0)),
                    pl.BlockSpec(video.shape, lambda i: (0, 0, 0)),
                    pl.BlockSpec(self._Wv_k.shape, lambda i: (0, 0, 0)),
                ],
                out_specs=pl.BlockSpec((3, B, n, d_c), lambda i: (0, 0, 0, 0)),
            ),
            compiler_params=pltpu.CompilerParams(
                dimension_semantics=("arbitrary",)),
        )(text, self._Wt_k, audio, self._Wa_k, video, self._Wv_k)

        adj = pl.pallas_call(
            _adj_kernel,
            out_shape=jax.ShapeDtypeStruct((3, B, n, n), jnp.float32),
            grid_spec=pltpu.PrefetchScalarGridSpec(
                num_scalar_prefetch=0,
                grid=(3,),
                in_specs=[
                    pl.BlockSpec((1, B, n, d_c), lambda m: (m, 0, 0, 0)),
                    pl.BlockSpec((1, d_c, 2 * d_c), lambda m: (m, 0, 0)),
                ],
                out_specs=pl.BlockSpec((1, B, n, n), lambda m: (m, 0, 0, 0)),
            ),
            compiler_params=pltpu.CompilerParams(
                dimension_semantics=("parallel",)),
        )(vertices, self._Wqk)

        return (vertices[0], vertices[1], vertices[2], adj[0], adj[1], adj[2])


# ---------------------------------------------------------------------------
# Pure-JAX reference (mirrors the PyTorch forward exactly)
# ---------------------------------------------------------------------------
def _reference_forward(text, audio, video, mod):
    n, d_c, routing = mod.n, mod.d_c, mod.routing

    def pri(x, W):
        return jnp.transpose(jnp.einsum('tbj,tnjd->tbnd', x, W), (1, 0, 2, 3))

    def route(caps):  # caps: (B, T, n, d_c)
        Bsz, T = caps.shape[0], caps.shape[1]
        b = jnp.zeros((Bsz, T, n), jnp.float32)
        vert = None
        for r in range(routing + 1):
            rc = jax.nn.softmax(b, axis=2)
            vert = jnp.tanh(jnp.sum(caps * rc[..., None], axis=1))
            if r < routing:
                b = b + jnp.sum(vert[:, None, :, :] * caps, axis=3)
        return vert

    def adj(vert, WQ, WK):
        Q = vert @ WQ
        K = vert @ WK
        s = jnp.einsum('bqd,bkd->bqk', Q, K) / d_c
        return jnp.eye(n, dtype=jnp.float32) + jax.nn.relu(s)

    tv = route(pri(text, mod.W_tpc))
    av = route(pri(audio, mod.W_apc))
    vv = route(pri(video, mod.W_vpc))
    return (tv, av, vv,
            adj(tv, mod.WQt, mod.WKt),
            adj(av, mod.WQa, mod.WKa),
            adj(vv, mod.WQv, mod.WKv))


if __name__ == "__main__":
    key = jax.random.PRNGKey(0)
    k_param, k_t, k_a, k_v = jax.random.split(key, 4)

    MULT_d = 16                 # feature dim J = 2*MULT_d = 32
    J = 2 * MULT_d
    dim_capsule = 16
    vertex_num = 8
    routing = 3
    T_t = T_a = T_v = 8
    B = 2

    text = jax.random.normal(k_t, (T_t, B, J), dtype=jnp.float32)
    audio = jax.random.normal(k_a, (T_a, B, J), dtype=jnp.float32)
    video = jax.random.normal(k_v, (T_v, B, J), dtype=jnp.float32)

    module = CapsuleSequenceToGraph(MULT_d, dim_capsule, vertex_num, routing,
                                    T_t, T_a, T_v, k_param)
    outs = module(text, audio, video, batch_size=B)
    outs = jax.block_until_ready(outs)
    tv, av, vv, adj_t, adj_a, adj_v = outs

    assert tv.shape == (B, vertex_num, dim_capsule)
    assert adj_t.shape == (B, vertex_num, vertex_num)

    refs = _reference_forward(text, audio, video, module)
    for got, ref in zip(outs, refs):
        assert got.shape == ref.shape
        assert jnp.allclose(got, ref, atol=1e-3, rtol=1e-3)

    print("KERNEL_OK")
</pallas_src>

<mosaic_0001>
module attributes {stable_mosaic.version = 11 : i64} {
  func.func @_vertex_kernel(%arg0: i32, %arg1: memref<8x2x32xf32, #tpu.memory_space<vmem>>, %arg2: memref<8x32x128xf32, #tpu.memory_space<vmem>>, %arg3: memref<8x2x32xf32, #tpu.memory_space<vmem>>, %arg4: memref<8x32x128xf32, #tpu.memory_space<vmem>>, %arg5: memref<8x2x32xf32, #tpu.memory_space<vmem>>, %arg6: memref<8x32x128xf32, #tpu.memory_space<vmem>>, %arg7: memref<3x2x8x16xf32, #tpu.memory_space<vmem>>) attributes {dimension_semantics = [#tpu.dimension_semantics<arbitrary>], iteration_bounds = array<i64: 1>, scalar_prefetch = 0 : i64, scratch_operands = 0 : i64, tpu.core_type = #tpu.core_type<tc>, window_params = [{pipeline_mode = #tpu.pipeline_mode<synchronous>, transform_indices = @transform_0, window_bounds = array<i64: 8, 2, 32>}, {pipeline_mode = #tpu.pipeline_mode<synchronous>, transform_indices = @transform_1, window_bounds = array<i64: 8, 32, 128>}, {pipeline_mode = #tpu.pipeline_mode<synchronous>, transform_indices = @transform_2, window_bounds = array<i64: 8, 2, 32>}, {pipeline_mode = #tpu.pipeline_mode<synchronous>, transform_indices = @transform_3, window_bounds = array<i64: 8, 32, 128>}, {pipeline_mode = #tpu.pipeline_mode<synchronous>, transform_indices = @transform_4, window_bounds = array<i64: 8, 2, 32>}, {pipeline_mode = #tpu.pipeline_mode<synchronous>, transform_indices = @transform_5, window_bounds = array<i64: 8, 32, 128>}, {pipeline_mode = #tpu.pipeline_mode<synchronous>, transform_indices = @transform_6, window_bounds = array<i64: 3, 2, 8, 16>}]} {
    %c0 = arith.constant 0 : index
    %c0_0 = arith.constant 0 : index
    %c0_1 = arith.constant 0 : index
    %0 = vector.load %arg1[%c0, %c0_0, %c0_1] : memref<8x2x32xf32, #tpu.memory_space<vmem>>, vector<8x2x32xf32>
    %c0_2 = arith.constant 0 : index
    %c0_3 = arith.constant 0 : index
    %c0_4 = arith.constant 0 : index
    %1 = vector.load %arg2[%c0_2, %c0_3, %c0_4] : memref<8x32x128xf32, #tpu.memory_space<vmem>>, vector<8x32x128xf32>
    %cst = arith.constant dense<0.000000e+00> : vector<8x2x128xf32>
    %2 = tpu.matmul %0, %1, %cst {dimension_numbers = #tpu.dot_dimension_numbers<[2], [1], [1], [2], [0, 0, 0, 1, 1, 2], [0], [0]>} : vector<8x2x32xf32>, vector<8x32x128xf32>, vector<8x2x128xf32> -> vector<8x2x128xf32>
    %3 = vector.shape_cast %2 : vector<8x2x128xf32> to vector<8x2x8x16xf32>
    %cst_5 = arith.constant 0.000000e+00 : f32
    %4 = vector.broadcast %cst_5 : f32 to vector<8x2x8xf32>
    %cst_6 = arith.constant dense<0xFF800000> : vector<8x2xf32>
    %5 = vector.multi_reduction <maximumf>, %4, %cst_6 [2] : vector<8x2x8xf32> to vector<8x2xf32>
    %6 = vector.shape_cast %5 : vector<8x2xf32> to vector<8x2x1xf32>
    %7 = vector.broadcast %6 : vector<8x2x1xf32> to vector<8x2x8xf32>
    %8 = arith.subf %4, %7 : vector<8x2x8xf32>
    %9 = math.exp %8 : vector<8x2x8xf32>
    %cst_7 = arith.constant dense<0.000000e+00> : vector<8x2xf32>
    %10 = vector.multi_reduction <add>, %9, %cst_7 [2] : vector<8x2x8xf32> to vector<8x2xf32>
    %11 = vector.shape_cast %10 : vector<8x2xf32> to vector<8x2x1xf32>
    %12 = vector.broadcast %11 : vector<8x2x1xf32> to vector<8x2x8xf32>
    %13 = arith.divf %9, %12 : vector<8x2x8xf32>
    %14 = vector.shape_cast %13 : vector<8x2x8xf32> to vector<8x2x8x1xf32>
    %15 = vector.broadcast %14 : vector<8x2x8x1xf32> to vector<8x2x8x16xf32>
    %16 = arith.mulf %3, %15 : vector<8x2x8x16xf32>
    %cst_8 = arith.constant dense<0.000000e+00> : vector<2x8x16xf32>
    %17 = vector.multi_reduction <add>, %16, %cst_8 [0] : vector<8x2x8x16xf32> to vector<2x8x16xf32>
    %18 = math.tanh %17 : vector<2x8x16xf32>
    %19 = vector.shape_cast %18 : vector<2x8x16xf32> to vector<1x2x8x16xf32>
    %20 = vector.broadcast %19 : vector<1x2x8x16xf32> to vector<8x2x8x16xf32>
    %21 = arith.mulf %20, %3 : vector<8x2x8x16xf32>
    %cst_9 = arith.constant dense<0.000000e+00> : vector<8x2x8xf32>
    %22 = vector.multi_reduction <add>, %21, %cst_9 [3] : vector<8x2x8x16xf32> to vector<8x2x8xf32>
    %23 = arith.addf %4, %22 : vector<8x2x8xf32>
    %cst_10 = arith.constant dense<0xFF800000> : vector<8x2xf32>
    %24 = vector.multi_reduction <maximumf>, %23, %cst_10 [2] : vector<8x2x8xf32> to vector<8x2xf32>
    %25 = vector.shape_cast %24 : vector<8x2xf32> to vector<8x2x1xf32>
    %26 = vector.broadcast %25 : vector<8x2x1xf32> to vector<8x2x8xf32>
    %27 = arith.subf %23, %26 : vector<8x2x8xf32>
    %28 = math.exp %27 : vector<8x2x8xf32>
    %cst_11 = arith.constant dense<0.000000e+00> : vector<8x2xf32>
    %29 = vector.multi_reduction <add>, %28, %cst_11 [2] : vector<8x2x8xf32> to vector<8x2xf32>
    %30 = vector.shape_cast %29 : vector<8x2xf32> to vector<8x2x1xf32>
    %31 = vector.broadcast %30 : vector<8x2x1xf32> to vector<8x2x8xf32>
    %32 = arith.divf %28, %31 : vector<8x2x8xf32>
    %33 = vector.shape_cast %32 : vector<8x2x8xf32> to vector<8x2x8x1xf32>
    %34 = vector.broadcast %33 : vector<8x2x8x1xf32> to vector<8x2x8x16xf32>
    %35 = arith.mulf %3, %34 : vector<8x2x8x16xf32>
    %cst_12 = arith.constant dense<0.000000e+00> : vector<2x8x16xf32>
    %36 = vector.multi_reduction <add>, %35, %cst_12 [0] : vector<8x2x8x16xf32> to vector<2x8x16xf32>
    %37 = math.tanh %36 : vector<2x8x16xf32>
    %38 = vector.shape_cast %37 : vector<2x8x16xf32> to vector<1x2x8x16xf32>
    %39 = vector.broadcast %38 : vector<1x2x8x16xf32> to vector<8x2x8x16xf32>
    %40 = arith.mulf %39, %3 : vector<8x2x8x16xf32>
    %cst_13 = arith.constant dense<0.000000e+00> : vector<8x2x8xf32>
    %41 = vector.multi_reduction <add>, %40, %cst_13 [3] : vector<8x2x8x16xf32> to vector<8x2x8xf32>
    %42 = arith.addf %23, %41 : vector<8x2x8xf32>
    %cst_14 = arith.constant dense<0xFF800000> : vector<8x2xf32>
    %43 = vector.multi_reduction <maximumf>, %42, %cst_14 [2] : vector<8x2x8xf32> to vector<8x2xf32>
    %44 = vector.shape_cast %43 : vector<8x2xf32> to vector<8x2x1xf32>
    %45 = vector.broadcast %44 : vector<8x2x1xf32> to vector<8x2x8xf32>
    %46 = arith.subf %42, %45 : vector<8x2x8xf32>
    %47 = math.exp %46 : vector<8x2x8xf32>
    %cst_15 = arith.constant dense<0.000000e+00> : vector<8x2xf32>
    %48 = vector.multi_reduction <add>, %47, %cst_15 [2] : vector<8x2x8xf32> to vector<8x2xf32>
    %49 = vector.shape_cast %48 : vector<8x2xf32> to vector<8x2x1xf32>
    %50 = vector.broadcast %49 : vector<8x2x1xf32> to vector<8x2x8xf32>
    %51 = arith.divf %47, %50 : vector<8x2x8xf32>
    %52 = vector.shape_cast %51 : vector<8x2x8xf32> to vector<8x2x8x1xf32>
    %53 = vector.broadcast %52 : vector<8x2x8x1xf32> to vector<8x2x8x16xf32>
    %54 = arith.mulf %3, %53 : vector<8x2x8x16xf32>
    %cst_16 = arith.constant dense<0.000000e+00> : vector<2x8x16xf32>
    %55 = vector.multi_reduction <add>, %54, %cst_16 [0] : vector<8x2x8x16xf32> to vector<2x8x16xf32>
    %56 = math.tanh %55 : vector<2x8x16xf32>
    %57 = vector.shape_cast %56 : vector<2x8x16xf32> to vector<1x2x8x16xf32>
    %58 = vector.broadcast %57 : vector<1x2x8x16xf32> to vector<8x2x8x16xf32>
    %59 = arith.mulf %58, %3 : vector<8x2x8x16xf32>
    %cst_17 = arith.constant dense<0.000000e+00> : vector<8x2x8xf32>
    %60 = vector.multi_reduction <add>, %59, %cst_17 [3] : vector<8x2x8x16xf32> to vector<8x2x8xf32>
    %61 = arith.addf %42, %60 : vector<8x2x8xf32>
    %cst_18 = arith.constant dense<0xFF800000> : vector<8x2xf32>
    %62 = vector.multi_reduction <maximumf>, %61, %cst_18 [2] : vector<8x2x8xf32> to vector<8x2xf32>
    %63 = vector.shape_cast %62 : vector<8x2xf32> to vector<8x2x1xf32>
    %64 = vector.broadcast %63 : vector<8x2x1xf32> to vector<8x2x8xf32>
    %65 = arith.subf %61, %64 : vector<8x2x8xf32>
    %66 = math.exp %65 : vector<8x2x8xf32>
    %cst_19 = arith.constant dense<0.000000e+00> : vector<8x2xf32>
    %67 = vector.multi_reduction <add>, %66, %cst_19 [2] : vector<8x2x8xf32> to vector<8x2xf32>
    %68 = vector.shape_cast %67 : vector<8x2xf32> to vector<8x2x1xf32>
    %69 = vector.broadcast %68 : vector<8x2x1xf32> to vector<8x2x8xf32>
    %70 = arith.divf %66, %69 : vector<8x2x8xf32>
    %71 = vector.shape_cast %70 : vector<8x2x8xf32> to vector<8x2x8x1xf32>
    %72 = vector.broadcast %71 : vector<8x2x8x1xf32> to vector<8x2x8x16xf32>
    %73 = arith.mulf %3, %72 : vector<8x2x8x16xf32>
    %cst_20 = arith.constant dense<0.000000e+00> : vector<2x8x16xf32>
    %74 = vector.multi_reduction <add>, %73, %cst_20 [0] : vector<8x2x8x16xf32> to vector<2x8x16xf32>
    %75 = math.tanh %74 : vector<2x8x16xf32>
    %c0_21 = arith.constant 0 : index
    %c0_22 = arith.constant 0 : index
    %c0_23 = arith.constant 0 : index
    %c0_24 = arith.constant 0 : index
    %76 = vector.load %arg7[%c0_21, %c0_22, %c0_23, %c0_24] : memref<3x2x8x16xf32, #tpu.memory_space<vmem>>, vector<1x2x8x16xf32>
    %77 = vector.shape_cast %76 : vector<1x2x8x16xf32> to vector<2x8x16xf32>
    %78 = vector.shape_cast %75 : vector<2x8x16xf32> to vector<1x2x8x16xf32>
    tpu.vector_store %arg7[%c0_21, %c0_22, %c0_23, %c0_24], %78 {strides = array<i32>} : memref<3x2x8x16xf32, #tpu.memory_space<vmem>>, vector<1x2x8x16xf32>,
    %c0_25 = arith.constant 0 : index
    %c0_26 = arith.constant 0 : index
    %c0_27 = arith.constant 0 : index
    %79 = vector.load %arg3[%c0_25, %c0_26, %c0_27] : memref<8x2x32xf32, #tpu.memory_space<vmem>>, vector<8x2x32xf32>
    %c0_28 = arith.constant 0 : index
    %c0_29 = arith.constant 0 : index
    %c0_30 = arith.constant 0 : index
    %80 = vector.load %arg4[%c0_28, %c0_29, %c0_30] : memref<8x32x128xf32, #tpu.memory_space<vmem>>, vector<8x32x128xf32>
    %cst_31 = arith.constant dense<0.000000e+00> : vector<8x2x128xf32>
    %81 = tpu.matmul %79, %80, %cst_31 {dimension_numbers = #tpu.dot_dimension_numbers<[2], [1], [1], [2], [0, 0, 0, 1, 1, 2], [0], [0]>} : vector<8x2x32xf32>, vector<8x32x128xf32>, vector<8x2x128xf32> -> vector<8x2x128xf32>
    %82 = vector.shape_cast %81 : vector<8x2x128xf32> to vector<8x2x8x16xf32>
    %cst_32 = arith.constant 0.000000e+00 : f32
    %83 = vector.broadcast %cst_32 : f32 to vector<8x2x8xf32>
    %cst_33 = arith.constant dense<0xFF800000> : vector<8x2xf32>
    %84 = vector.multi_reduction <maximumf>, %83, %cst_33 [2] : vector<8x2x8xf32> to vector<8x2xf32>
    %85 = vector.shape_cast %84 : vector<8x2xf32> to vector<8x2x1xf32>
    %86 = vector.broadcast %85 : vector<8x2x1xf32> to vector<8x2x8xf32>
    %87 = arith.subf %83, %86 : vector<8x2x8xf32>
    %88 = math.exp %87 : vector<8x2x8xf32>
    %cst_34 = arith.constant dense<0.000000e+00> : vector<8x2xf32>
    %89 = vector.multi_reduction <add>, %88, %cst_34 [2] : vector<8x2x8xf32> to vector<8x2xf32>
    %90 = vector.shape_cast %89 : vector<8x2xf32> to vector<8x2x1xf32>
    %91 = vector.broadcast %90 : vector<8x2x1xf32> to vector<8x2x8xf32>
    %92 = arith.divf %88, %91 : vector<8x2x8xf32>
    %93 = vector.shape_cast %92 : vector<8x2x8xf32> to vector<8x2x8x1xf32>
    %94 = vector.broadcast %93 : vector<8x2x8x1xf32> to vector<8x2x8x16xf32>
    %95 = arith.mulf %82, %94 : vector<8x2x8x16xf32>
    %cst_35 = arith.constant dense<0.000000e+00> : vector<2x8x16xf32>
    %96 = vector.multi_reduction <add>, %95, %cst_35 [0] : vector<8x2x8x16xf32> to vector<2x8x16xf32>
    %97 = math.tanh %96 : vector<2x8x16xf32>
    %98 = vector.shape_cast %97 : vector<2x8x16xf32> to vector<1x2x8x16xf32>
    %99 = vector.broadcast %98 : vector<1x2x8x16xf32> to vector<8x2x8x16xf32>
    %100 = arith.mulf %99, %82 : vector<8x2x8x16xf32>
    %cst_36 = arith.constant dense<0.000000e+00> : vector<8x2x8xf32>
    %101 = vector.multi_reduction <add>, %100, %cst_36 [3] : vector<8x2x8x16xf32> to vector<8x2x8xf32>
    %102 = arith.addf %83, %101 : vector<8x2x8xf32>
    %cst_37 = arith.constant dense<0xFF800000> : vector<8x2xf32>
    %103 = vector.multi_reduction <maximumf>, %102, %cst_37 [2] : vector<8x2x8xf32> to vector<8x2xf32>
    %104 = vector.shape_cast %103 : vector<8x2xf32> to vector<8x2x1xf32>
    %105 = vector.broadcast %104 : vector<8x2x1xf32> to vector<8x2x8xf32>
    %106 = arith.subf %102, %105 : vector<8x2x8xf32>
    %107 = math.exp %106 : vector<8x2x8xf32>
    %cst_38 = arith.constant dense<0.000000e+00> : vector<8x2xf32>
    %108 = vector.multi_reduction <add>, %107, %cst_38 [2] : vector<8x2x8xf32> to vector<8x2xf32>
    %109 = vector.shape_cast %108 : vector<8x2xf32> to vector<8x2x1xf32>
    %110 = vector.broadcast %109 : vector<8x2x1xf32> to vector<8x2x8xf32>
    %111 = arith.divf %107, %110 : vector<8x2x8xf32>
    %112 = vector.shape_cast %111 : vector<8x2x8xf32> to vector<8x2x8x1xf32>
    %113 = vector.broadcast %112 : vector<8x2x8x1xf32> to vector<8x2x8x16xf32>
    %114 = arith.mulf %82, %113 : vector<8x2x8x16xf32>
    %cst_39 = arith.constant dense<0.000000e+00> : vector<2x8x16xf32>
    %115 = vector.multi_reduction <add>, %114, %cst_39 [0] : vector<8x2x8x16xf32> to vector<2x8x16xf32>
    %116 = math.tanh %115 : vector<2x8x16xf32>
    %117 = vector.shape_cast %116 : vector<2x8x16xf32> to vector<1x2x8x16xf32>
    %118 = vector.broadcast %117 : vector<1x2x8x16xf32> to vector<8x2x8x16xf32>
    %119 = arith.mulf %118, %82 : vector<8x2x8x16xf32>
    %cst_40 = arith.constant dense<0.000000e+00> : vector<8x2x8xf32>
    %120 = vector.multi_reduction <add>, %119, %cst_40 [3] : vector<8x2x8x16xf32> to vector<8x2x8xf32>
    %121 = arith.addf %102, %120 : vector<8x2x8xf32>
    %cst_41 = arith.constant dense<0xFF800000> : vector<8x2xf32>
    %122 = vector.multi_reduction <maximumf>, %121, %cst_41 [2] : vector<8x2x8xf32> to vector<8x2xf32>
    %123 = vector.shape_cast %122 : vector<8x2xf32> to vector<8x2x1xf32>
    %124 = vector.broadcast %123 : vector<8x2x1xf32> to vector<8x2x8xf32>
    %125 = arith.subf %121, %124 : vector<8x2x8xf32>
    %126 = math.exp %125 : vector<8x2x8xf32>
    %cst_42 = arith.constant dense<0.000000e+00> : vector<8x2xf32>
    %127 = vector.multi_reduction <add>, %126, %cst_42 [2] : vector<8x2x8xf32> to vector<8x2xf32>
    %128 = vector.shape_cast %127 : vector<8x2xf32> to vector<8x2x1xf32>
    %129 = vector.broadcast %128 : vector<8x2x1xf32> to vector<8x2x8xf32>
    %130 = arith.divf %126, %129 : vector<8x2x8xf32>
    %131 = vector.shape_cast %130 : vector<8x2x8xf32> to vector<8x2x8x1xf32>
    %132 = vector.broadcast %131 : vector<8x2x8x1xf32> to vector<8x2x8x16xf32>
    %133 = arith.mulf %82, %132 : vector<8x2x8x16xf32>
    %cst_43 = arith.constant dense<0.000000e+00> : vector<2x8x16xf32>
    %134 = vector.multi_reduction <add>, %133, %cst_43 [0] : vector<8x2x8x16xf32> to vector<2x8x16xf32>
    %135 = math.tanh %134 : vector<2x8x16xf32>
    %136 = vector.shape_cast %135 : vector<2x8x16xf32> to vector<1x2x8x16xf32>
    %137 = vector.broadcast %136 : vector<1x2x8x16xf32> to vector<8x2x8x16xf32>
    %138 = arith.mulf %137, %82 : vector<8x2x8x16xf32>
    %cst_44 = arith.constant dense<0.000000e+00> : vector<8x2x8xf32>
    %139 = vector.multi_reduction <add>, %138, %cst_44 [3] : vector<8x2x8x16xf32> to vector<8x2x8xf32>
    %140 = arith.addf %121, %139 : vector<8x2x8xf32>
    %cst_45 = arith.constant dense<0xFF800000> : vector<8x2xf32>
    %141 = vector.multi_reduction <maximumf>, %140, %cst_45 [2] : vector<8x2x8xf32> to vector<8x2xf32>
    %142 = vector.shape_cast %141 : vector<8x2xf32> to vector<8x2x1xf32>
    %143 = vector.broadcast %142 : vector<8x2x1xf32> to vector<8x2x8xf32>
    %144 = arith.subf %140, %143 : vector<8x2x8xf32>
    %145 = math.exp %144 : vector<8x2x8xf32>
    %cst_46 = arith.constant dense<0.000000e+00> : vector<8x2xf32>
    %146 = vector.multi_reduction <add>, %145, %cst_46 [2] : vector<8x2x8xf32> to vector<8x2xf32>
    %147 = vector.shape_cast %146 : vector<8x2xf32> to vector<8x2x1xf32>
    %148 = vector.broadcast %147 : vector<8x2x1xf32> to vector<8x2x8xf32>
    %149 = arith.divf %145, %148 : vector<8x2x8xf32>
    %150 = vector.shape_cast %149 : vector<8x2x8xf32> to vector<8x2x8x1xf32>
    %151 = vector.broadcast %150 : vector<8x2x8x1xf32> to vector<8x2x8x16xf32>
    %152 = arith.mulf %82, %151 : vector<8x2x8x16xf32>
    %cst_47 = arith.constant dense<0.000000e+00> : vector<2x8x16xf32>
    %153 = vector.multi_reduction <add>, %152, %cst_47 [0] : vector<8x2x8x16xf32> to vector<2x8x16xf32>
    %154 = math.tanh %153 : vector<2x8x16xf32>
    %c1 = arith.constant 1 : index
    %c0_48 = arith.constant 0 : index
    %c0_49 = arith.constant 0 : index
    %c0_50 = arith.constant 0 : index
    %155 = vector.load %arg7[%c1, %c0_48, %c0_49, %c0_50] : memref<3x2x8x16xf32, #tpu.memory_space<vmem>>, vector<1x2x8x16xf32>
    %156 = vector.shape_cast %155 : vector<1x2x8x16xf32> to vector<2x8x16xf32>
    %157 = vector.shape_cast %154 : vector<2x8x16xf32> to vector<1x2x8x16xf32>
    tpu.vector_store %arg7[%c1, %c0_48, %c0_49, %c0_50], %157 {strides = array<i32>} : memref<3x2x8x16xf32, #tpu.memory_space<vmem>>, vector<1x2x8x16xf32>,
    %c0_51 = arith.constant 0 : index
    %c0_52 = arith.constant 0 : index
    %c0_53 = arith.constant 0 : index
    %158 = vector.load %arg5[%c0_51, %c0_52, %c0_53] : memref<8x2x32xf32, #tpu.memory_space<vmem>>, vector<8x2x32xf32>
    %c0_54 = arith.constant 0 : index
    %c0_55 = arith.constant 0 : index
    %c0_56 = arith.constant 0 : index
    %159 = vector.load %arg6[%c0_54, %c0_55, %c0_56] : memref<8x32x128xf32, #tpu.memory_space<vmem>>, vector<8x32x128xf32>
    %cst_57 = arith.constant dense<0.000000e+00> : vector<8x2x128xf32>
    %160 = tpu.matmul %158, %159, %cst_57 {dimension_numbers = #tpu.dot_dimension_numbers<[2], [1], [1], [2], [0, 0, 0, 1, 1, 2], [0], [0]>} : vector<8x2x32xf32>, vector<8x32x128xf32>, vector<8x2x128xf32> -> vector<8x2x128xf32>
    %161 = vector.shape_cast %160 : vector<8x2x128xf32> to vector<8x2x8x16xf32>
    %cst_58 = arith.constant 0.000000e+00 : f32
    %162 = vector.broadcast %cst_58 : f32 to vector<8x2x8xf32>
    %cst_59 = arith.constant dense<0xFF800000> : vector<8x2xf32>
    %163 = vector.multi_reduction <maximumf>, %162, %cst_59 [2] : vector<8x2x8xf32> to vector<8x2xf32>
    %164 = vector.shape_cast %163 : vector<8x2xf32> to vector<8x2x1xf32>
    %165 = vector.broadcast %164 : vector<8x2x1xf32> to vector<8x2x8xf32>
    %166 = arith.subf %162, %165 : vector<8x2x8xf32>
    %167 = math.exp %166 : vector<8x2x8xf32>
    %cst_60 = arith.constant dense<0.000000e+00> : vector<8x2xf32>
    %168 = vector.multi_reduction <add>, %167, %cst_60 [2] : vector<8x2x8xf32> to vector<8x2xf32>
    %169 = vector.shape_cast %168 : vector<8x2xf32> to vector<8x2x1xf32>
    %170 = vector.broadcast %169 : vector<8x2x1xf32> to vector<8x2x8xf32>
    %171 = arith.divf %167, %170 : vector<8x2x8xf32>
    %172 = vector.shape_cast %171 : vector<8x2x8xf32> to vector<8x2x8x1xf32>
    %173 = vector.broadcast %172 : vector<8x2x8x1xf32> to vector<8x2x8x16xf32>
    %174 = arith.mulf %161, %173 : vector<8x2x8x16xf32>
    %cst_61 = arith.constant dense<0.000000e+00> : vector<2x8x16xf32>
    %175 = vector.multi_reduction <add>, %174, %cst_61 [0] : vector<8x2x8x16xf32> to vector<2x8x16xf32>
    %176 = math.tanh %175 : vector<2x8x16xf32>
    %177 = vector.shape_cast %176 : vector<2x8x16xf32> to vector<1x2x8x16xf32>
    %178 = vector.broadcast %177 : vector<1x2x8x16xf32> to vector<8x2x8x16xf32>
    %179 = arith.mulf %178, %161 : vector<8x2x8x16xf32>
    %cst_62 = arith.constant dense<0.000000e+00> : vector<8x2x8xf32>
    %180 = vector.multi_reduction <add>, %179, %cst_62 [3] : vector<8x2x8x16xf32> to vector<8x2x8xf32>
    %181 = arith.addf %162, %180 : vector<8x2x8xf32>
    %cst_63 = arith.constant dense<0xFF800000> : vector<8x2xf32>
    %182 = vector.multi_reduction <maximumf>, %181, %cst_63 [2] : vector<8x2x8xf32> to vector<8x2xf32>
    %183 = vector.shape_cast %182 : vector<8x2xf32> to vector<8x2x1xf32>
    %184 = vector.broadcast %183 : vector<8x2x1xf32> to vector<8x2x8xf32>
    %185 = arith.subf %181, %184 : vector<8x2x8xf32>
    %186 = math.exp %185 : vector<8x2x8xf32>
    %cst_64 = arith.constant dense<0.000000e+00> : vector<8x2xf32>
    %187 = vector.multi_reduction <add>, %186, %cst_64 [2] : vector<8x2x8xf32> to vector<8x2xf32>
    %188 = vector.shape_cast %187 : vector<8x2xf32> to vector<8x2x1xf32>
    %189 = vector.broadcast %188 : vector<8x2x1xf32> to vector<8x2x8xf32>
    %190 = arith.divf %186, %189 : vector<8x2x8xf32>
    %191 = vector.shape_cast %190 : vector<8x2x8xf32> to vector<8x2x8x1xf32>
    %192 = vector.broadcast %191 : vector<8x2x8x1xf32> to vector<8x2x8x16xf32>
    %193 = arith.mulf %161, %192 : vector<8x2x8x16xf32>
    %cst_65 = arith.constant dense<0.000000e+00> : vector<2x8x16xf32>
    %194 = vector.multi_reduction <add>, %193, %cst_65 [0] : vector<8x2x8x16xf32> to vector<2x8x16xf32>
    %195 = math.tanh %194 : vector<2x8x16xf32>
    %196 = vector.shape_cast %195 : vector<2x8x16xf32> to vector<1x2x8x16xf32>
    %197 = vector.broadcast %196 : vector<1x2x8x16xf32> to vector<8x2x8x16xf32>
    %198 = arith.mulf %197, %161 : vector<8x2x8x16xf32>
    %cst_66 = arith.constant dense<0.000000e+00> : vector<8x2x8xf32>
    %199 = vector.multi_reduction <add>, %198, %cst_66 [3] : vector<8x2x8x16xf32> to vector<8x2x8xf32>
    %200 = arith.addf %181, %199 : vector<8x2x8xf32>
    %cst_67 = arith.constant dense<0xFF800000> : vector<8x2xf32>
    %201 = vector.multi_reduction <maximumf>, %200, %cst_67 [2] : vector<8x2x8xf32> to vector<8x2xf32>
    %202 = vector.shape_cast %201 : vector<8x2xf32> to vector<8x2x1xf32>
    %203 = vector.broadcast %202 : vector<8x2x1xf32> to vector<8x2x8xf32>
    %204 = arith.subf %200, %203 : vector<8x2x8xf32>
    %205 = math.exp %204 : vector<8x2x8xf32>
    %cst_68 = arith.constant dense<0.000000e+00> : vector<8x2xf32>
    %206 = vector.multi_reduction <add>, %205, %cst_68 [2] : vector<8x2x8xf32> to vector<8x2xf32>
    %207 = vector.shape_cast %206 : vector<8x2xf32> to vector<8x2x1xf32>
    %208 = vector.broadcast %207 : vector<8x2x1xf32> to vector<8x2x8xf32>
    %209 = arith.divf %205, %208 : vector<8x2x8xf32>
    %210 = vector.shape_cast %209 : vector<8x2x8xf32> to vector<8x2x8x1xf32>
    %211 = vector.broadcast %210 : vector<8x2x8x1xf32> to vector<8x2x8x16xf32>
    %212 = arith.mulf %161, %211 : vector<8x2x8x16xf32>
    %cst_69 = arith.constant dense<0.000000e+00> : vector<2x8x16xf32>
    %213 = vector.multi_reduction <add>, %212, %cst_69 [0] : vector<8x2x8x16xf32> to vector<2x8x16xf32>
    %214 = math.tanh %213 : vector<2x8x16xf32>
    %215 = vector.shape_cast %214 : vector<2x8x16xf32> to vector<1x2x8x16xf32>
    %216 = vector.broadcast %215 : vector<1x2x8x16xf32> to vector<8x2x8x16xf32>
    %217 = arith.mulf %216, %161 : vector<8x2x8x16xf32>
    %cst_70 = arith.constant dense<0.000000e+00> : vector<8x2x8xf32>
    %218 = vector.multi_reduction <add>, %217, %cst_70 [3] : vector<8x2x8x16xf32> to vector<8x2x8xf32>
    %219 = arith.addf %200, %218 : vector<8x2x8xf32>
    %cst_71 = arith.constant dense<0xFF800000> : vector<8x2xf32>
    %220 = vector.multi_reduction <maximumf>, %219, %cst_71 [2] : vector<8x2x8xf32> to vector<8x2xf32>
    %221 = vector.shape_cast %220 : vector<8x2xf32> to vector<8x2x1xf32>
    %222 = vector.broadcast %221 : vector<8x2x1xf32> to vector<8x2x8xf32>
    %223 = arith.subf %219, %222 : vector<8x2x8xf32>
    %224 = math.exp %223 : vector<8x2x8xf32>
    %cst_72 = arith.constant dense<0.000000e+00> : vector<8x2xf32>
    %225 = vector.multi_reduction <add>, %224, %cst_72 [2] : vector<8x2x8xf32> to vector<8x2xf32>
    %226 = vector.shape_cast %225 : vector<8x2xf32> to vector<8x2x1xf32>
    %227 = vector.broadcast %226 : vector<8x2x1xf32> to vector<8x2x8xf32>
    %228 = arith.divf %224, %227 : vector<8x2x8xf32>
    %229 = vector.shape_cast %228 : vector<8x2x8xf32> to vector<8x2x8x1xf32>
    %230 = vector.broadcast %229 : vector<8x2x8x1xf32> to vector<8x2x8x16xf32>
    %231 = arith.mulf %161, %230 : vector<8x2x8x16xf32>
    %cst_73 = arith.constant dense<0.000000e+00> : vector<2x8x16xf32>
    %232 = vector.multi_reduction <add>, %231, %cst_73 [0] : vector<8x2x8x16xf32> to vector<2x8x16xf32>
    %233 = math.tanh %232 : vector<2x8x16xf32>
    %c2 = arith.constant 2 : index
    %c0_74 = arith.constant 0 : index
    %c0_75 = arith.constant 0 : index
    %c0_76 = arith.constant 0 : index
    %234 = vector.load %arg7[%c2, %c0_74, %c0_75, %c0_76] : memref<3x2x8x16xf32, #tpu.memory_space<vmem>>, vector<1x2x8x16xf32>
    %235 = vector.shape_cast %234 : vector<1x2x8x16xf32> to vector<2x8x16xf32>
    %236 = vector.shape_cast %233 : vector<2x8x16xf32> to vector<1x2x8x16xf32>
    tpu.vector_store %arg7[%c2, %c0_74, %c0_75, %c0_76], %236 {strides = array<i32>} : memref<3x2x8x16xf32, #tpu.memory_space<vmem>>, vector<1x2x8x16xf32>,
    return
  }
  func.func @transform_0(%arg0: i32) -> (i32, i32, i32) {
    %c0_i32 = arith.constant 0 : i32
    %c0_i32_0 = arith.constant 0 : i32
    %c0_i32_1 = arith.constant 0 : i32
    %c0_i32_2 = arith.constant 0 : i32
    return %c0_i32, %c0_i32_0, %c0_i32_1 : i32, i32, i32
  }
  func.func @transform_1(%arg0: i32) -> (i32, i32, i32) {
    %c0_i32 = arith.constant 0 : i32
    %c0_i32_0 = arith.constant 0 : i32
    %c0_i32_1 = arith.constant 0 : i32
    %c0_i32_2 = arith.constant 0 : i32
    return %c0_i32, %c0_i32_0, %c0_i32_1 : i32, i32, i32
  }
  func.func @transform_2(%arg0: i32) -> (i32, i32, i32) {
    %c0_i32 = arith.constant 0 : i32
    %c0_i32_0 = arith.constant 0 : i32
    %c0_i32_1 = arith.constant 0 : i32
    %c0_i32_2 = arith.constant 0 : i32
    return %c0_i32, %c0_i32_0, %c0_i32_1 : i32, i32, i32
  }
  func.func @transform_3(%arg0: i32) -> (i32, i32, i32) {
    %c0_i32 = arith.constant 0 : i32
    %c0_i32_0 = arith.constant 0 : i32
    %c0_i32_1 = arith.constant 0 : i32
    %c0_i32_2 = arith.constant 0 : i32
    return %c0_i32, %c0_i32_0, %c0_i32_1 : i32, i32, i32
  }
  func.func @transform_4(%arg0: i32) -> (i32, i32, i32) {
    %c0_i32 = arith.constant 0 : i32
    %c0_i32_0 = arith.constant 0 : i32
    %c0_i32_1 = arith.constant 0 : i32
    %c0_i32_2 = arith.constant 0 : i32
    return %c0_i32, %c0_i32_0, %c0_i32_1 : i32, i32, i32
  }
  func.func @transform_5(%arg0: i32) -> (i32, i32, i32) {
    %c0_i32 = arith.constant 0 : i32
    %c0_i32_0 = arith.constant 0 : i32
    %c0_i32_1 = arith.constant 0 : i32
    %c0_i32_2 = arith.constant 0 : i32
    return %c0_i32, %c0_i32_0, %c0_i32_1 : i32, i32, i32
  }
  func.func @transform_6(%arg0: i32) -> (i32, i32, i32, i32) {
    %c0_i32 = arith.constant 0 : i32
    %c0_i32_0 = arith.constant 0 : i32
    %c0_i32_1 = arith.constant 0 : i32
    %c0_i32_2 = arith.constant 0 : i32
    %c0_i32_3 = arith.constant 0 : i32
    return %c0_i32, %c0_i32_0, %c0_i32_1, %c0_i32_2 : i32, i32, i32, i32
  }
}

</mosaic_0001>

<bundles_post_ra>
// kernel: tpu_custom_call.1
= control target key start
LH: loop header
LB: loop body
LE: loop exit
PB: predicated region body
PF: predicated region fallthrough
CT: control target
= control target key end

     0   :  { %11 = vsyncpa [#allocation3], 0  ;;  %s17110_s0 = inlined_call_operand.hbm [shape: f32[8,2,32], index: 0, kind: input, shape index: {}]   ;;  %s17111_s1 = inlined_call_operand.hbm [shape: f32[8,32,128], index: 1, kind: input, shape index: {}]   ;;  %s17112_s2 = inlined_call_operand.hbm [shape: f32[8,2,32], index: 2, kind: input, shape index: {}]   ;;  %s17113_s3 = inlined_call_operand.hbm [shape: f32[8,32,128], index: 3, kind: input, shape index: {}]   ;;  %s17114_s4 = inlined_call_operand.hbm [shape: f32[8,2,32], index: 4, kind: input, shape index: {}]   ;;  %s17115_s5 = inlined_call_operand.hbm [shape: f32[8,32,128], index: 5, kind: input, shape index: {}]   ;;  %s17116_s6 = inlined_call_operand.hbm [shape: f32[3,2,8,16], index: 6, kind: output, shape index: {}]  }
   0x1   :  { %12 = vsyncpa [#allocation6], 0 }
   0x2   :  { %13 = vsyncpa [#allocation9], 0 }
   0x3   :  { %14 = vsyncpa [#allocation12], 0  ;;  %s33_s23 = sshll.u32 %s17111_s1, 4  ;;  %s34_s23 = int_to_ptr.hbm [resolvable:$true] %s33_s23 }
   0x4   :  { %15 = vsyncpa [#allocation4], 0  ;;  %s10242_s24 = smov [#allocation5]   ;;  %s59_s28 = sshll.u32 %s17113_s3, 4  ;;  %s60_s28 = int_to_ptr.hbm [resolvable:$true] %s59_s28 }
   0x5   :  { %s35_s25 = sshll.u32 %s10242_s24, 4  ;;  %s10243_s29 = smov 128   ;;  %s36_s25 = int_to_ptr.vmem [resolvable:$true] %s35_s25 }
   0x6   :  { %s10244_s30 = smov 8   ;;  %s10245_s7 = smov [#allocation8]  }
   0x7   :  { %41 = dma.hbm_to_vmem [thread:$0]  %s34_s23, 4096, %s36_s25, [#allocation6], %s10243_s29, %s10243_s29, %s10244_s30  }
   0x8   :  { %s61_s8 = sshll.u32 %s10245_s7, 4  ;;  %s20_s10 = sshll.u32 %s17110_s0, 4  ;;  %s62_s8 = int_to_ptr.vmem [resolvable:$true] %s61_s8  ;;  %s21_s10 = int_to_ptr.hbm [resolvable:$true] %s20_s10 }
   0x9   :  { %67 = dma.hbm_to_vmem [thread:$0]  %s60_s28, 4096, %s62_s8, [#allocation9], %s10243_s29, %s10243_s29, %s10244_s30  }
   0xa   :  { %s10246_s3 = smov [#allocation2]   ;;  %s46_s14 = sshll.u32 %s17112_s2, 4  ;;  %s47_s14 = int_to_ptr.hbm [resolvable:$true] %s46_s14 }
   0xb   :  { %s22_s11 = sshll.u32 %s10246_s3, 4  ;;  %s10247_s15 = smov 32   ;;  %s23_s11 = int_to_ptr.vmem [resolvable:$true] %s22_s11 }
   0xc   :  { %s10248_s16 = smov 2   ;;  %s10249_s0 = smov [#allocation7]  }
   0xd   :  { %28 = dma.hbm_to_vmem [thread:$0]  %s21_s10, 256, %s23_s11, [#allocation3], %s10247_s15, %s10247_s15, %s10248_s16  }
   0xe   :  { %s48_s17 = sshll.u32 %s10249_s0, 4  ;;  %s72_s20 = sshll.u32 %s17114_s4, 4  ;;  %s49_s17 = int_to_ptr.vmem [resolvable:$true] %s48_s17  ;;  %s73_s20 = int_to_ptr.hbm [resolvable:$true] %s72_s20 }
   0xf   :  { %54 = dma.hbm_to_vmem [thread:$0]  %s47_s14, 256, %s49_s17, [#allocation6], %s10247_s15, %s10247_s15, %s10248_s16  }
  0x10   :  { %s85_s2 = sshll.u32 %s17115_s5, 4  ;;  %s10250_s23 = smov [#allocation10]   ;;  %s86_s2 = int_to_ptr.hbm [resolvable:$true] %s85_s2 }
  0x11   :  { %s74_s24 = sshll.u32 %s10250_s23, 4  ;;  %s10251_s25 = smov [#allocation11]   ;;  %s75_s24 = int_to_ptr.vmem [resolvable:$true] %s74_s24 }
  0x12   :  { %80 = dma.hbm_to_vmem [thread:$0]  %s73_s20, 256, %s75_s24, [#allocation9], %s10247_s15, %s10247_s15, %s10248_s16  }
  0x13   :  { %s87_s26 = sshll.u32 %s10251_s25, 4  ;;  %s88_s26 = int_to_ptr.vmem [resolvable:$true] %s87_s26 }
  0x14   :  { %93 = dma.hbm_to_vmem [thread:$0]  %s86_s2, 4096, %s88_s26, [#allocation12], %s10243_s29, %s10243_s29, %s10244_s30  }
  0x15   :  { %10232 = dma.done.wait [#allocation3], 256  }
  0x16   :  { %10233 = vsyncadd [#allocation3], 4294967040 }
  0x17   :  { %10234 = dma.done.wait [#allocation6], 4352  }
  0x18   :  { %10235 = vsyncadd [#allocation6], 4294962944 }
  0x19   :  { %10236 = dma.done.wait [#allocation9], 4352  }
  0x1a   :  { %10237 = vsyncadd [#allocation9], 4294962944 }
  0x1b   :  { %10238 = dma.done.wait [#allocation12], 4096  }
  0x1c   :  { %10239 = vsyncadd [#allocation12], 4294963200  ;;  %v129_v0 = vld [vmem:[#allocation5 + $0x18] sm:$0xff]  ;;  %v128_v1 = vld [vmem:[#allocation5 + $0x10] sm:$0xff]  ;;  %vm158_vm0 = vcmask 261120   ;;  %s10252_s4 = smov 80  }
  0x1d   :  { %174 = vmatpush.msra.mxu0 %v129_v0  ;;  %v133_v2 = vld [vmem:[#allocation5 + $0x38] sm:$0xff]  ;;  %v127_v3 = vld [vmem:[#allocation5 + $0x8] sm:$0xff]  ;;  %v132_v4 = vld [vmem:[#allocation5 + $0x30] sm:$0xff]  ;;  %s10253_s5 = smov 96   ;;  %s10254_s27 = smov 112   ;;  %vm840_vm1 = vcmask 64512  }
  0x1e   :  { %197 = vmatpush.msra.mxu1 %v133_v2  ;;  %v131_v5 = vld [vmem:[#allocation5 + $0x28] sm:$0xff]  ;;  %v137_v6 = vld [vmem:[#allocation5 + $0x58] sm:$0xff]  ;;  %v126_v8 = vld [vmem:[#allocation5] sm:$0xff]  ;;  %s10255_s28 = smov 64   ;;  %s10256_s7 = smov 48   ;;  %vm520_vm2 = vcmask 1047556  }
  0x1f   :  { %175 = vmatpush.msra.mxu0 %v128_v1  ;;  %v141_v7 = vld [vmem:[#allocation5 + $0x78] sm:$0xff]  ;;  %220 = vmatpush.msra.mxu2 %v137_v6  ;;  %v136_v9 = vld [vmem:[#allocation5 + $0x50] sm:$0xff]  ;;  %v130_v12 = vld [vmem:[#allocation5 + $0x20] sm:$0xff]  ;;  %s10257_s8 = smov 16   ;;  %vm875_vm5 = vcmask 130048   ;;  %vm1022_vm8 = vcmask 1041409  }
  0x20   :  { %198 = vmatpush.msra.mxu1 %v132_v4  ;;  %v140_v10 = vld [vmem:[#allocation5 + $0x70] sm:$0xff]  ;;  %243 = vmatpush.msra.mxu3 %v141_v7  ;;  %v135_v14 = vld [vmem:[#allocation5 + $0x48] sm:$0xff]  ;;  %v145_v16 = vld [vmem:[#allocation5 + $0x98] sm:$0xff]  ;;  %vm1039_vm9 = vcmask 58368   ;;  %s10262_s9 = smov [#allocation13]   ;;  %s9374_s11 = sshll.u32 %s17116_s6, 4  ;;  %s9375_s11 = int_to_ptr.hbm [resolvable:$true] %s9374_s11 }
  0x21   :  { %176 = vmatpush.msra.mxu0 %v127_v3  ;;  %v118_v11 = vld [vmem:[#allocation2] sm:$0x3]  ;;  %v119_v13 = vld [vmem:[#allocation2 + $0x2] sm:$0x3]  ;;  %221 = vmatpush.msra.mxu2 %v136_v9  ;;  %v139_v15 = vld [vmem:[#allocation5 + $0x68] sm:$0xff]  ;;  %s9372_s1 = sshll.u32 %s10262_s9, 4  ;;  %s9373_s1 = int_to_ptr.vmem [resolvable:$true] %s9372_s1 }
  0x22   :  { %199 = vmatpush.msra.mxu1 %v131_v5  ;;  %244 = vmatpush.msra.mxu3 %v140_v10  ;;  %v134_v17 = vld [vmem:[#allocation5 + $0x40] sm:$0xff]  ;;  %v149_v18 = vld [vmem:[#allocation5 + $0xb8] sm:$0xff]  ;;  %v120_v20 = vld [vmem:[#allocation2 + $0x4] sm:$0x3] }
  0x23   :  { %177 = vmatpush.msra.mxu0 %v126_v8  ;;  %222 = vmatpush.msra.mxu2 %v135_v14  ;;  %v138_v19 = vld [vmem:[#allocation5 + $0x60] sm:$0xff]  ;;  %v121_v21 = vld [vmem:[#allocation2 + $0x6] sm:$0x3]  ;;  %v153_v24 = vld [vmem:[#allocation5 + $0xd8] sm:$0xff] }
  0x24   :  { %9390 = vmatmul.msk.f32.vlgmr.msra.gmra.mxu0 %vm158_vm0, %v118_v11  ;;  %200 = vmatpush.msra.mxu1 %v130_v12  ;;  %v144_v22 = vld [vmem:[#allocation5 + $0x90] sm:$0xff]  ;;  %v143_v25 = vld [vmem:[#allocation5 + $0x88] sm:$0xff]  ;;  %v157_v26 = vld [vmem:[#allocation5 + $0xf8] sm:$0xff] }
  0x25   :  { %9391 = vmatmul.msk.f32.vlgmr.msra.gmra.mxu1 %vm158_vm0, %v119_v13  ;;  %245 = vmatpush.msra.mxu3 %v139_v15  ;;  %v148_v23 = vld [vmem:[#allocation5 + $0xb0] sm:$0xff]  ;;  %v147_v27 = vld [vmem:[#allocation5 + $0xa8] sm:$0xff]  ;;  %v142_v29 = vld [vmem:[#allocation5 + $0x80] sm:$0xff] }
  0x26   :  { %266 = vmatpush.msrb.mxu0 %v145_v16  ;;  %223 = vmatpush.msra.mxu2 %v134_v17  ;;  %v152_v28 = vld [vmem:[#allocation5 + $0xd0] sm:$0xff]  ;;  %v122_v31 = vld [vmem:[#allocation2 + $0x8] sm:$0x3]  ;;  %v146_v32 = vld [vmem:[#allocation5 + $0xa0] sm:$0xff] }
  0x27   :  { %289 = vmatpush.msrb.mxu1 %v149_v18  ;;  %246 = vmatpush.msra.mxu3 %v138_v19  ;;  %v156_v30 = vld [vmem:[#allocation5 + $0xf0] sm:$0xff]  ;;  %v123_v33 = vld [vmem:[#allocation2 + $0xa] sm:$0x3]  ;;  %v151_v34 = vld [vmem:[#allocation5 + $0xc8] sm:$0xff] }
  0x28   :  { %9392 = vmatmul.msk.f32.vlgmr.msra.gmra.mxu2 %vm158_vm0, %v120_v20  ;;  %9393 = vmatmul.msk.f32.vlgmr.msra.gmra.mxu3 %vm158_vm0, %v121_v21  ;;  %v155_v35 = vld [vmem:[#allocation5 + $0xe8] sm:$0xff]  ;;  %v150_v36 = vld [vmem:[#allocation5 + $0xc0] sm:$0xff]  ;;  %v124_v38 = vld [vmem:[#allocation2 + $0xc] sm:$0x3] }
  0x29   :  { %267 = vmatpush.msrb.mxu0 %v144_v22  ;;  %290 = vmatpush.msrb.mxu1 %v148_v23  ;;  %v154_v37 = vld [vmem:[#allocation5 + $0xe0] sm:$0xff]  ;;  %v125_v39 = vld [vmem:[#allocation2 + $0xe] sm:$0x3]  ;;  %v3229_v40 = vld [vmem:[#allocation8 + $0x18] sm:$0xff] }
  0x2a   :  { %312 = vmatpush.msrb.mxu2 %v153_v24  ;;  %335 = vmatpush.msrb.mxu3 %v157_v26  ;;  %v3233_v41 = vld [vmem:[#allocation8 + $0x38] sm:$0xff]  ;;  %v3228_v42 = vld [vmem:[#allocation8 + $0x10] sm:$0xff]  ;;  %v3227_v46 = vld [vmem:[#allocation8 + $0x8] sm:$0xff] }
  0x2b   :  { %268 = vmatpush.msrb.mxu0 %v143_v25  ;;  %291 = vmatpush.msrb.mxu1 %v147_v27  ;;  %v3232_v43 = vld [vmem:[#allocation8 + $0x30] sm:$0xff]  ;;  %v3237_v44 = vld [vmem:[#allocation8 + $0x58] sm:$0xff]  ;;  %v3231_v47 = vld [vmem:[#allocation8 + $0x28] sm:$0xff] }
  0x2c   :  { %313 = vmatpush.msrb.mxu2 %v152_v28  ;;  %336 = vmatpush.msrb.mxu3 %v156_v30  ;;  %v3241_v45 = vld [vmem:[#allocation8 + $0x78] sm:$0xff]  ;;  %v3236_v48 = vld [vmem:[#allocation8 + $0x50] sm:$0xff]  ;;  %v3226_v50 = vld [vmem:[#allocation8] sm:$0xff] }
  0x2d   :  { %269 = vmatpush.msrb.mxu0 %v142_v29  ;;  %292 = vmatpush.msrb.mxu1 %v146_v32  ;;  %v3240_v49 = vld [vmem:[#allocation8 + $0x70] sm:$0xff]  ;;  %v3230_v51 = vld [vmem:[#allocation8 + $0x20] sm:$0xff]  ;;  %v3235_v52 = vld [vmem:[#allocation8 + $0x48] sm:$0xff] }
  0x2e   :  { %9394 = vmatmul.msk.f32.vlgmr.msrb.gmra.mxu0 %vm158_vm0, %v122_v31  ;;  %9395 = vmatmul.msk.f32.vlgmr.msrb.gmra.mxu1 %vm158_vm0, %v123_v33  ;;  %v3239_v53 = vld [vmem:[#allocation8 + $0x68] sm:$0xff]  ;;  %v3218_v54 = vld [vmem:[#allocation7] sm:$0x3]  ;;  %v3219_v55 = vld [vmem:[#allocation7 + $0x2] sm:$0x3] }
  0x2f   :  { %314 = vmatpush.msrb.mxu2 %v151_v34  ;;  %337 = vmatpush.msrb.mxu3 %v155_v35  ;;  %v3234_v56 = vld [vmem:[#allocation8 + $0x40] sm:$0xff]  ;;  %v3245_v58 = vld [vmem:[#allocation8 + $0x98] sm:$0xff]  ;;  %v3220_v59 = vld [vmem:[#allocation7 + $0x4] sm:$0x3] }
  0x30   :  { %3273 = vmatpush.msra.mxu0 %v3229_v40  ;;  %3296 = vmatpush.msra.mxu1 %v3233_v41  ;;  %v3238_v57 = vld [vmem:[#allocation8 + $0x60] sm:$0xff]  ;;  %v3221_v60 = vld [vmem:[#allocation7 + $0x6] sm:$0x3]  ;;  %v3253_v61 = vld [vmem:[#allocation8 + $0xd8] sm:$0xff] }
  0x31   :  { %315 = vmatpush.msrb.mxu2 %v150_v36  ;;  %338 = vmatpush.msrb.mxu3 %v154_v37  ;;  %v3244_v62 = vld [vmem:[#allocation8 + $0x90] sm:$0xff]  ;;  %v3257_v0 = vld [vmem:[#allocation8 + $0xf8] sm:$0xff]  ;;  %v3243_v2 = vld [vmem:[#allocation8 + $0x88] sm:$0xff] }
  0x32   :  { %9396 = vmatmul.msk.f32.vlgmr.msrb.gmra.mxu2 %vm158_vm0, %v124_v38  ;;  %9397 = vmatmul.msk.f32.vlgmr.msrb.gmra.mxu3 %vm158_vm0, %v125_v39  ;;  %v3252_v1 = vld [vmem:[#allocation8 + $0xd0] sm:$0xff]  ;;  %v3251_v4 = vld [vmem:[#allocation8 + $0xc8] sm:$0xff]  ;;  %v3242_v5 = vld [vmem:[#allocation8 + $0x80] sm:$0xff] }
  0x33   :  { %3319 = vmatpush.msra.mxu2 %v3237_v44  ;;  %3342 = vmatpush.msra.mxu3 %v3241_v45  ;;  %v3256_v3 = vld [vmem:[#allocation8 + $0xf0] sm:$0xff]  ;;  %v3255_v6 = vld [vmem:[#allocation8 + $0xe8] sm:$0xff]  ;;  %v3222_v7 = vld [vmem:[#allocation7 + $0x8] sm:$0x3] }
  0x34   :  { %3274 = vmatpush.msra.mxu0 %v3228_v42  ;;  %3297 = vmatpush.msra.mxu1 %v3232_v43  ;;  %v3250_v8 = vld [vmem:[#allocation8 + $0xc0] sm:$0xff]  ;;  %v3224_v11 = vld [vmem:[#allocation7 + $0xc] sm:$0x3]  ;;  %v3225_v12 = vld [vmem:[#allocation7 + $0xe] sm:$0x3] }
  0x35   :  { %3320 = vmatpush.msra.mxu2 %v3236_v48  ;;  %3343 = vmatpush.msra.mxu3 %v3240_v49  ;;  %v3254_v10 = vld [vmem:[#allocation8 + $0xe0] sm:$0xff]  ;;  %v3249_v13 = vld [vmem:[#allocation8 + $0xb8] sm:$0xff]  ;;  %v3248_v14 = vld [vmem:[#allocation8 + $0xb0] sm:$0xff] }
  0x36   :  { %3275 = vmatpush.msra.mxu0 %v3227_v46  ;;  %3298 = vmatpush.msra.mxu1 %v3231_v47  ;;  %v3247_v15 = vld [vmem:[#allocation8 + $0xa8] sm:$0xff]  ;;  %v3246_v16 = vld [vmem:[#allocation8 + $0xa0] sm:$0xff]  ;;  %v3223_v17 = vld [vmem:[#allocation7 + $0xa] sm:$0x3] }
  0x37   :  { %3321 = vmatpush.msra.mxu2 %v3235_v52  ;;  %3344 = vmatpush.msra.mxu3 %v3239_v53 }
  0x38   :  { %3276 = vmatpush.msra.mxu0 %v3226_v50  ;;  %3299 = vmatpush.msra.mxu1 %v3230_v51  ;;  %v10258_v50 = vmov 0.0  }
  0x39   :  { %9398 = vmatmul.msk.f32.vlgmr.msra.gmra.mxu0 %vm158_vm0, %v3218_v54  ;;  %9399 = vmatmul.msk.f32.vlgmr.msra.gmra.mxu1 %vm158_vm0, %v3219_v55  ;;  %v841_v51 = vsel %vm840_vm1, 1.0, %v10258_v50 }
  0x3a   :  { %3322 = vmatpush.msra.mxu2 %v3234_v56  ;;  %3345 = vmatpush.msra.mxu3 %v3238_v57 }
  0x3b   :  { %3365 = vmatpush.msrb.mxu0 %v3245_v58  ;;  %9400 = vmatmul.msk.f32.vlgmr.msra.gmra.mxu2 %vm158_vm0, %v3220_v59 }
  0x3c   :  { %9401 = vmatmul.msk.f32.vlgmr.msra.gmra.mxu3 %vm158_vm0, %v3221_v60  ;;  %3411 = vmatpush.msrb.mxu2 %v3253_v61 }
  0x3d   :  { %3366 = vmatpush.msrb.mxu0 %v3244_v62  ;;  %3434 = vmatpush.msrb.mxu3 %v3257_v0 }
  0x3e   :  { %3412 = vmatpush.msrb.mxu2 %v3252_v1  ;;  %3388 = vmatpush.msrb.mxu1 %v3249_v13 }
  0x3f   :  { %3367 = vmatpush.msrb.mxu0 %v3243_v2  ;;  %3435 = vmatpush.msrb.mxu3 %v3256_v3 }
  0x40   :  { %3413 = vmatpush.msrb.mxu2 %v3251_v4  ;;  %3389 = vmatpush.msrb.mxu1 %v3248_v14 }
  0x41   :  { %3368 = vmatpush.msrb.mxu0 %v3242_v5  ;;  %3436 = vmatpush.msrb.mxu3 %v3255_v6 }
  0x42   :  { %9402 = vmatmul.msk.f32.vlgmr.msrb.gmra.mxu0 %vm158_vm0, %v3222_v7  ;;  %3414 = vmatpush.msrb.mxu2 %v3250_v8 }
  0x43   :  { %3437 = vmatpush.msrb.mxu3 %v3254_v10  ;;  %9404 = vmatmul.msk.f32.vlgmr.msrb.gmra.mxu2 %vm158_vm0, %v3224_v11 }
  0x44   :  { %9405 = vmatmul.msk.f32.vlgmr.msrb.gmra.mxu3 %vm158_vm0, %v3225_v12  ;;  %3390 = vmatpush.msrb.mxu1 %v3247_v15 }
  0x46   :  { %3391 = vmatpush.msrb.mxu1 %v3246_v16 }
  0x47   :  { %9403 = vmatmul.msk.f32.vlgmr.msrb.gmra.mxu1 %vm158_vm0, %v3223_v17 }
  0xa1   :  { %v10342_v63 = vpop.f32.mrf.mxu0 }
  0xa2   :  { %399 = vrot.lane.b32.xlu1 %v10342_v63, %s10252_s4  ;;  %375 = vrot.lane.b32.xlu2 %v10342_v63, %s10253_s5  ;;  %v10351_v9 = vpop.f32.mrf.mxu1 }
  0xa3   :  { %351 = vrot.lane.b32.xlu0 %v10342_v63, %s10254_s27 }
  0xaa   :  { %425 = vrot.lane.b32.xlu1 %v10351_v9, %s10255_s28  ;;  %401 = vrot.lane.b32.xlu2 %v10351_v9, %s10252_s4 }
  0xab   :  { %353 = vrot.lane.b32.xlu0 %v10351_v9, %s10254_s27  ;;  %v10375_v18 = vpop.f32.mrf.mxu2  ;;  %v10377_v19 = vpop.f32.mrf.mxu3 }
  0xac   :  { %v10403_v20 = vpop.f32.mrf.mxu0  ;;  %v10411_v21 = vpop.f32.mrf.mxu1 }
  0xb2   :  { %471 = vrot.lane.b32.xlu1 %v10342_v63, %s10247_s15  ;;  %447 = vrot.lane.b32.xlu2 %v10342_v63, %s10256_s7 }
  0xb3   :  { %377 = vrot.lane.b32.xlu0 %v10351_v9, %s10253_s5 }
  0xb5   :  { %v10443_v22 = vpop.f32.mrf.mxu2  ;;  %v10445_v23 = vpop.f32.mrf.mxu3 }
  0xb6   :  { %17482 = vst [vmem:[#allocation19_spill] sm:$0xff] %v10443_v22  ;;  %v10497_v35 = vpop.f32.mrf.mxu0  ;;  %v10501_v37 = vpop.f32.mrf.mxu1 }
  0xb7   :  { %17483 = vst [vmem:[#allocation20_spill] sm:$0xff] %v10445_v23 }
  0xb8   :  { %17484 = vst [vmem:[#allocation21_spill] sm:$0xff] %v10497_v35 }
  0xb9   :  { %17485 = vst [vmem:[#allocation22_spill] sm:$0xff] %v10501_v37 }
  0xba   :  { %497 = vrot.lane.b32.xlu1 %v10351_v9, %s10257_s8  ;;  %473 = vrot.lane.b32.xlu2 %v10351_v9, %s10247_s15 }
  0xbb   :  { %423 = vrot.lane.b32.xlu0 %v10342_v63, %s10255_s28 }
  0xbe   :  { %v10511_v40 = vpop.f32.mrf.mxu2 }
  0xbf   :  { %v10509_v39 = vpop.f32.mrf.mxu3  ;;  %17487 = vst [vmem:[#allocation24_spill] sm:$0xff] %v10511_v40  ;;  %v10515_v42 = vpop.f32.mrf.mxu0 }
  0xc0   :  { %17486 = vst [vmem:[#allocation23_spill] sm:$0xff] %v10509_v39 }
  0xc1   :  { %17488 = vst [vmem:[#allocation25_spill] sm:$0xff] %v10515_v42 }
  0xc2   :  { %355 = vrot.lane.b32.xlu1 %v10375_v18, %s10254_s27  ;;  %381 = vrot.lane.b32.xlu2 %v10377_v19, %s10253_s5 }
  0xc3   :  { %449 = vrot.lane.b32.xlu0 %v10351_v9, %s10256_s7 }
  0xc4   :  { %v10547_v54 = vpop.f32.mrf.mxu1 }
  0xc5   :  { %17491 = vst [vmem:[#allocation28_spill] sm:$0xff] %v10547_v54 }
  0xc6   :  { %v10527_v46 = vpop.f32.mrf.mxu2 }
  0xc7   :  { %v10525_v45 = vpop.f32.mrf.mxu3  ;;  %17490 = vst [vmem:[#allocation27_spill] sm:$0xff] %v10527_v46 }
  0xc8   :  { %17489 = vst [vmem:[#allocation26_spill] sm:$0xff] %v10525_v45 }
  0xca   :  { %357 = vrot.lane.b32.xlu1 %v10377_v19, %s10254_s27  ;;  %427 = vrot.lane.b32.xlu2 %v10375_v18, %s10255_s28 }
  0xcb   :  { %495 = vrot.lane.b32.xlu0 %v10342_v63, %s10257_s8 }
  0xd2   :  { %379 = vrot.lane.b32.xlu1 %v10375_v18, %s10253_s5  ;;  %453 = vrot.lane.b32.xlu2 %v10377_v19, %s10256_s7 }
  0xd3   :  { %403 = vrot.lane.b32.xlu0 %v10375_v18, %s10252_s4 }
  0xda   :  { %405 = vrot.lane.b32.xlu1 %v10377_v19, %s10252_s4  ;;  %499 = vrot.lane.b32.xlu2 %v10375_v18, %s10257_s8 }
  0xdb   :  { %429 = vrot.lane.b32.xlu0 %v10377_v19, %s10255_s28 }
  0xe2   :  { %451 = vrot.lane.b32.xlu1 %v10375_v18, %s10256_s7  ;;  %359 = vrot.lane.b32.xlu2 %v10403_v20, %s10254_s27 }
  0xe3   :  { %475 = vrot.lane.b32.xlu0 %v10375_v18, %s10247_s15 }
  0xea   :  { %477 = vrot.lane.b32.xlu1 %v10377_v19, %s10247_s15  ;;  %361 = vrot.lane.b32.xlu2 %v10411_v21, %s10254_s27 }
  0xeb   :  { %501 = vrot.lane.b32.xlu0 %v10377_v19, %s10257_s8 }
  0xf2   :  { %385 = vrot.lane.b32.xlu1 %v10411_v21, %s10253_s5  ;;  %407 = vrot.lane.b32.xlu2 %v10403_v20, %s10252_s4 }
  0xf3   :  { %383 = vrot.lane.b32.xlu0 %v10403_v20, %s10253_s5 }
  0xfa   :  { %431 = vrot.lane.b32.xlu1 %v10403_v20, %s10255_s28  ;;  %433 = vrot.lane.b32.xlu2 %v10411_v21, %s10255_s28 }
  0xfb   :  { %409 = vrot.lane.b32.xlu0 %v10411_v21, %s10252_s4 }
  0xfc   :  { %v10453_v24 = vpop.permute.xlu2 %375 }
 0x102   :  { %457 = vrot.lane.b32.xlu1 %v10411_v21, %s10256_s7  ;;  %479 = vrot.lane.b32.xlu2 %v10403_v20, %s10247_s15 }
 0x103   :  { %455 = vrot.lane.b32.xlu0 %v10403_v20, %s10256_s7 }
 0x104   :  { %v10465_v27 = vpop.permute.xlu2 %401 }
 0x10a   :  { %503 = vrot.lane.b32.xlu1 %v10403_v20, %s10257_s8  ;;  %505 = vrot.lane.b32.xlu2 %v10411_v21, %s10257_s8 }
 0x10b   :  { %481 = vrot.lane.b32.xlu0 %v10411_v21, %s10247_s15 }
 0x10c   :  { %v10477_v30 = vpop.permute.xlu2 %447 }
 0x112   :  { %365 = vrot.lane.b32.xlu1 %v10445_v23, %s10254_s27  ;;  %387 = vrot.lane.b32.xlu2 %v10443_v22, %s10253_s5 }
 0x113   :  { %363 = vrot.lane.b32.xlu0 %v10443_v22, %s10254_s27 }
 0x114   :  { %v10457_v26 = vpop.permute.xlu1 %399  ;;  %v10489_v33 = vpop.permute.xlu2 %473 }
 0x115   :  { %v10455_v25 = vpop.permute.xlu0 %351  ;;  %v526_v50 = vrot.slane %v10457_v26, 4 }
 0x11a   :  { %411 = vrot.lane.b32.xlu1 %v10443_v22, %s10252_s4  ;;  %413 = vrot.lane.b32.xlu2 %v10445_v23, %s10252_s4 }
 0x11b   :  { %389 = vrot.lane.b32.xlu0 %v10445_v23, %s10253_s5 }
 0x11c   :  { %v10473_v29 = vpop.permute.xlu1 %425  ;;  %v10507_v38 = vpop.permute.xlu2 %381 }
 0x11d   :  { %v10467_v28 = vpop.permute.xlu0 %353 }
 0x122   :  { %437 = vrot.lane.b32.xlu1 %v10445_v23, %s10255_s28  ;;  %459 = vrot.lane.b32.xlu2 %v10443_v22, %s10256_s7 }
 0x123   :  { %435 = vrot.lane.b32.xlu0 %v10443_v22, %s10255_s28 }
 0x124   :  { %v10487_v32 = vpop.permute.xlu1 %471  ;;  %v10523_v44 = vpop.permute.xlu2 %427 }
 0x125   :  { %v10483_v31 = vpop.permute.xlu0 %377 }
 0x12a   :  { %483 = vrot.lane.b32.xlu1 %v10443_v22, %s10247_s15  ;;  %485 = vrot.lane.b32.xlu2 %v10445_v23, %s10247_s15 }
 0x12b   :  { %461 = vrot.lane.b32.xlu0 %v10445_v23, %s10256_s7 }
 0x12c   :  { %v10499_v36 = vpop.permute.xlu1 %497  ;;  %v10537_v49 = vpop.permute.xlu2 %453 }
 0x12d   :  { %v10495_v34 = vpop.permute.xlu0 %423  ;;  %v578_v26 = vrot.slane %v10499_v36, 4  ;;  %v10260_v36 = vmov 1934713408  }
 0x132   :  { %509 = vrot.lane.b32.xlu1 %v10445_v23, %s10257_s8 }
 0x133   :  { %507 = vrot.lane.b32.xlu0 %v10443_v22, %s10257_s8 }
 0x134   :  { %v10517_v43 = vpop.permute.xlu1 %355  ;;  %v10549_v55 = vpop.permute.xlu2 %499 }
 0x135   :  { %v10513_v41 = vpop.permute.xlu0 %449 }
 0x13a   :  { %3452 = vrot.lane.b32.xlu1 %v10501_v37, %s10254_s27 }
 0x13b   :  { %3450 = vrot.lane.b32.xlu0 %v10497_v35, %s10254_s27 }
 0x13c   :  { %v10533_v48 = vpop.permute.xlu1 %357  ;;  %v10563_v58 = vpop.permute.xlu2 %359 }
 0x13d   :  { %v10529_v47 = vpop.permute.xlu0 %495 }
 0x142   :  { %3458 = vrot.lane.b32.xlu1 %v10515_v42, %s10254_s27 }
 0x143   :  { %3456 = vrot.lane.b32.xlu0 %v10509_v39, %s10254_s27 }
 0x144   :  { %v10545_v53 = vpop.permute.xlu1 %379  ;;  %v10575_v61 = vpop.permute.xlu2 %361 }
 0x145   :  { %v10541_v52 = vpop.permute.xlu0 %403 }
 0x14a   :  { %3464 = vrot.lane.b32.xlu1 %v10525_v45, %s10254_s27 }
 0x14b   :  { %3462 = vrot.lane.b32.xlu0 %v10527_v46, %s10254_s27 }
 0x14c   :  { %v10557_v57 = vpop.permute.xlu1 %405  ;;  %v10587_v1 = vpop.permute.xlu2 %407 }
 0x14d   :  { %v10555_v56 = vpop.permute.xlu0 %429 }
 0x152   :  { %3478 = vrot.lane.b32.xlu1 %v10511_v40, %s10253_s5 }
 0x153   :  { %3476 = vrot.lane.b32.xlu0 %v10501_v37, %s10253_s5  ;;  %842 = vadd.xlane.f32.xlu2 %v841_v51  ;;  %v10259_v51 = vmov 1983009808  }
 0x154   :  { %v10567_v60 = vpop.permute.xlu1 %451  ;;  %v10599_v4 = vpop.permute.xlu2 %433 }
 0x155   :  { %v10565_v59 = vpop.permute.xlu0 %475 }
 0x15a   :  { %3484 = vrot.lane.b32.xlu1 %v10547_v54, %s10253_s5 }
 0x15b   :  { %3482 = vrot.lane.b32.xlu0 %v10515_v42, %s10253_s5 }
 0x15c   :  { %v10581_v0 = vpop.permute.xlu1 %477  ;;  %v10613_v7 = vpop.permute.xlu2 %479 }
 0x15d   :  { %v10577_v62 = vpop.permute.xlu0 %501 }
 0x162   :  { %3498 = vrot.lane.b32.xlu1 %v10497_v35, %s10252_s4 }
 0x163   :  { %3488 = vrot.lane.b32.xlu0 %v10525_v45, %s10253_s5 }
 0x164   :  { %v10597_v3 = vpop.permute.xlu1 %385  ;;  %v10621_v11 = vpop.permute.xlu2 %505 }
 0x165   :  { %v10591_v2 = vpop.permute.xlu0 %383 }
 0x16a   :  { %3504 = vrot.lane.b32.xlu1 %v10509_v39, %s10252_s4 }
 0x16b   :  { %3502 = vrot.lane.b32.xlu0 %v10511_v40, %s10252_s4  ;;  %3454 = vrot.lane.b32.xlu2 %v10511_v40, %s10254_s27 }
 0x16c   :  { %v10609_v6 = vpop.permute.xlu1 %431  ;;  %v10629_v14 = vpop.permute.xlu2 %387 }
 0x16d   :  { %v10607_v5 = vpop.permute.xlu0 %409 }
 0x172   :  { %3510 = vrot.lane.b32.xlu1 %v10527_v46, %s10252_s4 }
 0x173   :  { %3508 = vrot.lane.b32.xlu0 %v10547_v54, %s10252_s4  ;;  %3460 = vrot.lane.b32.xlu2 %v10547_v54, %s10254_s27  ;;  %v527_v54 = vsel %vm520_vm2, %v526_v50, %v10455_v25  ;;  %v606_v50 = vrot.slane %v10541_v52, 4  ;;  %v532_v52 = vrot.slane %v10487_v32, 4 }
 0x174   :  { %v10617_v10 = vpop.permute.xlu1 %457  ;;  %v10637_v17 = vpop.permute.xlu2 %413 }
 0x175   :  { %v10615_v8 = vpop.permute.xlu0 %455  ;;  %v533_v32 = vsel %vm520_vm2, %v532_v52, %v10495_v34  ;;  %v686_v52 = vrot.slane %v10587_v1, 4 }
 0x17a   :  { %3524 = vrot.lane.b32.xlu1 %v10501_v37, %s10255_s28 }
 0x17b   :  { %3474 = vrot.lane.b32.xlu2 %v10497_v35, %s10253_s5  ;;  %3522 = vrot.lane.b32.xlu0 %v10497_v35, %s10255_s28 }
 0x17c   :  { %v10625_v13 = vpop.permute.xlu1 %503  ;;  %v10666_v23 = vpop.permute.xlu2 %459 }
 0x17d   :  { %v10623_v12 = vpop.permute.xlu0 %481 }
 0x182   :  { %3530 = vrot.lane.b32.xlu1 %v10515_v42, %s10255_s28 }
 0x183   :  { %3480 = vrot.lane.b32.xlu2 %v10509_v39, %s10253_s5  ;;  %3528 = vrot.lane.b32.xlu0 %v10509_v39, %s10255_s28  ;;  %v523_v39 = vunpack.c.l.s4 %v10259_v51  ;;  %v560_v51 = vrot.slane %v10483_v31, 4  ;;  %v547_v31 = vunpack.c.l.s4 %v10260_v36 }
 0x184   :  { %v10635_v16 = vpop.permute.xlu1 %365 }
 0x185   :  { %v10631_v15 = vpop.permute.xlu0 %363 }
 0x18b   :  { %3486 = vrot.lane.b32.xlu2 %v10527_v46, %s10253_s5  ;;  %v519_v46 = vrot.slane %v10453_v24, 4  ;;  %v646_v24 = vrot.slane %v10557_v57, 4  ;;  %v640_v57 = vrot.slane %v10507_v38, 4 }
 0x18d   :  { %v10642_v35 = vpop.permute.xlu0 %389 }
 0x193   :  { %3500 = vrot.lane.b32.xlu2 %v10501_v37, %s10252_s4  ;;  %v10647_v37 = vpop.permute.xlu1 %411 }
 0x19b   :  { %3506 = vrot.lane.b32.xlu2 %v10515_v42, %s10252_s4  ;;  %v538_v42 = vrot.slane %v10529_v47, 4  ;;  %v579_v47 = vsel %vm520_vm2, %v578_v26, %v10513_v41  ;;  %v561_v41 = vsel %vm520_vm2, %v560_v51, %v10351_v9  ;;  %v647_v9 = vsel %vm520_vm2, %v646_v24, %v10533_v48  ;;  %v10683_v26 = vpop.permute.xlu0 %435 }
 0x19c   :  { %v10695_v48 = vunpack.c.0.s8 %v547_v31 }
 0x19d   :  { %v539_v25 = vsel %vm520_vm2, %v538_v42, %v10477_v30 }
 0x19e   :  { %17493 = vst [vmem:[#allocation30_spill] sm:$0xff] %v10695_v48 }
 0x1a3   :  { %3512 = vrot.lane.b32.xlu2 %v10525_v45, %s10252_s4  ;;  %v10649_v45 = vunpack.c.0.s8 %v523_v39 }
 0x1a5   :  { %17492 = vst [vmem:[#allocation29_spill] sm:$0xff] %v10649_v45  ;;  %v531_v22 = vperm.slane %v527_v54, %v10649_v45  ;;  %v572_v54 = vrot.slane %v10489_v33, 4  ;;  %v583_v30 = vperm.slane %v579_v47, %v10649_v45  ;;  %v607_v33 = vsel %vm520_vm2, %v606_v50, %v10517_v43 }
 0x1a6   :  { %v600_v43 = vrot.slane %v10545_v53, 4  ;;  %v611_v50 = vperm.slane %v607_v33, %v10649_v45  ;;  %v651_v34 = vperm.slane %v647_v9, %v10649_v45  ;;  %v641_v53 = vsel %vm520_vm2, %v640_v57, %v10377_v19 }
 0x1a7   :  { %v590_v51 = vrot.slane %v583_v30, 4  ;;  %v645_v19 = vperm.slane %v641_v53, %v10649_v45 }
 0x1a8   :  { %v601_v30 = vsel %vm520_vm2, %v600_v43, %v10375_v18 }
 0x1a9   :  { %v605_v18 = vperm.slane %v601_v30, %v10649_v45 }
 0x1ab   :  { %3526 = vrot.lane.b32.xlu2 %v10511_v40, %s10255_s28  ;;  %v566_v40 = vrot.slane %v10465_v27, 4  ;;  %v521_v27 = vsel %vm520_vm2, %v519_v46, %v10342_v63  ;;  %v618_v63 = vrot.slane %v10549_v55, 4  ;;  %v573_v46 = vsel %vm520_vm2, %v572_v54, %v10473_v29 }
 0x1ac   :  { %v612_v29 = vrot.slane %v10565_v59, 4  ;;  %v525_v38 = vperm.slane %v521_v27, %v10649_v45  ;;  %v537_v59 = vperm.slane %v533_v32, %v10649_v45  ;;  %v10723_v32 = vpop.permute.xlu0 %461 }
 0x1ad   :  { %v567_v39 = vsel %vm520_vm2, %v566_v40, %v10467_v28  ;;  %v543_v28 = vperm.slane %v539_v25, %v10649_v45  ;;  %v544_v40 = vrot.slane %v531_v22, 4  ;;  %v565_v22 = vperm.slane %v561_v41, %v10649_v45  ;;  %v10693_v25 = vpop.permute.xlu1 %437 }
 0x1ae   :  { %v571_v42 = vperm.slane %v567_v39, %v10649_v45  ;;  %v619_v55 = vsel %vm520_vm2, %v618_v63, %v10567_v60  ;;  %v577_v60 = vperm.slane %v573_v46, %v10649_v45  ;;  %v613_v31 = vsel %vm520_vm2, %v612_v29, %v10523_v44  ;;  %v10714_v63 = vpop.permute.xlu2 %485 }
 0x1af   :  { %v550_v47 = vrot.slane %v543_v28, 4  ;;  %v545_v24 = vsel %vm520_vm2, %v544_v40, %v525_v38  ;;  %v623_v27 = vperm.slane %v619_v55, %v10649_v45  ;;  %v624_v40 = vrot.slane %v611_v50, 4 }
 0x1b0   :  { %v584_v39 = vrot.slane %v571_v42, 4  ;;  %v591_v54 = vsel %vm520_vm2, %v590_v51, %v577_v60  ;;  %v549_v28 = vperm.slane %v545_v24, %v10695_v48  ;;  %v664_v42 = vrot.slane %v651_v34, 4 }
 0x1b1   :  { %v551_v41 = vsel %vm520_vm2, %v550_v47, %v537_v59  ;;  %v630_v44 = vrot.slane %v623_v27, 4  ;;  %v617_v57 = vperm.slane %v613_v31, %v10649_v45  ;;  %v595_v33 = vperm.slane %v591_v54, %v10695_v48 }
 0x1b2   :  { %v585_v36 = vsel %vm520_vm2, %v584_v39, %v565_v22  ;;  %v555_v9 = vperm.slane %v551_v41, %v10695_v48  ;;  %v658_v22 = vrot.slane %v10577_v62, 4  ;;  %v625_v1 = vsel %vm520_vm2, %v624_v40, %v605_v18 }
 0x1b3   :  { %v589_v46 = vperm.slane %v585_v36, %v10695_v48  ;;  %v665_v55 = vsel %vm520_vm2, %v664_v42, %v645_v19  ;;  %v687_v29 = vsel %vm520_vm2, %v686_v52, %v10563_v58  ;;  %v726_v38 = vrot.slane %v10607_v5, 4 }
 0x1b4   :  { %v558_v51 = vrot.slane %v549_v28, 4  ;;  %v631_v47 = vsel %vm520_vm2, %v630_v44, %v617_v57  ;;  %v596_v50 = vrot.slane %v595_v33, 4  ;;  %v556_v34 = vrot.slane %v555_v9, 4  ;;  %v508_v57 = vpop.permute.xlu0 %507 }
 0x1b5   :  { %v10731_v43 = vpop.permute.xlu1 %483  ;;  %v598_v39 = vrot.slane %v589_v46, 4  ;;  %v659_v62 = vsel %vm520_vm2, %v658_v22, %v10537_v49  ;;  %v629_v24 = vperm.slane %v625_v1, %v10695_v48  ;;  %v10737_v60 = vperm.slane %v665_v55, %v10695_v48 }
 0x1b6   :  { %v691_v58 = vperm.slane %v687_v29, %v10649_v45  ;;  %v680_v5 = vrot.slane %v10591_v2, 4  ;;  %v635_v59 = vperm.slane %v631_v47, %v10695_v48  ;;  %v652_v27 = vrot.slane %v10581_v0, 4 }
 0x1b7   :  { %v727_v53 = vsel %vm520_vm2, %v726_v38, %v10575_v61  ;;  %v698_v36 = vrot.slane %v10625_v13, 4  ;;  %v663_v49 = vperm.slane %v659_v62, %v10649_v45  ;;  %v738_v54 = vrot.slane %v10621_v11, 4 }
 0x1b8   :  { %v732_v41 = vrot.slane %v10623_v12, 4  ;;  %v10753_v2 = vsel %vm520_vm2, %v595_v33, %v598_v39  ;;  %v720_v0 = vrot.slane %v10597_v3, 4  ;;  %v10757_v30 = vsel %vm520_vm2, %v596_v50, %v589_v46 }
 0x1b9   :  { %17494 = vst [vmem:[#allocation31_spill] sm:$0xff] %v10753_v2  ;;  %v10760_v61 = vsel %vm520_vm2, %v555_v9, %v558_v51  ;;  %v10763_v13 = vsel %vm520_vm2, %v556_v34, %v549_v28  ;;  %v681_v11 = vsel %vm520_vm2, %v680_v5, %v10403_v20  ;;  %v731_v12 = vperm.slane %v727_v53, %v10649_v45 }
 0x1ba   :  { %17495 = vst [vmem:[#allocation32_spill] sm:$0xff] %v10757_v30  ;;  %v739_v40 = vsel %vm520_vm2, %v738_v54, %v10617_v10  ;;  %v638_v42 = vrot.slane %v629_v24, 4  ;;  %v704_v52 = vrot.slane %v691_v58, 4  ;;  %v653_v3 = vsel %vm520_vm2, %v652_v27, %v10555_v56 }
 0x1bb   :  { %17496 = vst [vmem:[#allocation33_spill] sm:$0xff] %v10760_v61  ;;  %v699_v19 = vsel %vm520_vm2, %v698_v36, %v10615_v8  ;;  %v678_v46 = vrot.slane %v10737_v60, 4  ;;  %v636_v28 = vrot.slane %v635_v59, 4  ;;  %v670_v44 = vrot.slane %v663_v49, 4 }
 0x1bc   :  { %17497 = vst [vmem:[#allocation34_spill] sm:$0xff] %v10763_v13  ;;  %v733_v20 = vsel %vm520_vm2, %v732_v41, %v10599_v4  ;;  %v692_v33 = vrot.slane %v10613_v7, 4  ;;  %v721_v10 = vsel %vm520_vm2, %v720_v0, %v10411_v21  ;;  %v685_v9 = vperm.slane %v681_v11, %v10649_v45 }
 0x1bd   :  { %v743_v56 = vperm.slane %v739_v40, %v10649_v45  ;;  %v10783_v8 = vsel %vm520_vm2, %v635_v59, %v638_v42  ;;  %v657_v22 = vperm.slane %v653_v3, %v10649_v45  ;;  %v744_v1 = vrot.slane %v731_v12, 4  ;;  %v510_v4 = vpop.permute.xlu1 %509 }
 0x1be   :  { %17498 = vst [vmem:[#allocation35_spill] sm:$0xff] %v10783_v8  ;;  %v703_v55 = vperm.slane %v699_v19, %v10649_v45  ;;  %v693_v7 = vsel %vm520_vm2, %v692_v33, %v10609_v6  ;;  %v737_v29 = vperm.slane %v733_v20, %v10649_v45  ;;  %v778_v21 = vrot.slane %v508_v57, 4  ;;  %v17502_v20 = vld [vmem:[#allocation20_spill] sm:$0xff] }
 0x1bf   :  { %v10792_v51 = vsel %vm520_vm2, %v636_v28, %v629_v24  ;;  %v671_v47 = vsel %vm520_vm2, %v670_v44, %v657_v22  ;;  %v725_v39 = vperm.slane %v721_v10, %v10649_v45  ;;  %v766_v50 = vrot.slane %v10647_v37, 4 }
 0x1c0   :  { %17499 = vst [vmem:[#allocation36_spill] sm:$0xff] %v10792_v51  ;;  %v705_v34 = vsel %vm520_vm2, %v704_v52, %v685_v9  ;;  %v750_v62 = vrot.slane %v743_v56, 4  ;;  %v818_v58 = vrot.slane %v510_v4, 4  ;;  %v697_v6 = vperm.slane %v693_v7, %v10649_v45 }
 0x1c1   :  { %v745_v59 = vsel %vm520_vm2, %v744_v1, %v725_v39  ;;  %v806_v27 = vrot.slane %v10637_v17, 4  ;;  %v710_v53 = vrot.slane %v703_v55, 4  ;;  %v779_v36 = vsel %vm520_vm2, %v778_v21, %v10666_v23 }
 0x1c2   :  { %v751_v24 = vsel %vm520_vm2, %v750_v62, %v737_v29  ;;  %v767_v37 = vsel %vm520_vm2, %v766_v50, %v10631_v15  ;;  %v800_v54 = vrot.slane %v10642_v35, 4  ;;  %v772_v41 = vrot.slane %v10731_v43, 4 }
 0x1c3   :  { %v819_v17 = vsel %vm520_vm2, %v818_v58, %v10723_v32  ;;  %v675_v23 = vperm.slane %v671_v47, %v10695_v48  ;;  %v709_v40 = vperm.slane %v705_v34, %v10695_v48  ;;  %v760_v15 = vrot.slane %v10629_v14, 4 }
 0x1c4   :  { %v783_v35 = vperm.slane %v779_v36, %v10649_v45  ;;  %v749_v32 = vperm.slane %v745_v59, %v10695_v48  ;;  %v711_v42 = vsel %vm520_vm2, %v710_v53, %v697_v6  ;;  %v755_v3 = vperm.slane %v751_v24, %v10695_v48 }
 0x1c5   :  { %v771_v14 = vperm.slane %v767_v37, %v10649_v45  ;;  %v823_v19 = vperm.slane %v819_v17, %v10649_v45  ;;  %v812_v44 = vrot.slane %v10714_v63, 4  ;;  %v801_v57 = vsel %vm520_vm2, %v800_v54, %v17502_v20 }
 0x1c6   :  { %v10746_v31 = vpop.xlane.xlu2 %842  ;;  %v773_v33 = vsel %vm520_vm2, %v772_v41, %v10683_v26  ;;  %v790_v56 = vrot.slane %v783_v35, 4  ;;  %v676_v22 = vrot.slane %v675_v23, 4  ;;  %v718_v1 = vrot.slane %v709_v40, 4 }
 0x1c7   :  { %9438 = vrcp.f32 %v10746_v31  ;;  %v855_v0 = vand.u32 2147483648, %v10746_v31  ;;  %vm849_vm4 = vweird.f32 %v10746_v31  ;;  %v853_v12 = vand.u32 2147483647, %v10746_v31 }
 0x1c8   :  { %v715_v55 = vperm.slane %v711_v42, %v10695_v48  ;;  %v813_v63 = vsel %vm520_vm2, %v812_v44, %v10693_v25  ;;  %v784_v4 = vrot.slane %v771_v14, 4  ;;  %v805_v7 = vperm.slane %v801_v57, %v10649_v45 }
 0x1c9   :  { %v856_v28 = vor.u32 1.1754944e-38, %v855_v0  ;;  %vm854_vm7 = vcmp.eq.f32.partialorder %v853_v12, 8.507059e+37  ;;  %v777_v26 = vperm.slane %v773_v33, %v10649_v45  ;;  %v830_v29 = vrot.slane %v823_v19, 4 }
 0x1ca   :  { %v758_v21 = vrot.slane %v749_v32, 4  ;;  %v756_v47 = vrot.slane %v755_v3, 4  ;;  %v817_v34 = vperm.slane %v813_v63, %v10649_v45  ;;  %v10854_v58 = vsel %vm520_vm2, %v676_v22, %v10737_v60 }
 0x1cb   :  { %v791_v62 = vsel %vm520_vm2, %v790_v56, %v777_v26  ;;  %v716_v6 = vrot.slane %v715_v55, 4 }
 0x1cc   :  { %v10862_v59 = vsel %vm520_vm2, %v755_v3, %v758_v21  ;;  %v831_v36 = vsel %vm520_vm2, %v830_v29, %v817_v34  ;;  %v10877_v54 = vsel %vm520_vm2, %v756_v47, %v749_v32 }
 0x1cd   :  { %v9439_v18 = vpop.eup %9438  ;;  %17507 = vst [vmem:[#allocation38_spill] sm:$0xff] %v10862_v59 }
 0x1ce   :  { %v845_v38 = vmul.f32 %v9439_v18, %v10746_v31  ;;  %vm850_vm3 = vweird.f32 %v9439_v18  ;;  %v807_v31 = vsel %vm520_vm2, %v806_v27, %v10635_v16  ;;  %v17503_v16 = vld [vmem:[#allocation19_spill] sm:$0xff]  ;;  %v10865_v27 = vsel %vm520_vm2, %v715_v55, %v718_v1  ;;  %17509 = vst [vmem:[#allocation40_spill] sm:$0xff] %v10877_v54 }
 0x1cf   :  { %vm10817_vm6 = vmor %vm849_vm4, %vm850_vm3  ;;  %v761_v10 = vsel %vm520_vm2, %v760_v15, %v17503_v16  ;;  %v811_v9 = vperm.slane %v807_v31, %v10649_v45  ;;  %17505 = vst [vmem:[#allocation19_spill] sm:$0xff] %v10854_v58  ;;  %v10894_v31 = vsel %vm520_vm2, %v716_v6, %v709_v40 }
 0x1d0   :  { %v846_v5 = vsub.f32 1.0, %v845_v38  ;;  %v765_v38 = vperm.slane %v761_v10, %v10649_v45  ;;  %17508 = vst [vmem:[#allocation39_spill] sm:$0xff] %v10865_v27 }
 0x1d1   :  { %v824_v50 = vrot.slane %v811_v9, 4  ;;  %17510 = vst [vmem:[#allocation41_spill] sm:$0xff] %v10894_v31 }
 0x1d2   :  { %v847_v49 = vmul.f32 %v9439_v18, %v846_v5  ;;  %v10859_v5 = vsel %vm520_vm2, %v675_v23, %v678_v46  ;;  %v785_v53 = vsel %vm520_vm2, %v784_v4, %v765_v38  ;;  %v835_v23 = vperm.slane %v831_v36, %v10695_v48 }
 0x1d3   :  { %17506 = vst [vmem:[#allocation37_spill] sm:$0xff] %v10859_v5  ;;  %v825_v24 = vsel %vm520_vm2, %v824_v50, %v805_v7 }
 0x1d4   :  { %v848_v11 = vadd.f32 %v9439_v18, %v847_v49  ;;  %v795_v49 = vperm.slane %v791_v62, %v10695_v48  ;;  %v829_v12 = vperm.slane %v825_v24, %v10695_v48  ;;  %v836_v16 = vrot.slane %v835_v23, 4 }
 0x1d6   :  { %v852_v52 = vsel %vm10817_vm6, %v9439_v18, %v848_v11  ;;  %v789_v11 = vperm.slane %v785_v53, %v10695_v48  ;;  %v838_v33 = vrot.slane %v829_v12, 4  ;;  %v10921_v38 = vsel %vm520_vm2, %v836_v16, %v829_v12 }
 0x1d7   :  { %v10838_v18 = vsel %vm854_vm7, %v856_v28, %v852_v52  ;;  %v796_v52 = vrot.slane %v795_v49, 4  ;;  %17513 = vst [vmem:[#allocation44_spill] sm:$0xff] %v10921_v38 }
 0x1d8   :  { %17504 = vst [vmem:[#allocation20_spill] sm:$0xff] %v10838_v18  ;;  %v859_v39 = vmul.f32 %v10838_v18, %v10763_v13  ;;  %v862_v25 = vmul.f32 %v10838_v18, %v10753_v2  ;;  %v863_v60 = vmul.f32 %v10838_v18, %v10792_v51  ;;  %v861_v46 = vmul.f32 %v10838_v18, %v10757_v30 }
 0x1d9   :  { %v864_v41 = vmul.f32 %v10838_v18, %v10783_v8  ;;  %v860_v17 = vmul.f32 %v10838_v18, %v10760_v61  ;;  %v865_v35 = vmul.f32 %v10838_v18, %v10854_v58  ;;  %v866_v43 = vmul.f32 %v10838_v18, %v10859_v5 }
 0x1da   :  { %v876_v37 = vsel %vm875_vm5, %v859_v39, 0.0  ;;  %v892_v0 = vsel %vm875_vm5, %v862_v25, 0.0  ;;  %v877_v15 = vsel %vm875_vm5, %v861_v46, 0.0  ;;  %v879_v3 = vsel %vm875_vm5, %v863_v60, 0.0 }
 0x1db   :  { %v878_v32 = vadd.f32 %v877_v15, %v876_v37  ;;  %v891_v42 = vsel %vm875_vm5, %v860_v17, 0.0  ;;  %v867_v19 = vmul.f32 %v10838_v18, %v10894_v31  ;;  %v868_v28 = vmul.f32 %v10838_v18, %v10865_v27 }
 0x1dc   :  { %v893_v14 = vadd.f32 %v892_v0, %v891_v42  ;;  %v894_v44 = vsel %vm875_vm5, %v864_v41, 0.0  ;;  %v798_v57 = vrot.slane %v789_v11, 4  ;;  %v869_v40 = vmul.f32 %v10838_v18, %v10877_v54 }
 0x1dd   :  { %v880_v20 = vadd.f32 %v879_v3, %v878_v32  ;;  %v870_v9 = vmul.f32 %v10838_v18, %v10862_v59  ;;  %v881_v56 = vsel %vm875_vm5, %v865_v35, 0.0  ;;  %v896_v22 = vsel %vm875_vm5, %v866_v43, 0.0 }
 0x1de   :  { %v895_v10 = vadd.f32 %v894_v44, %v893_v14  ;;  %v10909_v1 = vsel %vm520_vm2, %v796_v52, %v789_v11  ;;  %v10912_v55 = vsel %vm520_vm2, %v795_v49, %v798_v57  ;;  %v883_v29 = vsel %vm875_vm5, %v867_v19, 0.0 }
 0x1df   :  { %17511 = vst [vmem:[#allocation42_spill] sm:$0xff] %v10909_v1  ;;  %v882_v63 = vadd.f32 %v881_v56, %v880_v20  ;;  %v871_v7 = vmul.f32 %v10838_v18, %v10909_v1  ;;  %v872_v26 = vmul.f32 %v10838_v18, %v10912_v55  ;;  %v898_v21 = vsel %vm875_vm5, %v868_v28, 0.0 }
 0x1e0   :  { %17512 = vst [vmem:[#allocation43_spill] sm:$0xff] %v10912_v55  ;;  %v897_v4 = vadd.f32 %v896_v22, %v895_v10  ;;  %v10924_v47 = vsel %vm520_vm2, %v835_v23, %v838_v33  ;;  %v873_v34 = vmul.f32 %v10838_v18, %v10921_v38  ;;  %v885_v25 = vsel %vm875_vm5, %v869_v40, 0.0 }
 0x1e1   :  { %17514 = vst [vmem:[#allocation45_spill] sm:$0xff] %v10924_v47  ;;  %v884_v39 = vadd.f32 %v883_v29, %v882_v63  ;;  %v874_v62 = vmul.f32 %v10838_v18, %v10924_v47  ;;  %v900_v6 = vsel %vm875_vm5, %v870_v9, 0.0  ;;  %v887_v36 = vsel %vm875_vm5, %v871_v7, 0.0  ;;  %v10957_v63 = vpop.permute.xlu0 %3450  ;;  %v10962_v29 = vpop.permute.xlu2 %3454 }
 0x1e2   :  { %v899_v50 = vadd.f32 %v898_v21, %v897_v4  ;;  %v902_v49 = vsel %vm875_vm5, %v872_v26, 0.0  ;;  %v889_v37 = vsel %vm875_vm5, %v873_v34, 0.0 }
 0x1e3   :  { %v886_v53 = vadd.f32 %v885_v25, %v884_v39  ;;  %v904_v41 = vsel %vm875_vm5, %v874_v62, 0.0 }
 0x1e4   :  { %v901_v24 = vadd.f32 %v900_v6, %v899_v50  ;;  %v10966_v50 = vpop.permute.xlu1 %3452 }
 0x1e5   :  { %v888_v60 = vadd.f32 %v887_v36, %v886_v53 }
 0x1e6   :  { %v903_v46 = vadd.f32 %v902_v49, %v901_v24 }
 0x1e7   :  { %v890_v0 = vadd.f32 %v889_v37, %v888_v60 }
 0x1e8   :  { %v905_v17 = vadd.f32 %v904_v41, %v903_v46 }
 0x1e9   :  { %9440 = vtanh.f32 %v890_v0  ;;  %v10971_v6 = vpop.permute.xlu0 %3456  ;;  %v10975_v36 = vpop.permute.xlu2 %3460 }
 0x1ea   :  { %9442 = vtanh.f32 %v905_v17  ;;  %v17515_v17 = vld [vmem:[#allocation27_spill] sm:$0xff] }
 0x1ec   :  { %v10977_v49 = vpop.permute.xlu1 %3458 }
 0x1ef   :  { %v9441_v11 = vpop.eup %9440 }
 0x1f0   :  { %v9443_v12 = vpop.eup %9442  ;;  %v910_v23 = vmul.f32 %v9441_v11, %v10757_v30  ;;  %v908_v15 = vmul.f32 %v9441_v11, %v10763_v13  ;;  %v912_v3 = vmul.f32 %v9441_v11, %v10792_v51  ;;  %v914_v20 = vmul.f32 %v9441_v11, %v10854_v58 }
 0x1f1   :  { %v909_v35 = vmul.f32 %v9443_v12, %v10760_v61  ;;  %v911_v52 = vmul.f32 %v9443_v12, %v10753_v2  ;;  %v913_v14 = vmul.f32 %v9443_v12, %v10783_v8  ;;  %v915_v57 = vmul.f32 %v9443_v12, %v10859_v5  ;;  %v10980_v46 = vpop.permute.xlu0 %3462  ;;  %v10982_v37 = vpop.permute.xlu2 %3474 }
 0x1f2   :  { %v930_v43 = vsel %vm875_vm5, %v910_v23, 0.0  ;;  %v924_v32 = vsel %vm875_vm5, %v908_v15, 0.0  ;;  %v936_v28 = vsel %vm875_vm5, %v912_v3, 0.0  ;;  %v916_v33 = vmul.f32 %v9441_v11, %v10894_v31  ;;  %v17516_v23 = vld [vmem:[#allocation26_spill] sm:$0xff]  ;;  %v17520_v3 = vld [vmem:[#allocation25_spill] sm:$0xff] }
 0x1f3   :  { %931 = vadd.xlane.f32.xlu2 %v930_v43  ;;  %925 = vadd.xlane.f32.xlu0 %v924_v32  ;;  %v927_v42 = vsel %vm875_vm5, %v909_v35, 0.0  ;;  %v933_v19 = vsel %vm875_vm5, %v911_v52, 0.0  ;;  %v939_v44 = vsel %vm875_vm5, %v913_v14, 0.0  ;;  %v942_v16 = vsel %vm875_vm5, %v914_v20, 0.0  ;;  %v17517_v15 = vld [vmem:[#allocation22_spill] sm:$0xff]  ;;  %v17518_v43 = vld [vmem:[#allocation28_spill] sm:$0xff] }
 0x1f4   :  { %928 = vadd.xlane.f32.xlu1 %v927_v42  ;;  %v945_v10 = vsel %vm875_vm5, %v915_v57, 0.0  ;;  %v948_v40 = vsel %vm875_vm5, %v916_v33, 0.0  ;;  %v917_v9 = vmul.f32 %v9443_v12, %v10865_v27  ;;  %v918_v56 = vmul.f32 %v9441_v11, %v10877_v54  ;;  %v10984_v41 = vpop.permute.xlu1 %3464  ;;  %v17519_v32 = vld [vmem:[#allocation24_spill] sm:$0xff]  ;;  %v17522_v20 = vld [vmem:[#allocation23_spill] sm:$0xff] }
 0x1f5   :  { %v919_v22 = vmul.f32 %v9443_v12, %v10862_v59  ;;  %v920_v21 = vmul.f32 %v9441_v11, %v10909_v1  ;;  %v921_v39 = vmul.f32 %v9443_v12, %v10912_v55  ;;  %v922_v34 = vmul.f32 %v9441_v11, %v10921_v38 }
 0x1f6   :  { %v951_v4 = vsel %vm875_vm5, %v917_v9, 0.0  ;;  %v954_v7 = vsel %vm875_vm5, %v918_v56, 0.0  ;;  %v923_v24 = vmul.f32 %v9443_v12, %v10924_v47  ;;  %v1004_v55 = vlaneseq }
 0x1f7   :  { %v957_v26 = vsel %vm875_vm5, %v919_v22, 0.0  ;;  %v960_v62 = vsel %vm875_vm5, %v920_v21, 0.0  ;;  %v963_v25 = vsel %vm875_vm5, %v921_v39, 0.0  ;;  %v966_v53 = vsel %vm875_vm5, %v922_v34, 0.0 }
 0x1f8   :  { %v969_v60 = vsel %vm875_vm5, %v923_v24, 0.0  ;;  %v11100_v38 = vand.u32 127, %v1004_v55 }
 0x1f9   :  { %v10986_v0 = vpop.permute.xlu0 %3476  ;;  %v10990_v11 = vpop.permute.xlu2 %3480 }
 0x1fa   :  { %17533 = vst [vmem:[#allocation48_spill] sm:$0xff] %v11100_v38 }
 0x1fb   :  { %934 = vadd.xlane.f32.xlu2 %v933_v19  ;;  %937 = vadd.xlane.f32.xlu0 %v936_v28  ;;  %v17521_v19 = vld [vmem:[#allocation21_spill] sm:$0xff] }
 0x1fc   :  { %940 = vadd.xlane.f32.xlu1 %v939_v44  ;;  %v10992_v12 = vpop.permute.xlu1 %3478 }
 0x201   :  { %v10998_v35 = vpop.permute.xlu0 %3482  ;;  %v11004_v42 = vpop.permute.xlu2 %3486 }
 0x203   :  { %943 = vadd.xlane.f32.xlu2 %v942_v16  ;;  %946 = vadd.xlane.f32.xlu0 %v945_v10 }
 0x204   :  { %949 = vadd.xlane.f32.xlu1 %v948_v40  ;;  %v11006_v52 = vpop.permute.xlu1 %3484 }
 0x209   :  { %v11010_v14 = vpop.permute.xlu0 %3488  ;;  %v11020_v44 = vpop.permute.xlu2 %3500 }
 0x20b   :  { %952 = vadd.xlane.f32.xlu2 %v951_v4  ;;  %955 = vadd.xlane.f32.xlu0 %v954_v7 }
 0x20c   :  { %958 = vadd.xlane.f32.xlu1 %v957_v26  ;;  %v11016_v28 = vpop.permute.xlu1 %3498 }
 0x211   :  { %v11024_v57 = vpop.permute.xlu0 %3502  ;;  %v11032_v16 = vpop.permute.xlu2 %3506 }
 0x213   :  { %961 = vadd.xlane.f32.xlu2 %v960_v62  ;;  %964 = vadd.xlane.f32.xlu0 %v963_v25 }
 0x214   :  { %967 = vadd.xlane.f32.xlu1 %v966_v53  ;;  %v11030_v33 = vpop.permute.xlu1 %3504 }
 0x219   :  { %v11038_v10 = vpop.permute.xlu0 %3508  ;;  %v11046_v9 = vpop.permute.xlu2 %3512 }
 0x21b   :  { %970 = vadd.xlane.f32.xlu2 %v969_v60 }
 0x21c   :  { %v11042_v40 = vpop.permute.xlu1 %3510 }
 0x221   :  { %v11050_v56 = vpop.permute.xlu0 %3522  ;;  %v11060_v4 = vpop.permute.xlu2 %3526 }
 0x224   :  { %v11056_v22 = vpop.permute.xlu1 %3524 }
 0x227   :  { %3534 = vrot.lane.b32.xlu0 %v17515_v17, %s10255_s28 }
 0x229   :  { %v11064_v7 = vpop.permute.xlu0 %3528 }
 0x22c   :  { %v11072_v21 = vpop.permute.xlu1 %3530 }
 0x22d   :  { %3536 = vrot.lane.b32.xlu1 %v17516_v23, %s10255_s28 }
 0x22f   :  { %3548 = vrot.lane.b32.xlu0 %v17517_v15, %s10256_s7 }
 0x233   :  { %3532 = vrot.lane.b32.xlu2 %v17518_v43, %s10255_s28 }
 0x235   :  { %3550 = vrot.lane.b32.xlu1 %v17519_v32, %s10256_s7 }
 0x237   :  { %3554 = vrot.lane.b32.xlu0 %v17520_v3, %s10256_s7 }
 0x23b   :  { %3546 = vrot.lane.b32.xlu2 %v17521_v19, %s10256_s7 }
 0x23d   :  { %3556 = vrot.lane.b32.xlu1 %v17518_v43, %s10256_s7 }
 0x23f   :  { %3560 = vrot.lane.b32.xlu0 %v17516_v23, %s10256_s7 }
 0x243   :  { %3552 = vrot.lane.b32.xlu2 %v17522_v20, %s10256_s7 }
 0x245   :  { %3570 = vrot.lane.b32.xlu1 %v17521_v19, %s10247_s15 }
 0x247   :  { %3574 = vrot.lane.b32.xlu0 %v17519_v32, %s10247_s15 }
 0x24b   :  { %3558 = vrot.lane.b32.xlu2 %v17515_v17, %s10256_s7 }
 0x24d   :  { %3576 = vrot.lane.b32.xlu1 %v17522_v20, %s10247_s15 }
 0x24f   :  { %3580 = vrot.lane.b32.xlu0 %v17518_v43, %s10247_s15 }
 0x253   :  { %3572 = vrot.lane.b32.xlu2 %v17517_v15, %s10247_s15 }
 0x255   :  { %3582 = vrot.lane.b32.xlu1 %v17515_v17, %s10247_s15 }
 0x257   :  { %3594 = vrot.lane.b32.xlu0 %v17521_v19, %s10257_s8 }
 0x25b   :  { %3578 = vrot.lane.b32.xlu2 %v17520_v3, %s10247_s15 }
 0x25d   :  { %3596 = vrot.lane.b32.xlu1 %v17517_v15, %s10257_s8 }
 0x25f   :  { %3600 = vrot.lane.b32.xlu0 %v17522_v20, %s10257_s8 }
 0x263   :  { %3584 = vrot.lane.b32.xlu2 %v17516_v23, %s10247_s15 }
 0x265   :  { %3602 = vrot.lane.b32.xlu1 %v17520_v3, %s10257_s8 }
 0x266   :  { %v11070_v26 = vpop.xlane.xlu2 %931  ;;  %v11076_v39 = vpop.xlane.xlu0 %925 }
 0x267   :  { %17523 = vst [vmem:[#allocation27_spill] sm:$0xff] %v11070_v26  ;;  %3606 = vrot.lane.b32.xlu0 %v17515_v17, %s10257_s8  ;;  %v11084_v62 = vpop.xlane.xlu1 %928  ;;  %v1006_v27 = vperm.slane %v11076_v39, %v11100_v38  ;;  %v1008_v51 = vperm.slane %v11070_v26, %v11100_v38 }
 0x268   :  { %17524 = vst [vmem:[#allocation26_spill] sm:$0xff] %v11076_v39  ;;  %v1007_v5 = vperm.slane %v11084_v62, %v11100_v38 }
 0x269   :  { %17526 = vst [vmem:[#allocation28_spill] sm:$0xff] %v11084_v62 }
 0x26a   :  { %v1023_v8 = vsel %vm1022_vm8, %v1007_v5, %v1006_v27 }
 0x26b   :  { %3598 = vrot.lane.b32.xlu2 %v17519_v32, %s10257_s8  ;;  %v1040_v61 = vsel %vm1039_vm9, %v1023_v8, -inf }
 0x26d   :  { %3608 = vrot.lane.b32.xlu1 %v17516_v23, %s10257_s8 }
 0x26e   :  { %v11082_v34 = vpop.xlane.xlu2 %934  ;;  %v11086_v25 = vpop.xlane.xlu0 %937 }
 0x26f   :  { %17525 = vst [vmem:[#allocation22_spill] sm:$0xff] %v11082_v34  ;;  %v11092_v24 = vpop.xlane.xlu1 %940  ;;  %v1009_v55 = vperm.slane %v11082_v34, %v11100_v38  ;;  %v1010_v27 = vperm.slane %v11086_v25, %v11100_v38 }
 0x270   :  { %17527 = vst [vmem:[#allocation24_spill] sm:$0xff] %v11086_v25  ;;  %v1011_v8 = vperm.slane %v11092_v24, %v11100_v38  ;;  %v3824_v25 = vrot.slane %v11038_v10, 4  ;;  %v3904_v10 = vrot.slane %v11046_v9, 4 }
 0x271   :  { %17529 = vst [vmem:[#allocation21_spill] sm:$0xff] %v11092_v24  ;;  %v1024_v5 = vsel %vm1022_vm8, %v1009_v55, %v1008_v51  ;;  %v3864_v24 = vrot.slane %v11042_v40, 4 }
 0x272   :  { %v1025_v51 = vsel %vm1022_vm8, %v1011_v8, %v1010_v27 }
 0x273   :  { %3604 = vrot.lane.b32.xlu2 %v17518_v43, %s10257_s8 }
 0x276   :  { %v11090_v53 = vpop.xlane.xlu2 %943  ;;  %v11094_v60 = vpop.xlane.xlu0 %946 }
 0x277   :  { %17528 = vst [vmem:[#allocation25_spill] sm:$0xff] %v11090_v53  ;;  %v11098_v1 = vpop.xlane.xlu1 %949  ;;  %v1012_v2 = vperm.slane %v11090_v53, %v11100_v38  ;;  %v1013_v30 = vperm.slane %v11094_v60, %v11100_v38  ;;  %v1043_v53 = vsel %vm1039_vm9, %v1024_v5, -inf }
 0x278   :  { %17530 = vst [vmem:[#allocation23_spill] sm:$0xff] %v11094_v60  ;;  %v1014_v55 = vperm.slane %v11098_v1, %v11100_v38 }
 0x279   :  { %17532 = vst [vmem:[#allocation47_spill] sm:$0xff] %v11098_v1  ;;  %v1026_v34 = vsel %vm1022_vm8, %v1013_v30, %v1012_v2 }
 0x27e   :  { %v11096_v47 = vpop.xlane.xlu2 %952  ;;  %v11104_v54 = vpop.xlane.xlu0 %955 }
 0x27f   :  { %17531 = vst [vmem:[#allocation46_spill] sm:$0xff] %v11096_v47  ;;  %v11110_v31 = vpop.xlane.xlu1 %958  ;;  %v1015_v60 = vperm.slane %v11096_v47, %v11100_v38  ;;  %v1046_v47 = vsel %vm1039_vm9, %v1025_v51, -inf }
 0x280   :  { %17535 = vst [vmem:[#allocation50_spill] sm:$0xff] %v11104_v54  ;;  %v1017_v27 = vperm.slane %v11110_v31, %v11100_v38 }
 0x281   :  { %17536 = vst [vmem:[#allocation51_spill] sm:$0xff] %v11110_v31 }
 0x286   :  { %v11102_v59 = vpop.xlane.xlu2 %961  ;;  %v11124_v13 = vpop.xlane.xlu0 %964 }
 0x287   :  { %17534 = vst [vmem:[#allocation49_spill] sm:$0xff] %v11102_v59  ;;  %v11137_v62 = vpop.xlane.xlu1 %967  ;;  %v1018_v2 = vperm.slane %v11102_v59, %v11100_v38  ;;  %v1019_v30 = vperm.slane %v11124_v13, %v11100_v38 }
 0x288   :  { %17538 = vst [vmem:[#allocation53_spill] sm:$0xff] %v11124_v13 }
 0x289   :  { %17539 = vst [vmem:[#allocation54_spill] sm:$0xff] %v11137_v62  ;;  %v1029_v8 = vsel %vm1022_vm8, %v1019_v30, %v1018_v2 }
 0x28e   :  { %v11113_v58 = vpop.xlane.xlu2 %970 }
 0x28f   :  { %17537 = vst [vmem:[#allocation52_spill] sm:$0xff] %v11113_v58 }
 0x291   :  { %1041 = vmax.xlane.f32.xlu0 %v1040_v61  ;;  %v1049_v61 = vsel %vm1039_vm9, %v1026_v34, -inf  ;;  %v1016_v34 = vperm.slane %v11104_v54, %v11100_v38  ;;  %v1020_v54 = vperm.slane %v11137_v62, %v11100_v38 }
 0x296   :  { %v11132_v26 = vpop.permute.xlu2 %3532 }
 0x297   :  { %1044 = vmax.xlane.f32.xlu1 %v1043_v53  ;;  %v1027_v53 = vsel %vm1022_vm8, %v1015_v60, %v1014_v55  ;;  %v1058_v60 = vsel %vm1039_vm9, %v1029_v8, -inf  ;;  %v1028_v55 = vsel %vm1022_vm8, %v1017_v27, %v1016_v34 }
 0x298   :  { %v1052_v13 = vsel %vm1039_vm9, %v1027_v53, -inf  ;;  %v1055_v2 = vsel %vm1039_vm9, %v1028_v55, -inf }
 0x299   :  { %v11147_v5 = vpop.permute.xlu0 %3534  ;;  %1050 = vmax.xlane.f32.xlu0 %v1049_v61  ;;  %v1021_v61 = vperm.slane %v11113_v58, %v11100_v38 }
 0x29b   :  { %v1030_v30 = vsel %vm1022_vm8, %v1021_v61, %v1020_v54  ;;  %v3704_v54 = vrot.slane %v11024_v57, 4  ;;  %v3698_v61 = vrot.slane %v10992_v12, 4 }
 0x29c   :  { %1047 = vmax.xlane.f32.xlu2 %v1046_v47 }
 0x29d   :  { %v3705_v12 = vsel %vm520_vm2, %v3704_v54, %v10962_v29  ;;  %v3825_v29 = vsel %vm520_vm2, %v3824_v25, %v10975_v36  ;;  %v3738_v54 = vrot.slane %v10990_v11, 4 }
 0x29e   :  { %v11156_v59 = vpop.permute.xlu2 %3546  ;;  %v3829_v11 = vperm.slane %v3825_v29, %v10649_v45 }
 0x29f   :  { %1053 = vmax.xlane.f32.xlu1 %v1052_v13  ;;  %v11161_v51 = vpop.permute.xlu1 %3536  ;;  %v1061_v13 = vsel %vm1039_vm9, %v1030_v30, -inf  ;;  %v3618_v30 = vrot.slane %v10982_v37, 4  ;;  %v3699_v37 = vsel %vm520_vm2, %v3698_v61, %v17519_v32  ;;  %v3865_v32 = vsel %vm520_vm2, %v3864_v24, %v10980_v46 }
 0x2a0   :  { %v3818_v61 = vrot.slane %v11006_v52, 4  ;;  %v3905_v46 = vsel %vm520_vm2, %v3904_v10, %v10984_v41  ;;  %v3869_v52 = vperm.slane %v3865_v32, %v10649_v45 }
 0x2a1   :  { %v11167_v47 = vpop.permute.xlu0 %3548  ;;  %1059 = vmax.xlane.f32.xlu0 %v1058_v60  ;;  %v3624_v60 = vrot.slane %v11016_v28, 4  ;;  %v3664_v28 = vrot.slane %v11020_v44, 4  ;;  %v3619_v40 = vsel %vm520_vm2, %v3618_v30, %v17521_v19  ;;  %v3778_v19 = vrot.slane %v10998_v35, 4 }
 0x2a2   :  { %v3739_v35 = vsel %vm520_vm2, %v3738_v54, %v17522_v20  ;;  %v3819_v20 = vsel %vm520_vm2, %v3818_v61, %v17518_v43 }
 0x2a3   :  { %v3625_v55 = vsel %vm520_vm2, %v3624_v60, %v10957_v63  ;;  %v3658_v60 = vrot.slane %v10986_v0, 4  ;;  %v3709_v0 = vperm.slane %v3705_v12, %v10649_v45  ;;  %v3665_v9 = vsel %vm520_vm2, %v3664_v28, %v10966_v50 }
 0x2a4   :  { %1056 = vmax.xlane.f32.xlu2 %v1055_v2  ;;  %v3629_v57 = vperm.slane %v3625_v55, %v10649_v45  ;;  %v3623_v50 = vperm.slane %v3619_v40, %v10649_v45  ;;  %v3779_v28 = vsel %vm520_vm2, %v3778_v19, %v17520_v3  ;;  %v3909_v12 = vperm.slane %v3905_v46, %v10649_v45 }
 0x2a5   :  { %v3659_v30 = vsel %vm520_vm2, %v3658_v60, %v17517_v15  ;;  %v3743_v10 = vperm.slane %v3739_v35, %v10649_v45  ;;  %v3882_v40 = vrot.slane %v3869_v52, 4  ;;  %v3823_v43 = vperm.slane %v3819_v20, %v10649_v45 }
 0x2a6   :  { %v11171_v53 = vpop.permute.xlu2 %3552  ;;  %v3642_v55 = vrot.slane %v3629_v57, 4  ;;  %v3663_v54 = vperm.slane %v3659_v30, %v10649_v45 }
 0x2a7   :  { %1062 = vmax.xlane.f32.xlu1 %v1061_v13  ;;  %v11174_v58 = vpop.permute.xlu1 %3550  ;;  %v3744_v13 = vrot.slane %v11030_v33, 4  ;;  %v3784_v33 = vrot.slane %v11032_v16, 4  ;;  %v3858_v16 = vrot.slane %v11004_v42, 4 }
 0x2a9   :  { %v11176_v8 = vpop.permute.xlu0 %3554  ;;  %v3745_v44 = vsel %vm520_vm2, %v3744_v13, %v10971_v6  ;;  %v3898_v6 = vrot.slane %v11010_v14, 4  ;;  %v3785_v25 = vsel %vm520_vm2, %v3784_v33, %v10977_v49  ;;  %v3669_v14 = vperm.slane %v3665_v9, %v10649_v45 }
 0x2aa   :  { %v3749_v36 = vperm.slane %v3745_v44, %v10649_v45  ;;  %v3703_v49 = vperm.slane %v3699_v37, %v10649_v45  ;;  %v3722_v13 = vrot.slane %v3709_v0, 4  ;;  %v3859_v41 = vsel %vm520_vm2, %v3858_v16, %v17515_v17 }
 0x2ab   :  { %v3789_v57 = vperm.slane %v3785_v25, %v10649_v45  ;;  %v3899_v15 = vsel %vm520_vm2, %v3898_v6, %v17516_v23  ;;  %v3842_v37 = vrot.slane %v3829_v11, 4  ;;  %v3643_v17 = vsel %vm520_vm2, %v3642_v55, %v3623_v50 }
 0x2ac   :  { %v3762_v60 = vrot.slane %v3749_v36, 4  ;;  %v3863_v3 = vperm.slane %v3859_v41, %v10649_v45  ;;  %v3682_v44 = vrot.slane %v3669_v14, 4  ;;  %v3723_v29 = vsel %vm520_vm2, %v3722_v13, %v3703_v49 }
 0x2ad   :  { %v3783_v0 = vperm.slane %v3779_v28, %v10649_v45  ;;  %v3802_v32 = vrot.slane %v3789_v57, 4  ;;  %v3922_v23 = vrot.slane %v3909_v12, 4  ;;  %v3903_v16 = vperm.slane %v3899_v15, %v10649_v45 }
 0x2ae   :  { %v11178_v34 = vpop.permute.xlu2 %3558  ;;  %v11263_v9 = vperm.slane %v3643_v17, %v10695_v48  ;;  %v3843_v19 = vsel %vm520_vm2, %v3842_v37, %v3823_v43  ;;  %v3763_v61 = vsel %vm520_vm2, %v3762_v60, %v3743_v10  ;;  %v11270_v55 = vperm.slane %v3723_v29, %v10695_v48 }
 0x2af   :  { %v11180_v27 = vpop.permute.xlu1 %3556  ;;  %v3883_v36 = vsel %vm520_vm2, %v3882_v40, %v3863_v3  ;;  %v3683_v11 = vsel %vm520_vm2, %v3682_v44, %v3663_v54  ;;  %v11278_v50 = vperm.slane %v3843_v19, %v10695_v48  ;;  %v11281_v35 = vperm.slane %v3763_v61, %v10695_v48 }
 0x2b0   :  { %v3803_v52 = vsel %vm520_vm2, %v3802_v32, %v3783_v0  ;;  %v3923_v14 = vsel %vm520_vm2, %v3922_v23, %v3903_v16  ;;  %v11286_v49 = vperm.slane %v3883_v36, %v10695_v48  ;;  %v11289_v13 = vperm.slane %v3683_v11, %v10695_v48 }
 0x2b1   :  { %v11182_v62 = vpop.permute.xlu0 %3560  ;;  %v3736_v28 = vrot.slane %v11270_v55, 4  ;;  %v3656_v20 = vrot.slane %v11263_v9, 4  ;;  %v11297_v12 = vperm.slane %v3803_v52, %v10695_v48  ;;  %v11300_v15 = vperm.slane %v3923_v14, %v10695_v48 }
 0x2b2   :  { %v3776_v10 = vrot.slane %v11281_v35, 4  ;;  %v3696_v3 = vrot.slane %v11289_v13, 4 }
 0x2b3   :  { %v3936_v23 = vrot.slane %v11300_v15, 4 }
 0x2b6   :  { %v11189_v2 = vpop.permute.xlu2 %3572 }
 0x2b7   :  { %v11194_v31 = vpop.permute.xlu1 %3570 }
 0x2b8   :  { %v3630_v25 = vrot.slane %v11194_v31, 4  ;;  %v3670_v31 = vrot.slane %v11189_v2, 4  ;;  %v3856_v2 = vrot.slane %v11278_v50, 4 }
 0x2b9   :  { %v11201_v63 = vpop.permute.xlu0 %3574 }
 0x2ba   :  { %v3631_v57 = vsel %vm520_vm2, %v3630_v25, %v11050_v56  ;;  %v3710_v60 = vrot.slane %v11201_v63, 4  ;;  %v3896_v56 = vrot.slane %v11286_v49, 4  ;;  %v3671_v44 = vsel %vm520_vm2, %v3670_v31, %v11056_v22 }
 0x2bb   :  { %v3635_v63 = vperm.slane %v3631_v57, %v10649_v45  ;;  %v3675_v22 = vperm.slane %v3671_v44, %v10649_v45 }
 0x2bc   :  { %v3711_v16 = vsel %vm520_vm2, %v3710_v60, %v11060_v4 }
 0x2bd   :  { %v3715_v14 = vperm.slane %v3711_v16, %v10649_v45 }
 0x2be   :  { %v11230_v42 = vpop.permute.xlu2 %3578 }
 0x2bf   :  { %v11237_v24 = vpop.permute.xlu1 %3576  ;;  %v3790_v17 = vrot.slane %v11230_v42, 4  ;;  %v3816_v42 = vrot.slane %v11297_v12, 4 }
 0x2c1   :  { %v11250_v33 = vpop.permute.xlu0 %3580  ;;  %v11323_v61 = vsel %vm520_vm2, %v3790_v17, %v11072_v21 }
 0x2c2   :  { %v3830_v29 = vrot.slane %v11250_v33, 4 }
 0x2c6   :  { %v11267_v6 = vpop.permute.xlu2 %3584 }
 0x2c7   :  { %v11275_v46 = vpop.permute.xlu1 %3582 }
 0x2c9   :  { %v3595_v30 = vpop.permute.xlu0 %3594 }
 0x2ca   :  { %v3636_v41 = vrot.slane %v3595_v30, 4  ;;  %v3831_v30 = vsel %vm520_vm2, %v3830_v29, %v11132_v26 }
 0x2cb   :  { %v3835_v26 = vperm.slane %v3831_v30, %v10649_v45 }
 0x2cc   :  { %v3637_v37 = vsel %vm520_vm2, %v3636_v41, %v11156_v59  ;;  %v3750_v59 = vrot.slane %v11237_v24, 4 }
 0x2cd   :  { %v3641_v40 = vperm.slane %v3637_v37, %v10649_v45  ;;  %v3870_v37 = vrot.slane %v11275_v46, 4 }
 0x2ce   :  { %v3599_v43 = vpop.permute.xlu2 %3598  ;;  %v3751_v21 = vsel %vm520_vm2, %v3750_v59, %v11064_v7 }
 0x2cf   :  { %v3648_v54 = vrot.slane %v3641_v40, 4  ;;  %v3716_v0 = vrot.slane %v3599_v43, 4  ;;  %v3597_v32 = vpop.permute.xlu1 %3596  ;;  %v3755_v40 = vperm.slane %v3751_v21, %v10649_v45 }
 0x2d0   :  { %v3676_v19 = vrot.slane %v3597_v32, 4 }
 0x2d1   :  { %v3649_v24 = vsel %vm520_vm2, %v3648_v54, %v3635_v63  ;;  %v3717_v33 = vsel %vm520_vm2, %v3716_v0, %v11174_v58  ;;  %v3601_v36 = vpop.permute.xlu0 %3600  ;;  %v3910_v58 = vrot.slane %v11267_v6, 4 }
 0x2d2   :  { %v3653_v11 = vperm.slane %v3649_v24, %v10695_v48  ;;  %v3721_v25 = vperm.slane %v3717_v33, %v10649_v45  ;;  %v3677_v4 = vsel %vm520_vm2, %v3676_v19, %v11167_v47  ;;  %v3756_v52 = vrot.slane %v3601_v36, 4 }
 0x2d3   :  { %v3681_v31 = vperm.slane %v3677_v4, %v10649_v45  ;;  %v3795_v47 = vperm.slane %v11323_v61, %v10649_v45  ;;  %v11359_v54 = vsel %vm520_vm2, %v3910_v58, %v11161_v51 }
 0x2d4   :  { %v3654_v41 = vrot.slane %v3653_v11, 4  ;;  %v3728_v57 = vrot.slane %v3721_v25, 4  ;;  %v3757_v60 = vsel %vm520_vm2, %v3756_v52, %v11171_v53  ;;  %v11349_v63 = vsel %vm520_vm2, %v3653_v11, %v3656_v20 }
 0x2d5   :  { %v3688_v17 = vrot.slane %v3681_v31, 4  ;;  %v3761_v7 = vperm.slane %v3757_v60, %v10649_v45  ;;  %17540 = vst [vmem:[#allocation55_spill] sm:$0xff] %v11349_v63  ;;  %v3871_v20 = vsel %vm520_vm2, %v3870_v37, %v11147_v5  ;;  %v3915_v4 = vperm.slane %v11359_v54, %v10649_v45 }
 0x2d6   :  { %v3729_v44 = vsel %vm520_vm2, %v3728_v57, %v3715_v14  ;;  %v3605_v6 = vpop.permute.xlu2 %3604  ;;  %v11353_v53 = vsel %vm520_vm2, %v3654_v41, %v11263_v9 }
 0x2d7   :  { %17541 = vst [vmem:[#allocation56_spill] sm:$0xff] %v11353_v53  ;;  %v3733_v43 = vperm.slane %v3729_v44, %v10695_v48  ;;  %v3689_v46 = vsel %vm520_vm2, %v3688_v17, %v3675_v22  ;;  %v3768_v59 = vrot.slane %v3761_v7, 4  ;;  %v3603_v29 = vpop.permute.xlu1 %3602  ;;  %v3836_v32 = vrot.slane %v3605_v6, 4 }
 0x2d8   :  { %v3693_v0 = vperm.slane %v3689_v46, %v10695_v48  ;;  %v3796_v16 = vrot.slane %v3603_v29, 4  ;;  %v3939_v22 = vmul.f32 %v11349_v63, %v10838_v18  ;;  %v3938_v61 = vmul.f32 %v11353_v53, %v10838_v18 }
 0x2d9   :  { %v11365_v9 = vsel %vm520_vm2, %v3733_v43, %v3736_v28  ;;  %v3769_v19 = vsel %vm520_vm2, %v3768_v59, %v3755_v40  ;;  %v3734_v51 = vrot.slane %v3733_v43, 4  ;;  %v3607_v36 = vpop.permute.xlu0 %3606  ;;  %v3837_v11 = vsel %vm520_vm2, %v3836_v32, %v11180_v27 }
 0x2da   :  { %17542 = vst [vmem:[#allocation57_spill] sm:$0xff] %v11365_v9  ;;  %v11373_v24 = vsel %vm520_vm2, %v3693_v0, %v3696_v3  ;;  %v3773_v33 = vperm.slane %v3769_v19, %v10695_v48  ;;  %v3943_v5 = vmul.f32 %v11365_v9, %v10838_v18  ;;  %v3797_v25 = vsel %vm520_vm2, %v3796_v16, %v11176_v8 }
 0x2db   :  { %17543 = vst [vmem:[#allocation58_spill] sm:$0xff] %v11373_v24  ;;  %v3941_v28 = vmul.f32 %v11373_v24, %v10838_v18  ;;  %v3875_v3 = vperm.slane %v3871_v20, %v10649_v45  ;;  %v3694_v52 = vrot.slane %v3693_v0, 4  ;;  %v3841_v30 = vperm.slane %v3837_v11, %v10649_v45 }
 0x2dc   :  { %v11390_v14 = vsel %vm520_vm2, %v3773_v33, %v3776_v10  ;;  %v3774_v21 = vrot.slane %v3773_v33, 4  ;;  %v3801_v31 = vperm.slane %v3797_v25, %v10649_v45  ;;  %v3876_v27 = vrot.slane %v3607_v36, 4 }
 0x2dd   :  { %17544 = vst [vmem:[#allocation59_spill] sm:$0xff] %v11390_v14  ;;  %v11396_v8 = vsel %vm520_vm2, %v3734_v51, %v11270_v55  ;;  %v3969_v58 = vsel %vm875_vm5, %v3939_v22, 0.0  ;;  %v3970_v41 = vsel %vm875_vm5, %v3941_v28, 0.0  ;;  %v3954_v57 = vsel %vm875_vm5, %v3938_v61, 0.0 }
 0x2de   :  { %17545 = vst [vmem:[#allocation60_spill] sm:$0xff] %v11396_v8  ;;  %v3972_v60 = vsel %vm875_vm5, %v3943_v5, 0.0  ;;  %v3945_v10 = vmul.f32 %v11390_v14, %v10838_v18  ;;  %v3848_v37 = vrot.slane %v3841_v30, 4  ;;  %v3808_v17 = vrot.slane %v3801_v31, 4 }
 0x2df   :  { %v3609_v7 = vpop.permute.xlu1 %3608  ;;  %v3877_v40 = vsel %vm520_vm2, %v3876_v27, %v11178_v34  ;;  %v3971_v55 = vadd.f32 %v3970_v41, %v3969_v58  ;;  %v11408_v6 = vsel %vm520_vm2, %v3694_v52, %v11289_v13  ;;  %v11412_v43 = vsel %vm520_vm2, %v3774_v21, %v11281_v35 }
 0x2e0   :  { %v3916_v44 = vrot.slane %v3609_v7, 4  ;;  %17546 = vst [vmem:[#allocation61_spill] sm:$0xff] %v11408_v6  ;;  %v3849_v46 = vsel %vm520_vm2, %v3848_v37, %v3835_v26  ;;  %v3809_v59 = vsel %vm520_vm2, %v3808_v17, %v3795_v47  ;;  %v3881_v29 = vperm.slane %v3877_v40, %v10649_v45 }
 0x2e1   :  { %17547 = vst [vmem:[#allocation62_spill] sm:$0xff] %v11412_v43  ;;  %v3853_v54 = vperm.slane %v3849_v46, %v10695_v48  ;;  %v3813_v34 = vperm.slane %v3809_v59, %v10695_v48  ;;  %v3973_v32 = vadd.f32 %v3972_v60, %v3971_v55  ;;  %v3974_v13 = vsel %vm875_vm5, %v3945_v10, 0.0 }
 0x2e2   :  { %v3917_v0 = vsel %vm520_vm2, %v3916_v44, %v11182_v62  ;;  %v3888_v16 = vrot.slane %v3881_v29, 4  ;;  %v3940_v26 = vmul.f32 %v11408_v6, %v10838_v18  ;;  %v3942_v36 = vmul.f32 %v11396_v8, %v10838_v18 }
 0x2e3   :  { %v3921_v35 = vperm.slane %v3917_v0, %v10649_v45  ;;  %v3854_v20 = vrot.slane %v3853_v54, 4  ;;  %v11428_v47 = vsel %vm520_vm2, %v3853_v54, %v3856_v2  ;;  %v3814_v19 = vrot.slane %v3813_v34, 4 }
 0x2e4   :  { %17548 = vst [vmem:[#allocation63_spill] sm:$0xff] %v11428_v47  ;;  %v11433_v62 = vsel %vm520_vm2, %v3813_v34, %v3816_v42  ;;  %v3949_v22 = vmul.f32 %v11428_v47, %v10838_v18  ;;  %v3889_v51 = vsel %vm520_vm2, %v3888_v16, %v3875_v3  ;;  %v3975_v42 = vadd.f32 %v3974_v13, %v3973_v32 }
 0x2e5   :  { %17549 = vst [vmem:[#allocation64_spill] sm:$0xff] %v11433_v62  ;;  %v3947_v61 = vmul.f32 %v11433_v62, %v10838_v18  ;;  %v3928_v33 = vrot.slane %v3921_v35, 4  ;;  %v11444_v2 = vsel %vm520_vm2, %v3814_v19, %v11297_v12  ;;  %v3893_v5 = vperm.slane %v3889_v51, %v10695_v48 }
 0x2e6   :  { %17550 = vst [vmem:[#allocation65_spill] sm:$0xff] %v11444_v2  ;;  %v3944_v28 = vmul.f32 %v11412_v43, %v10838_v18  ;;  %v11451_v11 = vsel %vm520_vm2, %v3854_v20, %v11278_v50  ;;  %v3955_v3 = vsel %vm875_vm5, %v3940_v26, 0.0  ;;  %v3978_v31 = vsel %vm875_vm5, %v3949_v22, 0.0 }
 0x2e7   :  { %17551 = vst [vmem:[#allocation66_spill] sm:$0xff] %v11451_v11  ;;  %v3976_v25 = vsel %vm875_vm5, %v3947_v61, 0.0  ;;  %v3894_v52 = vrot.slane %v3893_v5, 4  ;;  %v11458_v12 = vsel %vm520_vm2, %v3893_v5, %v3896_v56  ;;  %v3929_v21 = vsel %vm520_vm2, %v3928_v33, %v3915_v4 }
 0x2e8   :  { %17552 = vst [vmem:[#allocation67_spill] sm:$0xff] %v11458_v12  ;;  %v3977_v30 = vadd.f32 %v3976_v25, %v3975_v42  ;;  %v3946_v27 = vmul.f32 %v11444_v2, %v10838_v18  ;;  %v3951_v50 = vmul.f32 %v11458_v12, %v10838_v18  ;;  %v3933_v58 = vperm.slane %v3929_v21, %v10695_v48  ;;  %v17578_v48 = vld [vmem:[#allocation24_spill] sm:$0xff] }
 0x2e9   :  { %v11469_v41 = vsel %vm520_vm2, %v3894_v52, %v11286_v49  ;;  %v3956_v56 = vadd.f32 %v3955_v3, %v3954_v57  ;;  %v3957_v10 = vsel %vm875_vm5, %v3942_v36, 0.0  ;;  %v3959_v4 = vsel %vm875_vm5, %v3944_v28, 0.0 }
 0x2ea   :  { %17553 = vst [vmem:[#allocation68_spill] sm:$0xff] %v11469_v41  ;;  %v3979_v60 = vadd.f32 %v3978_v31, %v3977_v30  ;;  %v3980_v37 = vsel %vm875_vm5, %v3951_v50, 0.0  ;;  %v3934_v17 = vrot.slane %v3933_v58, 4  ;;  %v11477_v7 = vsel %vm520_vm2, %v3933_v58, %v3936_v23 }
 0x2eb   :  { %17554 = vst [vmem:[#allocation69_spill] sm:$0xff] %v11477_v7  ;;  %v3948_v40 = vmul.f32 %v11451_v11, %v10838_v18  ;;  %v3953_v49 = vmul.f32 %v11477_v7, %v10838_v18  ;;  %v3958_v44 = vadd.f32 %v3957_v10, %v3956_v56  ;;  %v3961_v57 = vsel %vm875_vm5, %v3946_v27, 0.0 }
 0x2ec   :  { %v3950_v55 = vmul.f32 %v11469_v41, %v10838_v18  ;;  %v11488_v46 = vsel %vm520_vm2, %v3934_v17, %v11300_v15  ;;  %v3981_v59 = vadd.f32 %v3980_v37, %v3979_v60 }
 0x2ed   :  { %17555 = vst [vmem:[#allocation70_spill] sm:$0xff] %v11488_v46  ;;  %v3982_v23 = vsel %vm875_vm5, %v3953_v49, 0.0  ;;  %v3960_v29 = vadd.f32 %v3959_v4, %v3958_v44  ;;  %v3952_v54 = vmul.f32 %v11488_v46, %v10838_v18  ;;  %v3963_v32 = vsel %vm875_vm5, %v3948_v40, 0.0 }
 0x2ee   :  { %v3983_v34 = vadd.f32 %v3982_v23, %v3981_v59  ;;  %v3965_v13 = vsel %vm875_vm5, %v3950_v55, 0.0 }
 0x2ef   :  { %v3962_v0 = vadd.f32 %v3961_v57, %v3960_v29  ;;  %v3967_v35 = vsel %vm875_vm5, %v3952_v54, 0.0 }
 0x2f0   :  { %9444 = vtanh.f32 %v3983_v34 }
 0x2f1   :  { %v3964_v16 = vadd.f32 %v3963_v32, %v3962_v0 }
 0x2f3   :  { %v3966_v26 = vadd.f32 %v3965_v13, %v3964_v16 }
 0x2f5   :  { %v3968_v15 = vadd.f32 %v3967_v35, %v3966_v26 }
 0x2f6   :  { %v9445_v20 = vpop.eup %9444 }
 0x2f7   :  { %v3987_v19 = vmul.f32 %v9445_v20, %v11349_v63  ;;  %9446 = vtanh.f32 %v3968_v15  ;;  %v3991_v25 = vmul.f32 %v9445_v20, %v11365_v9  ;;  %v3989_v3 = vmul.f32 %v9445_v20, %v11373_v24 }
 0x2f8   :  { %v3993_v52 = vmul.f32 %v9445_v20, %v11390_v14  ;;  %v3997_v4 = vmul.f32 %v9445_v20, %v11428_v47  ;;  %v3995_v37 = vmul.f32 %v9445_v20, %v11433_v62  ;;  %v3999_v17 = vmul.f32 %v9445_v20, %v11458_v12 }
 0x2f9   :  { %v4005_v22 = vsel %vm875_vm5, %v3987_v19, 0.0  ;;  %v4017_v21 = vsel %vm875_vm5, %v3991_v25, 0.0  ;;  %v4011_v30 = vsel %vm875_vm5, %v3989_v3, 0.0  ;;  %v4001_v29 = vmul.f32 %v9445_v20, %v11477_v7 }
 0x2fa   :  { %4006 = vadd.xlane.f32.xlu0 %v4005_v22  ;;  %v4023_v31 = vsel %vm875_vm5, %v3993_v52, 0.0  ;;  %v4035_v40 = vsel %vm875_vm5, %v3997_v4, 0.0  ;;  %v4029_v49 = vsel %vm875_vm5, %v3995_v37, 0.0  ;;  %v4041_v44 = vsel %vm875_vm5, %v3999_v17, 0.0 }
 0x2fb   :  { %v4047_v54 = vsel %vm875_vm5, %v4001_v29, 0.0 }
 0x2fd   :  { %v9447_v61 = vpop.eup %9446 }
 0x2fe   :  { %v3988_v51 = vmul.f32 %v9447_v61, %v11408_v6  ;;  %v3986_v33 = vmul.f32 %v9447_v61, %v11353_v53  ;;  %v3990_v36 = vmul.f32 %v9447_v61, %v11396_v8  ;;  %v3994_v27 = vmul.f32 %v9447_v61, %v11444_v2 }
 0x2ff   :  { %v3992_v50 = vmul.f32 %v9447_v61, %v11412_v43  ;;  %v3996_v58 = vmul.f32 %v9447_v61, %v11451_v11  ;;  %v4000_v57 = vmul.f32 %v9447_v61, %v11488_v46  ;;  %v3998_v55 = vmul.f32 %v9447_v61, %v11469_v41 }
 0x300   :  { %v4008_v5 = vsel %vm875_vm5, %v3988_v51, 0.0  ;;  %v4002_v42 = vsel %vm875_vm5, %v3986_v33, 0.0  ;;  %v4014_v28 = vsel %vm875_vm5, %v3990_v36, 0.0  ;;  %v4026_v60 = vsel %vm875_vm5, %v3994_v27, 0.0 }
 0x301   :  { %4009 = vadd.xlane.f32.xlu1 %v4008_v5  ;;  %4003 = vadd.xlane.f32.xlu2 %v4002_v42  ;;  %v4020_v56 = vsel %vm875_vm5, %v3992_v50, 0.0  ;;  %v4032_v10 = vsel %vm875_vm5, %v3996_v58, 0.0  ;;  %v4044_v59 = vsel %vm875_vm5, %v4000_v57, 0.0  ;;  %v4038_v23 = vsel %vm875_vm5, %v3998_v55, 0.0 }
 0x302   :  { %4015 = vadd.xlane.f32.xlu0 %v4014_v28 }
 0x304   :  { %v11528_v34 = vpop.xlane.xlu0 %1041 }
 0x309   :  { %4018 = vadd.xlane.f32.xlu1 %v4017_v21  ;;  %4012 = vadd.xlane.f32.xlu2 %v4011_v30 }
 0x30a   :  { %4024 = vadd.xlane.f32.xlu0 %v4023_v31  ;;  %v11530_v0 = vpop.xlane.xlu1 %1044 }
 0x30c   :  { %v11532_v32 = vpop.xlane.xlu0 %1050 }
 0x30f   :  { %v11534_v13 = vpop.xlane.xlu2 %1047 }
 0x311   :  { %4027 = vadd.xlane.f32.xlu1 %v4026_v60  ;;  %4021 = vadd.xlane.f32.xlu2 %v4020_v56  ;;  %v10261_v60 = vmov 0  }
 0x312   :  { %4033 = vadd.xlane.f32.xlu0 %v4032_v10  ;;  %v11536_v16 = vpop.xlane.xlu1 %1053  ;;  %9435 = vset.pattern.permute.xlu2 %v10261_v60 }
 0x313   :  { %9436 = vset.pattern.permute.xlu0 %v10261_v60  ;;  %9437 = vset.pattern.permute.xlu1 %v10261_v60 }
 0x314   :  { %v11538_v35 = vpop.xlane.xlu0 %1059 }
 0x317   :  { %v11540_v26 = vpop.xlane.xlu2 %1056 }
 0x319   :  { %4036 = vadd.xlane.f32.xlu1 %v4035_v40  ;;  %4030 = vadd.xlane.f32.xlu2 %v4029_v49 }
 0x31a   :  { %4042 = vadd.xlane.f32.xlu0 %v4041_v44  ;;  %v11542_v15 = vpop.xlane.xlu1 %1062 }
 0x31b   :  { %v1086_v18 = vperm.slane %v11542_v15, 0 }
 0x321   :  { %4045 = vadd.xlane.f32.xlu1 %v4044_v59  ;;  %4039 = vadd.xlane.f32.xlu2 %v4038_v23 }
 0x329   :  { %4048 = vadd.xlane.f32.xlu2 %v4047_v54 }
 0x36d   :  { %v11544_v20 = vpop.xlane.xlu0 %4006 }
 0x36e   :  { %17556 = vst [vmem:[#allocation71_spill] sm:$0xff] %v11544_v20  ;;  %v4083_v61 = vperm.slane %v11544_v20, %v11100_v38 }
 0x374   :  { %v11546_v19 = vpop.xlane.xlu2 %4003  ;;  %v11548_v22 = vpop.xlane.xlu1 %4009 }
 0x375   :  { %17557 = vst [vmem:[#allocation72_spill] sm:$0xff] %v11546_v19  ;;  %v4082_v51 = vperm.slane %v11546_v19, %v11100_v38  ;;  %v11554_v33 = vpop.xlane.xlu0 %4015  ;;  %v4084_v25 = vperm.slane %v11548_v22, %v11100_v38 }
 0x376   :  { %17558 = vst [vmem:[#allocation73_spill] sm:$0xff] %v11548_v22  ;;  %v4086_v3 = vperm.slane %v11554_v33, %v11100_v38 }
 0x377   :  { %17559 = vst [vmem:[#allocation74_spill] sm:$0xff] %v11554_v33  ;;  %v4098_v36 = vsel %vm1022_vm8, %v4083_v61, %v4082_v51 }
 0x378   :  { %v4114_v5 = vsel %vm1039_vm9, %v4098_v36, -inf }
 0x379   :  { %4115 = vmax.xlane.f32.xlu0 %v4114_v5 }
 0x37c   :  { %v11558_v42 = vpop.xlane.xlu2 %4012  ;;  %v11560_v28 = vpop.xlane.xlu1 %4018 }
 0x37d   :  { %17560 = vst [vmem:[#allocation75_spill] sm:$0xff] %v11558_v42  ;;  %v4085_v52 = vperm.slane %v11558_v42, %v11100_v38  ;;  %v4087_v21 = vperm.slane %v11560_v28, %v11100_v38  ;;  %v11570_v30 = vpop.xlane.xlu0 %4024 }
 0x37e   :  { %17561 = vst [vmem:[#allocation76_spill] sm:$0xff] %v11560_v28  ;;  %v4089_v4 = vperm.slane %v11570_v30, %v11100_v38 }
 0x37f   :  { %17562 = vst [vmem:[#allocation77_spill] sm:$0xff] %v11570_v30  ;;  %v4099_v31 = vsel %vm1022_vm8, %v4085_v52, %v4084_v25  ;;  %v4100_v27 = vsel %vm1022_vm8, %v4087_v21, %v4086_v3  ;;  %v1072_v21 = vperm.slane %v11528_v34, 0 }
 0x380   :  { %v4117_v50 = vsel %vm1039_vm9, %v4099_v31, -inf  ;;  %v4120_v58 = vsel %vm1039_vm9, %v4100_v27, -inf }
 0x381   :  { %4118 = vmax.xlane.f32.xlu1 %v4117_v50  ;;  %4121 = vmax.xlane.f32.xlu2 %v4120_v58  ;;  %v1073_v50 = vperm.slane %v11528_v34, 1  ;;  %v1104_v58 = vsub.f32 %v11076_v39, %v1072_v21 }
 0x384   :  { %v11576_v56 = vpop.xlane.xlu2 %4021  ;;  %v11578_v10 = vpop.xlane.xlu1 %4027 }
 0x385   :  { %17563 = vst [vmem:[#allocation78_spill] sm:$0xff] %v11576_v56  ;;  %v4088_v37 = vperm.slane %v11576_v56, %v11100_v38  ;;  %v11586_v49 = vpop.xlane.xlu0 %4033  ;;  %v4090_v55 = vperm.slane %v11578_v10, %v11100_v38 }
 0x386   :  { %17564 = vst [vmem:[#allocation79_spill] sm:$0xff] %v11578_v10  ;;  %v4092_v59 = vperm.slane %v11586_v49, %v11100_v38 }
 0x387   :  { %v4101_v17 = vsel %vm1022_vm8, %v4089_v4, %v4088_v37  ;;  %17565 = vst [vmem:[#allocation80_spill] sm:$0xff] %v11586_v49 }
 0x388   :  { %v4123_v40 = vsel %vm1039_vm9, %v4101_v17, -inf }
 0x389   :  { %4124 = vmax.xlane.f32.xlu0 %v4123_v40  ;;  %v17572_v40 = vld [vmem:[#allocation28_spill] sm:$0xff] }
 0x38c   :  { %v11588_v44 = vpop.xlane.xlu2 %4030  ;;  %v11590_v57 = vpop.xlane.xlu1 %4036 }
 0x38d   :  { %17566 = vst [vmem:[#allocation81_spill] sm:$0xff] %v11588_v44  ;;  %v4091_v23 = vperm.slane %v11588_v44, %v11100_v38  ;;  %v4093_v29 = vperm.slane %v11590_v57, %v11100_v38  ;;  %v11604_v5 = vpop.xlane.xlu0 %4042 }
 0x38e   :  { %17567 = vst [vmem:[#allocation82_spill] sm:$0xff] %v11590_v57  ;;  %v4095_v3 = vperm.slane %v11604_v5, %v11100_v38 }
 0x38f   :  { %v4102_v54 = vsel %vm1022_vm8, %v4091_v23, %v4090_v55  ;;  %v4103_v61 = vsel %vm1022_vm8, %v4093_v29, %v4092_v59  ;;  %17568 = vst [vmem:[#allocation83_spill] sm:$0xff] %v11604_v5  ;;  %v1105_v55 = vsub.f32 %v17572_v40, %v1073_v50  ;;  %v1120_v59 = vmul.f32 1.442695, %v1104_v58  ;;  %v17574_v50 = vld [vmem:[#allocation21_spill] sm:$0xff] }
 0x390   :  { %v4126_v51 = vsel %vm1039_vm9, %v4102_v54, -inf  ;;  %v4129_v36 = vsel %vm1039_vm9, %v4103_v61, -inf  ;;  %v1075_v23 = vperm.slane %v11530_v0, 1  ;;  %v17573_v61 = vld [vmem:[#allocation22_spill] sm:$0xff] }
 0x391   :  { %4127 = vmax.xlane.f32.xlu1 %v4126_v51  ;;  %4130 = vmax.xlane.f32.xlu2 %v4129_v36  ;;  %9448 = vpow2.f32 %v1120_v59  ;;  %v1122_v54 = vmul.f32 1.442695, %v1105_v55  ;;  %v1080_v36 = vperm.slane %v11536_v16, 0  ;;  %v17575_v55 = vld [vmem:[#allocation27_spill] sm:$0xff] }
 0x392   :  { %v1107_v51 = vsub.f32 %v17573_v61, %v1075_v23 }
 0x393   :  { %9450 = vpow2.f32 %v1122_v54  ;;  %v1112_v21 = vsub.f32 %v11098_v1, %v1080_v36  ;;  %v1076_v36 = vperm.slane %v11534_v13, 0  ;;  %v1078_v1 = vperm.slane %v11532_v32, 0 }
 0x394   :  { %v11606_v25 = vpop.xlane.xlu2 %4039  ;;  %v11617_v60 = vpop.xlane.xlu1 %4045 }
 0x395   :  { %17569 = vst [vmem:[#allocation84_spill] sm:$0xff] %v11606_v25  ;;  %v4094_v52 = vperm.slane %v11606_v25, %v11100_v38  ;;  %v4096_v37 = vperm.slane %v11617_v60, %v11100_v38  ;;  %v1108_v45 = vsub.f32 %v17578_v48, %v1076_v36 }
 0x396   :  { %17570 = vst [vmem:[#allocation85_spill] sm:$0xff] %v11617_v60 }
 0x397   :  { %v4104_v31 = vsel %vm1022_vm8, %v4095_v3, %v4094_v52  ;;  %v1126_v3 = vmul.f32 1.442695, %v1107_v51  ;;  %v1077_v52 = vperm.slane %v11534_v13, 1  ;;  %v1082_v13 = vperm.slane %v11540_v26, 0 }
 0x398   :  { %v4132_v27 = vsel %vm1039_vm9, %v4104_v31, -inf  ;;  %v1074_v31 = vperm.slane %v11530_v0, 0  ;;  %v17576_v0 = vld [vmem:[#allocation51_spill] sm:$0xff] }
 0x399   :  { %4133 = vmax.xlane.f32.xlu0 %v4132_v27  ;;  %v11634_v27 = vpop.eup %9448  ;;  %9452 = vpow2.f32 %v1126_v3  ;;  %v1109_v58 = vsub.f32 %v17574_v50, %v1077_v52  ;;  %v17577_v52 = vld [vmem:[#allocation23_spill] sm:$0xff] }
 0x39a   :  { %v1106_v59 = vsub.f32 %v17575_v55, %v1074_v31  ;;  %v11640_v23 = vpop.eup %9450 }
 0x39c   :  { %v11619_v4 = vpop.xlane.xlu2 %4048  ;;  %v1124_v51 = vmul.f32 1.442695, %v1106_v59 }
 0x39d   :  { %17571 = vst [vmem:[#allocation86_spill] sm:$0xff] %v11619_v4  ;;  %v4097_v17 = vperm.slane %v11619_v4, %v11100_v38 }
 0x39f   :  { %v4105_v29 = vsel %vm1022_vm8, %v4097_v17, %v4096_v37  ;;  %v1136_v37 = vmul.f32 1.442695, %v1112_v21  ;;  %v1083_v17 = vperm.slane %v11540_v26, 1  ;;  %v11646_v3 = vpop.eup %9452 }
 0x3a0   :  { %v4135_v34 = vsel %vm1039_vm9, %v4105_v29, -inf  ;;  %v1079_v29 = vperm.slane %v11532_v32, 1 }
 0x3a1   :  { %4136 = vmax.xlane.f32.xlu1 %v4135_v34  ;;  %v1130_v34 = vmul.f32 1.442695, %v1109_v58  ;;  %9454 = vpow2.f32 %v1136_v37  ;;  %v1115_v54 = vsub.f32 %v17576_v0, %v1083_v17  ;;  %v17579_v17 = vld [vmem:[#allocation54_spill] sm:$0xff] }
 0x3a2   :  { %v1111_v21 = vsub.f32 %v17577_v52, %v1079_v29  ;;  %v1118_v59 = vsub.f32 %v17579_v17, %v1086_v18  ;;  %v1128_v29 = vmul.f32 1.442695, %v1108_v45  ;;  %v1085_v45 = vperm.slane %v11538_v35, 1 }
 0x3a3   :  { %9456 = vpow2.f32 %v1130_v34  ;;  %v1142_v31 = vmul.f32 1.442695, %v1115_v54  ;;  %v1081_v17 = vperm.slane %v11536_v16, 1 }
 0x3a4   :  { %9458 = vpow2.f32 %v1124_v51  ;;  %v1134_v37 = vmul.f32 1.442695, %v1111_v21  ;;  %v17580_v51 = vld [vmem:[#allocation50_spill] sm:$0xff]  ;;  %v1148_v52 = vmul.f32 1.442695, %v1118_v59  ;;  %v17581_v21 = vld [vmem:[#allocation25_spill] sm:$0xff] }
 0x3a5   :  { %9460 = vpow2.f32 %v1142_v31  ;;  %v1114_v36 = vsub.f32 %v17580_v51, %v1082_v13  ;;  %v1110_v26 = vsub.f32 %v17581_v21, %v1078_v1  ;;  %v17582_v59 = vld [vmem:[#allocation53_spill] sm:$0xff] }
 0x3a6   :  { %9462 = vpow2.f32 %v1134_v37  ;;  %v1117_v1 = vsub.f32 %v17582_v59, %v1085_v45  ;;  %v17584_v45 = vld [vmem:[#allocation49_spill] sm:$0xff] }
 0x3a7   :  { %v11652_v58 = vpop.eup %9454  ;;  %9464 = vpow2.f32 %v1128_v29  ;;  %v1140_v18 = vmul.f32 1.442695, %v1114_v36  ;;  %v1132_v32 = vmul.f32 1.442695, %v1110_v26  ;;  %v17583_v29 = vld [vmem:[#allocation46_spill] sm:$0xff]  ;;  %v1084_v36 = vperm.slane %v11538_v35, 0 }
 0x3a8   :  { %9466 = vpow2.f32 %v1148_v52  ;;  %v1113_v21 = vsub.f32 %v17583_v29, %v1081_v17  ;;  %v1146_v52 = vmul.f32 1.442695, %v1117_v1  ;;  %v17585_v35 = vld [vmem:[#allocation52_spill] sm:$0xff] }
 0x3a9   :  { %1169 = vperm.xlu2 %9435, %v11634_v27   ;;  %v11658_v34 = vpop.eup %9456  ;;  %9468 = vpow2.f32 %v1140_v18  ;;  %v1116_v17 = vsub.f32 %v17584_v45, %v1084_v36 }
 0x3aa   :  { %v11660_v54 = vpop.eup %9458  ;;  %9470 = vpow2.f32 %v1132_v32  ;;  %v1138_v16 = vmul.f32 1.442695, %v1113_v21  ;;  %v1087_v32 = vperm.slane %v11542_v15, 1 }
 0x3ab   :  { %v11666_v31 = vpop.eup %9460  ;;  %9472 = vpow2.f32 %v1146_v52  ;;  %v1144_v18 = vmul.f32 1.442695, %v1116_v17 }
 0x3ac   :  { %v11671_v37 = vpop.eup %9462  ;;  %9474 = vpow2.f32 %v1138_v16  ;;  %v1119_v1 = vsub.f32 %v17585_v35, %v1087_v32 }
 0x3ad   :  { %1172 = vperm.xlu0 %9436, %v11640_v23   ;;  %v11673_v13 = vpop.eup %9464  ;;  %9476 = vpow2.f32 %v1144_v18 }
 0x3ae   :  { %v11679_v39 = vpop.eup %9466  ;;  %v1150_v52 = vmul.f32 1.442695, %v1119_v1 }
 0x3af   :  { %v11683_v26 = vpop.eup %9468 }
 0x3b0   :  { %v11685_v0 = vpop.eup %9470  ;;  %9478 = vpow2.f32 %v1150_v52 }
 0x3b1   :  { %1178 = vperm.xlu2 %9435, %v11646_v3   ;;  %v11691_v59 = vpop.eup %9472 }
 0x3b2   :  { %v11693_v21 = vpop.eup %9474 }
 0x3b3   :  { %v11698_v29 = vpop.eup %9476 }
 0x3b5   :  { %1193 = vperm.xlu0 %9436, %v11652_v58  }
 0x3b6   :  { %v11701_v16 = vpop.eup %9478 }
 0x3b9   :  { %1184 = vperm.xlu2 %9435, %v11658_v34  }
 0x3ba   :  { %1175 = vperm.xlu1 %9437, %v11660_v54  }
 0x3bd   :  { %1202 = vperm.xlu0 %9436, %v11666_v31  }
 0x3c1   :  { %1190 = vperm.xlu2 %9435, %v11671_v37  }
 0x3c2   :  { %1181 = vperm.xlu1 %9437, %v11673_v13  }
 0x3c5   :  { %1211 = vperm.xlu0 %9436, %v11679_v39  }
 0x3c9   :  { %1199 = vperm.xlu2 %9435, %v11683_v26  }
 0x3ca   :  { %1187 = vperm.xlu1 %9437, %v11685_v0  }
 0x3d1   :  { %1208 = vperm.xlu2 %9435, %v11691_v59  }
 0x3d2   :  { %1196 = vperm.xlu1 %9437, %v11693_v21  }
 0x3da   :  { %1205 = vperm.xlu1 %9437, %v11698_v29  }
 0x3e2   :  { %1214 = vperm.xlu1 %9437, %v11701_v16  }
 0x3ec   :  { %v4116_v15 = vpop.xlane.xlu0 %4115 }
 0x3ed   :  { %v4146_v36 = vperm.slane %v4116_v15, 0  ;;  %v4147_v17 = vperm.slane %v4116_v15, 1 }
 0x3ef   :  { %v4178_v45 = vsub.f32 %v11546_v19, %v4146_v36  ;;  %v4179_v40 = vsub.f32 %v11544_v20, %v4147_v17 }
 0x3f1   :  { %v4194_v18 = vmul.f32 1.442695, %v4178_v45  ;;  %v4196_v51 = vmul.f32 1.442695, %v4179_v40 }
 0x3f3   :  { %9480 = vpow2.f32 %v4194_v18 }
 0x3f4   :  { %9482 = vpow2.f32 %v4196_v51  ;;  %v4122_v32 = vpop.xlane.xlu2 %4121  ;;  %v4119_v1 = vpop.xlane.xlu1 %4118 }
 0x3f5   :  { %v4150_v35 = vperm.slane %v4122_v32, 0  ;;  %v4148_v55 = vperm.slane %v4119_v1, 0  ;;  %v4149_v52 = vperm.slane %v4119_v1, 1  ;;  %v4151_v36 = vperm.slane %v4122_v32, 1 }
 0x3f7   :  { %v4182_v61 = vsub.f32 %v11554_v33, %v4150_v35  ;;  %v4180_v50 = vsub.f32 %v11548_v22, %v4148_v55  ;;  %v4181_v48 = vsub.f32 %v11558_v42, %v4149_v52  ;;  %v4183_v35 = vsub.f32 %v11560_v28, %v4151_v36 }
 0x3f9   :  { %v11709_v15 = vpop.eup %9480  ;;  %v4202_v19 = vmul.f32 1.442695, %v4182_v61  ;;  %v4198_v17 = vmul.f32 1.442695, %v4180_v50  ;;  %v4200_v40 = vmul.f32 1.442695, %v4181_v48 }
 0x3fa   :  { %v11711_v45 = vpop.eup %9482  ;;  %4243 = vperm.xlu2 %9435, %v11709_v15   ;;  %v4204_v32 = vmul.f32 1.442695, %v4183_v35 }
 0x3fb   :  { %9484 = vpow2.f32 %v4202_v19  ;;  %4246 = vperm.xlu0 %9436, %v11711_v45  }
 0x3fc   :  { %v4125_v51 = vpop.xlane.xlu0 %4124  ;;  %9486 = vpow2.f32 %v4198_v17 }
 0x3fd   :  { %v4152_v55 = vperm.slane %v4125_v51, 0  ;;  %v4153_v18 = vperm.slane %v4125_v51, 1  ;;  %9488 = vpow2.f32 %v4200_v40 }
 0x3ff   :  { %v4184_v1 = vsub.f32 %v11576_v56, %v4152_v55  ;;  %v4185_v61 = vsub.f32 %v11570_v30, %v4153_v18 }
 0x401   :  { %v11718_v50 = vpop.eup %9484  ;;  %v4206_v48 = vmul.f32 1.442695, %v4184_v1  ;;  %v4208_v52 = vmul.f32 1.442695, %v4185_v61 }
 0x402   :  { %4255 = vperm.xlu2 %9435, %v11718_v50   ;;  %v11721_v19 = vpop.eup %9486 }
 0x403   :  { %9490 = vpow2.f32 %v4206_v48  ;;  %v11723_v22 = vpop.eup %9488  ;;  %4249 = vperm.xlu1 %9437, %v11721_v19  }
 0x404   :  { %9492 = vpow2.f32 %v4208_v52  ;;  %v4131_v36 = vpop.xlane.xlu2 %4130  ;;  %v4128_v17 = vpop.xlane.xlu1 %4127  ;;  %4252 = vperm.xlu0 %9436, %v11723_v22  }
 0x405   :  { %9494 = vpow2.f32 %v4204_v32  ;;  %v4156_v40 = vperm.slane %v4131_v36, 0  ;;  %v4154_v51 = vperm.slane %v4128_v17, 0  ;;  %v4155_v35 = vperm.slane %v4128_v17, 1 }
 0x406   :  { %v4157_v48 = vperm.slane %v4131_v36, 1 }
 0x407   :  { %v4188_v55 = vsub.f32 %v11586_v49, %v4156_v40  ;;  %v4186_v18 = vsub.f32 %v11578_v10, %v4154_v51  ;;  %v4187_v1 = vsub.f32 %v11588_v44, %v4155_v35 }
 0x408   :  { %v4189_v40 = vsub.f32 %v11590_v57, %v4157_v48 }
 0x409   :  { %v11730_v61 = vpop.eup %9490  ;;  %v4214_v52 = vmul.f32 1.442695, %v4188_v55  ;;  %v4210_v42 = vmul.f32 1.442695, %v4186_v18  ;;  %v4212_v28 = vmul.f32 1.442695, %v4187_v1 }
 0x40a   :  { %v11732_v33 = vpop.eup %9492  ;;  %v4216_v55 = vmul.f32 1.442695, %v4189_v40 }
 0x40b   :  { %v11734_v32 = vpop.eup %9494  ;;  %9496 = vpow2.f32 %v4214_v52  ;;  %4264 = vperm.xlu2 %9435, %v11732_v33  }
 0x40c   :  { %4258 = vperm.xlu1 %9437, %v11734_v32   ;;  %v11738_v17 = vpop.xlane.xlu0 %4133  ;;  %9498 = vpow2.f32 %v4210_v42  ;;  %4261 = vperm.xlu0 %9436, %v11730_v61   ;;  %v1170_v40 = vpop.permute.xlu2 %1169 }
 0x40d   :  { %v4159_v36 = vperm.slane %v11738_v17, 1  ;;  %9500 = vpow2.f32 %v4212_v28  ;;  %v1216_v20 = vperm.slane %v1170_v40, %v11100_v38 }
 0x40f   :  { %v4191_v51 = vsub.f32 %v11604_v5, %v4159_v36 }
 0x411   :  { %v11744_v35 = vpop.eup %9496  ;;  %v4220_v18 = vmul.f32 1.442695, %v4191_v51 }
 0x412   :  { %v11746_v1 = vpop.eup %9498 }
 0x413   :  { %4273 = vperm.xlu2 %9435, %v11744_v35   ;;  %v11749_v52 = vpop.eup %9500  ;;  %9502 = vpow2.f32 %v4220_v18 }
 0x414   :  { %4267 = vperm.xlu1 %9437, %v11746_v1   ;;  %v11752_v42 = vpop.xlane.xlu1 %4136  ;;  %9504 = vpow2.f32 %v4216_v55  ;;  %4270 = vperm.xlu0 %9436, %v11749_v52   ;;  %v1179_v55 = vpop.permute.xlu2 %1178 }
 0x415   :  { %v4160_v28 = vperm.slane %v11752_v42, 0  ;;  %v1219_v5 = vperm.slane %v1179_v55, %v11100_v38 }
 0x417   :  { %v4192_v48 = vsub.f32 %v11617_v60, %v4160_v28 }
 0x419   :  { %v4222_v36 = vmul.f32 1.442695, %v4192_v48  ;;  %v11757_v51 = vpop.eup %9502 }
 0x41a   :  { %v11759_v44 = vpop.eup %9504 }
 0x41b   :  { %9506 = vpow2.f32 %v4222_v36  ;;  %4282 = vperm.xlu2 %9435, %v11757_v51  }
 0x41c   :  { %4276 = vperm.xlu1 %9437, %v11759_v44   ;;  %v1185_v49 = vpop.permute.xlu2 %1184 }
 0x41f   :  { %v1173_v57 = vpop.permute.xlu0 %1172 }
 0x420   :  { %v1217_v56 = vperm.slane %v1173_v57, %v11100_v38 }
 0x421   :  { %v11763_v18 = vpop.eup %9506 }
 0x422   :  { %v1232_v12 = vsel %vm1022_vm8, %v1217_v56, %v1216_v20 }
 0x423   :  { %v1248_v41 = vsel %vm1039_vm9, %v1232_v12, 0.0 }
 0x424   :  { %4285 = vperm.xlu1 %9437, %v11763_v18   ;;  %v1191_v60 = vpop.permute.xlu2 %1190 }
 0x427   :  { %v1194_v7 = vpop.permute.xlu0 %1193 }
 0x42c   :  { %v1176_v10 = vpop.permute.xlu1 %1175  ;;  %v1200_v47 = vpop.permute.xlu2 %1199 }
 0x42d   :  { %v1218_v48 = vperm.slane %v1176_v10, %v11100_v38 }
 0x42f   :  { %v1233_v36 = vsel %vm1022_vm8, %v1219_v5, %v1218_v48  ;;  %v1224_v5 = vperm.slane %v1194_v7, %v11100_v38  ;;  %v1223_v48 = vperm.slane %v1191_v60, %v11100_v38  ;;  %v1203_v20 = vpop.permute.xlu0 %1202 }
 0x430   :  { %v1251_v46 = vsel %vm1039_vm9, %v1233_v36, 0.0 }
 0x434   :  { %v1182_v28 = vpop.permute.xlu1 %1181 }
 0x435   :  { %v1220_v40 = vperm.slane %v1182_v28, %v11100_v38 }
 0x43c   :  { %v1188_v30 = vpop.permute.xlu1 %1187 }
 0x43d   :  { %v1222_v10 = vperm.slane %v1188_v30, %v11100_v38  ;;  %v1209_v30 = vpop.permute.xlu2 %1208 }
 0x43e   :  { %1252 = vadd.xlane.f32.xlu0 %v1251_v46  ;;  %v1221_v46 = vperm.slane %v1185_v49, %v11100_v38  ;;  %v1229_v49 = vperm.slane %v1209_v30, %v11100_v38 }
 0x43f   :  { %v1235_v12 = vsel %vm1022_vm8, %v1223_v48, %v1222_v10  ;;  %v1212_v48 = vpop.permute.xlu0 %1211 }
 0x440   :  { %v1257_v7 = vsel %vm1039_vm9, %v1235_v12, 0.0 }
 0x444   :  { %1249 = vadd.xlane.f32.xlu2 %v1248_v41  ;;  %v1197_v55 = vpop.permute.xlu1 %1196  ;;  %v1234_v41 = vsel %vm1022_vm8, %v1221_v46, %v1220_v40 }
 0x445   :  { %v1225_v57 = vperm.slane %v1197_v55, %v11100_v38  ;;  %v1254_v60 = vsel %vm1039_vm9, %v1234_v41, 0.0 }
 0x447   :  { %v1236_v36 = vsel %vm1022_vm8, %v1225_v57, %v1224_v5  ;;  %v1227_v5 = vperm.slane %v1203_v20, %v11100_v38  ;;  %v1226_v57 = vperm.slane %v1200_v47, %v11100_v38 }
 0x448   :  { %v1260_v56 = vsel %vm1039_vm9, %v1236_v36, 0.0 }
 0x449   :  { %1261 = vadd.xlane.f32.xlu0 %v1260_v56  ;;  %v1237_v40 = vsel %vm1022_vm8, %v1227_v5, %v1226_v57  ;;  %v1230_v56 = vperm.slane %v1212_v48, %v11100_v38 }
 0x44a   :  { %v1263_v12 = vsel %vm1039_vm9, %v1237_v40, 0.0 }
 0x44c   :  { %1258 = vadd.xlane.f32.xlu2 %v1257_v7  ;;  %v1206_v55 = vpop.permute.xlu1 %1205 }
 0x44d   :  { %v1228_v28 = vperm.slane %v1206_v55, %v11100_v38 }
 0x44e   :  { %1255 = vadd.xlane.f32.xlu1 %v1254_v60 }
 0x44f   :  { %v1238_v10 = vsel %vm1022_vm8, %v1229_v49, %v1228_v28 }
 0x450   :  { %v1266_v36 = vsel %vm1039_vm9, %v1238_v10, 0.0 }
 0x454   :  { %1267 = vadd.xlane.f32.xlu2 %v1266_v36  ;;  %v1215_v46 = vpop.permute.xlu1 %1214  ;;  %v4244_v30 = vpop.permute.xlu2 %4243 }
 0x455   :  { %v1231_v20 = vperm.slane %v1215_v46, %v11100_v38  ;;  %v4290_v55 = vperm.slane %v4244_v30, %v11100_v38 }
 0x456   :  { %1264 = vadd.xlane.f32.xlu1 %v1263_v12 }
 0x457   :  { %v1239_v41 = vsel %vm1022_vm8, %v1231_v20, %v1230_v56 }
 0x458   :  { %v1269_v47 = vsel %vm1039_vm9, %v1239_v41, 0.0 }
 0x459   :  { %1270 = vadd.xlane.f32.xlu0 %v1269_v47 }
 0x45c   :  { %v4256_v49 = vpop.permute.xlu2 %4255 }
 0x45d   :  { %v4294_v20 = vperm.slane %v4256_v49, %v11100_v38 }
 0x465   :  { %v4265_v56 = vpop.permute.xlu2 %4264 }
 0x466   :  { %v4297_v30 = vperm.slane %v4265_v56, %v11100_v38 }
 0x46d   :  { %v4247_v7 = vpop.permute.xlu0 %4246 }
 0x46e   :  { %v4291_v60 = vperm.slane %v4247_v7, %v11100_v38 }
 0x470   :  { %v4306_v28 = vsel %vm1022_vm8, %v4291_v60, %v4290_v55 }
 0x471   :  { %v4322_v5 = vsel %vm1039_vm9, %v4306_v28, 0.0 }
 0x472   :  { %4323 = vadd.xlane.f32.xlu2 %v4322_v5 }
 0x475   :  { %v4250_v57 = vpop.permute.xlu1 %4249 }
 0x476   :  { %v4253_v10 = vpop.permute.xlu0 %4252  ;;  %v4292_v48 = vperm.slane %v4250_v57, %v11100_v38 }
 0x477   :  { %v4293_v40 = vperm.slane %v4253_v10, %v11100_v38 }
 0x479   :  { %v4307_v36 = vsel %vm1022_vm8, %v4293_v40, %v4292_v48 }
 0x47a   :  { %v4325_v46 = vsel %vm1039_vm9, %v4307_v36, 0.0 }
 0x47b   :  { %4326 = vadd.xlane.f32.xlu1 %v4325_v46  ;;  %v4274_v46 = vpop.permute.xlu2 %4273 }
 0x47e   :  { %v4259_v12 = vpop.permute.xlu1 %4258  ;;  %v4262_v41 = vpop.permute.xlu0 %4261 }
 0x47f   :  { %v4295_v47 = vperm.slane %v4259_v12, %v11100_v38  ;;  %v4296_v7 = vperm.slane %v4262_v41, %v11100_v38  ;;  %v4300_v12 = vperm.slane %v4274_v46, %v11100_v38 }
 0x481   :  { %v4308_v55 = vsel %vm1022_vm8, %v4295_v47, %v4294_v20  ;;  %v4309_v60 = vsel %vm1022_vm8, %v4297_v30, %v4296_v7  ;;  %v4158_v30 = vperm.slane %v11738_v17, 0 }
 0x482   :  { %v4328_v28 = vsel %vm1039_vm9, %v4308_v55, 0.0  ;;  %v4331_v5 = vsel %vm1039_vm9, %v4309_v60, 0.0  ;;  %v4161_v60 = vperm.slane %v11752_v42, 1 }
 0x483   :  { %4329 = vadd.xlane.f32.xlu0 %v4328_v28  ;;  %4332 = vadd.xlane.f32.xlu2 %v4331_v5  ;;  %v4190_v7 = vsub.f32 %v11606_v25, %v4158_v30 }
 0x484   :  { %v4193_v28 = vsub.f32 %v11619_v4, %v4161_v60 }
 0x485   :  { %v4218_v55 = vmul.f32 1.442695, %v4190_v7 }
 0x486   :  { %v4268_v57 = vpop.permute.xlu1 %4267  ;;  %v4271_v10 = vpop.permute.xlu0 %4270  ;;  %v4224_v5 = vmul.f32 1.442695, %v4193_v28 }
 0x487   :  { %v4298_v49 = vperm.slane %v4268_v57, %v11100_v38  ;;  %v4299_v48 = vperm.slane %v4271_v10, %v11100_v38  ;;  %9508 = vpow2.f32 %v4218_v55 }
 0x488   :  { %9510 = vpow2.f32 %v4224_v5 }
 0x489   :  { %v4310_v40 = vsel %vm1022_vm8, %v4299_v48, %v4298_v49  ;;  %v11831_v49 = vpop.permute.xlu2 %4282 }
 0x48a   :  { %v4334_v36 = vsel %vm1039_vm9, %v4310_v40, 0.0 }
 0x48b   :  { %4335 = vadd.xlane.f32.xlu1 %v4334_v36 }
 0x48d   :  { %v11826_v57 = vpop.eup %9508 }
 0x48e   :  { %v4277_v56 = vpop.permute.xlu1 %4276  ;;  %v11829_v10 = vpop.eup %9510 }
 0x48f   :  { %v4301_v20 = vperm.slane %v4277_v56, %v11100_v38 }
 0x491   :  { %v4311_v41 = vsel %vm1022_vm8, %v4301_v20, %v4300_v12 }
 0x492   :  { %v4337_v47 = vsel %vm1039_vm9, %v4311_v41, 0.0 }
 0x493   :  { %4338 = vadd.xlane.f32.xlu0 %v4337_v47 }
 0x496   :  { %v11839_v40 = vpop.permute.xlu1 %4285 }
 0x4a7   :  { %4279 = vperm.xlu0 %9436, %v11826_v57  }
 0x4af   :  { %4288 = vperm.xlu0 %9436, %v11829_v10  }
 0x4b1   :  { %v11834_v17 = vpop.xlane.xlu0 %1252 }
 0x4b2   :  { %v1282_v48 = vperm.slane %v11834_v17, 0 }
 0x4b4   :  { %9512 = vrcp.f32 %v1282_v48  ;;  %v1353_v47 = vand.u32 2147483648, %v1282_v48  ;;  %v1351_v7 = vand.u32 2147483647, %v1282_v48  ;;  %vm1347_vm11 = vweird.f32 %v1282_v48 }
 0x4b6   :  { %v1354_v28 = vor.u32 1.1754944e-38, %v1353_v47  ;;  %vm1352_vm13 = vcmp.eq.f32.partialorder %v1351_v7, 8.507059e+37 }
 0x4b7   :  { %v11837_v42 = vpop.xlane.xlu2 %1249 }
 0x4ba   :  { %v9513_v36 = vpop.eup %9512 }
 0x4bb   :  { %v1343_v46 = vmul.f32 %v9513_v36, %v1282_v48  ;;  %vm1348_vm10 = vweird.f32 %v9513_v36 }
 0x4bc   :  { %vm1349_vm12 = vmor %vm1347_vm11, %vm1348_vm10 }
 0x4bd   :  { %v1344_v56 = vsub.f32 1.0, %v1343_v46 }
 0x4bf   :  { %v11841_v12 = vpop.xlane.xlu2 %1258  ;;  %v1345_v41 = vmul.f32 %v9513_v36, %v1344_v56 }
 0x4c0   :  { %v1287_v20 = vperm.slane %v11841_v12, 1 }
 0x4c1   :  { %v11844_v30 = vpop.xlane.xlu1 %1255  ;;  %v1346_v60 = vadd.f32 %v9513_v36, %v1345_v41 }
 0x4c2   :  { %v1284_v55 = vperm.slane %v11844_v30, 0  ;;  %9514 = vrcp.f32 %v1287_v20  ;;  %vm1422_vm6 = vweird.f32 %v1287_v20 }
 0x4c3   :  { %v1350_v5 = vsel %vm1349_vm12, %v9513_v36, %v1346_v60 }
 0x4c4   :  { %9516 = vrcp.f32 %v1284_v55  ;;  %v1355_v46 = vsel %vm1352_vm13, %v1354_v28, %v1350_v5  ;;  %v1383_v7 = vand.u32 2147483648, %v1284_v55  ;;  %vm1377_vm15 = vweird.f32 %v1284_v55 }
 0x4c5   :  { %v1356_v4 = vmul.f32 %v11660_v54, %v1355_v46  ;;  %v1381_v54 = vand.u32 2147483647, %v1284_v55 }
 0x4c6   :  { %v1384_v46 = vor.u32 1.1754944e-38, %v1383_v7 }
 0x4c7   :  { %v11848_v25 = vpop.xlane.xlu2 %1267  ;;  %1564 = vperm.xlu0 %9436, %v1356_v4   ;;  %vm1382_vm3 = vcmp.eq.f32.partialorder %v1381_v54, 8.507059e+37 }
 0x4c8   :  { %v9515_v56 = vpop.eup %9514  ;;  %v11853_v14 = vperm.slane %v11848_v25, 1 }
 0x4c9   :  { %v11850_v11 = vpop.xlane.xlu1 %1264  ;;  %v1418_v62 = vmul.f32 %v9515_v56, %v1287_v20  ;;  %vm1423_vm4 = vweird.f32 %v9515_v56 }
 0x4ca   :  { %v9517_v2 = vpop.eup %9516  ;;  %v1290_v48 = vperm.slane %v11850_v11, 0  ;;  %vm1424_vm7 = vmor %vm1422_vm6, %vm1423_vm4 }
 0x4cb   :  { %v1373_v41 = vmul.f32 %v9517_v2, %v1284_v55  ;;  %v1419_v47 = vsub.f32 1.0, %v1418_v62  ;;  %vm1378_vm14 = vweird.f32 %v9517_v2 }
 0x4cc   :  { %9518 = vrcp.f32 %v1290_v48  ;;  %vm1379_vm1 = vmor %vm1377_vm15, %vm1378_vm14  ;;  %vm1467_vm12 = vweird.f32 %v1290_v48 }
 0x4cd   :  { %v1374_v36 = vsub.f32 1.0, %v1373_v41  ;;  %9520 = vrcp.f32 %v11853_v14  ;;  %v1420_v4 = vmul.f32 %v9515_v56, %v1419_v47  ;;  %v1428_v41 = vand.u32 2147483648, %v1287_v20 }
 0x4cf   :  { %v1375_v60 = vmul.f32 %v9517_v2, %v1374_v36  ;;  %v1421_v8 = vadd.f32 %v9515_v56, %v1420_v4  ;;  %v1426_v36 = vand.u32 2147483647, %v1287_v20  ;;  %v1429_v54 = vor.u32 1.1754944e-38, %v1428_v41 }
 0x4d1   :  { %v1376_v28 = vadd.f32 %v9517_v2, %v1375_v60  ;;  %v1425_v55 = vsel %vm1424_vm7, %v9515_v56, %v1421_v8  ;;  %vm1427_vm10 = vcmp.eq.f32.partialorder %v1426_v36, 8.507059e+37 }
 0x4d2   :  { %v9519_v5 = vpop.eup %9518  ;;  %v1430_v7 = vsel %vm1427_vm10, %v1429_v54, %v1425_v55 }
 0x4d3   :  { %v1463_v9 = vmul.f32 %v9519_v5, %v1290_v48  ;;  %v1380_v43 = vsel %vm1379_vm1, %v9517_v2, %v1376_v28  ;;  %v9521_v62 = vpop.eup %9520  ;;  %vm1468_vm11 = vweird.f32 %v9519_v5  ;;  %v1473_v28 = vand.u32 2147483648, %v1290_v48 }
 0x4d4   :  { %v1385_v24 = vsel %vm1382_vm3, %v1384_v46, %v1380_v43  ;;  %v1508_v47 = vmul.f32 %v9521_v62, %v11853_v14  ;;  %v1431_v43 = vmul.f32 %v11671_v37, %v1430_v7  ;;  %vm1469_vm13 = vmor %vm1467_vm12, %vm1468_vm11  ;;  %vm1513_vm15 = vweird.f32 %v9521_v62 }
 0x4d5   :  { %v1464_v63 = vsub.f32 1.0, %v1463_v9  ;;  %v1386_v53 = vmul.f32 %v11673_v13, %v1385_v24  ;;  %v1471_v9 = vand.u32 2147483647, %v1290_v48  ;;  %v1474_v20 = vor.u32 1.1754944e-38, %v1473_v28  ;;  %v11866_v48 = vpop.xlane.xlu0 %1261 }
 0x4d6   :  { %v1509_v2 = vsub.f32 1.0, %v1508_v47  ;;  %vm1512_vm1 = vweird.f32 %v11853_v14  ;;  %v1516_v37 = vand.u32 2147483647, %v11853_v14 }
 0x4d7   :  { %1574 = vperm.xlu0 %9436, %v1386_v53   ;;  %v1465_v60 = vmul.f32 %v9519_v5, %v1464_v63  ;;  %vm1472_vm14 = vcmp.eq.f32.partialorder %v1471_v9, 8.507059e+37  ;;  %v1518_v63 = vand.u32 2147483648, %v11853_v14  ;;  %vm1514_vm3 = vmor %vm1512_vm1, %vm1513_vm15 }
 0x4d8   :  { %v1510_v13 = vmul.f32 %v9521_v62, %v1509_v2  ;;  %vm1517_vm4 = vcmp.eq.f32.partialorder %v1516_v37, 8.507059e+37 }
 0x4d9   :  { %v1466_v4 = vadd.f32 %v9519_v5, %v1465_v60  ;;  %v1519_v36 = vor.u32 1.1754944e-38, %v1518_v63 }
 0x4da   :  { %v1511_v8 = vadd.f32 %v9521_v62, %v1510_v13 }
 0x4db   :  { %v1470_v24 = vsel %vm1469_vm13, %v9519_v5, %v1466_v4 }
 0x4dc   :  { %v1475_v53 = vsel %vm1472_vm14, %v1474_v20, %v1470_v24  ;;  %v1515_v41 = vsel %vm1514_vm3, %v9521_v62, %v1511_v8 }
 0x4dd   :  { %v1476_v46 = vmul.f32 %v11683_v26, %v1475_v53  ;;  %v1520_v47 = vsel %vm1517_vm4, %v1519_v36, %v1515_v41  ;;  %v11870_v54 = vpop.xlane.xlu0 %1270 }
 0x4de   :  { %v1521_v55 = vmul.f32 %v11691_v59, %v1520_v47 }
 0x4df   :  { %1589 = vperm.xlu0 %9436, %v1431_v43  }
 0x4e5   :  { %v11861_v56 = vpop.xlane.xlu2 %4323 }
 0x4e6   :  { %v4354_v5 = vperm.slane %v11861_v56, 0 }
 0x4e7   :  { %1604 = vperm.xlu0 %9436, %v1476_v46  }
 0x4e8   :  { %9522 = vrcp.f32 %v4354_v5  ;;  %v4397_v4 = vand.u32 2147483648, %v4354_v5  ;;  %v4395_v62 = vand.u32 2147483647, %v4354_v5  ;;  %vm4391_vm7 = vweird.f32 %v4354_v5 }
 0x4ea   :  { %v4398_v59 = vor.u32 1.1754944e-38, %v4397_v4  ;;  %vm4396_vm11 = vcmp.eq.f32.partialorder %v4395_v62, 8.507059e+37 }
 0x4ee   :  { %v9523_v60 = vpop.eup %9522  ;;  %v11872_v7 = vpop.xlane.xlu1 %4326 }
 0x4ef   :  { %v4387_v26 = vmul.f32 %v9523_v60, %v4354_v5  ;;  %1619 = vperm.xlu0 %9436, %v1521_v55   ;;  %v4357_v14 = vperm.slane %v11872_v7, 1  ;;  %vm4392_vm6 = vweird.f32 %v9523_v60 }
 0x4f0   :  { %vm4393_vm10 = vmor %vm4391_vm7, %vm4392_vm6 }
 0x4f1   :  { %v4388_v2 = vsub.f32 1.0, %v4387_v26  ;;  %9524 = vrcp.f32 %v4357_v14  ;;  %v4442_v37 = vand.u32 2147483648, %v4357_v14  ;;  %v4440_v5 = vand.u32 2147483647, %v4357_v14 }
 0x4f2   :  { %vm4436_vm13 = vweird.f32 %v4357_v14 }
 0x4f3   :  { %v4389_v28 = vmul.f32 %v9523_v60, %v4388_v2  ;;  %vm4441_vm15 = vcmp.eq.f32.partialorder %v4440_v5, 8.507059e+37 }
 0x4f5   :  { %v4390_v43 = vadd.f32 %v9523_v60, %v4389_v28 }
 0x4f6   :  { %v11875_v9 = vpop.xlane.xlu0 %4329 }
 0x4f7   :  { %v4394_v24 = vsel %vm4393_vm10, %v9523_v60, %v4390_v43  ;;  %v4359_v13 = vperm.slane %v11875_v9, 1  ;;  %v9525_v53 = vpop.eup %9524  ;;  %v4443_v60 = vor.u32 1.1754944e-38, %v4442_v37 }
 0x4f8   :  { %v4399_v20 = vsel %vm4396_vm11, %v4398_v59, %v4394_v24  ;;  %v4432_v63 = vmul.f32 %v9525_v53, %v4357_v14  ;;  %vm4437_vm12 = vweird.f32 %v9525_v53 }
 0x4f9   :  { %v4400_v8 = vmul.f32 %v11709_v15, %v4399_v20  ;;  %9526 = vrcp.f32 %v4359_v13  ;;  %vm4438_vm14 = vmor %vm4436_vm13, %vm4437_vm12  ;;  %v4472_v59 = vand.u32 2147483648, %v4359_v13  ;;  %v4470_v14 = vand.u32 2147483647, %v4359_v13 }
 0x4fa   :  { %v4433_v46 = vsub.f32 1.0, %v4432_v63  ;;  %vm4466_vm3 = vweird.f32 %v4359_v13 }
 0x4fb   :  { %4628 = vperm.xlu0 %9436, %v4400_v8   ;;  %vm4471_vm6 = vcmp.eq.f32.partialorder %v4470_v14, 8.507059e+37 }
 0x4fc   :  { %v4434_v41 = vmul.f32 %v9525_v53, %v4433_v46 }
 0x4fe   :  { %v11879_v36 = vpop.xlane.xlu1 %4335  ;;  %v4435_v55 = vadd.f32 %v9525_v53, %v4434_v41 }
 0x4ff   :  { %v4362_v47 = vperm.slane %v11879_v36, 0  ;;  %v9527_v26 = vpop.eup %9526 }
 0x500   :  { %v4439_v2 = vsel %vm4438_vm14, %v9525_v53, %v4435_v55  ;;  %v4462_v15 = vmul.f32 %v9527_v26, %v4359_v13  ;;  %vm4467_vm1 = vweird.f32 %v9527_v26  ;;  %v4473_v53 = vor.u32 1.1754944e-38, %v4472_v59 }
 0x501   :  { %9528 = vrcp.f32 %v4362_v47  ;;  %v4444_v4 = vsel %vm4441_vm15, %v4443_v60, %v4439_v2  ;;  %vm4468_vm4 = vmor %vm4466_vm3, %vm4467_vm1  ;;  %v4517_v5 = vand.u32 2147483648, %v4362_v47  ;;  %v4515_v2 = vand.u32 2147483647, %v4362_v47 }
 0x502   :  { %v4445_v28 = vmul.f32 %v11723_v22, %v4444_v4  ;;  %v4463_v62 = vsub.f32 1.0, %v4462_v15  ;;  %vm4511_vm10 = vweird.f32 %v4362_v47  ;;  %v11888_v13 = vperm.slane %v11837_v42, 1 }
 0x503   :  { %vm4516_vm12 = vcmp.eq.f32.partialorder %v4515_v2, 8.507059e+37 }
 0x504   :  { %4643 = vperm.xlu0 %9436, %v4445_v28   ;;  %v4464_v20 = vmul.f32 %v9527_v26, %v4463_v62  ;;  %v4518_v28 = vor.u32 1.1754944e-38, %v4517_v5 }
 0x506   :  { %v11883_v43 = vpop.xlane.xlu0 %4338  ;;  %v4465_v46 = vadd.f32 %v9527_v26, %v4464_v20 }
 0x507   :  { %v4365_v24 = vperm.slane %v11883_v43, 1  ;;  %v9529_v8 = vpop.eup %9528 }
 0x508   :  { %v4507_v63 = vmul.f32 %v9529_v8, %v4362_v47  ;;  %v4469_v41 = vsel %vm4468_vm4, %v9527_v26, %v4465_v46  ;;  %vm4512_vm7 = vweird.f32 %v9529_v8  ;;  %vm1332_vm4 = vweird.f32 %v11888_v13 }
 0x509   :  { %9530 = vrcp.f32 %v4365_v24  ;;  %v4474_v22 = vsel %vm4471_vm6, %v4473_v53, %v4469_v41  ;;  %vm4513_vm11 = vmor %vm4511_vm10, %vm4512_vm7  ;;  %v4560_v46 = vand.u32 2147483647, %v4365_v24  ;;  %vm4556_vm14 = vweird.f32 %v4365_v24 }
 0x50a   :  { %v4508_v37 = vsub.f32 1.0, %v4507_v63  ;;  %v4475_v55 = vmul.f32 %v11734_v32, %v4474_v22  ;;  %v4562_v32 = vand.u32 2147483648, %v4365_v24  ;;  %9532 = vrcp.f32 %v11888_v13 }
 0x50b   :  { %vm4561_vm1 = vcmp.eq.f32.partialorder %v4560_v46, 8.507059e+37  ;;  %v11898_v22 = vperm.slane %v11837_v42, 0  ;;  %v11911_v42 = vperm.slane %v11866_v48, 0  ;;  %v11932_v46 = vperm.slane %v11841_v12, 0 }
 0x50c   :  { %v4509_v60 = vmul.f32 %v9529_v8, %v4508_v37  ;;  %4653 = vperm.xlu0 %9436, %v4475_v55   ;;  %v4563_v53 = vor.u32 1.1754944e-38, %v4562_v32  ;;  %v11893_v37 = vperm.slane %v11844_v30, 1 }
 0x50e   :  { %v4510_v15 = vadd.f32 %v9529_v8, %v4509_v60  ;;  %9534 = vrcp.f32 %v11893_v37 }
 0x50f   :  { %v9531_v4 = vpop.eup %9530  ;;  %9536 = vrcp.f32 %v11898_v22 }
 0x510   :  { %v4552_v62 = vmul.f32 %v9531_v4, %v4365_v24  ;;  %v4514_v59 = vsel %vm4513_vm11, %v9529_v8, %v4510_v15  ;;  %vm4557_vm13 = vweird.f32 %v9531_v4  ;;  %v9533_v60 = vpop.eup %9532 }
 0x511   :  { %v4519_v26 = vsel %vm4516_vm12, %v4518_v28, %v4514_v59  ;;  %vm4558_vm15 = vmor %vm4556_vm14, %vm4557_vm13  ;;  %v1328_v15 = vmul.f32 %v9533_v60, %v11888_v13  ;;  %vm1333_vm3 = vweird.f32 %v9533_v60  ;;  %vm1392_vm12 = vweird.f32 %v11893_v37 }
 0x512   :  { %v4553_v20 = vsub.f32 1.0, %v4552_v62  ;;  %v4520_v14 = vmul.f32 %v11746_v1, %v4519_v26  ;;  %v4303_v1 = vperm.slane %v11831_v49, %v11100_v38  ;;  %v11908_v49 = vperm.slane %v11834_v17, 1  ;;  %vm1334_vm6 = vmor %vm1332_vm4, %vm1333_vm3 }
 0x513   :  { %v1329_v28 = vsub.f32 1.0, %v1328_v15  ;;  %v11952_v15 = vperm.slane %v11870_v54, 0  ;;  %vm1317_vm14 = vweird.f32 %v11898_v22 }
 0x514   :  { %v4554_v63 = vmul.f32 %v9531_v4, %v4553_v20  ;;  %4668 = vperm.xlu0 %9436, %v4520_v14   ;;  %v11916_v59 = vpop.eup %9534  ;;  %9538 = vrcp.f32 %v11908_v49 }
 0x515   :  { %v11918_v26 = vpop.eup %9536  ;;  %9540 = vrcp.f32 %v11911_v42  ;;  %v1388_v14 = vmul.f32 %v11916_v59, %v11893_v37  ;;  %vm1393_vm10 = vweird.f32 %v11916_v59 }
 0x516   :  { %v4555_v47 = vadd.f32 %v9531_v4, %v4554_v63  ;;  %v1313_v32 = vmul.f32 %v11918_v26, %v11898_v22  ;;  %v11929_v63 = vperm.slane %v11850_v11, 1  ;;  %v1336_v11 = vand.u32 2147483647, %v11888_v13  ;;  %vm11973_vm13 = vmor %vm1392_vm12, %vm1393_vm10 }
 0x517   :  { %vm1318_vm11 = vweird.f32 %v11918_v26 }
 0x518   :  { %v4559_v41 = vsel %vm4558_vm15, %v9531_v4, %v4555_v47  ;;  %9542 = vrcp.f32 %v11929_v63  ;;  %vm1337_vm7 = vcmp.eq.f32.partialorder %v1336_v11, 8.507059e+37  ;;  %vm11983_vm15 = vmor %vm1317_vm14, %vm1318_vm11  ;;  %vm1362_vm11 = vweird.f32 %v11908_v49 }
 0x519   :  { %v4280_v8 = vpop.permute.xlu0 %4279  ;;  %v4564_v55 = vsel %vm4561_vm1, %v4563_v53, %v4559_v41  ;;  %v1389_v53 = vsub.f32 1.0, %v1388_v14  ;;  %9544 = vrcp.f32 %v11932_v46  ;;  %v1398_v14 = vand.u32 2147483648, %v11893_v37 }
 0x51a   :  { %v4302_v5 = vperm.slane %v4280_v8, %v11100_v38  ;;  %v4565_v24 = vmul.f32 %v11759_v44, %v4564_v55  ;;  %v4304_v44 = vperm.slane %v11839_v40, %v11100_v38  ;;  %v1330_v40 = vmul.f32 %v9533_v60, %v1329_v28  ;;  %v11934_v47 = vpop.eup %9538 }
 0x51b   :  { %v11936_v41 = vpop.eup %9540  ;;  %v1358_v12 = vmul.f32 %v11934_v47, %v11908_v49  ;;  %v11946_v55 = vperm.slane %v11866_v48, 1  ;;  %vm1363_vm4 = vweird.f32 %v11934_v47 }
 0x51c   :  { %v4312_v2 = vsel %vm1022_vm8, %v4303_v1, %v4302_v5  ;;  %4683 = vperm.xlu0 %9436, %v4565_v24   ;;  %v1331_v8 = vadd.f32 %v9533_v60, %v1330_v40  ;;  %v1314_v1 = vsub.f32 1.0, %v1313_v32  ;;  %v1338_v5 = vand.u32 2147483648, %v11888_v13  ;;  %vm12030_vm12 = vmor %vm1362_vm11, %vm1363_vm4 }
 0x51d   :  { %v4340_v30 = vsel %vm1039_vm9, %v4312_v2, 0.0  ;;  %v1433_v24 = vmul.f32 %v11936_v41, %v11911_v42  ;;  %9546 = vrcp.f32 %v11946_v55 }
 0x51e   :  { %4341 = vadd.xlane.f32.xlu2 %v4340_v30  ;;  %v1335_v2 = vsel %vm1334_vm6, %v9533_v60, %v1331_v8  ;;  %v1390_v30 = vmul.f32 %v11916_v59, %v1389_v53  ;;  %v1315_v13 = vmul.f32 %v11918_v26, %v1314_v1  ;;  %9548 = vrcp.f32 %v11952_v15 }
 0x51f   :  { %v1434_v48 = vsub.f32 1.0, %v1433_v24  ;;  %v1396_v53 = vand.u32 2147483647, %v11893_v37  ;;  %v1323_v8 = vand.u32 2147483648, %v11898_v22  ;;  %v1366_v24 = vand.u32 2147483647, %v11908_v49 }
 0x520   :  { %v1391_v60 = vadd.f32 %v11916_v59, %v1390_v30  ;;  %v1316_v40 = vadd.f32 %v11918_v26, %v1315_v13  ;;  %vm1438_vm6 = vweird.f32 %v11936_v41 }
 0x521   :  { %v4289_v4 = vpop.permute.xlu0 %4288  ;;  %vm1397_vm1 = vcmp.eq.f32.partialorder %v1396_v53, 8.507059e+37 }
 0x522   :  { %v4305_v62 = vperm.slane %v4289_v4, %v11100_v38  ;;  %v1339_v4 = vor.u32 1.1754944e-38, %v1338_v5  ;;  %v1320_v30 = vsel %vm11983_vm15, %v11918_v26, %v1316_v40 }
 0x524   :  { %v4313_v20 = vsel %vm1022_vm8, %v4305_v62, %v4304_v44  ;;  %v1359_v44 = vsub.f32 1.0, %v1358_v12  ;;  %v1340_v28 = vsel %vm1337_vm7, %v1339_v4, %v1335_v2  ;;  %v1321_v62 = vand.u32 2147483647, %v11898_v22 }
 0x525   :  { %v4343_v17 = vsel %vm1039_vm9, %v4313_v20, 0.0  ;;  %v11956_v20 = vpop.eup %9542  ;;  %v1341_v32 = vmul.f32 %v11640_v23, %v1340_v28  ;;  %v1395_v23 = vsel %vm11973_vm13, %v11916_v59, %v1391_v60  ;;  %v1435_v12 = vmul.f32 %v11936_v41, %v1434_v48 }
 0x526   :  { %4344 = vadd.xlane.f32.xlu1 %v4343_v17  ;;  %v11961_v17 = vpop.eup %9544  ;;  %v1478_v1 = vmul.f32 %v11956_v20, %v11929_v63  ;;  %v11990_v2 = vperm.slane %v11848_v25, 0  ;;  %v1399_v22 = vor.u32 1.1754944e-38, %v1398_v14  ;;  %v1360_v4 = vmul.f32 %v11934_v47, %v1359_v44 }
 0x527   :  { %v1403_v11 = vmul.f32 %v11961_v17, %v11932_v46  ;;  %v11996_v13 = vpop.eup %9546  ;;  %vm1322_vm3 = vcmp.eq.f32.partialorder %v1321_v62, 8.507059e+37  ;;  %v1324_v59 = vor.u32 1.1754944e-38, %v1323_v8  ;;  %v1368_v28 = vand.u32 2147483648, %v11908_v49 }
 0x528   :  { %v11999_v48 = vpop.eup %9548  ;;  %v1479_v60 = vsub.f32 1.0, %v1478_v1  ;;  %v12002_v25 = vperm.slane %v11861_v56, 1  ;;  %v1400_v14 = vsel %vm1397_vm1, %v1399_v22, %v1395_v23  ;;  %v1436_v44 = vadd.f32 %v11936_v41, %v1435_v12 }
 0x529   :  { %v1325_v26 = vsel %vm1322_vm3, %v1324_v59, %v1320_v30  ;;  %9550 = vrcp.f32 %v11990_v2  ;;  %vm1437_vm7 = vweird.f32 %v11911_v42  ;;  %v1443_v62 = vand.u32 2147483648, %v11911_v42 }
 0x52a   :  { %v1361_v40 = vadd.f32 %v11934_v47, %v1360_v4  ;;  %v1448_v56 = vmul.f32 %v11996_v13, %v11946_v55  ;;  %v1523_v53 = vmul.f32 %v11999_v48, %v11952_v15  ;;  %v1401_v8 = vmul.f32 %v11658_v34, %v1400_v14  ;;  %vm12019_vm10 = vmor %vm1437_vm7, %vm1438_vm6 }
 0x52b   :  { %v1441_v1 = vand.u32 2147483647, %v11911_v42  ;;  %9552 = vrcp.f32 %v12002_v25  ;;  %v1326_v5 = vmul.f32 %v11634_v27, %v1325_v26  ;;  %v1480_v23 = vmul.f32 %v11956_v20, %v1479_v60 }
 0x52c   :  { %v1440_v37 = vsel %vm12019_vm10, %v11936_v41, %v1436_v44  ;;  %v12036_v42 = vperm.slane %v11870_v54, 1  ;;  %v1444_v49 = vor.u32 1.1754944e-38, %v1443_v62  ;;  %v1365_v12 = vsel %vm12030_vm12, %v11934_v47, %v1361_v40 }
 0x52d   :  { %vm1367_vm13 = vcmp.eq.f32.partialorder %v1366_v24, 8.507059e+37  ;;  %v1449_v22 = vsub.f32 1.0, %v1448_v56  ;;  %v1524_v41 = vsub.f32 1.0, %v1523_v53  ;;  %vm1442_vm14 = vcmp.eq.f32.partialorder %v1441_v1, 8.507059e+37  ;;  %v4333_v1 = vpop.xlane.xlu2 %4332 }
 0x52e   :  { %v1369_v30 = vor.u32 1.1754944e-38, %v1368_v28  ;;  %v12044_v59 = vperm.slane %v11875_v9, 0  ;;  %v1445_v60 = vsel %vm1442_vm14, %v1444_v49, %v1440_v37  ;;  %v1481_v54 = vadd.f32 %v11956_v20, %v1480_v23 }
 0x52f   :  { %v12041_v4 = vpop.eup %9550  ;;  %vm1483_vm15 = vweird.f32 %v11956_v20  ;;  %vm1408_vm1 = vweird.f32 %v11961_v17  ;;  %9554 = vrcp.f32 %v12036_v42  ;;  %vm1482_vm3 = vweird.f32 %v11929_v63 }
 0x530   :  { %v1370_v14 = vsel %vm1367_vm13, %v1369_v30, %v1365_v12  ;;  %v1486_v9 = vand.u32 2147483647, %v11929_v63  ;;  %v1413_v28 = vand.u32 2147483648, %v11932_v46  ;;  %v1493_v26 = vmul.f32 %v12041_v4, %v11990_v2  ;;  %vm12060_vm4 = vmor %vm1482_vm3, %vm1483_vm15 }
 0x531   :  { %v12051_v24 = vpop.eup %9552  ;;  %v1446_v44 = vmul.f32 %v11652_v58, %v1445_v60  ;;  %vm1407_vm6 = vweird.f32 %v11932_v46  ;;  %v1411_v40 = vand.u32 2147483647, %v11932_v46  ;;  %9556 = vrcp.f32 %v12044_v59 }
 0x532   :  { %v1371_v56 = vmul.f32 %v11646_v3, %v1370_v14  ;;  %vm12071_vm7 = vmor %vm1407_vm6, %vm1408_vm1  ;;  %v1525_v58 = vmul.f32 %v11999_v48, %v1524_v41  ;;  %vm1487_vm10 = vcmp.eq.f32.partialorder %v1486_v9, 8.507059e+37  ;;  %v12084_v34 = vperm.slane %v4333_v1, 1 }
 0x533   :  { %vm1412_vm11 = vcmp.eq.f32.partialorder %v1411_v40, 8.507059e+37  ;;  %vm1528_vm12 = vweird.f32 %v11999_v48  ;;  %vm1453_vm13 = vweird.f32 %v11996_v13  ;;  %vm1527_vm14 = vweird.f32 %v11952_v15 }
 0x534   :  { %v1526_v49 = vadd.f32 %v11999_v48, %v1525_v58  ;;  %v1533_v30 = vand.u32 2147483648, %v11952_v15  ;;  %v1458_v60 = vand.u32 2147483648, %v11946_v55  ;;  %vm12099_vm15 = vmor %vm1527_vm14, %vm1528_vm12  ;;  %vm1452_vm1 = vweird.f32 %v11946_v55 }
 0x535   :  { %v12082_v37 = vpop.eup %9554  ;;  %9558 = vrcp.f32 %v12084_v34  ;;  %vm12111_vm3 = vmor %vm1452_vm1, %vm1453_vm13  ;;  %v12127_v62 = vperm.slane %v11883_v43, 0  ;;  %v1503_v43 = vand.u32 2147483648, %v11990_v2  ;;  %vm4406_vm12 = vweird.f32 %v12002_v25 }
 0x536   :  { %1559 = vperm.xlu2 %9435, %v1341_v32   ;;  %v1404_v32 = vsub.f32 1.0, %v1403_v11  ;;  %v1494_v11 = vsub.f32 1.0, %v1493_v26  ;;  %v1530_v9 = vsel %vm12099_vm15, %v11999_v48, %v1526_v49  ;;  %v1538_v48 = vmul.f32 %v12082_v37, %v12036_v42 }
 0x537   :  { %v12093_v41 = vpop.eup %9556  ;;  %v1534_v26 = vor.u32 1.1754944e-38, %v1533_v30  ;;  %v12165_v14 = vperm.slane %v11879_v36, 1  ;;  %v4455_v36 = vand.u32 2147483647, %v12044_v59 }
 0x538   :  { %v1405_v27 = vmul.f32 %v11961_v17, %v1404_v32  ;;  %v1488_v32 = vand.u32 2147483648, %v11929_v63  ;;  %v1485_v63 = vsel %vm12060_vm4, %v11956_v20, %v1481_v54  ;;  %v1414_v20 = vor.u32 1.1754944e-38, %v1413_v28 }
 0x539   :  { %v1495_v28 = vmul.f32 %v12041_v4, %v1494_v11 }
 0x53a   :  { %v1406_v47 = vadd.f32 %v11961_v17, %v1405_v27  ;;  %v1489_v46 = vor.u32 1.1754944e-38, %v1488_v32  ;;  %v1456_v32 = vand.u32 2147483647, %v11946_v55 }
 0x53c   :  { %v1410_v3 = vsel %vm12071_vm7, %v11961_v17, %v1406_v47  ;;  %v1490_v23 = vsel %vm1487_vm10, %v1489_v46, %v1485_v63  ;;  %v12089_v17 = vperm.slane %v11872_v7, 0  ;;  %v1531_v7 = vand.u32 2147483647, %v11952_v15 }
 0x53d   :  { %v1415_v27 = vsel %vm1412_vm11, %v1414_v20, %v1410_v3  ;;  %v1491_v54 = vmul.f32 %v11666_v31, %v1490_v23  ;;  %v4447_v15 = vmul.f32 %v12093_v41, %v12044_v59  ;;  %vm1457_vm6 = vcmp.eq.f32.partialorder %v1456_v32, 8.507059e+37 }
 0x53e   :  { %1579 = vperm.xlu2 %9435, %v1401_v8   ;;  %v4402_v8 = vmul.f32 %v12051_v24, %v12002_v25  ;;  %v1416_v47 = vmul.f32 %v11685_v0, %v1415_v27  ;;  %9560 = vrcp.f32 %v12089_v17  ;;  %vm1532_vm4 = vcmp.eq.f32.partialorder %v1531_v7, 8.507059e+37 }
 0x53f   :  { %1554 = vperm.xlu1 %9437, %v1326_v5   ;;  %v1450_v5 = vmul.f32 %v11996_v13, %v1449_v22  ;;  %vm1498_vm7 = vweird.f32 %v12041_v4  ;;  %v1535_v40 = vsel %vm1532_vm4, %v1534_v26, %v1530_v9  ;;  %v1496_v63 = vadd.f32 %v12041_v4, %v1495_v28 }
 0x540   :  { %v4403_v12 = vsub.f32 1.0, %v4402_v8  ;;  %v4448_v53 = vsub.f32 1.0, %v4447_v15  ;;  %vm4407_vm10 = vweird.f32 %v12051_v24  ;;  %v12134_v8 = vpop.eup %9558  ;;  %v1539_v46 = vsub.f32 1.0, %v1538_v48 }
 0x541   :  { %v1451_v22 = vadd.f32 %v11996_v13, %v1450_v5  ;;  %v4412_v3 = vand.u32 2147483648, %v12002_v25  ;;  %vm1497_vm11 = vweird.f32 %v11990_v2  ;;  %v1536_v20 = vmul.f32 %v11679_v39, %v1535_v40  ;;  %vm4408_vm14 = vmor %vm4406_vm12, %vm4407_vm10 }
 0x542   :  { %v4404_v55 = vmul.f32 %v12051_v24, %v4403_v12  ;;  %vm12146_vm13 = vmor %vm1497_vm11, %vm1498_vm7  ;;  %v1501_v23 = vand.u32 2147483647, %v11990_v2  ;;  %9562 = vrcp.f32 %v12127_v62  ;;  %v4449_v12 = vmul.f32 %v12093_v41, %v4448_v53 }
 0x543   :  { %v1455_v0 = vsel %vm12111_vm3, %v11996_v13, %v1451_v22  ;;  %v12130_v13 = vperm.slane %v4333_v1, 0  ;;  %v4410_v1 = vand.u32 2147483647, %v12002_v25  ;;  %v1500_v39 = vsel %vm12146_vm13, %v12041_v4, %v1496_v63 }
 0x544   :  { %v4405_v58 = vadd.f32 %v12051_v24, %v4404_v55  ;;  %v12139_v5 = vpop.eup %9560  ;;  %v4492_v25 = vmul.f32 %v12134_v8, %v12084_v34  ;;  %v1504_v22 = vor.u32 1.1754944e-38, %v1503_v43  ;;  %v1540_v30 = vmul.f32 %v12082_v37, %v1539_v46 }
 0x545   :  { %9564 = vrcp.f32 %v12130_v13  ;;  %v4417_v2 = vmul.f32 %v12139_v5, %v12089_v17  ;;  %vm4411_vm15 = vcmp.eq.f32.partialorder %v4410_v1, 8.507059e+37  ;;  %vm1502_vm1 = vcmp.eq.f32.partialorder %v1501_v23, 8.507059e+37 }
 0x546   :  { %1594 = vperm.xlu2 %9435, %v1446_v44   ;;  %v1459_v44 = vor.u32 1.1754944e-38, %v1458_v60  ;;  %v4409_v49 = vsel %vm4408_vm14, %v12051_v24, %v4405_v58  ;;  %v1505_v60 = vsel %vm1502_vm1, %v1504_v22, %v1500_v39  ;;  %v4450_v24 = vadd.f32 %v12093_v41, %v4449_v12 }
 0x547   :  { %1569 = vperm.xlu1 %9437, %v1371_v56   ;;  %vm4452_vm3 = vweird.f32 %v12093_v41  ;;  %v4418_v32 = vsub.f32 1.0, %v4417_v2  ;;  %v1541_v9 = vadd.f32 %v12082_v37, %v1540_v30  ;;  %vm1543_vm4 = vweird.f32 %v12082_v37 }
 0x548   :  { %v1460_v56 = vsel %vm1457_vm6, %v1459_v44, %v1455_v0  ;;  %v12169_v7 = vpop.eup %9562  ;;  %vm4451_vm6 = vweird.f32 %v12044_v59  ;;  %v1548_v15 = vand.u32 2147483648, %v12036_v42  ;;  %v1506_v0 = vmul.f32 %v11698_v29, %v1505_v60 }
 0x549   :  { %v1461_v27 = vmul.f32 %v11693_v21, %v1460_v56  ;;  %v4413_v21 = vor.u32 1.1754944e-38, %v4412_v3  ;;  %vm12181_vm7 = vmor %vm4451_vm6, %vm4452_vm3  ;;  %vm1542_vm10 = vweird.f32 %v12036_v42  ;;  %v1546_v48 = vand.u32 2147483647, %v12036_v42 }
 0x54a   :  { %9566 = vrcp.f32 %v12165_v14  ;;  %vm1544_vm11 = vmor %vm1542_vm10, %vm1543_vm4  ;;  %v4419_v40 = vmul.f32 %v12139_v5, %v4418_v32  ;;  %vm4456_vm12 = vcmp.eq.f32.partialorder %v4455_v36, 8.507059e+37  ;;  %v1549_v56 = vor.u32 1.1754944e-38, %v1548_v15 }
 0x54b   :  { %v4414_v4 = vsel %vm4411_vm15, %v4413_v21, %v4409_v49  ;;  %v12174_v31 = vpop.eup %9564  ;;  %v1545_v42 = vsel %vm1544_vm11, %v12082_v37, %v1541_v9  ;;  %vm1547_vm13 = vcmp.eq.f32.partialorder %v1546_v48, 8.507059e+37  ;;  %vm4497_vm14 = vweird.f32 %v12134_v8 }
 0x54c   :  { %v4415_v28 = vmul.f32 %v11711_v45, %v4414_v4  ;;  %v4537_v45 = vmul.f32 %v12169_v7, %v12127_v62  ;;  %v4477_v26 = vmul.f32 %v12174_v31, %v12130_v13  ;;  %v1550_v58 = vsel %vm1547_vm13, %v1549_v56, %v1545_v42 }
 0x54d   :  { %v4502_v3 = vand.u32 2147483648, %v12084_v34  ;;  %v4420_v43 = vadd.f32 %v12139_v5, %v4419_v40  ;;  %vm4422_vm15 = vweird.f32 %v12139_v5  ;;  %vm4496_vm1 = vweird.f32 %v12084_v34 }
 0x54e   :  { %1609 = vperm.xlu2 %9435, %v1491_v54   ;;  %v4493_v54 = vsub.f32 1.0, %v4492_v25  ;;  %v4538_v53 = vsub.f32 1.0, %v4537_v45  ;;  %v4478_v46 = vsub.f32 1.0, %v4477_v26  ;;  %v4500_v1 = vand.u32 2147483647, %v12084_v34  ;;  %vm4498_vm3 = vmor %vm4496_vm1, %vm4497_vm14 }
 0x54f   :  { %1584 = vperm.xlu1 %9437, %v1416_v47   ;;  %v4457_v47 = vand.u32 2147483648, %v12044_v59  ;;  %v4454_v59 = vsel %vm12181_vm7, %v12093_v41, %v4450_v24  ;;  %v4427_v11 = vand.u32 2147483648, %v12089_v17  ;;  %v1551_v23 = vmul.f32 %v11701_v16, %v1550_v58 }
 0x550   :  { %v4494_v29 = vmul.f32 %v12134_v8, %v4493_v54  ;;  %v12203_v37 = vpop.eup %9566  ;;  %vm4421_vm4 = vweird.f32 %v12089_v17  ;;  %v4539_v25 = vmul.f32 %v12169_v7, %v4538_v53  ;;  %v4503_v34 = vor.u32 1.1754944e-38, %v4502_v3 }
 0x551   :  { %v4458_v44 = vor.u32 1.1754944e-38, %v4457_v47  ;;  %vm4423_vm6 = vmor %vm4421_vm4, %vm4422_vm15  ;;  %v4479_v16 = vmul.f32 %v12174_v31, %v4478_v46  ;;  %vm4501_vm7 = vcmp.eq.f32.partialorder %v4500_v1, 8.507059e+37  ;;  %v4428_v12 = vor.u32 1.1754944e-38, %v4427_v11 }
 0x552   :  { %v4495_v41 = vadd.f32 %v12134_v8, %v4494_v29  ;;  %v4424_v49 = vsel %vm4423_vm6, %v12139_v5, %v4420_v43  ;;  %v4540_v21 = vadd.f32 %v12169_v7, %v4539_v25  ;;  %vm4542_vm11 = vweird.f32 %v12169_v7 }
 0x553   :  { %v4459_v63 = vsel %vm4456_vm12, %v4458_v44, %v4454_v59  ;;  %v4547_v22 = vand.u32 2147483648, %v12127_v62  ;;  %v4480_v30 = vadd.f32 %v12174_v31, %v4479_v16  ;;  %vm4482_vm12 = vweird.f32 %v12174_v31 }
 0x554   :  { %v4499_v39 = vsel %vm4498_vm3, %v12134_v8, %v4495_v41  ;;  %vm4541_vm13 = vweird.f32 %v12127_v62  ;;  %v4545_v4 = vand.u32 2147483647, %v12127_v62  ;;  %v4487_v60 = vand.u32 2147483648, %v12130_v13 }
 0x555   :  { %v4504_v2 = vsel %vm4501_vm7, %v4503_v34, %v4499_v39  ;;  %vm4543_vm14 = vmor %vm4541_vm13, %vm4542_vm11  ;;  %vm4481_vm15 = vweird.f32 %v12130_v13  ;;  %v4485_v24 = vand.u32 2147483647, %v12130_v13  ;;  %v4548_v47 = vor.u32 1.1754944e-38, %v4547_v22 }
 0x556   :  { %1624 = vperm.xlu2 %9435, %v1536_v20   ;;  %v4460_v20 = vmul.f32 %v11718_v50, %v4459_v63  ;;  %v4522_v50 = vmul.f32 %v12203_v37, %v12165_v14  ;;  %v4505_v5 = vmul.f32 %v11732_v33, %v4504_v2  ;;  %v4544_v32 = vsel %vm4543_vm14, %v12169_v7, %v4540_v21  ;;  %vm4483_vm1 = vmor %vm4481_vm15, %vm4482_vm12 }
 0x557   :  { %1599 = vperm.xlu1 %9437, %v1461_v27   ;;  %v4425_v27 = vand.u32 2147483647, %v12089_v17  ;;  %v4484_v33 = vsel %vm4483_vm1, %v12174_v31, %v4480_v30  ;;  %vm4546_vm3 = vcmp.eq.f32.partialorder %v4545_v4, 8.507059e+37  ;;  %v4488_v62 = vor.u32 1.1754944e-38, %v4487_v60 }
 0x558   :  { %v4523_v8 = vsub.f32 1.0, %v4522_v50  ;;  %vm4486_vm4 = vcmp.eq.f32.partialorder %v4485_v24, 8.507059e+37  ;;  %vm4527_vm6 = vweird.f32 %v12203_v37  ;;  %v4532_v7 = vand.u32 2147483648, %v12165_v14 }
 0x559   :  { %vm4426_vm10 = vcmp.eq.f32.partialorder %v4425_v27, 8.507059e+37  ;;  %vm4526_vm7 = vweird.f32 %v12165_v14  ;;  %v4530_v31 = vand.u32 2147483647, %v12165_v14 }
 0x55a   :  { %v4429_v17 = vsel %vm4426_vm10, %v4428_v12, %v4424_v49  ;;  %v4524_v9 = vmul.f32 %v12203_v37, %v4523_v8  ;;  %vm4528_vm10 = vmor %vm4526_vm7, %vm4527_vm6  ;;  %v4533_v55 = vor.u32 1.1754944e-38, %v4532_v7 }
 0x55b   :  { %v4430_v54 = vmul.f32 %v11721_v19, %v4429_v17  ;;  %v4489_v19 = vsel %vm4486_vm4, %v4488_v62, %v4484_v33  ;;  %vm4531_vm11 = vcmp.eq.f32.partialorder %v4530_v31, 8.507059e+37  ;;  %v1565_v62 = vpop.permute.xlu0 %1564 }
 0x55c   :  { %v4525_v36 = vadd.f32 %v12203_v37, %v4524_v9  ;;  %v4490_v15 = vmul.f32 %v11730_v61, %v4489_v19 }
 0x55e   :  { %4633 = vperm.xlu2 %9435, %v4415_v28   ;;  %v4549_v28 = vsel %vm4546_vm3, %v4548_v47, %v4544_v32 }
 0x55f   :  { %1614 = vperm.xlu1 %9437, %v1506_v0   ;;  %v4550_v13 = vmul.f32 %v11744_v35, %v4549_v28  ;;  %v4529_v0 = vsel %vm4528_vm10, %v12203_v37, %v4525_v36 }
 0x560   :  { %v4534_v48 = vsel %vm4531_vm11, %v4533_v55, %v4529_v0  ;;  %v17606_v55 = vld [vmem:[#allocation34_spill] sm:$0xff] }
 0x561   :  { %v4535_v45 = vmul.f32 %v11749_v52, %v4534_v48 }
 0x566   :  { %4648 = vperm.xlu2 %9435, %v4460_v20  }
 0x567   :  { %1629 = vperm.xlu1 %9437, %v1551_v23  }
 0x56e   :  { %4663 = vperm.xlu2 %9435, %v4505_v5  }
 0x56f   :  { %4638 = vperm.xlu1 %9437, %v4430_v54  }
 0x576   :  { %4678 = vperm.xlu2 %9435, %v4550_v13  }
 0x577   :  { %4658 = vperm.xlu1 %9437, %v4490_v15   ;;  %v1575_v15 = vpop.permute.xlu0 %1574 }
 0x57f   :  { %4673 = vperm.xlu1 %9437, %v4535_v45   ;;  %v1590_v45 = vpop.permute.xlu0 %1589 }
 0x591   :  { %v4342_v35 = vpop.xlane.xlu2 %4341 }
 0x592   :  { %v4366_v59 = vperm.slane %v4342_v35, 0  ;;  %v4367_v29 = vperm.slane %v4342_v35, 1  ;;  %v6304_v35 = vld [vmem:[#allocation11 + $0x18] sm:$0xff] }
 0x593   :  { %6348 = vmatpush.msra.mxu0 %v6304_v35 }
 0x594   :  { %9568 = vrcp.f32 %v4366_v59  ;;  %v4577_v58 = vand.u32 2147483648, %v4366_v59  ;;  %v4592_v41 = vand.u32 2147483648, %v4367_v29  ;;  %v4575_v46 = vand.u32 2147483647, %v4366_v59 }
 0x595   :  { %9570 = vrcp.f32 %v4367_v29  ;;  %v4590_v43 = vand.u32 2147483647, %v4367_v29  ;;  %vm4571_vm14 = vweird.f32 %v4366_v59  ;;  %vm4586_vm15 = vweird.f32 %v4367_v29 }
 0x596   :  { %v4578_v11 = vor.u32 1.1754944e-38, %v4577_v58  ;;  %v4593_v39 = vor.u32 1.1754944e-38, %v4592_v41  ;;  %vm4576_vm4 = vcmp.eq.f32.partialorder %v4575_v46, 8.507059e+37  ;;  %v6312_v46 = vld [vmem:[#allocation11 + $0x58] sm:$0xff] }
 0x597   :  { %vm4591_vm6 = vcmp.eq.f32.partialorder %v4590_v43, 8.507059e+37  ;;  %6394 = vmatpush.msra.mxu2 %v6312_v46  ;;  %v17618_v46 = vld [vmem:[#allocation44_spill] sm:$0xff] }
 0x599   :  { %v4345_v61 = vpop.xlane.xlu1 %4344  ;;  %v1560_v22 = vpop.permute.xlu2 %1559 }
 0x59a   :  { %v9569_v26 = vpop.eup %9568  ;;  %v4368_v44 = vperm.slane %v4345_v61, 0  ;;  %v4369_v14 = vperm.slane %v4345_v61, 1 }
 0x59b   :  { %v9571_v42 = vpop.eup %9570  ;;  %v4567_v40 = vmul.f32 %v9569_v26, %v4366_v59  ;;  %vm4572_vm12 = vweird.f32 %v9569_v26  ;;  %v17607_v59 = vld [vmem:[#allocation32_spill] sm:$0xff] }
 0x59c   :  { %v4582_v56 = vmul.f32 %v9571_v42, %v4367_v29  ;;  %9572 = vrcp.f32 %v4368_v44  ;;  %vm4587_vm13 = vweird.f32 %v9571_v42  ;;  %vm4573_vm1 = vmor %vm4571_vm14, %vm4572_vm12  ;;  %v4607_v8 = vand.u32 2147483648, %v4368_v44 }
 0x59d   :  { %v4568_v63 = vsub.f32 1.0, %v4567_v40  ;;  %9574 = vrcp.f32 %v4369_v14  ;;  %vm4588_vm3 = vmor %vm4586_vm15, %vm4587_vm13  ;;  %v4622_v30 = vand.u32 2147483648, %v4369_v14  ;;  %v4605_v4 = vand.u32 2147483647, %v4368_v44  ;;  %v17610_v40 = vld [vmem:[#allocation33_spill] sm:$0xff] }
 0x59e   :  { %v4583_v53 = vsub.f32 1.0, %v4582_v56  ;;  %v4620_v54 = vand.u32 2147483647, %v4369_v14  ;;  %vm4601_vm11 = vweird.f32 %v4368_v44  ;;  %vm4616_vm12 = vweird.f32 %v4369_v14 }
 0x59f   :  { %v4569_v52 = vmul.f32 %v9569_v26, %v4568_v63  ;;  %v4623_v47 = vor.u32 1.1754944e-38, %v4622_v30  ;;  %vm4606_vm15 = vcmp.eq.f32.partialorder %v4605_v4, 8.507059e+37  ;;  %v1634_v29 = vmul.f32 %v1565_v62, %v17607_v59  ;;  %v17611_v63 = vld [vmem:[#allocation19_spill] sm:$0xff]  ;;  %v6309_v30 = vld [vmem:[#allocation11 + $0x40] sm:$0xff] }
 0x5a0   :  { %v4584_v3 = vmul.f32 %v9571_v42, %v4583_v53  ;;  %v1633_v56 = vmul.f32 %v1560_v22, %v17610_v40  ;;  %v6307_v22 = vld [vmem:[#allocation11 + $0x30] sm:$0xff] }
 0x5a1   :  { %v4570_v37 = vadd.f32 %v9569_v26, %v4569_v52  ;;  %v1580_v13 = vpop.permute.xlu2 %1579  ;;  %v6303_v52 = vld [vmem:[#allocation11 + $0x10] sm:$0xff] }
 0x5a2   :  { %v9573_v20 = vpop.eup %9572  ;;  %v4585_v1 = vadd.f32 %v9571_v42, %v4584_v3  ;;  %v6316_v3 = vld [vmem:[#allocation11 + $0x78] sm:$0xff]  ;;  %6349 = vmatpush.msra.mxu0 %v6303_v52 }
 0x5a3   :  { %v9575_v23 = vpop.eup %9574  ;;  %v4597_v27 = vmul.f32 %v9573_v20, %v4368_v44  ;;  %v4574_v25 = vsel %vm4573_vm1, %v9569_v26, %v4570_v37  ;;  %vm4602_vm7 = vweird.f32 %v9573_v20  ;;  %vm4621_vm1 = vcmp.eq.f32.partialorder %v4620_v54, 8.507059e+37  ;;  %v6302_v37 = vld [vmem:[#allocation11 + $0x8] sm:$0xff]  ;;  %6417 = vmatpush.msra.mxu3 %v6316_v3  ;;  %v6295_v54 = vld [vmem:[#allocation10 + $0x4] sm:$0x3] }
 0x5a4   :  { %v4612_v50 = vmul.f32 %v9575_v23, %v4369_v14  ;;  %v4589_v34 = vsel %vm4588_vm3, %v9571_v42, %v4585_v1  ;;  %v4579_v49 = vsel %vm4576_vm4, %v4578_v11, %v4574_v25  ;;  %vm4617_vm10 = vweird.f32 %v9575_v23  ;;  %vm4603_vm13 = vmor %vm4601_vm11, %vm4602_vm7  ;;  %v17609_v14 = vld [vmem:[#allocation36_spill] sm:$0xff]  ;;  %v6315_v1 = vld [vmem:[#allocation11 + $0x70] sm:$0xff]  ;;  %6350 = vmatpush.msra.mxu0 %v6302_v37 }
 0x5a5   :  { %v4598_v16 = vsub.f32 1.0, %v4597_v27  ;;  %v4594_v12 = vsel %vm4591_vm6, %v4593_v39, %v4589_v34  ;;  %v4580_v2 = vmul.f32 %v11826_v57, %v4579_v49  ;;  %v4608_v57 = vor.u32 1.1754944e-38, %v4607_v8  ;;  %vm4618_vm14 = vmor %vm4616_vm12, %vm4617_vm10  ;;  %v6308_v11 = vld [vmem:[#allocation11 + $0x38] sm:$0xff]  ;;  %v6310_v27 = vld [vmem:[#allocation11 + $0x48] sm:$0xff]  ;;  %6418 = vmatpush.msra.mxu3 %v6315_v1 }
 0x5a6   :  { %v4613_v17 = vsub.f32 1.0, %v4612_v50  ;;  %v4595_v21 = vmul.f32 %v11757_v51, %v4594_v12  ;;  %v1636_v42 = vmul.f32 %v1575_v15, %v17609_v14  ;;  %v1663_v25 = vsel %vm875_vm5, %v1633_v56, 0.0  ;;  %v17612_v50 = vld [vmem:[#allocation35_spill] sm:$0xff]  ;;  %6371 = vmatpush.msra.mxu1 %v6308_v11  ;;  %v6332_v56 = vld [vmem:[#allocation11 + $0xf8] sm:$0xff] }
 0x5a7   :  { %4688 = vperm.xlu1 %9437, %v4580_v2   ;;  %v4599_v5 = vmul.f32 %v9573_v20, %v4598_v16  ;;  %v1637_v34 = vmul.f32 %v1580_v13, %v17612_v50  ;;  %v6314_v16 = vld [vmem:[#allocation11 + $0x68] sm:$0xff]  ;;  %v6293_v12 = vld [vmem:[#allocation10] sm:$0x3]  ;;  %v1605_v2 = vpop.permute.xlu0 %1604 }
 0x5a8   :  { %4693 = vperm.xlu2 %9435, %v4595_v21   ;;  %v4614_v60 = vmul.f32 %v9575_v23, %v4613_v17  ;;  %v1651_v39 = vsel %vm875_vm5, %v1636_v42, 0.0  ;;  %6419 = vmatpush.msra.mxu3 %v6314_v16  ;;  %v6319_v42 = vld [vmem:[#allocation11 + $0x90] sm:$0xff]  ;;  %v6324_v16 = vld [vmem:[#allocation11 + $0xb8] sm:$0xff] }
 0x5a9   :  { %v4600_v24 = vadd.f32 %v9573_v20, %v4599_v5  ;;  %v1595_v0 = vpop.permute.xlu2 %1594  ;;  %v17613_v5 = vld [vmem:[#allocation41_spill] sm:$0xff]  ;;  %6372 = vmatpush.msra.mxu1 %v6307_v22  ;;  %v6331_v1 = vld [vmem:[#allocation11 + $0xf0] sm:$0xff]  ;;  %v6297_v22 = vld [vmem:[#allocation10 + $0x8] sm:$0x3] }
 0x5aa   :  { %v4615_v32 = vadd.f32 %v9575_v23, %v4614_v60  ;;  %v1640_v4 = vmul.f32 %v1595_v0, %v17613_v5  ;;  %v6313_v60 = vld [vmem:[#allocation11 + $0x60] sm:$0xff] }
 0x5ab   :  { %v4604_v51 = vsel %vm4603_vm13, %v9573_v20, %v4600_v24  ;;  %v6311_v20 = vld [vmem:[#allocation11 + $0x50] sm:$0xff]  ;;  %6420 = vmatpush.msra.mxu3 %v6313_v60  ;;  %v6305_v0 = vld [vmem:[#allocation11 + $0x20] sm:$0xff] }
 0x5ac   :  { %v4619_v33 = vsel %vm4618_vm14, %v9575_v23, %v4615_v32  ;;  %v4609_v9 = vsel %vm4606_vm15, %v4608_v57, %v4604_v51  ;;  %v6301_v23 = vld [vmem:[#allocation11] sm:$0xff]  ;;  %6395 = vmatpush.msra.mxu2 %v6311_v20  ;;  %v6306_v32 = vld [vmem:[#allocation11 + $0x28] sm:$0xff]  ;;  %v6296_v57 = vld [vmem:[#allocation10 + $0x6] sm:$0x3]  ;;  %v1655_v13 = vsel %vm875_vm5, %v1640_v4, 0.0 }
 0x5ad   :  { %v4624_v28 = vsel %vm4621_vm1, %v4623_v47, %v4619_v33  ;;  %v4610_v19 = vmul.f32 %v11763_v18, %v4609_v9  ;;  %v17608_v18 = vld [vmem:[#allocation31_spill] sm:$0xff]  ;;  %6351 = vmatpush.msra.mxu0 %v6301_v23  ;;  %v17614_v47 = vld [vmem:[#allocation37_spill] sm:$0xff]  ;;  %v1666_v33 = vsel %vm875_vm5, %v1637_v34, 0.0  ;;  %6373 = vmatpush.msra.mxu1 %v6306_v32  ;;  %v6318_v20 = vld [vmem:[#allocation11 + $0x88] sm:$0xff] }
 0x5ae   :  { %v4625_v36 = vmul.f32 %v11829_v10, %v4624_v28  ;;  %v1649_v10 = vsel %vm875_vm5, %v1634_v29, 0.0  ;;  %6396 = vmatpush.msra.mxu2 %v6310_v27  ;;  %9406 = vmatmul.msk.f32.vlgmr.msra.gmra.mxu0 %vm158_vm0, %v6293_v12  ;;  %v1639_v51 = vmul.f32 %v1590_v45, %v17614_v47  ;;  %v17615_v9 = vld [vmem:[#allocation39_spill] sm:$0xff]  ;;  %v6299_v34 = vld [vmem:[#allocation10 + $0xc] sm:$0x3]  ;;  %v6330_v12 = vld [vmem:[#allocation11 + $0xe8] sm:$0xff] }
 0x5af   :  { %4698 = vperm.xlu0 %9436, %v4610_v19   ;;  %v17616_v19 = vld [vmem:[#allocation40_spill] sm:$0xff]  ;;  %9409 = vmatmul.msk.f32.vlgmr.msra.gmra.mxu3 %vm158_vm0, %v6296_v57  ;;  %v6327_v29 = vld [vmem:[#allocation11 + $0xd0] sm:$0xff]  ;;  %v1620_v11 = vpop.permute.xlu0 %1619  ;;  %v6322_v32 = vld [vmem:[#allocation11 + $0xa8] sm:$0xff] }
 0x5b0   :  { %4703 = vperm.xlu1 %9437, %v4625_v36   ;;  %6397 = vmatpush.msra.mxu2 %v6309_v30  ;;  %v1642_v36 = vmul.f32 %v1605_v2, %v17616_v19  ;;  %v1668_v45 = vsel %vm875_vm5, %v1639_v51, 0.0  ;;  %v17620_v2 = vld [vmem:[#allocation43_spill] sm:$0xff] }
 0x5b1   :  { %v1555_v7 = vpop.permute.xlu1 %1554  ;;  %v12254_v58 = vpop.permute.xlu2 %1609  ;;  %9408 = vmatmul.msk.f32.vlgmr.msra.gmra.mxu2 %vm158_vm0, %v6295_v54  ;;  %6374 = vmatpush.msra.mxu1 %v6305_v0  ;;  %v6323_v30 = vld [vmem:[#allocation11 + $0xb0] sm:$0xff]  ;;  %v6329_v54 = vld [vmem:[#allocation11 + $0xe0] sm:$0xff] }
 0x5b2   :  { %v1632_v48 = vmul.f32 %v1555_v7, %v17606_v55  ;;  %6509 = vmatpush.msrb.mxu3 %v6332_v56 }
 0x5b3   :  { %6463 = vmatpush.msrb.mxu1 %v6324_v16 }
 0x5b4   :  { %v1648_v26 = vsel %vm875_vm5, %v1632_v48, 0.0  ;;  %v6294_v48 = vld [vmem:[#allocation10 + $0x2] sm:$0x3]  ;;  %6510 = vmatpush.msrb.mxu3 %v6331_v1 }
 0x5b5   :  { %v1650_v41 = vadd.f32 %v1649_v10, %v1648_v26  ;;  %9407 = vmatmul.msk.f32.vlgmr.msra.gmra.mxu1 %vm158_vm0, %v6294_v48  ;;  %v6326_v10 = vld [vmem:[#allocation11 + $0xc8] sm:$0xff] }
 0x5b6   :  { %6511 = vmatpush.msrb.mxu3 %v6330_v12  ;;  %6464 = vmatpush.msrb.mxu1 %v6323_v30 }
 0x5b7   :  { %v1652_v21 = vadd.f32 %v1651_v39, %v1650_v41  ;;  %v17617_v41 = vld [vmem:[#allocation38_spill] sm:$0xff]  ;;  %v6325_v39 = vld [vmem:[#allocation11 + $0xc0] sm:$0xff] }
 0x5b8   :  { %v1643_v52 = vmul.f32 %v12254_v58, %v17617_v41  ;;  %v6317_v58 = vld [vmem:[#allocation11 + $0x80] sm:$0xff]  ;;  %6512 = vmatpush.msrb.mxu3 %v6329_v54  ;;  %6465 = vmatpush.msrb.mxu1 %v6322_v32 }
 0x5b9   :  { %v1570_v31 = vpop.permute.xlu1 %1569  ;;  %v1625_v7 = vpop.permute.xlu2 %1624 }
 0x5ba   :  { %v1635_v44 = vmul.f32 %v1570_v31, %v17608_v18  ;;  %v6328_v31 = vld [vmem:[#allocation11 + $0xd8] sm:$0xff]  ;;  %v1646_v3 = vmul.f32 %v1625_v7, %v17618_v46 }
 0x5bb   :  { %6486 = vmatpush.msrb.mxu2 %v6328_v31 }
 0x5bc   :  { %v1664_v43 = vsel %vm875_vm5, %v1635_v44, 0.0 }
 0x5bd   :  { %v1665_v17 = vadd.f32 %v1664_v43, %v1663_v25  ;;  %v17619_v43 = vld [vmem:[#allocation42_spill] sm:$0xff]  ;;  %6487 = vmatpush.msrb.mxu2 %v6327_v29 }
 0x5bf   :  { %v1667_v28 = vadd.f32 %v1666_v33, %v1665_v17  ;;  %6488 = vmatpush.msrb.mxu2 %v6326_v10  ;;  %v1645_v17 = vmul.f32 %v1620_v11, %v17620_v2  ;;  %v17621_v33 = vld [vmem:[#allocation45_spill] sm:$0xff] }
 0x5c1   :  { %v1585_v61 = vpop.permute.xlu1 %1584  ;;  %v1669_v26 = vadd.f32 %v1668_v45, %v1667_v28  ;;  %6489 = vmatpush.msrb.mxu2 %v6325_v39  ;;  %v1674_v51 = vsel %vm875_vm5, %v1645_v17, 0.0  ;;  %v6321_v28 = vld [vmem:[#allocation11 + $0xa0] sm:$0xff] }
 0x5c2   :  { %v1638_v53 = vmul.f32 %v1585_v61, %v17611_v63  ;;  %v6320_v61 = vld [vmem:[#allocation11 + $0x98] sm:$0xff]  ;;  %9412 = vmatmul.msk.f32.vlgmr.msrb.gmra.mxu2 %vm158_vm0, %v6299_v34  ;;  %6466 = vmatpush.msrb.mxu1 %v6321_v28 }
 0x5c3   :  { %6440 = vmatpush.msrb.mxu0 %v6320_v61 }
 0x5c4   :  { %v1653_v49 = vsel %vm875_vm5, %v1638_v53, 0.0  ;;  %v1657_v53 = vsel %vm875_vm5, %v1642_v36, 0.0 }
 0x5c5   :  { %v1654_v24 = vadd.f32 %v1653_v49, %v1652_v21  ;;  %6441 = vmatpush.msrb.mxu0 %v6319_v42  ;;  %v1672_v21 = vsel %vm875_vm5, %v1643_v52, 0.0 }
 0x5c7   :  { %v1656_v15 = vadd.f32 %v1655_v13, %v1654_v24  ;;  %6442 = vmatpush.msrb.mxu0 %v6318_v20  ;;  %v6300_v24 = vld [vmem:[#allocation10 + $0xe] sm:$0x3]  ;;  %v6298_v13 = vld [vmem:[#allocation10 + $0xa] sm:$0x3]  ;;  %v4629_v20 = vpop.permute.xlu0 %4628 }
 0x5c8   :  { %9413 = vmatmul.msk.f32.vlgmr.msrb.gmra.mxu3 %vm158_vm0, %v6300_v24  ;;  %9411 = vmatmul.msk.f32.vlgmr.msrb.gmra.mxu1 %vm158_vm0, %v6298_v13  ;;  %v17622_v13 = vld [vmem:[#allocation56_spill] sm:$0xff] }
 0x5c9   :  { %v1600_v8 = vpop.permute.xlu1 %1599  ;;  %v1658_v27 = vadd.f32 %v1657_v53, %v1656_v15  ;;  %6443 = vmatpush.msrb.mxu0 %v6317_v58 }
 0x5ca   :  { %v1641_v62 = vmul.f32 %v1600_v8, %v17615_v9  ;;  %v1661_v8 = vsel %vm875_vm5, %v1646_v3, 0.0  ;;  %9410 = vmatmul.msk.f32.vlgmr.msrb.gmra.mxu0 %vm158_vm0, %v6297_v22 }
 0x5cc   :  { %v1670_v35 = vsel %vm875_vm5, %v1641_v62, 0.0 }
 0x5cd   :  { %v1671_v23 = vadd.f32 %v1670_v35, %v1669_v26 }
 0x5cf   :  { %v1673_v4 = vadd.f32 %v1672_v21, %v1671_v23  ;;  %v4634_v23 = vpop.permute.xlu2 %4633  ;;  %v4644_v16 = vpop.permute.xlu0 %4643 }
 0x5d1   :  { %v1615_v44 = vpop.permute.xlu1 %1614  ;;  %v1675_v36 = vadd.f32 %v1674_v51, %v1673_v4 }
 0x5d2   :  { %v1644_v37 = vmul.f32 %v1615_v44, %v17619_v43 }
 0x5d4   :  { %v1659_v25 = vsel %vm875_vm5, %v1644_v37, 0.0 }
 0x5d5   :  { %v1660_v49 = vadd.f32 %v1659_v25, %v1658_v27 }
 0x5d7   :  { %v1662_v60 = vadd.f32 %v1661_v8, %v1660_v49  ;;  %v4649_v21 = vpop.permute.xlu2 %4648  ;;  %v4654_v24 = vpop.permute.xlu0 %4653 }
 0x5d9   :  { %9576 = vtanh.f32 %v1662_v60  ;;  %v1630_v57 = vpop.permute.xlu1 %1629 }
 0x5da   :  { %v1647_v62 = vmul.f32 %v1630_v57, %v17621_v33 }
 0x5dc   :  { %v1676_v7 = vsel %vm875_vm5, %v1647_v62, 0.0 }
 0x5dd   :  { %v1677_v15 = vadd.f32 %v1676_v7, %v1675_v36  ;;  %v4706_v7 = vmul.f32 %v4629_v20, %v17622_v13 }
 0x5df   :  { %v9577_v31 = vpop.eup %9576  ;;  %9578 = vtanh.f32 %v1677_v15  ;;  %v4664_v51 = vpop.permute.xlu2 %4663 }
 0x5e0   :  { %v1682_v0 = vmul.f32 %v9577_v31, %v17607_v59  ;;  %v1680_v48 = vmul.f32 %v9577_v31, %v17606_v55  ;;  %v1684_v53 = vmul.f32 %v9577_v31, %v17609_v14  ;;  %v1688_v52 = vmul.f32 %v9577_v31, %v17613_v5  ;;  %v4669_v15 = vpop.permute.xlu0 %4668 }
 0x5e1   :  { %v1686_v3 = vmul.f32 %v9577_v31, %v17611_v63  ;;  %v1690_v12 = vmul.f32 %v9577_v31, %v17616_v19  ;;  %v4639_v17 = vpop.permute.xlu1 %4638  ;;  %v1694_v8 = vmul.f32 %v9577_v31, %v17618_v46  ;;  %v1692_v22 = vmul.f32 %v9577_v31, %v17619_v43  ;;  %v17623_v31 = vld [vmem:[#allocation55_spill] sm:$0xff]  ;;  %v17683_v46 = vld [vmem:[#allocation49_spill] sm:$0xff] }
 0x5e2   :  { %v1702_v45 = vsel %vm875_vm5, %v1682_v0, 0.0  ;;  %v1696_v35 = vsel %vm875_vm5, %v1680_v48, 0.0  ;;  %v1708_v37 = vsel %vm875_vm5, %v1684_v53, 0.0  ;;  %v1720_v1 = vsel %vm875_vm5, %v1688_v52, 0.0 }
 0x5e3   :  { %1703 = vadd.xlane.f32.xlu1 %v1702_v45  ;;  %1697 = vadd.xlane.f32.xlu0 %v1696_v35  ;;  %v1714_v11 = vsel %vm875_vm5, %v1686_v3, 0.0  ;;  %v1726_v30 = vsel %vm875_vm5, %v1690_v12, 0.0  ;;  %v1738_v4 = vsel %vm875_vm5, %v1694_v8, 0.0  ;;  %v1732_v60 = vsel %vm875_vm5, %v1692_v22, 0.0  ;;  %v17624_v45 = vld [vmem:[#allocation58_spill] sm:$0xff] }
 0x5e4   :  { %v4708_v36 = vmul.f32 %v4639_v17, %v11408_v6  ;;  %v4707_v0 = vmul.f32 %v4634_v23, %v17623_v31  ;;  %v4709_v35 = vmul.f32 %v4644_v16, %v17624_v45 }
 0x5e5   :  { %v9579_v29 = vpop.eup %9578 }
 0x5e6   :  { %v1681_v61 = vmul.f32 %v9579_v29, %v17610_v40  ;;  %v1685_v26 = vmul.f32 %v9579_v29, %v17612_v50  ;;  %v1683_v44 = vmul.f32 %v9579_v29, %v17608_v18  ;;  %v1687_v27 = vmul.f32 %v9579_v29, %v17614_v47 }
 0x5e7   :  { %v1691_v39 = vmul.f32 %v9579_v29, %v17617_v41  ;;  %v1689_v25 = vmul.f32 %v9579_v29, %v17615_v9  ;;  %v1693_v54 = vmul.f32 %v9579_v29, %v17620_v2  ;;  %v1695_v32 = vmul.f32 %v9579_v29, %v17621_v33  ;;  %v17671_v33 = vld [vmem:[#allocation25_spill] sm:$0xff] }
 0x5e8   :  { %v1699_v10 = vsel %vm875_vm5, %v1681_v61, 0.0  ;;  %v1711_v42 = vsel %vm875_vm5, %v1685_v26, 0.0  ;;  %v1705_v56 = vsel %vm875_vm5, %v1683_v44, 0.0  ;;  %v1717_v34 = vsel %vm875_vm5, %v1687_v27, 0.0  ;;  %v17625_v26 = vld [vmem:[#allocation60_spill] sm:$0xff]  ;;  %v4684_v17 = vpop.permute.xlu0 %4683 }
 0x5e9   :  { %1700 = vadd.xlane.f32.xlu2 %v1699_v10  ;;  %v1729_v49 = vsel %vm875_vm5, %v1691_v39, 0.0  ;;  %v1723_v58 = vsel %vm875_vm5, %v1689_v25, 0.0  ;;  %v4659_v57 = vpop.permute.xlu1 %4658  ;;  %v1735_v62 = vsel %vm875_vm5, %v1693_v54, 0.0  ;;  %v1741_v28 = vsel %vm875_vm5, %v1695_v32, 0.0  ;;  %v4679_v10 = vpop.permute.xlu2 %4678  ;;  %v17631_v32 = vld [vmem:[#allocation66_spill] sm:$0xff] }
 0x5ea   :  { %v4723_v48 = vsel %vm875_vm5, %v4708_v36, 0.0  ;;  %v4722_v61 = vsel %vm875_vm5, %v4706_v7, 0.0  ;;  %v4710_v44 = vmul.f32 %v4649_v21, %v17625_v26  ;;  %v4737_v53 = vsel %vm875_vm5, %v4707_v0, 0.0 }
 0x5eb   :  { %1712 = vadd.xlane.f32.xlu1 %v1711_v42  ;;  %1706 = vadd.xlane.f32.xlu0 %v1705_v56  ;;  %v17626_v42 = vld [vmem:[#allocation62_spill] sm:$0xff]  ;;  %v4724_v52 = vadd.f32 %v4723_v48, %v4722_v61  ;;  %v4738_v3 = vsel %vm875_vm5, %v4709_v35, 0.0 }
 0x5ec   :  { %v4712_v56 = vmul.f32 %v4659_v57, %v17626_v42  ;;  %v4739_v23 = vadd.f32 %v4738_v3, %v4737_v53  ;;  %v4725_v27 = vsel %vm875_vm5, %v4710_v44, 0.0  ;;  %v4716_v57 = vmul.f32 %v4679_v10, %v17631_v32  ;;  %v17635_v10 = vld [vmem:[#allocation70_spill] sm:$0xff] }
 0x5ed   :  { %v4726_v25 = vadd.f32 %v4725_v27, %v4724_v52 }
 0x5ee   :  { %v4727_v39 = vsel %vm875_vm5, %v4712_v56, 0.0  ;;  %v4731_v35 = vsel %vm875_vm5, %v4716_v57, 0.0 }
 0x5ef   :  { %v4728_v8 = vadd.f32 %v4727_v39, %v4726_v25 }
 0x5f1   :  { %1709 = vadd.xlane.f32.xlu2 %v1708_v37  ;;  %v4674_v29 = vpop.permute.xlu1 %4673  ;;  %v17627_v37 = vld [vmem:[#allocation57_spill] sm:$0xff] }
 0x5f2   :  { %v4711_v20 = vmul.f32 %v4654_v24, %v17627_v37 }
 0x5f3   :  { %1721 = vadd.xlane.f32.xlu1 %v1720_v1  ;;  %1715 = vadd.xlane.f32.xlu0 %v1714_v11  ;;  %v17628_v1 = vld [vmem:[#allocation59_spill] sm:$0xff] }
 0x5f4   :  { %v4713_v11 = vmul.f32 %v4664_v51, %v17628_v1  ;;  %v4740_v12 = vsel %vm875_vm5, %v4711_v20, 0.0  ;;  %v17632_v51 = vld [vmem:[#allocation68_spill] sm:$0xff] }
 0x5f6   :  { %v4742_v21 = vsel %vm875_vm5, %v4713_v11, 0.0 }
 0x5f9   :  { %1718 = vadd.xlane.f32.xlu2 %v1717_v34  ;;  %v17629_v34 = vld [vmem:[#allocation64_spill] sm:$0xff] }
 0x5fb   :  { %1730 = vadd.xlane.f32.xlu1 %v1729_v49  ;;  %1724 = vadd.xlane.f32.xlu0 %v1723_v58  ;;  %v4715_v49 = vmul.f32 %v4674_v29, %v17629_v34  ;;  %v17630_v58 = vld [vmem:[#allocation65_spill] sm:$0xff] }
 0x5fc   :  { %v4714_v16 = vmul.f32 %v4669_v15, %v17630_v58  ;;  %v17634_v15 = vld [vmem:[#allocation67_spill] sm:$0xff] }
 0x5fe   :  { %v4729_v54 = vsel %vm875_vm5, %v4714_v16, 0.0 }
 0x5ff   :  { %v4730_v7 = vadd.f32 %v4729_v54, %v4728_v8 }
 0x601   :  { %1727 = vadd.xlane.f32.xlu2 %v1726_v30  ;;  %v4741_v30 = vadd.f32 %v4740_v12, %v4739_v23  ;;  %v4732_v56 = vadd.f32 %v4731_v35, %v4730_v7  ;;  %v17636_v23 = vld [vmem:[#allocation69_spill] sm:$0xff] }
 0x603   :  { %1739 = vadd.xlane.f32.xlu1 %v1738_v4  ;;  %1733 = vadd.xlane.f32.xlu0 %v1732_v60  ;;  %v4694_v4 = vpop.permute.xlu2 %4693  ;;  %v4744_v60 = vsel %vm875_vm5, %v4715_v49, 0.0  ;;  %v4743_v24 = vadd.f32 %v4742_v21, %v4741_v30 }
 0x604   :  { %v4719_v0 = vmul.f32 %v4694_v4, %v17634_v15 }
 0x605   :  { %v4745_v48 = vadd.f32 %v4744_v60, %v4743_v24 }
 0x606   :  { %v4748_v44 = vsel %vm875_vm5, %v4719_v0, 0.0 }
 0x609   :  { %1736 = vadd.xlane.f32.xlu2 %v1735_v62 }
 0x60b   :  { %1742 = vadd.xlane.f32.xlu0 %v1741_v28  ;;  %v17633_v28 = vld [vmem:[#allocation63_spill] sm:$0xff] }
 0x60c   :  { %v4717_v36 = vmul.f32 %v4684_v17, %v17633_v28 }
 0x60e   :  { %v4746_v61 = vsel %vm875_vm5, %v4717_v36, 0.0 }
 0x60f   :  { %v4747_v52 = vadd.f32 %v4746_v61, %v4745_v48 }
 0x611   :  { %v4749_v39 = vadd.f32 %v4748_v44, %v4747_v52 }
 0x619   :  { %v4689_v22 = vpop.permute.xlu1 %4688 }
 0x61a   :  { %v4718_v62 = vmul.f32 %v4689_v22, %v17632_v51 }
 0x61c   :  { %v4733_v29 = vsel %vm875_vm5, %v4718_v62, 0.0 }
 0x61d   :  { %v4734_v11 = vadd.f32 %v4733_v29, %v4732_v56 }
 0x621   :  { %v4699_v53 = vpop.permute.xlu0 %4698 }
 0x622   :  { %v4720_v3 = vmul.f32 %v4699_v53, %v17635_v10  ;;  %v4704_v20 = vpop.permute.xlu1 %4703 }
 0x623   :  { %v4721_v27 = vmul.f32 %v4704_v20, %v17636_v23 }
 0x624   :  { %v4735_v25 = vsel %vm875_vm5, %v4720_v3, 0.0 }
 0x625   :  { %v4736_v49 = vadd.f32 %v4735_v25, %v4734_v11  ;;  %v4750_v16 = vsel %vm875_vm5, %v4721_v27, 0.0 }
 0x626   :  { %v4751_v12 = vadd.f32 %v4750_v16, %v4749_v39 }
 0x627   :  { %9580 = vtanh.f32 %v4736_v49 }
 0x628   :  { %9582 = vtanh.f32 %v4751_v12 }
 0x62d   :  { %v9581_v17 = vpop.eup %9580 }
 0x62e   :  { %v9583_v21 = vpop.eup %9582  ;;  %v4756_v8 = vmul.f32 %v9581_v17, %v11408_v6  ;;  %v4754_v22 = vmul.f32 %v9581_v17, %v17622_v13  ;;  %v4760_v24 = vmul.f32 %v9581_v17, %v17626_v42  ;;  %v4758_v62 = vmul.f32 %v9581_v17, %v17625_v26  ;;  %v17659_v26 = vld [vmem:[#allocation26_spill] sm:$0xff] }
 0x62f   :  { %v4755_v30 = vmul.f32 %v9583_v21, %v17623_v31  ;;  %v4757_v57 = vmul.f32 %v9583_v21, %v17624_v45  ;;  %v4763_v48 = vmul.f32 %v9583_v21, %v17629_v34  ;;  %v4759_v35 = vmul.f32 %v9583_v21, %v17627_v37  ;;  %v17669_v45 = vld [vmem:[#allocation23_spill] sm:$0xff] }
 0x630   :  { %v4776_v4 = vsel %vm875_vm5, %v4756_v8, 0.0  ;;  %v4770_v60 = vsel %vm875_vm5, %v4754_v22, 0.0  ;;  %v4788_v36 = vsel %vm875_vm5, %v4760_v24, 0.0  ;;  %v4782_v0 = vsel %vm875_vm5, %v4758_v62, 0.0 }
 0x631   :  { %4777 = vadd.xlane.f32.xlu1 %v4776_v4  ;;  %4771 = vadd.xlane.f32.xlu2 %v4770_v60  ;;  %v4773_v54 = vsel %vm875_vm5, %v4755_v30, 0.0  ;;  %v4779_v7 = vsel %vm875_vm5, %v4757_v57, 0.0  ;;  %v4761_v29 = vmul.f32 %v9583_v21, %v17628_v1  ;;  %v4797_v61 = vsel %vm875_vm5, %v4763_v48, 0.0  ;;  %v12385_v4 = vpop.f32.mrf.mxu0 }
 0x632   :  { %4774 = vadd.xlane.f32.xlu0 %v4773_v54  ;;  %v4785_v44 = vsel %vm875_vm5, %v4759_v35, 0.0  ;;  %v4766_v53 = vmul.f32 %v9581_v17, %v17632_v51  ;;  %v4762_v52 = vmul.f32 %v9581_v17, %v17630_v58  ;;  %v4764_v3 = vmul.f32 %v9581_v17, %v17631_v32  ;;  %17637 = vst [vmem:[#allocation87_spill] sm:$0xff] %v12385_v4  ;;  %v12395_v24 = vpop.f32.mrf.mxu3  ;;  %v17651_v32 = vld [vmem:[#allocation27_spill] sm:$0xff]  ;;  %v17653_v58 = vld [vmem:[#allocation50_spill] sm:$0xff] }
 0x633   :  { %v4791_v56 = vsel %vm875_vm5, %v4761_v29, 0.0  ;;  %v4769_v39 = vmul.f32 %v9583_v21, %v17636_v23  ;;  %v4765_v25 = vmul.f32 %v9583_v21, %v17633_v28  ;;  %v4767_v49 = vmul.f32 %v9583_v21, %v17634_v15  ;;  %v12389_v21 = vpop.f32.mrf.mxu1  ;;  %17640 = vst [vmem:[#allocation90_spill] sm:$0xff] %v12395_v24  ;;  %v17649_v23 = vld [vmem:[#allocation22_spill] sm:$0xff] }
 0x634   :  { %v4806_v20 = vsel %vm875_vm5, %v4766_v53, 0.0  ;;  %v4794_v11 = vsel %vm875_vm5, %v4762_v52, 0.0  ;;  %v4800_v27 = vsel %vm875_vm5, %v4764_v3, 0.0  ;;  %v4768_v22 = vmul.f32 %v9581_v17, %v17635_v10  ;;  %17638 = vst [vmem:[#allocation88_spill] sm:$0xff] %v12389_v21  ;;  %v12391_v60 = vpop.f32.mrf.mxu2 }
 0x635   :  { %v4815_v16 = vsel %vm875_vm5, %v4769_v39, 0.0  ;;  %v4803_v12 = vsel %vm875_vm5, %v4765_v25, 0.0  ;;  %v4809_v8 = vsel %vm875_vm5, %v4767_v49, 0.0  ;;  %17639 = vst [vmem:[#allocation89_spill] sm:$0xff] %v12391_v60 }
 0x636   :  { %v4812_v30 = vsel %vm875_vm5, %v4768_v22, 0.0 }
 0x639   :  { %4789 = vadd.xlane.f32.xlu1 %v4788_v36  ;;  %4780 = vadd.xlane.f32.xlu2 %v4779_v7 }
 0x63a   :  { %4783 = vadd.xlane.f32.xlu0 %v4782_v0 }
 0x641   :  { %4798 = vadd.xlane.f32.xlu1 %v4797_v61  ;;  %4786 = vadd.xlane.f32.xlu2 %v4785_v44 }
 0x642   :  { %4792 = vadd.xlane.f32.xlu0 %v4791_v56 }
 0x645   :  { %v12405_v57 = vpop.f32.mrf.mxu2  ;;  %v12409_v7 = vpop.f32.mrf.mxu1 }
 0x646   :  { %17642 = vst [vmem:[#allocation92_spill] sm:$0xff] %v12405_v57 }
 0x647   :  { %v12399_v17 = vpop.f32.mrf.mxu0  ;;  %17643 = vst [vmem:[#allocation93_spill] sm:$0xff] %v12409_v7 }
 0x648   :  { %17641 = vst [vmem:[#allocation91_spill] sm:$0xff] %v12399_v17 }
 0x649   :  { %4807 = vadd.xlane.f32.xlu1 %v4806_v20  ;;  %4795 = vadd.xlane.f32.xlu2 %v4794_v11 }
 0x64a   :  { %4801 = vadd.xlane.f32.xlu0 %v4800_v27 }
 0x64b   :  { %v12411_v0 = vpop.f32.mrf.mxu3 }
 0x64c   :  { %17644 = vst [vmem:[#allocation94_spill] sm:$0xff] %v12411_v0 }
 0x651   :  { %4816 = vadd.xlane.f32.xlu1 %v4815_v16  ;;  %4804 = vadd.xlane.f32.xlu2 %v4803_v12  ;;  %v17645_v16 = vld [vmem:[#allocation24_spill] sm:$0xff] }
 0x652   :  { %4810 = vadd.xlane.f32.xlu0 %v4809_v8 }
 0x656   :  { %v1698_v54 = vpop.xlane.xlu0 %1697  ;;  %v1704_v48 = vpop.xlane.xlu1 %1703 }
 0x657   :  { %v12459_v34 = vadd.f32 %v1704_v48, %v17651_v32  ;;  %v17657_v32 = vld [vmem:[#allocation51_spill] sm:$0xff]  ;;  %v12478_v37 = vadd.f32 %v1698_v54, %v17659_v26 }
 0x659   :  { %4813 = vadd.xlane.f32.xlu2 %v4812_v30  ;;  %v17647_v30 = vld [vmem:[#allocation21_spill] sm:$0xff]  ;;  %17652 = vst [vmem:[#allocation27_spill] sm:$0xff] %v12459_v34  ;;  %v1776_v54 = vperm.slane %v12478_v37, %v11100_v38 }
 0x65a   :  { %17660 = vst [vmem:[#allocation26_spill] sm:$0xff] %v12478_v37 }
 0x65c   :  { %v1701_v62 = vpop.xlane.xlu2 %1700 }
 0x65e   :  { %v1707_v36 = vpop.xlane.xlu0 %1706  ;;  %v1713_v61 = vpop.xlane.xlu1 %1712 }
 0x65f   :  { %v12449_v10 = vadd.f32 %v1713_v61, %v17647_v30  ;;  %v12454_v28 = vadd.f32 %v1707_v36, %v17649_v23  ;;  %v1778_v23 = vperm.slane %v12459_v34, %v11100_v38  ;;  %v17655_v36 = vld [vmem:[#allocation28_spill] sm:$0xff] }
 0x660   :  { %v12472_v1 = vadd.f32 %v1701_v62, %v17655_v36  ;;  %v17663_v36 = vld [vmem:[#allocation47_spill] sm:$0xff] }
 0x661   :  { %17648 = vst [vmem:[#allocation21_spill] sm:$0xff] %v12449_v10 }
 0x662   :  { %17650 = vst [vmem:[#allocation22_spill] sm:$0xff] %v12454_v28 }
 0x663   :  { %17656 = vst [vmem:[#allocation28_spill] sm:$0xff] %v12472_v1 }
 0x664   :  { %v1710_v35 = vpop.xlane.xlu2 %1709 }
 0x665   :  { %v12442_v12 = vadd.f32 %v1710_v35, %v17645_v16  ;;  %v1781_v35 = vperm.slane %v12449_v10, %v11100_v38  ;;  %v1779_v16 = vperm.slane %v12454_v28, %v11100_v38 }
 0x666   :  { %6525 = vrot.lane.b32.xlu0 %v12385_v4, %s10254_s27  ;;  %v1716_v29 = vpop.xlane.xlu0 %1715  ;;  %v1722_v53 = vpop.xlane.xlu1 %1721 }
 0x667   :  { %17646 = vst [vmem:[#allocation24_spill] sm:$0xff] %v12442_v12  ;;  %v1780_v15 = vperm.slane %v12442_v12, %v11100_v38  ;;  %v12513_v2 = vadd.f32 %v1716_v29, %v17671_v33  ;;  %v17675_v29 = vld [vmem:[#allocation54_spill] sm:$0xff] }
 0x669   :  { %v1794_v30 = vsel %vm1022_vm8, %v1781_v35, %v1780_v15  ;;  %v1793_v35 = vsel %vm1022_vm8, %v1779_v16, %v1778_v23  ;;  %v17667_v23 = vld [vmem:[#allocation71_spill] sm:$0xff]  ;;  %17672 = vst [vmem:[#allocation25_spill] sm:$0xff] %v12513_v2 }
 0x66a   :  { %6527 = vrot.lane.b32.xlu1 %v12389_v21, %s10254_s27  ;;  %v1814_v6 = vsel %vm1039_vm9, %v1794_v30, -inf  ;;  %v17665_v30 = vld [vmem:[#allocation72_spill] sm:$0xff] }
 0x66c   :  { %v1719_v44 = vpop.xlane.xlu2 %1718 }
 0x66d   :  { %v12509_v13 = vadd.f32 %v1719_v44, %v17669_v45 }
 0x66e   :  { %6531 = vrot.lane.b32.xlu0 %v12395_v24, %s10254_s27  ;;  %v1725_v56 = vpop.xlane.xlu0 %1724  ;;  %v1731_v20 = vpop.xlane.xlu1 %1730 }
 0x66f   :  { %v12475_v48 = vadd.f32 %v1731_v20, %v17657_v32  ;;  %v1777_v20 = vperm.slane %v12472_v1, %v11100_v38  ;;  %v12490_v32 = vadd.f32 %v1722_v53, %v17663_v36  ;;  %17670 = vst [vmem:[#allocation23_spill] sm:$0xff] %v12509_v13  ;;  %v1783_v33 = vperm.slane %v12509_v13, %v11100_v38 }
 0x671   :  { %6529 = vrot.lane.b32.xlu2 %v12391_v60, %s10254_s27  ;;  %17658 = vst [vmem:[#allocation51_spill] sm:$0xff] %v12475_v48  ;;  %v1787_v26 = vperm.slane %v12475_v48, %v11100_v38  ;;  %v1784_v36 = vperm.slane %v12490_v32, %v11100_v38 }
 0x672   :  { %6533 = vrot.lane.b32.xlu1 %v12399_v17, %s10254_s27  ;;  %17664 = vst [vmem:[#allocation47_spill] sm:$0xff] %v12490_v32 }
 0x674   :  { %v1728_v52 = vpop.xlane.xlu2 %1727 }
 0x675   :  { %v12466_v61 = vadd.f32 %v1728_v52, %v17653_v58  ;;  %v17661_v58 = vld [vmem:[#allocation46_spill] sm:$0xff] }
 0x676   :  { %6537 = vrot.lane.b32.xlu0 %v12405_v57, %s10254_s27  ;;  %v12435_v3 = vpop.xlane.xlu0 %1733  ;;  %v1740_v39 = vpop.xlane.xlu1 %1739  ;;  %v12482_v52 = vadd.f32 %v1725_v56, %v17661_v58  ;;  %v1811_v56 = vsel %vm1039_vm9, %v1793_v35, -inf  ;;  %v1792_v35 = vsel %vm1022_vm8, %v1777_v20, %v1776_v54 }
 0x677   :  { %17654 = vst [vmem:[#allocation50_spill] sm:$0xff] %v12466_v61  ;;  %v1786_v15 = vperm.slane %v12466_v61, %v11100_v38  ;;  %v1808_v20 = vsel %vm1039_vm9, %v1792_v35, -inf  ;;  %v12528_v54 = vadd.f32 %v1740_v39, %v17675_v29 }
 0x678   :  { %17662 = vst [vmem:[#allocation46_spill] sm:$0xff] %v12482_v52 }
 0x679   :  { %6535 = vrot.lane.b32.xlu2 %v12409_v7, %s10254_s27  ;;  %v1797_v53 = vsel %vm1022_vm8, %v1787_v26, %v1786_v15  ;;  %17676 = vst [vmem:[#allocation54_spill] sm:$0xff] %v12528_v54  ;;  %v1790_v39 = vperm.slane %v12528_v54, %v11100_v38 }
 0x67a   :  { %6539 = vrot.lane.b32.xlu1 %v12411_v0, %s10254_s27 }
 0x67c   :  { %v12439_v11 = vpop.xlane.xlu2 %1736 }
 0x67e   :  { %6551 = vrot.lane.b32.xlu0 %v12389_v21, %s10253_s5  ;;  %v1743_v27 = vpop.xlane.xlu0 %1742 }
 0x681   :  { %6549 = vrot.lane.b32.xlu2 %v12385_v4, %s10253_s5 }
 0x682   :  { %6553 = vrot.lane.b32.xlu1 %v12391_v60, %s10253_s5 }
 0x686   :  { %6557 = vrot.lane.b32.xlu0 %v12399_v17, %s10253_s5 }
 0x689   :  { %6555 = vrot.lane.b32.xlu2 %v12395_v24, %s10253_s5 }
 0x68a   :  { %6559 = vrot.lane.b32.xlu1 %v12409_v7, %s10253_s5 }
 0x68e   :  { %6563 = vrot.lane.b32.xlu0 %v12411_v0, %s10253_s5 }
 0x691   :  { %6561 = vrot.lane.b32.xlu2 %v12405_v57, %s10253_s5 }
 0x692   :  { %6573 = vrot.lane.b32.xlu1 %v12385_v4, %s10252_s4 }
 0x699   :  { %6575 = vrot.lane.b32.xlu2 %v12389_v21, %s10252_s4 }
 0x6a4   :  { %v4772_v25 = vpop.xlane.xlu2 %4771  ;;  %v12444_v8 = vpop.xlane.xlu1 %4777 }
 0x6a5   :  { %v4775_v49 = vpop.xlane.xlu0 %4774  ;;  %v12500_v16 = vadd.f32 %v4772_v25, %v17665_v30  ;;  %v1823_v25 = vsel %vm1039_vm9, %v1797_v53, -inf  ;;  %v17673_v30 = vld [vmem:[#allocation52_spill] sm:$0xff] }
 0x6a6   :  { %v12503_v58 = vadd.f32 %v4775_v49, %v17667_v23  ;;  %v12517_v49 = vadd.f32 %v1743_v27, %v17673_v30  ;;  %v1782_v23 = vperm.slane %v12513_v2, %v11100_v38 }
 0x6a7   :  { %17666 = vst [vmem:[#allocation72_spill] sm:$0xff] %v12500_v16  ;;  %v4850_v15 = vperm.slane %v12500_v16, %v11100_v38 }
 0x6a8   :  { %17668 = vst [vmem:[#allocation71_spill] sm:$0xff] %v12503_v58  ;;  %v4851_v26 = vperm.slane %v12503_v58, %v11100_v38  ;;  %v1791_v53 = vperm.slane %v12517_v49, %v11100_v38  ;;  %v1795_v29 = vsel %vm1022_vm8, %v1783_v33, %v1782_v23  ;;  %v17687_v23 = vld [vmem:[#allocation74_spill] sm:$0xff] }
 0x6a9   :  { %17674 = vst [vmem:[#allocation52_spill] sm:$0xff] %v12517_v49 }
 0x6aa   :  { %v4866_v35 = vsel %vm1022_vm8, %v4851_v26, %v4850_v15 }
 0x6ab   :  { %v4882_v43 = vsel %vm1039_vm9, %v4866_v35, -inf }
 0x6ac   :  { %v12451_v51 = vpop.xlane.xlu2 %4780  ;;  %v4790_v31 = vpop.xlane.xlu1 %4789 }
 0x6ad   :  { %v12446_v22 = vpop.xlane.xlu0 %4783 }
 0x6ae   :  { %v12565_v35 = vadd.f32 %v12446_v22, %v17687_v23 }
 0x6b0   :  { %17688 = vst [vmem:[#allocation74_spill] sm:$0xff] %v12565_v35 }
 0x6b4   :  { %v4787_v62 = vpop.xlane.xlu2 %4786  ;;  %v4799_v44 = vpop.xlane.xlu1 %4798 }
 0x6b5   :  { %v4793_v42 = vpop.xlane.xlu0 %4792 }
 0x6b8   :  { %1815 = vmax.xlane.f32.xlu0 %v1814_v6  ;;  %v1785_v6 = vperm.slane %v12482_v52, %v11100_v38 }
 0x6ba   :  { %v1796_v45 = vsel %vm1022_vm8, %v1785_v6, %v1784_v36  ;;  %v17677_v6 = vld [vmem:[#allocation77_spill] sm:$0xff] }
 0x6bb   :  { %v12536_v36 = vadd.f32 %v4793_v42, %v17677_v6  ;;  %v12552_v42 = vadd.f32 %v12435_v3, %v17683_v46 }
 0x6bc   :  { %1812 = vmax.xlane.f32.xlu1 %v1811_v56  ;;  %v4796_v27 = vpop.xlane.xlu2 %4795  ;;  %v1820_v56 = vsel %vm1039_vm9, %v1796_v45, -inf  ;;  %v17681_v45 = vld [vmem:[#allocation78_spill] sm:$0xff]  ;;  %v4808_v3 = vpop.xlane.xlu1 %4807 }
 0x6bd   :  { %v4802_v41 = vpop.xlane.xlu0 %4801  ;;  %17678 = vst [vmem:[#allocation77_spill] sm:$0xff] %v12536_v36  ;;  %v4857_v26 = vperm.slane %v12536_v36, %v11100_v38 }
 0x6be   :  { %17684 = vst [vmem:[#allocation49_spill] sm:$0xff] %v12552_v42 }
 0x6c0   :  { %1824 = vmax.xlane.f32.xlu0 %v1823_v25  ;;  %v17679_v25 = vld [vmem:[#allocation53_spill] sm:$0xff] }
 0x6c1   :  { %v12543_v30 = vadd.f32 %v12439_v11, %v17679_v25  ;;  %v1799_v11 = vsel %vm1022_vm8, %v1791_v53, %v1790_v39  ;;  %v17689_v39 = vld [vmem:[#allocation83_spill] sm:$0xff] }
 0x6c2   :  { %1809 = vmax.xlane.f32.xlu2 %v1808_v20  ;;  %v12546_v20 = vadd.f32 %v4790_v31, %v17681_v45  ;;  %v1817_v31 = vsel %vm1039_vm9, %v1795_v29, -inf  ;;  %v17691_v29 = vld [vmem:[#allocation75_spill] sm:$0xff] }
 0x6c3   :  { %17680 = vst [vmem:[#allocation53_spill] sm:$0xff] %v12543_v30  ;;  %v1789_v33 = vperm.slane %v12543_v30, %v11100_v38 }
 0x6c4   :  { %1821 = vmax.xlane.f32.xlu1 %v1820_v56  ;;  %17682 = vst [vmem:[#allocation78_spill] sm:$0xff] %v12546_v20  ;;  %v17685_v56 = vld [vmem:[#allocation76_spill] sm:$0xff]  ;;  %v4856_v46 = vperm.slane %v12546_v20, %v11100_v38  ;;  %v4805_v45 = vpop.xlane.xlu2 %4804 }
 0x6c5   :  { %v12555_v15 = vadd.f32 %v4787_v62, %v17685_v56  ;;  %v4811_v6 = vpop.xlane.xlu0 %4810  ;;  %v1829_v62 = vsel %vm1039_vm9, %v1799_v11, -inf  ;;  %v12580_v56 = vadd.f32 %v12451_v51, %v17691_v29  ;;  %v4854_v11 = vperm.slane %v12565_v35, %v11100_v38 }
 0x6c6   :  { %v12575_v25 = vadd.f32 %v4811_v6, %v17689_v39  ;;  %v4869_v22 = vsel %vm1022_vm8, %v4857_v26, %v4856_v46  ;;  %v17695_v6 = vld [vmem:[#allocation73_spill] sm:$0xff]  ;;  %v17697_v26 = vld [vmem:[#allocation82_spill] sm:$0xff] }
 0x6c7   :  { %17686 = vst [vmem:[#allocation76_spill] sm:$0xff] %v12555_v15  ;;  %v4855_v53 = vperm.slane %v12555_v15, %v11100_v38  ;;  %v4891_v47 = vsel %vm1039_vm9, %v4869_v22, -inf  ;;  %v12594_v46 = vadd.f32 %v4805_v45, %v17697_v26  ;;  %v17703_v26 = vld [vmem:[#allocation81_spill] sm:$0xff] }
 0x6c8   :  { %4883 = vmax.xlane.f32.xlu0 %v4882_v43  ;;  %v1788_v43 = vperm.slane %v12552_v42, %v11100_v38  ;;  %17690 = vst [vmem:[#allocation83_spill] sm:$0xff] %v12575_v25  ;;  %v4863_v51 = vperm.slane %v12575_v25, %v11100_v38 }
 0x6c9   :  { %17692 = vst [vmem:[#allocation75_spill] sm:$0xff] %v12580_v56  ;;  %v4868_v39 = vsel %vm1022_vm8, %v4855_v53, %v4854_v11  ;;  %v17701_v53 = vld [vmem:[#allocation79_spill] sm:$0xff] }
 0x6ca   :  { %1818 = vmax.xlane.f32.xlu2 %v1817_v31  ;;  %v17693_v31 = vld [vmem:[#allocation84_spill] sm:$0xff]  ;;  %v1798_v9 = vsel %vm1022_vm8, %v1789_v33, %v1788_v43  ;;  %17698 = vst [vmem:[#allocation82_spill] sm:$0xff] %v12594_v46  ;;  %v4853_v33 = vperm.slane %v12580_v56, %v11100_v38  ;;  %v4888_v45 = vsel %vm1039_vm9, %v4868_v39, -inf  ;;  %v12614_v11 = vadd.f32 %v4796_v27, %v17701_v53 }
 0x6cb   :  { %v12585_v23 = vadd.f32 %v4808_v3, %v17693_v31  ;;  %v1826_v3 = vsel %vm1039_vm9, %v1798_v9, -inf  ;;  %v17699_v43 = vld [vmem:[#allocation80_spill] sm:$0xff]  ;;  %v12621_v39 = vadd.f32 %v4799_v44, %v17703_v26 }
 0x6cc   :  { %1830 = vmax.xlane.f32.xlu1 %v1829_v62  ;;  %v12591_v62 = vadd.f32 %v12444_v8, %v17695_v6  ;;  %v12603_v22 = vadd.f32 %v4802_v41, %v17699_v43  ;;  %17702 = vst [vmem:[#allocation79_spill] sm:$0xff] %v12614_v11  ;;  %v4814_v27 = vpop.xlane.xlu2 %4813 }
 0x6cd   :  { %17694 = vst [vmem:[#allocation84_spill] sm:$0xff] %v12585_v23  ;;  %v4862_v8 = vperm.slane %v12585_v23, %v11100_v38 }
 0x6ce   :  { %17696 = vst [vmem:[#allocation73_spill] sm:$0xff] %v12591_v62  ;;  %v4852_v29 = vperm.slane %v12591_v62, %v11100_v38  ;;  %v4860_v41 = vperm.slane %v12603_v22, %v11100_v38 }
 0x6cf   :  { %17700 = vst [vmem:[#allocation80_spill] sm:$0xff] %v12603_v22  ;;  %v4872_v9 = vsel %vm1022_vm8, %v4863_v51, %v4862_v8  ;;  %v4858_v51 = vperm.slane %v12614_v11, %v11100_v38 }
 0x6d0   :  { %4892 = vmax.xlane.f32.xlu0 %v4891_v47  ;;  %v4861_v47 = vperm.slane %v12594_v46, %v11100_v38  ;;  %v4867_v31 = vsel %vm1022_vm8, %v4853_v33, %v4852_v29  ;;  %v4900_v6 = vsel %vm1039_vm9, %v4872_v9, -inf  ;;  %17704 = vst [vmem:[#allocation81_spill] sm:$0xff] %v12621_v39  ;;  %v4859_v33 = vperm.slane %v12621_v39, %v11100_v38  ;;  %v17705_v29 = vld [vmem:[#allocation85_spill] sm:$0xff] }
 0x6d1   :  { %v4885_v43 = vsel %vm1039_vm9, %v4867_v31, -inf  ;;  %v12631_v44 = vadd.f32 %v4814_v27, %v17705_v29 }
 0x6d2   :  { %1827 = vmax.xlane.f32.xlu2 %v1826_v3  ;;  %v4871_v3 = vsel %vm1022_vm8, %v4861_v47, %v4860_v41  ;;  %v4870_v9 = vsel %vm1022_vm8, %v4859_v33, %v4858_v51  ;;  %v17707_v47 = vld [vmem:[#allocation86_spill] sm:$0xff] }
 0x6d3   :  { %v4897_v8 = vsel %vm1039_vm9, %v4871_v3, -inf  ;;  %17706 = vst [vmem:[#allocation85_spill] sm:$0xff] %v12631_v44  ;;  %v4894_v41 = vsel %vm1039_vm9, %v4870_v9, -inf  ;;  %v4864_v31 = vperm.slane %v12631_v44, %v11100_v38 }
 0x6d4   :  { %4889 = vmax.xlane.f32.xlu1 %v4888_v45  ;;  %v4817_v45 = vpop.xlane.xlu1 %4816  ;;  %v12650_v51 = vpop.permute.xlu2 %6529 }
 0x6d5   :  { %v12635_v53 = vadd.f32 %v4817_v45, %v17707_v47  ;;  %17710 = vst [vmem:[#allocation96_spill] sm:$0xff] %v12650_v51 }
 0x6d7   :  { %17708 = vst [vmem:[#allocation86_spill] sm:$0xff] %v12635_v53 }
 0x6d8   :  { %4901 = vmax.xlane.f32.xlu0 %v4900_v6  ;;  %v4865_v6 = vperm.slane %v12635_v53, %v11100_v38  ;;  %v12652_v27 = vpop.permute.xlu0 %6525 }
 0x6d9   :  { %17711 = vst [vmem:[#allocation97_spill] sm:$0xff] %v12652_v27 }
 0x6da   :  { %4886 = vmax.xlane.f32.xlu2 %v4885_v43  ;;  %v4873_v26 = vsel %vm1022_vm8, %v4865_v6, %v4864_v31 }
 0x6db   :  { %v4903_v3 = vsel %vm1039_vm9, %v4873_v26, -inf }
 0x6dc   :  { %4898 = vmax.xlane.f32.xlu1 %v4897_v8  ;;  %v12646_v43 = vpop.permute.xlu1 %6527  ;;  %v12658_v33 = vpop.permute.xlu2 %6535 }
 0x6dd   :  { %17709 = vst [vmem:[#allocation95_spill] sm:$0xff] %v12646_v43 }
 0x6de   :  { %17713 = vst [vmem:[#allocation99_spill] sm:$0xff] %v12658_v33 }
 0x6e0   :  { %v12660_v45 = vpop.permute.xlu0 %6531 }
 0x6e1   :  { %17714 = vst [vmem:[#allocation100_spill] sm:$0xff] %v12660_v45 }
 0x6e2   :  { %4895 = vmax.xlane.f32.xlu2 %v4894_v41 }
 0x6e4   :  { %v12654_v8 = vpop.permute.xlu1 %6533  ;;  %v12664_v9 = vpop.permute.xlu2 %6549 }
 0x6e5   :  { %17712 = vst [vmem:[#allocation98_spill] sm:$0xff] %v12654_v8 }
 0x6e6   :  { %17716 = vst [vmem:[#allocation102_spill] sm:$0xff] %v12664_v9 }
 0x6e8   :  { %v12666_v47 = vpop.permute.xlu0 %6537 }
 0x6e9   :  { %17717 = vst [vmem:[#allocation103_spill] sm:$0xff] %v12666_v47 }
 0x6ea   :  { %4904 = vmax.xlane.f32.xlu2 %v4903_v3 }
 0x6ec   :  { %6577 = vrot.lane.b32.xlu0 %v12391_v60, %s10252_s4  ;;  %v12662_v29 = vpop.permute.xlu1 %6539  ;;  %v12670_v31 = vpop.permute.xlu2 %6555 }
 0x6ed   :  { %17715 = vst [vmem:[#allocation101_spill] sm:$0xff] %v12662_v29 }
 0x6ee   :  { %17719 = vst [vmem:[#allocation105_spill] sm:$0xff] %v12670_v31 }
 0x6f0   :  { %v12672_v6 = vpop.permute.xlu0 %6551 }
 0x6f1   :  { %17720 = vst [vmem:[#allocation106_spill] sm:$0xff] %v12672_v6 }
 0x6f4   :  { %v12668_v41 = vpop.permute.xlu1 %6553  ;;  %v12676_v3 = vpop.permute.xlu2 %6561 }
 0x6f5   :  { %6579 = vrot.lane.b32.xlu1 %v12395_v24, %s10252_s4  ;;  %17718 = vst [vmem:[#allocation104_spill] sm:$0xff] %v12668_v41 }
 0x6f6   :  { %17722 = vst [vmem:[#allocation108_spill] sm:$0xff] %v12676_v3 }
 0x6f8   :  { %v12678_v8 = vpop.permute.xlu0 %6557 }
 0x6f9   :  { %17723 = vst [vmem:[#allocation109_spill] sm:$0xff] %v12678_v8 }
 0x6fc   :  { %v12674_v26 = vpop.permute.xlu1 %6559  ;;  %v12682_v45 = vpop.permute.xlu2 %6575 }
 0x6fd   :  { %17721 = vst [vmem:[#allocation107_spill] sm:$0xff] %v12674_v26 }
 0x6fe   :  { %17725 = vst [vmem:[#allocation111_spill] sm:$0xff] %v12682_v45 }
 0x700   :  { %v12684_v29 = vpop.permute.xlu0 %6563 }
 0x701   :  { %17726 = vst [vmem:[#allocation112_spill] sm:$0xff] %v12684_v29 }
 0x702   :  { %6581 = vrot.lane.b32.xlu2 %v12399_v17, %s10252_s4 }
 0x704   :  { %v12680_v33 = vpop.permute.xlu1 %6573 }
 0x705   :  { %17724 = vst [vmem:[#allocation110_spill] sm:$0xff] %v12680_v33 }
 0x72b   :  { %v1816_v31 = vpop.xlane.xlu0 %1815 }
 0x72c   :  { %v1844_v8 = vperm.slane %v1816_v31, 0 }
 0x72f   :  { %v1813_v51 = vpop.xlane.xlu1 %1812 }
 0x730   :  { %v1842_v47 = vperm.slane %v1813_v51, 0  ;;  %v1843_v26 = vperm.slane %v1813_v51, 1  ;;  %v1845_v51 = vperm.slane %v1816_v31, 1 }
 0x732   :  { %v1874_v27 = vsub.f32 %v12459_v34, %v1842_v47  ;;  %v1875_v45 = vsub.f32 %v12454_v28, %v1843_v26 }
 0x733   :  { %v1825_v31 = vpop.xlane.xlu0 %1824 }
 0x734   :  { %v1892_v41 = vmul.f32 1.442695, %v1874_v27  ;;  %v1876_v27 = vsub.f32 %v12442_v12, %v1844_v8 }
 0x735   :  { %v1810_v43 = vpop.xlane.xlu2 %1809 }
 0x736   :  { %9584 = vpow2.f32 %v1892_v41  ;;  %v1840_v6 = vperm.slane %v1810_v43, 0  ;;  %v1841_v9 = vperm.slane %v1810_v43, 1 }
 0x737   :  { %v1822_v47 = vpop.xlane.xlu1 %1821 }
 0x738   :  { %v1872_v3 = vsub.f32 %v12478_v37, %v1840_v6  ;;  %v1873_v33 = vsub.f32 %v12472_v1, %v1841_v9  ;;  %v1894_v6 = vmul.f32 1.442695, %v1875_v45  ;;  %v1849_v37 = vperm.slane %v1822_v47, 1 }
 0x73a   :  { %v1888_v19 = vmul.f32 1.442695, %v1872_v3  ;;  %v1890_v29 = vmul.f32 1.442695, %v1873_v33  ;;  %v1896_v3 = vmul.f32 1.442695, %v1876_v27  ;;  %v1881_v8 = vsub.f32 %v12482_v52, %v1849_v37 }
 0x73c   :  { %v12690_v50 = vpop.eup %9584  ;;  %9586 = vpow2.f32 %v1888_v19  ;;  %v1877_v19 = vsub.f32 %v12449_v10, %v1845_v51  ;;  %v1850_v51 = vperm.slane %v1825_v31, 0 }
 0x73d   :  { %9588 = vpow2.f32 %v1890_v29  ;;  %v1819_v41 = vpop.xlane.xlu2 %1818  ;;  %1943 = vperm.xlu1 %9437, %v12690_v50  }
 0x73e   :  { %v1846_v43 = vperm.slane %v1819_v41, 0  ;;  %v1847_v1 = vperm.slane %v1819_v41, 1  ;;  %9590 = vpow2.f32 %v1894_v6  ;;  %v1898_v27 = vmul.f32 1.442695, %v1877_v19 }
 0x73f   :  { %v1848_v41 = vperm.slane %v1822_v47, 0  ;;  %v1882_v47 = vsub.f32 %v12466_v61, %v1850_v51 }
 0x740   :  { %v1878_v9 = vsub.f32 %v12513_v2, %v1846_v43  ;;  %v1879_v45 = vsub.f32 %v12509_v13, %v1847_v1  ;;  %v1906_v43 = vmul.f32 1.442695, %v1881_v8 }
 0x741   :  { %v1880_v37 = vsub.f32 %v12490_v32, %v1848_v41  ;;  %v1908_v41 = vmul.f32 1.442695, %v1882_v47 }
 0x742   :  { %v12695_v26 = vpop.eup %9586  ;;  %v1900_v33 = vmul.f32 1.442695, %v1878_v9  ;;  %v1902_v6 = vmul.f32 1.442695, %v1879_v45 }
 0x743   :  { %v12697_v34 = vpop.eup %9588  ;;  %1937 = vperm.xlu0 %9436, %v12695_v26   ;;  %v1904_v19 = vmul.f32 1.442695, %v1880_v37 }
 0x744   :  { %9592 = vpow2.f32 %v1900_v33  ;;  %1940 = vperm.xlu2 %9435, %v12697_v34   ;;  %v12704_v2 = vpop.eup %9590  ;;  %v1851_v33 = vperm.slane %v1825_v31, 1 }
 0x745   :  { %9594 = vpow2.f32 %v1896_v3  ;;  %v1828_v29 = vpop.xlane.xlu2 %1827  ;;  %v1831_v3 = vpop.xlane.xlu1 %1830 }
 0x746   :  { %v1852_v9 = vperm.slane %v1828_v29, 0  ;;  %9596 = vpow2.f32 %v1898_v27  ;;  %v1855_v8 = vperm.slane %v1831_v3, 1  ;;  %v1853_v13 = vperm.slane %v1828_v29, 1 }
 0x747   :  { %9598 = vpow2.f32 %v1906_v43  ;;  %v1883_v43 = vsub.f32 %v12475_v48, %v1851_v33 }
 0x748   :  { %v1884_v1 = vsub.f32 %v12552_v42, %v1852_v9  ;;  %9600 = vpow2.f32 %v1902_v6  ;;  %v4884_v9 = vpop.xlane.xlu0 %4883  ;;  %v1887_v31 = vsub.f32 %v12517_v49, %v1855_v8  ;;  %v1885_v29 = vsub.f32 %v12543_v30, %v1853_v13 }
 0x749   :  { %9602 = vpow2.f32 %v1904_v19  ;;  %v1910_v6 = vmul.f32 1.442695, %v1883_v43  ;;  %v4914_v37 = vperm.slane %v4884_v9, 0 }
 0x74a   :  { %v12706_v28 = vpop.eup %9592  ;;  %v1912_v45 = vmul.f32 1.442695, %v1884_v1  ;;  %v1854_v1 = vperm.slane %v1831_v3, 0  ;;  %v1918_v47 = vmul.f32 1.442695, %v1887_v31 }
 0x74b   :  { %v12708_v12 = vpop.eup %9594  ;;  %1946 = vperm.xlu0 %9436, %v12704_v2   ;;  %1955 = vperm.xlu1 %9437, %v12706_v28   ;;  %v1914_v19 = vmul.f32 1.442695, %v1885_v29  ;;  %v4946_v8 = vsub.f32 %v12500_v16, %v4914_v37 }
 0x74c   :  { %1949 = vperm.xlu2 %9435, %v12708_v12   ;;  %v12716_v27 = vpop.eup %9596  ;;  %9604 = vpow2.f32 %v1912_v45  ;;  %v1886_v13 = vsub.f32 %v12528_v54, %v1854_v1 }
 0x74d   :  { %v12718_v52 = vpop.eup %9598  ;;  %9606 = vpow2.f32 %v1908_v41  ;;  %v4887_v51 = vpop.xlane.xlu2 %4886  ;;  %v4915_v41 = vperm.slane %v4884_v9, 1  ;;  %v4962_v43 = vmul.f32 1.442695, %v4946_v8 }
 0x74e   :  { %v12720_v32 = vpop.eup %9600  ;;  %v4916_v42 = vperm.slane %v4887_v51, 0  ;;  %9608 = vpow2.f32 %v1910_v6  ;;  %v4890_v3 = vpop.xlane.xlu1 %4889  ;;  %v1916_v31 = vmul.f32 1.442695, %v1886_v13 }
 0x74f   :  { %v12728_v33 = vpop.eup %9602  ;;  %9610 = vpow2.f32 %v1918_v47  ;;  %v4918_v29 = vperm.slane %v4890_v3, 0  ;;  %v4919_v37 = vperm.slane %v4890_v3, 1  ;;  %v4947_v1 = vsub.f32 %v12503_v58, %v4915_v41 }
 0x750   :  { %9612 = vpow2.f32 %v1914_v19  ;;  %v4948_v45 = vsub.f32 %v12591_v62, %v4916_v42  ;;  %v4893_v42 = vpop.xlane.xlu0 %4892 }
 0x751   :  { %9614 = vpow2.f32 %v4962_v43  ;;  %v4950_v9 = vsub.f32 %v12565_v35, %v4918_v29  ;;  %v4951_v47 = vsub.f32 %v12555_v15, %v4919_v37  ;;  %v4964_v8 = vmul.f32 1.442695, %v4947_v1 }
 0x752   :  { %v12730_v61 = vpop.eup %9604  ;;  %v4966_v30 = vmul.f32 1.442695, %v4948_v45  ;;  %9616 = vpow2.f32 %v1916_v31  ;;  %v4921_v13 = vperm.slane %v4893_v42, 1  ;;  %v4917_v45 = vperm.slane %v4887_v51, 1 }
 0x753   :  { %1952 = vperm.xlu0 %9436, %v12716_v27   ;;  %1964 = vperm.xlu1 %9437, %v12718_v52   ;;  %v12732_v48 = vpop.eup %9606  ;;  %v4970_v3 = vmul.f32 1.442695, %v4950_v9  ;;  %v4972_v43 = vmul.f32 1.442695, %v4951_v47  ;;  %v4920_v1 = vperm.slane %v4893_v42, 0 }
 0x754   :  { %1958 = vperm.xlu2 %9435, %v12720_v32   ;;  %v12740_v6 = vpop.eup %9608  ;;  %9618 = vpow2.f32 %v4966_v30  ;;  %v4953_v29 = vsub.f32 %v12536_v36, %v4921_v13  ;;  %v4949_v30 = vsub.f32 %v12580_v56, %v4917_v45 }
 0x755   :  { %v12742_v49 = vpop.eup %9610  ;;  %v4896_v19 = vpop.xlane.xlu2 %4895  ;;  %9620 = vpow2.f32 %v4964_v8 }
 0x756   :  { %v12744_v16 = vpop.eup %9612  ;;  %v4922_v62 = vperm.slane %v4896_v19, 0  ;;  %9622 = vpow2.f32 %v4970_v3  ;;  %v4899_v51 = vpop.xlane.xlu1 %4898  ;;  %v4976_v9 = vmul.f32 1.442695, %v4953_v29  ;;  %v4968_v47 = vmul.f32 1.442695, %v4949_v30 }
 0x757   :  { %v12752_v41 = vpop.eup %9614  ;;  %9624 = vpow2.f32 %v4972_v43  ;;  %v4924_v35 = vperm.slane %v4899_v51, 0  ;;  %v4925_v13 = vperm.slane %v4899_v51, 1  ;;  %v4952_v3 = vsub.f32 %v12546_v20, %v4920_v1 }
 0x758   :  { %v12754_v54 = vpop.eup %9616  ;;  %v4954_v37 = vsub.f32 %v12614_v11, %v4922_v62  ;;  %9626 = vpow2.f32 %v4976_v9  ;;  %v4902_v62 = vpop.xlane.xlu0 %4901 }
 0x759   :  { %9628 = vpow2.f32 %v4968_v47  ;;  %v4956_v42 = vsub.f32 %v12603_v22, %v4924_v35  ;;  %v4957_v45 = vsub.f32 %v12594_v46, %v4925_v13  ;;  %v4974_v29 = vmul.f32 1.442695, %v4952_v3 }
 0x75a   :  { %v12756_v31 = vpop.eup %9618  ;;  %v4978_v15 = vmul.f32 1.442695, %v4954_v37  ;;  %v4927_v30 = vperm.slane %v4902_v62, 1  ;;  %v4923_v37 = vperm.slane %v4896_v19, 1  ;;  %v4926_v13 = vperm.slane %v4902_v62, 0 }
 0x75b   :  { %1973 = vperm.xlu1 %9437, %v12730_v61   ;;  %1961 = vperm.xlu0 %9436, %v12728_v33   ;;  %v12764_v8 = vpop.eup %9620  ;;  %v4982_v51 = vmul.f32 1.442695, %v4956_v42  ;;  %v4984_v9 = vmul.f32 1.442695, %v4957_v45 }
 0x75c   :  { %1967 = vperm.xlu2 %9435, %v12732_v48   ;;  %v12766_v36 = vpop.eup %9622  ;;  %9630 = vpow2.f32 %v4978_v15  ;;  %v4959_v35 = vsub.f32 %v12575_v25, %v4927_v30  ;;  %v4955_v15 = vsub.f32 %v12621_v39, %v4923_v37 }
 0x75d   :  { %v12768_v58 = vpop.eup %9624  ;;  %v4905_v43 = vpop.xlane.xlu2 %4904  ;;  %9632 = vpow2.f32 %v4974_v29 }
 0x75e   :  { %17727 = vst [vmem:[#allocation113_spill] sm:$0xff] %v12768_v58  ;;  %v12776_v1 = vpop.eup %9626  ;;  %v4928_v11 = vperm.slane %v4905_v43, 0  ;;  %9634 = vpow2.f32 %v4982_v51  ;;  %v4988_v47 = vmul.f32 1.442695, %v4959_v35  ;;  %v4980_v3 = vmul.f32 1.442695, %v4955_v15 }
 0x75f   :  { %v12778_v56 = vpop.eup %9628  ;;  %9636 = vpow2.f32 %v4984_v9  ;;  %v4958_v51 = vsub.f32 %v12585_v23, %v4926_v13  ;;  %v4929_v62 = vperm.slane %v4905_v43, 1 }
 0x760   :  { %17728 = vst [vmem:[#allocation114_spill] sm:$0xff] %v12778_v56  ;;  %v4960_v19 = vsub.f32 %v12631_v44, %v4928_v11  ;;  %9638 = vpow2.f32 %v4988_v47 }
 0x761   :  { %9640 = vpow2.f32 %v4980_v3  ;;  %v4986_v11 = vmul.f32 1.442695, %v4958_v51  ;;  %v4961_v15 = vsub.f32 %v12635_v53, %v4929_v62  ;;  %v12828_v51 = vpop.permute.xlu0 %6577 }
 0x762   :  { %v12780_v20 = vpop.eup %9630  ;;  %v4990_v45 = vmul.f32 1.442695, %v4960_v19  ;;  %17735 = vst [vmem:[#allocation121_spill] sm:$0xff] %v12828_v51 }
 0x763   :  { %1970 = vperm.xlu0 %9436, %v12740_v6   ;;  %1982 = vperm.xlu1 %9437, %v12742_v49   ;;  %17729 = vst [vmem:[#allocation115_spill] sm:$0xff] %v12780_v20  ;;  %v12788_v42 = vpop.eup %9632  ;;  %v4992_v19 = vmul.f32 1.442695, %v4961_v15 }
 0x764   :  { %1976 = vperm.xlu2 %9435, %v12744_v16   ;;  %v12790_v29 = vpop.eup %9634  ;;  %9642 = vpow2.f32 %v4990_v45 }
 0x765   :  { %v12792_v30 = vpop.eup %9636  ;;  %9644 = vpow2.f32 %v4986_v11  ;;  %v12817_v13 = vpop.permute.xlu2 %6581 }
 0x766   :  { %17730 = vst [vmem:[#allocation116_spill] sm:$0xff] %v12792_v30  ;;  %v12798_v37 = vpop.eup %9638  ;;  %9646 = vpow2.f32 %v4992_v19 }
 0x767   :  { %v12800_v9 = vpop.eup %9640  ;;  %17734 = vst [vmem:[#allocation120_spill] sm:$0xff] %v12817_v13  ;;  %v12830_v11 = vpop.permute.xlu1 %6579 }
 0x768   :  { %17736 = vst [vmem:[#allocation122_spill] sm:$0xff] %v12830_v11 }
 0x76a   :  { %v12802_v35 = vpop.eup %9642 }
 0x76b   :  { %5011 = vperm.xlu1 %9437, %v12752_v41   ;;  %1979 = vperm.xlu0 %9436, %v12754_v54   ;;  %17731 = vst [vmem:[#allocation117_spill] sm:$0xff] %v12802_v35  ;;  %v12808_v47 = vpop.eup %9644 }
 0x76c   :  { %5017 = vperm.xlu2 %9435, %v12756_v31   ;;  %17732 = vst [vmem:[#allocation118_spill] sm:$0xff] %v12808_v47  ;;  %v12815_v43 = vpop.eup %9646 }
 0x76d   :  { %17733 = vst [vmem:[#allocation119_spill] sm:$0xff] %v12815_v43 }
 0x773   :  { %5014 = vperm.xlu0 %9436, %v12764_v8   ;;  %5023 = vperm.xlu1 %9437, %v12766_v36  }
 0x774   :  { %5026 = vperm.xlu2 %9435, %v12768_v58  }
 0x77b   :  { %5020 = vperm.xlu0 %9436, %v12778_v56   ;;  %5032 = vperm.xlu1 %9437, %v12776_v1  }
 0x77c   :  { %5035 = vperm.xlu2 %9435, %v12780_v20  }
 0x783   :  { %5029 = vperm.xlu0 %9436, %v12788_v42   ;;  %5041 = vperm.xlu1 %9437, %v12790_v29  }
 0x784   :  { %5044 = vperm.xlu2 %9435, %v12792_v30  }
 0x78b   :  { %5038 = vperm.xlu0 %9436, %v12800_v9   ;;  %5050 = vperm.xlu1 %9437, %v12798_v37  }
 0x78c   :  { %5053 = vperm.xlu2 %9435, %v12802_v35  }
 0x793   :  { %5047 = vperm.xlu0 %9436, %v12808_v47   ;;  %6585 = vrot.lane.b32.xlu1 %v12405_v57, %s10252_s4 }
 0x794   :  { %6587 = vrot.lane.b32.xlu2 %v12411_v0, %s10252_s4 }
 0x79b   :  { %5056 = vperm.xlu0 %9436, %v12815_v43   ;;  %6599 = vrot.lane.b32.xlu1 %v12389_v21, %s10255_s28 }
 0x79c   :  { %6601 = vrot.lane.b32.xlu2 %v12391_v60, %s10255_s28 }
 0x79e   :  { %v1941_v3 = vpop.permute.xlu2 %1940 }
 0x79f   :  { %v1985_v44 = vperm.slane %v1941_v3, %v11100_v38 }
 0x7a3   :  { %6583 = vrot.lane.b32.xlu0 %v12409_v7, %s10252_s4 }
 0x7a6   :  { %v1950_v45 = vpop.permute.xlu2 %1949 }
 0x7a7   :  { %v1988_v11 = vperm.slane %v1950_v45, %v11100_v38 }
 0x7ab   :  { %6597 = vrot.lane.b32.xlu0 %v12385_v4, %s10255_s28 }
 0x7ae   :  { %v1959_v19 = vpop.permute.xlu2 %1958 }
 0x7af   :  { %v1944_v62 = vpop.permute.xlu1 %1943 }
 0x7b5   :  { %v1938_v15 = vpop.permute.xlu0 %1937 }
 0x7b6   :  { %v1984_v13 = vperm.slane %v1938_v15, %v11100_v38  ;;  %v1968_v53 = vpop.permute.xlu2 %1967  ;;  %v1991_v15 = vperm.slane %v1959_v19, %v11100_v38 }
 0x7b8   :  { %v2000_v39 = vsel %vm1022_vm8, %v1985_v44, %v1984_v13 }
 0x7b9   :  { %v2016_v25 = vsel %vm1039_vm9, %v2000_v39, 0.0 }
 0x7bd   :  { %v1947_v22 = vpop.permute.xlu0 %1946  ;;  %v1956_v46 = vpop.permute.xlu1 %1955 }
 0x7be   :  { %v1990_v23 = vperm.slane %v1956_v46, %v11100_v38  ;;  %v1977_v44 = vpop.permute.xlu2 %1976 }
 0x7bf   :  { %v1997_v19 = vperm.slane %v1977_v44, %v11100_v38 }
 0x7c0   :  { %v2003_v21 = vsel %vm1022_vm8, %v1991_v15, %v1990_v23 }
 0x7c1   :  { %v2025_v39 = vsel %vm1039_vm9, %v2003_v21, 0.0 }
 0x7c5   :  { %2017 = vadd.xlane.f32.xlu2 %v2016_v25  ;;  %v1953_v51 = vpop.permute.xlu0 %1952  ;;  %v1965_v10 = vpop.permute.xlu1 %1964  ;;  %v1987_v25 = vperm.slane %v1947_v22, %v11100_v38 }
 0x7c6   :  { %v1989_v60 = vperm.slane %v1953_v51, %v11100_v38  ;;  %v1986_v51 = vperm.slane %v1944_v62, %v11100_v38  ;;  %v5018_v23 = vpop.permute.xlu2 %5017  ;;  %v1993_v44 = vperm.slane %v1965_v10, %v11100_v38 }
 0x7c8   :  { %v2002_v0 = vsel %vm1022_vm8, %v1989_v60, %v1988_v11 }
 0x7c9   :  { %v2022_v3 = vsel %vm1039_vm9, %v2002_v0, 0.0  ;;  %v2001_v0 = vsel %vm1022_vm8, %v1987_v25, %v1986_v51 }
 0x7ca   :  { %2023 = vadd.xlane.f32.xlu1 %v2022_v3  ;;  %v2019_v21 = vsel %vm1039_vm9, %v2001_v0, 0.0 }
 0x7cd   :  { %2026 = vadd.xlane.f32.xlu2 %v2025_v39  ;;  %v1962_v46 = vpop.permute.xlu0 %1961  ;;  %v1974_v13 = vpop.permute.xlu1 %1973  ;;  %v1994_v39 = vperm.slane %v1968_v53, %v11100_v38 }
 0x7ce   :  { %v1996_v45 = vperm.slane %v1974_v13, %v11100_v38  ;;  %v1992_v22 = vperm.slane %v1962_v46, %v11100_v38  ;;  %v5027_v0 = vpop.permute.xlu2 %5026 }
 0x7d0   :  { %v2006_v60 = vsel %vm1022_vm8, %v1997_v19, %v1996_v45  ;;  %v2004_v45 = vsel %vm1022_vm8, %v1993_v44, %v1992_v22  ;;  %v5063_v44 = vperm.slane %v5027_v0, %v11100_v38 }
 0x7d1   :  { %v2034_v11 = vsel %vm1039_vm9, %v2006_v60, 0.0  ;;  %v2028_v51 = vsel %vm1039_vm9, %v2004_v45, 0.0 }
 0x7d5   :  { %2035 = vadd.xlane.f32.xlu2 %v2034_v11  ;;  %v1971_v15 = vpop.permute.xlu0 %1970  ;;  %2020 = vadd.xlane.f32.xlu0 %v2019_v21  ;;  %v1983_v3 = vpop.permute.xlu1 %1982 }
 0x7d6   :  { %v1995_v62 = vperm.slane %v1971_v15, %v11100_v38  ;;  %v1999_v53 = vperm.slane %v1983_v3, %v11100_v38 }
 0x7d8   :  { %v2005_v13 = vsel %vm1022_vm8, %v1995_v62, %v1994_v39 }
 0x7d9   :  { %v2031_v25 = vsel %vm1039_vm9, %v2005_v13, 0.0 }
 0x7da   :  { %2032 = vadd.xlane.f32.xlu1 %v2031_v25  ;;  %v5036_v25 = vpop.permute.xlu2 %5035 }
 0x7dd   :  { %v1980_v46 = vpop.permute.xlu0 %1979  ;;  %2029 = vadd.xlane.f32.xlu0 %v2028_v51  ;;  %v5012_v19 = vpop.permute.xlu1 %5011 }
 0x7de   :  { %v1998_v60 = vperm.slane %v1980_v46, %v11100_v38  ;;  %v5058_v22 = vperm.slane %v5012_v19, %v11100_v38  ;;  %v5060_v19 = vperm.slane %v5018_v23, %v11100_v38 }
 0x7e0   :  { %v2007_v11 = vsel %vm1022_vm8, %v1999_v53, %v1998_v60 }
 0x7e1   :  { %v2037_v10 = vsel %vm1039_vm9, %v2007_v11, 0.0 }
 0x7e5   :  { %v5015_v21 = vpop.permute.xlu0 %5014  ;;  %2038 = vadd.xlane.f32.xlu0 %v2037_v10  ;;  %v5024_v15 = vpop.permute.xlu1 %5023 }
 0x7e6   :  { %v5059_v39 = vperm.slane %v5015_v21, %v11100_v38  ;;  %v5062_v62 = vperm.slane %v5024_v15, %v11100_v38  ;;  %v5045_v10 = vpop.permute.xlu2 %5044 }
 0x7e8   :  { %v5074_v13 = vsel %vm1022_vm8, %v5059_v39, %v5058_v22  ;;  %v5076_v45 = vsel %vm1022_vm8, %v5063_v44, %v5062_v62  ;;  %v5069_v22 = vperm.slane %v5045_v10, %v11100_v38 }
 0x7e9   :  { %v5090_v3 = vsel %vm1039_vm9, %v5074_v13, 0.0  ;;  %v5096_v51 = vsel %vm1039_vm9, %v5076_v45, 0.0 }
 0x7ea   :  { %5091 = vadd.xlane.f32.xlu1 %v5090_v3 }
 0x7ed   :  { %v5021_v46 = vpop.permute.xlu0 %5020  ;;  %5097 = vadd.xlane.f32.xlu0 %v5096_v51  ;;  %v5033_v60 = vpop.permute.xlu1 %5032 }
 0x7ee   :  { %v5061_v53 = vperm.slane %v5021_v46, %v11100_v38  ;;  %v5065_v39 = vperm.slane %v5033_v60, %v11100_v38  ;;  %v5066_v46 = vperm.slane %v5036_v25, %v11100_v38 }
 0x7f0   :  { %v5075_v11 = vsel %vm1022_vm8, %v5061_v53, %v5060_v19 }
 0x7f1   :  { %v5093_v0 = vsel %vm1039_vm9, %v5075_v11, 0.0 }
 0x7f2   :  { %5094 = vadd.xlane.f32.xlu2 %v5093_v0 }
 0x7f5   :  { %v5030_v21 = vpop.permute.xlu0 %5029  ;;  %v5042_v15 = vpop.permute.xlu1 %5041 }
 0x7f6   :  { %v5064_v62 = vperm.slane %v5030_v21, %v11100_v38  ;;  %v5068_v44 = vperm.slane %v5042_v15, %v11100_v38 }
 0x7f8   :  { %v5077_v23 = vsel %vm1022_vm8, %v5065_v39, %v5064_v62  ;;  %v5079_v13 = vsel %vm1022_vm8, %v5069_v22, %v5068_v44  ;;  %v5054_v39 = vpop.permute.xlu2 %5053 }
 0x7f9   :  { %v5099_v3 = vsel %vm1039_vm9, %v5077_v23, 0.0  ;;  %v5105_v45 = vsel %vm1039_vm9, %v5079_v13, 0.0  ;;  %v5072_v62 = vperm.slane %v5054_v39, %v11100_v38 }
 0x7fa   :  { %5100 = vadd.xlane.f32.xlu1 %v5099_v3  ;;  %5106 = vadd.xlane.f32.xlu0 %v5105_v45 }
 0x7fd   :  { %v5039_v51 = vpop.permute.xlu0 %5038  ;;  %v5051_v11 = vpop.permute.xlu1 %5050 }
 0x7fe   :  { %v5067_v19 = vperm.slane %v5039_v51, %v11100_v38  ;;  %v5071_v10 = vperm.slane %v5051_v11, %v11100_v38 }
 0x800   :  { %v5078_v60 = vsel %vm1022_vm8, %v5067_v19, %v5066_v46  ;;  %v12900_v3 = vpop.permute.xlu2 %6587 }
 0x801   :  { %v5102_v53 = vsel %vm1039_vm9, %v5078_v60, 0.0  ;;  %17737 = vst [vmem:[#allocation123_spill] sm:$0xff] %v12900_v3 }
 0x802   :  { %5103 = vadd.xlane.f32.xlu2 %v5102_v53 }
 0x805   :  { %v5048_v0 = vpop.permute.xlu0 %5047  ;;  %v12904_v45 = vpop.permute.xlu1 %6585 }
 0x806   :  { %v5070_v21 = vperm.slane %v5048_v0, %v11100_v38  ;;  %17738 = vst [vmem:[#allocation124_spill] sm:$0xff] %v12904_v45 }
 0x808   :  { %v5080_v15 = vsel %vm1022_vm8, %v5071_v10, %v5070_v21  ;;  %v12906_v51 = vpop.permute.xlu2 %6601 }
 0x809   :  { %v5108_v22 = vsel %vm1039_vm9, %v5080_v15, 0.0  ;;  %17739 = vst [vmem:[#allocation125_spill] sm:$0xff] %v12906_v51 }
 0x80a   :  { %5109 = vadd.xlane.f32.xlu1 %v5108_v22 }
 0x80d   :  { %v5057_v25 = vpop.permute.xlu0 %5056  ;;  %v12908_v46 = vpop.permute.xlu1 %6599 }
 0x80e   :  { %v5073_v44 = vperm.slane %v5057_v25, %v11100_v38  ;;  %6603 = vrot.lane.b32.xlu0 %v12395_v24, %s10255_s28  ;;  %17740 = vst [vmem:[#allocation126_spill] sm:$0xff] %v12908_v46 }
 0x810   :  { %v5081_v23 = vsel %vm1022_vm8, %v5073_v44, %v5072_v62 }
 0x811   :  { %v5111_v13 = vsel %vm1039_vm9, %v5081_v23, 0.0 }
 0x812   :  { %5112 = vadd.xlane.f32.xlu2 %v5111_v13 }
 0x815   :  { %v12910_v19 = vpop.permute.xlu0 %6583 }
 0x816   :  { %17741 = vst [vmem:[#allocation127_spill] sm:$0xff] %v12910_v19 }
 0x81d   :  { %v12919_v15 = vpop.permute.xlu0 %6597 }
 0x81e   :  { %17742 = vst [vmem:[#allocation128_spill] sm:$0xff] %v12919_v15 }
 0x823   :  { %6605 = vrot.lane.b32.xlu1 %v12399_v17, %s10255_s28 }
 0x82a   :  { %6607 = vrot.lane.b32.xlu2 %v12409_v7, %s10255_s28 }
 0x838   :  { %v2018_v60 = vpop.xlane.xlu2 %2017 }
 0x839   :  { %v2048_v53 = vperm.slane %v2018_v60, 0  ;;  %v12912_v11 = vperm.slane %v2018_v60, 1 }
 0x83b   :  { %9648 = vrcp.f32 %v2048_v53  ;;  %v2104_v39 = vand.u32 2147483647, %v12912_v11  ;;  %v2106_v25 = vand.u32 2147483648, %v12912_v11  ;;  %v2089_v62 = vand.u32 2147483647, %v2048_v53 }
 0x83c   :  { %9650 = vrcp.f32 %v12912_v11  ;;  %v2091_v60 = vand.u32 2147483648, %v2048_v53  ;;  %vm2100_vm0 = vweird.f32 %v12912_v11  ;;  %vm2085_vm3 = vweird.f32 %v2048_v53 }
 0x83d   :  { %v2024_v0 = vpop.xlane.xlu1 %2023  ;;  %vm12934_vm4 = vcmp.eq.f32.partialorder %v2104_v39, 8.507059e+37  ;;  %v2107_v38 = vor.u32 1.1754944e-38, %v2106_v25  ;;  %vm12939_vm6 = vcmp.eq.f32.partialorder %v2089_v62, 8.507059e+37 }
 0x83e   :  { %v12915_v10 = vperm.slane %v2024_v0, 0  ;;  %v12917_v21 = vperm.slane %v2024_v0, 1  ;;  %v2092_v7 = vor.u32 1.1754944e-38, %v2091_v60 }
 0x840   :  { %9652 = vrcp.f32 %v12915_v10  ;;  %v2027_v22 = vpop.xlane.xlu2 %2026  ;;  %v2166_v46 = vand.u32 2147483648, %v12917_v21  ;;  %v2149_v39 = vand.u32 2147483647, %v12915_v10  ;;  %vm2145_vm11 = vweird.f32 %v12915_v10 }
 0x841   :  { %v9649_v44 = vpop.eup %9648  ;;  %9654 = vrcp.f32 %v12917_v21  ;;  %v12925_v23 = vperm.slane %v2027_v22, 0  ;;  %v12927_v13 = vperm.slane %v2027_v22, 1  ;;  %v2151_v22 = vand.u32 2147483648, %v12915_v10 }
 0x842   :  { %v9651_v0 = vpop.eup %9650  ;;  %v2081_v51 = vmul.f32 %v9649_v44, %v2048_v53  ;;  %vm2086_vm7 = vweird.f32 %v9649_v44  ;;  %v12951_v25 = vor.u32 1.1754944e-38, %v2166_v46  ;;  %vm2160_vm12 = vweird.f32 %v12917_v21 }
 0x843   :  { %v2096_v15 = vmul.f32 %v9651_v0, %v12912_v11  ;;  %9656 = vrcp.f32 %v12925_v23  ;;  %vm2101_vm10 = vweird.f32 %v9651_v0  ;;  %v12956_v18 = vor.u32 1.1754944e-38, %v2151_v22  ;;  %vm2087_vm13 = vmor %vm2085_vm3, %vm2086_vm7 }
 0x844   :  { %v2082_v19 = vsub.f32 1.0, %v2081_v51  ;;  %9658 = vrcp.f32 %v12927_v13  ;;  %v2164_v51 = vand.u32 2147483647, %v12917_v21  ;;  %v2194_v63 = vand.u32 2147483647, %v12927_v13  ;;  %vm2102_vm15 = vmor %vm2100_vm0, %vm2101_vm10 }
 0x845   :  { %v2097_v3 = vsub.f32 1.0, %v2096_v15  ;;  %vm12974_vm14 = vcmp.eq.f32.partialorder %v2149_v39, 8.507059e+37  ;;  %vm2190_vm3 = vweird.f32 %v12927_v13 }
 0x846   :  { %v12943_v17 = vpop.eup %9652  ;;  %v2083_v57 = vmul.f32 %v9649_v44, %v2082_v19  ;;  %vm12985_vm1 = vcmp.eq.f32.partialorder %v2164_v51, 8.507059e+37 }
 0x847   :  { %v12947_v4 = vpop.eup %9654  ;;  %v2141_v5 = vmul.f32 %v12943_v17, %v12915_v10  ;;  %v2098_v15 = vmul.f32 %v9651_v0, %v2097_v3  ;;  %vm2146_vm0 = vweird.f32 %v12943_v17 }
 0x848   :  { %v2156_v62 = vmul.f32 %v12947_v4, %v12917_v21  ;;  %v2036_v60 = vpop.xlane.xlu2 %2035  ;;  %v2021_v40 = vpop.xlane.xlu0 %2020  ;;  %v2084_v19 = vadd.f32 %v9649_v44, %v2083_v57  ;;  %vm2147_vm7 = vmor %vm2145_vm11, %vm2146_vm0 }
 0x849   :  { %v12959_v14 = vpop.eup %9656  ;;  %v2142_v55 = vsub.f32 1.0, %v2141_v5  ;;  %v12961_v59 = vperm.slane %v2036_v60, 0  ;;  %v12963_v3 = vperm.slane %v2036_v60, 1  ;;  %v12965_v46 = vperm.slane %v2021_v40, 0 }
 0x84a   :  { %v12968_v35 = vpop.eup %9658  ;;  %v2157_v57 = vsub.f32 1.0, %v2156_v62  ;;  %v12970_v30 = vperm.slane %v2021_v40, 1  ;;  %v2099_v22 = vadd.f32 %v9651_v0, %v2098_v15  ;;  %v2196_v5 = vand.u32 2147483648, %v12927_v13 }
 0x84b   :  { %v2186_v60 = vmul.f32 %v12968_v35, %v12927_v13  ;;  %9660 = vrcp.f32 %v12961_v59  ;;  %v2088_v40 = vsel %vm2087_vm13, %v9649_v44, %v2084_v19  ;;  %v2143_v53 = vmul.f32 %v12943_v17, %v2142_v55 }
 0x84c   :  { %v12992_v39 = vmul.f32 %v12959_v14, %v12925_v23  ;;  %9662 = vrcp.f32 %v12963_v3  ;;  %v2103_v62 = vsel %vm2102_vm15, %v9651_v0, %v2099_v22  ;;  %v2093_v43 = vsel %vm12939_vm6, %v2092_v7, %v2088_v40 }
 0x84d   :  { %v2187_v11 = vsub.f32 1.0, %v2186_v60  ;;  %9664 = vrcp.f32 %v12965_v46  ;;  %v2108_v44 = vsel %vm12934_vm4, %v2107_v38, %v2103_v62  ;;  %v2094_v55 = vmul.f32 %v12695_v26, %v2093_v43  ;;  %v2033_v51 = vpop.xlane.xlu1 %2032 }
 0x84e   :  { %9666 = vrcp.f32 %v12970_v30  ;;  %v2109_v19 = vmul.f32 %v12697_v34, %v2108_v44  ;;  %v13004_v58 = vperm.slane %v2033_v51, 0  ;;  %v2158_v24 = vmul.f32 %v12947_v4, %v2157_v57 }
 0x84f   :  { %2322 = vperm.xlu1 %9437, %v2094_v55   ;;  %vm2161_vm6 = vweird.f32 %v12947_v4  ;;  %v2144_v7 = vadd.f32 %v12943_v17, %v2143_v53  ;;  %v2188_v38 = vmul.f32 %v12968_v35, %v2187_v11  ;;  %v2172_v26 = vsub.f32 1.0, %v12992_v39 }
 0x850   :  { %2327 = vperm.xlu2 %9435, %v2109_v19   ;;  %9668 = vrcp.f32 %v13004_v58  ;;  %v2030_v43 = vpop.xlane.xlu0 %2029  ;;  %vm13013_vm4 = vcmp.eq.f32.partialorder %v2194_v63, 8.507059e+37  ;;  %v2197_v45 = vor.u32 1.1754944e-38, %v2196_v5  ;;  %v13019_v57 = vperm.slane %v2033_v51, 1  ;;  %vm2162_vm10 = vmor %vm2160_vm12, %vm2161_vm6 }
 0x851   :  { %v13017_v0 = vpop.eup %9660  ;;  %v13021_v22 = vperm.slane %v2030_v43, 0  ;;  %v2159_v60 = vadd.f32 %v12947_v4, %v2158_v24  ;;  %v2119_v40 = vand.u32 2147483647, %v12965_v46  ;;  %v13031_v53 = vperm.slane %v2030_v43, 1 }
 0x852   :  { %v13029_v63 = vpop.eup %9662  ;;  %v2148_v5 = vsel %vm2147_vm7, %v12943_v17, %v2144_v7  ;;  %v2189_v62 = vadd.f32 %v12968_v35, %v2188_v38  ;;  %vm2191_vm13 = vweird.f32 %v12968_v35  ;;  %v13042_v10 = vmul.f32 %v13017_v0, %v12961_v59 }
 0x853   :  { %v9665_v11 = vpop.eup %9664  ;;  %9670 = vrcp.f32 %v13021_v22  ;;  %v2163_v44 = vsel %vm2162_vm10, %v12947_v4, %v2159_v60  ;;  %v2153_v21 = vsel %vm12974_vm14, %v12956_v18, %v2148_v5  ;;  %vm2115_vm11 = vweird.f32 %v12965_v46  ;;  %vm13063_vm12 = vmor %vm2190_vm3, %vm2191_vm13 }
 0x854   :  { %v13049_v55 = vpop.eup %9666  ;;  %v2111_v17 = vmul.f32 %v9665_v11, %v12965_v46  ;;  %v2168_v51 = vsel %vm12985_vm1, %v12951_v25, %v2163_v44  ;;  %v2121_v19 = vand.u32 2147483648, %v12965_v46  ;;  %9672 = vrcp.f32 %v13019_v57 }
 0x855   :  { %v2126_v24 = vmul.f32 %v13049_v55, %v12970_v30  ;;  %v2154_v4 = vmul.f32 %v12708_v12, %v2153_v21  ;;  %vm13067_vm14 = vcmp.eq.f32.partialorder %v2119_v40, 8.507059e+37  ;;  %v13073_v15 = vmul.f32 %v13029_v63, %v12963_v3 }
 0x856   :  { %v9669_v25 = vpop.eup %9668  ;;  %v2112_v7 = vsub.f32 1.0, %v2111_v17  ;;  %v2169_v38 = vmul.f32 %v12716_v27, %v2168_v51  ;;  %v2193_v12 = vsel %vm13063_vm12, %v12968_v35, %v2189_v62  ;;  %9674 = vrcp.f32 %v13031_v53 }
 0x857   :  { %v2231_v43 = vmul.f32 %v9669_v25, %v13004_v58  ;;  %2342 = vperm.xlu1 %9437, %v2154_v4   ;;  %vm2116_vm15 = vweird.f32 %v9665_v11  ;;  %v2127_v60 = vsub.f32 1.0, %v2126_v24  ;;  %v2198_v5 = vsel %vm13013_vm4, %v2197_v45, %v2193_v12 }
 0x858   :  { %2347 = vperm.xlu2 %9435, %v2169_v38   ;;  %v2039_v40 = vpop.xlane.xlu0 %2038  ;;  %v2113_v44 = vmul.f32 %v9665_v11, %v2112_v7  ;;  %v2122_v27 = vor.u32 1.1754944e-38, %v2121_v19  ;;  %v2239_v51 = vand.u32 2147483647, %v13004_v58  ;;  %vm2235_vm1 = vweird.f32 %v13004_v58  ;;  %vm2117_vm3 = vmor %vm2115_vm11, %vm2116_vm15 }
 0x859   :  { %v13084_v21 = vpop.eup %9670  ;;  %v2232_v17 = vsub.f32 1.0, %v2231_v43  ;;  %v13086_v35 = vperm.slane %v2039_v40, 0  ;;  %v13088_v62 = vperm.slane %v2039_v40, 1  ;;  %v2241_v34 = vand.u32 2147483648, %v13004_v58 }
 0x85a   :  { %v2201_v4 = vmul.f32 %v13084_v21, %v13021_v22  ;;  %v2114_v24 = vadd.f32 %v9665_v11, %v2113_v44  ;;  %v13095_v45 = vpop.eup %9672  ;;  %v2199_v19 = vmul.f32 %v12720_v32, %v2198_v5  ;;  %vm2236_vm0 = vweird.f32 %v9669_v25 }
 0x85b   :  { %9676 = vrcp.f32 %v13086_v35  ;;  %v2233_v18 = vmul.f32 %v9669_v25, %v2232_v17  ;;  %vm13103_vm6 = vcmp.eq.f32.partialorder %v2239_v51, 8.507059e+37  ;;  %v2242_v44 = vor.u32 1.1754944e-38, %v2241_v34  ;;  %vm2237_vm4 = vmor %vm2235_vm1, %vm2236_vm0 }
 0x85c   :  { %v2202_v7 = vsub.f32 1.0, %v2201_v4  ;;  %9678 = vrcp.f32 %v13088_v62  ;;  %v2118_v38 = vsel %vm2117_vm3, %v9665_v11, %v2114_v24  ;;  %v13107_v43 = vpop.eup %9674  ;;  %v2128_v46 = vmul.f32 %v13049_v55, %v2127_v60 }
 0x85d   :  { %v5092_v40 = vpop.xlane.xlu1 %5091  ;;  %v2123_v32 = vsel %vm13067_vm14, %v2122_v27, %v2118_v38  ;;  %v2234_v5 = vadd.f32 %v9669_v25, %v2233_v18  ;;  %vm2130_vm7 = vweird.f32 %v12970_v30  ;;  %vm2131_vm10 = vweird.f32 %v13049_v55 }
 0x85e   :  { %v13112_v17 = vperm.slane %v5092_v40, 0  ;;  %v13114_v4 = vperm.slane %v5092_v40, 1  ;;  %v2124_v11 = vmul.f32 %v12690_v50, %v2123_v32  ;;  %v2129_v20 = vadd.f32 %v13049_v55, %v2128_v46  ;;  %vm2132_vm13 = vmor %vm2130_vm7, %vm2131_vm10 }
 0x85f   :  { %2357 = vperm.xlu1 %9437, %v2199_v19   ;;  %v2238_v51 = vsel %vm2237_vm4, %v9669_v25, %v2234_v5  ;;  %v2134_v27 = vand.u32 2147483647, %v12970_v30  ;;  %v2136_v58 = vand.u32 2147483648, %v12970_v30  ;;  %v2203_v24 = vmul.f32 %v13084_v21, %v2202_v7 }
 0x860   :  { %9680 = vrcp.f32 %v13112_v17  ;;  %2332 = vperm.xlu0 %9436, %v2124_v11   ;;  %v5098_v60 = vpop.xlane.xlu0 %5097  ;;  %v2243_v50 = vsel %vm13103_vm6, %v2242_v44, %v2238_v51  ;;  %v2277_v25 = vsub.f32 1.0, %v13073_v15  ;;  %v13142_v12 = vmul.f32 %v13095_v45, %v13019_v57 }
 0x861   :  { %v13128_v34 = vpop.eup %9676  ;;  %9682 = vrcp.f32 %v13114_v4  ;;  %v13132_v19 = vperm.slane %v5098_v60, 0  ;;  %v13134_v18 = vperm.slane %v5098_v60, 1  ;;  %v13146_v7 = vmul.f32 %v13107_v43, %v13031_v53 }
 0x862   :  { %v13138_v38 = vpop.eup %9678  ;;  %v2133_v15 = vsel %vm2132_vm13, %v13049_v55, %v2129_v20  ;;  %v2137_v40 = vor.u32 1.1754944e-38, %v2136_v58  ;;  %v2244_v32 = vmul.f32 %v12732_v48, %v2243_v50  ;;  %vm2135_vm11 = vcmp.eq.f32.partialorder %v2134_v27, 8.507059e+37 }
 0x863   :  { %17759 = vst [vmem:[#allocation129_spill] sm:$0xff] %v13134_v18  ;;  %9684 = vrcp.f32 %v13132_v19  ;;  %v2204_v30 = vadd.f32 %v13084_v21, %v2203_v24  ;;  %v13154_v5 = vmul.f32 %v13128_v34, %v13086_v35  ;;  %vm2205_vm12 = vweird.f32 %v13021_v22 }
 0x864   :  { %v2138_v44 = vsel %vm2135_vm11, %v2137_v40, %v2133_v15  ;;  %vm2206_vm14 = vweird.f32 %v13084_v21  ;;  %9686 = vrcp.f32 %v13134_v18  ;;  %v2209_v48 = vand.u32 2147483647, %v13021_v22 }
 0x865   :  { %v5095_v55 = vpop.xlane.xlu2 %5094  ;;  %v2139_v46 = vmul.f32 %v12704_v2, %v2138_v44  ;;  %vm13160_vm15 = vmor %vm2205_vm12, %vm2206_vm14  ;;  %v2211_v51 = vand.u32 2147483648, %v13021_v22  ;;  %v2278_v2 = vmul.f32 %v13029_v63, %v2277_v25  ;;  %v2247_v24 = vsub.f32 1.0, %v13142_v12 }
 0x866   :  { %v13166_v20 = vpop.eup %9680  ;;  %v13168_v27 = vperm.slane %v5095_v55, 0  ;;  %v13170_v60 = vperm.slane %v5095_v55, 1  ;;  %v2208_v50 = vsel %vm13160_vm15, %v13084_v21, %v2204_v30  ;;  %v13181_v15 = vmul.f32 %v13138_v38, %v13088_v62 }
 0x867   :  { %v13176_v58 = vpop.eup %9682  ;;  %v13185_v22 = vmul.f32 %v13166_v20, %v13112_v17  ;;  %2372 = vperm.xlu1 %9437, %v2244_v32   ;;  %v2212_v40 = vor.u32 1.1754944e-38, %v2211_v51  ;;  %vm2210_vm1 = vcmp.eq.f32.partialorder %v2209_v48, 8.507059e+37  ;;  %v2279_v21 = vadd.f32 %v13029_v63, %v2278_v2 }
 0x868   :  { %9688 = vrcp.f32 %v13168_v27  ;;  %2337 = vperm.xlu0 %9436, %v2139_v46   ;;  %vm2281_vm3 = vweird.f32 %v13029_v63  ;;  %v5170_v32 = vmul.f32 %v13176_v58, %v13114_v4  ;;  %vm2280_vm0 = vweird.f32 %v12963_v3 }
 0x869   :  { %v13190_v25 = vpop.eup %9684  ;;  %9690 = vrcp.f32 %v13170_v60  ;;  %v2213_v44 = vsel %vm2210_vm1, %v2212_v40, %v2208_v50  ;;  %v2284_v46 = vand.u32 2147483647, %v12963_v3  ;;  %vm13207_vm6 = vmor %vm2280_vm0, %vm2281_vm3  ;;  %v2286_v50 = vand.u32 2147483648, %v12963_v3 }
 0x86a   :  { %v2214_v55 = vmul.f32 %v12728_v33, %v2213_v44  ;;  %v13200_v11 = vpop.eup %9686  ;;  %v13205_v51 = vmul.f32 %v13190_v25, %v13132_v19  ;;  %v2173_v33 = vmul.f32 %v12959_v14, %v2172_v26  ;;  %v2283_v44 = vsel %vm13207_vm6, %v13029_v63, %v2279_v21 }
 0x86b   :  { %17762 = vst [vmem:[#allocation130_spill] sm:$0xff] %v13200_v11  ;;  %vm2175_vm4 = vweird.f32 %v12925_v23  ;;  %vm2176_vm7 = vweird.f32 %v12959_v14  ;;  %v2287_v13 = vor.u32 1.1754944e-38, %v2286_v50  ;;  %v2179_v39 = vand.u32 2147483647, %v12925_v23 }
 0x86c   :  { %2362 = vperm.xlu2 %9435, %v2214_v55   ;;  %v2174_v3 = vadd.f32 %v12959_v14, %v2173_v33  ;;  %v2181_v26 = vand.u32 2147483648, %v12925_v23  ;;  %v5171_v55 = vsub.f32 1.0, %v5170_v32  ;;  %v13228_v2 = vmul.f32 %v13200_v11, %v13134_v18  ;;  %vm13232_vm13 = vmor %vm2175_vm4, %vm2176_vm7 }
 0x86d   :  { %v5107_v48 = vpop.xlane.xlu0 %5106  ;;  %v5101_v30 = vpop.xlane.xlu1 %5100  ;;  %vm2285_vm10 = vcmp.eq.f32.partialorder %v2284_v46, 8.507059e+37  ;;  %v5216_v33 = vsub.f32 1.0, %v13205_v51  ;;  %vm2180_vm11 = vcmp.eq.f32.partialorder %v2179_v39, 8.507059e+37  ;;  %vm2250_vm12 = vweird.f32 %v13019_v57 }
 0x86e   :  { %v13224_v12 = vpop.eup %9688  ;;  %v13230_v63 = vperm.slane %v5107_v48, 0  ;;  %v2288_v40 = vsel %vm2285_vm10, %v2287_v13, %v2283_v44  ;;  %v13239_v23 = vperm.slane %v5101_v30, 1  ;;  %v2178_v32 = vsel %vm13232_vm13, %v12959_v14, %v2174_v3 }
 0x86f   :  { %v13236_v50 = vpop.eup %9690  ;;  %v2289_v47 = vmul.f32 %v12744_v16, %v2288_v40  ;;  %v13246_v46 = vperm.slane %v5101_v30, 0  ;;  %v2182_v56 = vor.u32 1.1754944e-38, %v2181_v26  ;;  %v13250_v18 = vmul.f32 %v13224_v12, %v13168_v27 }
 0x870   :  { %9692 = vrcp.f32 %v13230_v63  ;;  %v13252_v11 = vperm.slane %v5107_v48, 1  ;;  %v2248_v13 = vmul.f32 %v13095_v45, %v2247_v24  ;;  %v13257_v44 = vmul.f32 %v13236_v50, %v13170_v60 }
 0x871   :  { %2387 = vperm.xlu1 %9437, %v2289_v47   ;;  %v2183_v14 = vsel %vm2180_vm11, %v2182_v56, %v2178_v32  ;;  %vm2251_vm14 = vweird.f32 %v13095_v45  ;;  %9694 = vrcp.f32 %v13239_v23  ;;  %v2254_v48 = vand.u32 2147483647, %v13019_v57 }
 0x872   :  { %v2184_v16 = vmul.f32 %v12706_v28, %v2183_v14  ;;  %v2249_v30 = vadd.f32 %v13095_v45, %v2248_v13  ;;  %9696 = vrcp.f32 %v13246_v46  ;;  %vm13266_vm15 = vmor %vm2250_vm12, %vm2251_vm14  ;;  %v2256_v56 = vand.u32 2147483648, %v13019_v57 }
 0x873   :  { %v5172_v47 = vmul.f32 %v13176_v58, %v5171_v55  ;;  %vm5175_vm1 = vweird.f32 %v13176_v58  ;;  %vm5174_vm3 = vweird.f32 %v13114_v4  ;;  %v5178_v3 = vand.u32 2147483647, %v13114_v4 }
 0x874   :  { %2352 = vperm.xlu0 %9436, %v2184_v16   ;;  %v2253_v28 = vsel %vm13266_vm15, %v13095_v45, %v2249_v30  ;;  %v5180_v39 = vand.u32 2147483648, %v13114_v4  ;;  %v2257_v21 = vor.u32 1.1754944e-38, %v2256_v56  ;;  %vm2255_vm0 = vcmp.eq.f32.partialorder %v2254_v48, 8.507059e+37  ;;  %vm5176_vm6 = vmor %vm5174_vm3, %vm5175_vm1 }
 0x875   :  { %v5104_v40 = vpop.xlane.xlu2 %5103  ;;  %v5173_v32 = vadd.f32 %v13176_v58, %v5172_v47  ;;  %v17769_v4 = vsub.f32 1.0, %v13146_v7  ;;  %v5186_v47 = vsub.f32 1.0, %v13250_v18  ;;  %vm5179_vm4 = vcmp.eq.f32.partialorder %v5178_v3, 8.507059e+37 }
 0x876   :  { %v13279_v26 = vpop.eup %9692  ;;  %v13281_v57 = vperm.slane %v5104_v40, 0  ;;  %v13283_v55 = vperm.slane %v5104_v40, 1  ;;  %v2258_v16 = vsel %vm2255_vm0, %v2257_v21, %v2253_v28  ;;  %v5181_v24 = vor.u32 1.1754944e-38, %v5180_v39 }
 0x877   :  { %v13289_v45 = vmul.f32 %v13279_v26, %v13230_v63  ;;  %v2218_v14 = vmul.f32 %v13107_v43, %v17769_v4  ;;  %v5177_v30 = vsel %vm5176_vm6, %v13176_v58, %v5173_v32  ;;  %v13298_v56 = vpop.eup %9694  ;;  %v2259_v40 = vmul.f32 %v12740_v6, %v2258_v16 }
 0x878   :  { %9698 = vrcp.f32 %v13281_v57  ;;  %v13303_v48 = vpop.eup %9696  ;;  %v5182_v28 = vsel %vm5179_vm4, %v5181_v24, %v5177_v30  ;;  %v13310_v58 = vmul.f32 %v13298_v56, %v13239_v23  ;;  %vm2220_vm7 = vweird.f32 %v13031_v53 }
 0x879   :  { %9700 = vrcp.f32 %v13283_v55  ;;  %v2219_v21 = vadd.f32 %v13107_v43, %v2218_v14  ;;  %2377 = vperm.xlu2 %9435, %v2259_v40   ;;  %v5183_v39 = vmul.f32 %v12764_v8, %v5182_v28  ;;  %vm2221_vm10 = vweird.f32 %v13107_v43 }
 0x87a   :  { %9702 = vrcp.f32 %v13252_v11  ;;  %v5306_v6 = vsub.f32 1.0, %v13289_v45  ;;  %vm13316_vm13 = vmor %vm2220_vm7, %vm2221_vm10  ;;  %v2224_v32 = vand.u32 2147483647, %v13031_v53  ;;  %v2226_v4 = vand.u32 2147483648, %v13031_v53 }
 0x87b   :  { %v17772_v14 = vsub.f32 1.0, %v13154_v5  ;;  %v13327_v8 = vmul.f32 %v13303_v48, %v13246_v46  ;;  %5401 = vperm.xlu1 %9437, %v5183_v39   ;;  %v2223_v30 = vsel %vm13316_vm13, %v13107_v43, %v2219_v21  ;;  %vm2296_vm11 = vweird.f32 %v13128_v34 }
 0x87c   :  { %v2299_v24 = vand.u32 2147483647, %v13086_v35  ;;  %v2227_v53 = vor.u32 1.1754944e-38, %v2226_v4  ;;  %vm2295_vm12 = vweird.f32 %v13086_v35  ;;  %v2301_v28 = vand.u32 2147483648, %v13086_v35 }
 0x87d   :  { %v2293_v16 = vmul.f32 %v13128_v34, %v17772_v14  ;;  %v5261_v39 = vsub.f32 1.0, %v13310_v58  ;;  %vm2225_vm14 = vcmp.eq.f32.partialorder %v2224_v32, 8.507059e+37  ;;  %vm2297_vm15 = vmor %vm2295_vm12, %vm2296_vm11  ;;  %v5217_v21 = vmul.f32 %v13190_v25, %v5216_v33  ;;  %v5110_v13 = vpop.xlane.xlu1 %5109 }
 0x87e   :  { %v13334_v40 = vpop.eup %9698  ;;  %v2228_v4 = vsel %vm2225_vm14, %v2227_v53, %v2223_v30  ;;  %vm2300_vm1 = vcmp.eq.f32.partialorder %v2299_v24, 8.507059e+37  ;;  %v2302_v35 = vor.u32 1.1754944e-38, %v2301_v28  ;;  %vm5219_vm3 = vweird.f32 %v13132_v19 }
 0x87f   :  { %v2294_v5 = vadd.f32 %v13128_v34, %v2293_v16  ;;  %v13339_v14 = vpop.eup %9700  ;;  %v13344_v43 = vmul.f32 %v13334_v40, %v13281_v57  ;;  %v2229_v58 = vmul.f32 %v12718_v52, %v2228_v4  ;;  %v5218_v7 = vadd.f32 %v13190_v25, %v5217_v21 }
 0x880   :  { %v13349_v3 = vpop.eup %9702  ;;  %vm5220_vm0 = vweird.f32 %v13190_v25  ;;  %v13358_v51 = vmul.f32 %v13339_v14, %v13283_v55  ;;  %v5225_v30 = vand.u32 2147483648, %v13132_v19  ;;  %v13370_v53 = vperm.slane %v5110_v13, 0 }
 0x881   :  { %v2298_v16 = vsel %vm2297_vm15, %v13128_v34, %v2294_v5  ;;  %vm13360_vm6 = vmor %vm5219_vm3, %vm5220_vm0  ;;  %v5223_v34 = vand.u32 2147483647, %v13132_v19  ;;  %2367 = vperm.xlu0 %9436, %v2229_v58   ;;  %v13372_v5 = vperm.slane %v5110_v13, 1  ;;  %v17775_v21 = vsub.f32 1.0, %v13042_v10 }
 0x882   :  { %v2303_v33 = vsel %vm2300_vm1, %v2302_v35, %v2298_v16  ;;  %v5222_v24 = vsel %vm13360_vm6, %v13190_v25, %v5218_v7  ;;  %v5226_v28 = vor.u32 1.1754944e-38, %v5225_v30  ;;  %vm2265_vm7 = vweird.f32 %v12961_v59 }
 0x883   :  { %v2304_v52 = vmul.f32 %v12754_v54, %v2303_v33  ;;  %vm5224_vm4 = vcmp.eq.f32.partialorder %v5223_v34, 8.507059e+37  ;;  %v2263_v4 = vmul.f32 %v13017_v0, %v17775_v21  ;;  %9704 = vrcp.f32 %v13370_v53 }
 0x884   :  { %vm2266_vm10 = vweird.f32 %v13017_v0  ;;  %v2269_v54 = vand.u32 2147483647, %v12961_v59  ;;  %v2271_v19 = vand.u32 2147483648, %v12961_v59  ;;  %v5227_v25 = vsel %vm5224_vm4, %v5226_v28, %v5222_v24 }
 0x885   :  { %2392 = vperm.xlu2 %9435, %v2304_v52   ;;  %9706 = vrcp.f32 %v13372_v5  ;;  %v2264_v13 = vadd.f32 %v13017_v0, %v2263_v4  ;;  %v5187_v10 = vmul.f32 %v13224_v12, %v5186_v47  ;;  %v5113_v7 = vpop.xlane.xlu2 %5112  ;;  %v5228_v16 = vmul.f32 %v12766_v36, %v5227_v25  ;;  %vm2267_vm13 = vmor %vm2265_vm7, %vm2266_vm10 }
 0x886   :  { %vm2270_vm11 = vcmp.eq.f32.partialorder %v2269_v54, 8.507059e+37  ;;  %v2272_v35 = vor.u32 1.1754944e-38, %v2271_v19  ;;  %vm5189_vm12 = vweird.f32 %v13168_v27  ;;  %vm5190_vm14 = vweird.f32 %v13224_v12 }
 0x887   :  { %v2268_v58 = vsel %vm2267_vm13, %v13017_v0, %v2264_v13  ;;  %v5188_v59 = vadd.f32 %v13224_v12, %v5187_v10  ;;  %v5193_v33 = vand.u32 2147483647, %v13168_v27  ;;  %v5246_v18 = vsub.f32 1.0, %v13327_v8  ;;  %5416 = vperm.xlu1 %9437, %v5228_v16   ;;  %vm13394_vm15 = vmor %vm5189_vm12, %vm5190_vm14 }
 0x888   :  { %v2273_v47 = vsel %vm2270_vm11, %v2272_v35, %v2268_v58  ;;  %v5195_v36 = vand.u32 2147483648, %v13168_v27  ;;  %v13399_v34 = vperm.slane %v5113_v7, 1  ;;  %v5276_v0 = vsub.f32 1.0, %v13344_v43 }
 0x889   :  { %v2274_v30 = vmul.f32 %v12730_v61, %v2273_v47  ;;  %v5192_v52 = vsel %vm13394_vm15, %v13224_v12, %v5188_v59  ;;  %v5262_v8 = vmul.f32 %v13298_v56, %v5261_v39  ;;  %v13407_v24 = vpop.eup %9704  ;;  %v5291_v28 = vsub.f32 1.0, %v13358_v51 }
 0x88a   :  { %vm5194_vm1 = vcmp.eq.f32.partialorder %v5193_v33, 8.507059e+37  ;;  %v5196_v21 = vor.u32 1.1754944e-38, %v5195_v36  ;;  %vm5265_vm3 = vweird.f32 %v13298_v56  ;;  %9708 = vrcp.f32 %v13399_v34 }
 0x88b   :  { %v13411_v27 = vpop.eup %9706  ;;  %2382 = vperm.xlu0 %9436, %v2274_v30   ;;  %v5263_v61 = vadd.f32 %v13298_v56, %v5262_v8  ;;  %vm5264_vm0 = vweird.f32 %v13239_v23  ;;  %v5268_v12 = vand.u32 2147483647, %v13239_v23  ;;  %v13419_v39 = vmul.f32 %v13407_v24, %v13370_v53 }
 0x88c   :  { %v5197_v4 = vsel %vm5194_vm1, %v5196_v21, %v5192_v52  ;;  %vm13421_vm6 = vmor %vm5264_vm0, %vm5265_vm3  ;;  %v5270_v19 = vand.u32 2147483648, %v13239_v23  ;;  %v17780_v25 = vsub.f32 1.0, %v13181_v15  ;;  %v13431_v10 = vmul.f32 %v13411_v27, %v13372_v5 }
 0x88d   :  { %v5198_v16 = vmul.f32 %v12756_v31, %v5197_v4  ;;  %v13434_v35 = vperm.slane %v5113_v7, 0  ;;  %v5267_v58 = vsel %vm13421_vm6, %v13298_v56, %v5263_v61  ;;  %vm5269_vm4 = vcmp.eq.f32.partialorder %v5268_v12, 8.507059e+37 }
 0x88e   :  { %v2308_v13 = vmul.f32 %v13138_v38, %v17780_v25  ;;  %v5271_v59 = vor.u32 1.1754944e-38, %v5270_v19  ;;  %vm2310_vm7 = vweird.f32 %v13088_v62  ;;  %vm2311_vm10 = vweird.f32 %v13138_v38 }
 0x88f   :  { %5406 = vperm.xlu2 %9435, %v5198_v16   ;;  %v2314_v15 = vand.u32 2147483647, %v13088_v62  ;;  %v2316_v33 = vand.u32 2147483648, %v13088_v62  ;;  %v5247_v31 = vmul.f32 %v13303_v48, %v5246_v18  ;;  %v5336_v7 = vsub.f32 1.0, %v13419_v39  ;;  %vm13446_vm13 = vmor %vm2310_vm7, %vm2311_vm10 }
 0x890   :  { %v2309_v23 = vadd.f32 %v13138_v38, %v2308_v13  ;;  %v5272_v47 = vsel %vm5269_vm4, %v5271_v59, %v5267_v58  ;;  %vm5250_vm11 = vweird.f32 %v13303_v48  ;;  %v5253_v32 = vand.u32 2147483647, %v13246_v46  ;;  %v13452_v36 = vpop.eup %9708 }
 0x891   :  { %v5351_v30 = vsub.f32 1.0, %v13431_v10  ;;  %v5273_v52 = vmul.f32 %v12776_v1, %v5272_v47  ;;  %vm5249_vm12 = vweird.f32 %v13246_v46  ;;  %v13462_v18 = vmul.f32 %v13452_v36, %v13399_v34 }
 0x892   :  { %v2313_v62 = vsel %vm13446_vm13, %v13138_v38, %v2309_v23  ;;  %vm2315_vm14 = vcmp.eq.f32.partialorder %v2314_v15, 8.507059e+37  ;;  %v2317_v8 = vor.u32 1.1754944e-38, %v2316_v33  ;;  %v5248_v21 = vadd.f32 %v13303_v48, %v5247_v31  ;;  %vm13465_vm15 = vmor %vm5249_vm12, %vm5250_vm11 }
 0x893   :  { %5431 = vperm.xlu1 %9437, %v5273_v52   ;;  %vm13469_vm1 = vcmp.eq.f32.partialorder %v5253_v32, 8.507059e+37  ;;  %v5255_v38 = vand.u32 2147483648, %v13246_v46  ;;  %v5307_v12 = vmul.f32 %v13279_v26, %v5306_v6  ;;  %vm5309_vm3 = vweird.f32 %v13230_v63 }
 0x894   :  { %v5381_v4 = vsub.f32 1.0, %v13462_v18  ;;  %v2318_v54 = vsel %vm2315_vm14, %v2317_v8, %v2313_v62  ;;  %v5252_v19 = vsel %vm13465_vm15, %v13303_v48, %v5248_v21  ;;  %vm5310_vm0 = vweird.f32 %v13279_v26  ;;  %v17809_v62 = vld [vmem:[#allocation119_spill] sm:$0xff] }
 0x895   :  { %v2319_v25 = vmul.f32 %v12742_v49, %v2318_v54  ;;  %v5256_v13 = vor.u32 1.1754944e-38, %v5255_v38  ;;  %v5308_v46 = vadd.f32 %v13279_v26, %v5307_v12  ;;  %v5313_v45 = vand.u32 2147483647, %v13230_v63  ;;  %vm13486_vm6 = vmor %vm5309_vm3, %vm5310_vm0 }
 0x896   :  { %v5315_v10 = vand.u32 2147483648, %v13230_v63  ;;  %v17789_v16 = vsub.f32 1.0, %v13185_v22  ;;  %vm5159_vm4 = vweird.f32 %v13112_v17  ;;  %vm5160_vm7 = vweird.f32 %v13166_v20 }
 0x897   :  { %2397 = vperm.xlu0 %9436, %v2319_v25   ;;  %v5257_v49 = vsel %vm13469_vm1, %v5256_v13, %v5252_v19  ;;  %v5312_v48 = vsel %vm13486_vm6, %v13279_v26, %v5308_v46  ;;  %vm5314_vm10 = vcmp.eq.f32.partialorder %v5313_v45, 8.507059e+37  ;;  %v5163_v59 = vand.u32 2147483647, %v13112_v17  ;;  %vm5161_vm13 = vmor %vm5159_vm4, %vm5160_vm7 }
 0x898   :  { %v5157_v58 = vmul.f32 %v13166_v20, %v17789_v16  ;;  %v5258_v63 = vmul.f32 %v12788_v42, %v5257_v49  ;;  %v5316_v22 = vor.u32 1.1754944e-38, %v5315_v10  ;;  %v5165_v15 = vand.u32 2147483648, %v13112_v17  ;;  %v17802_v16 = vld [vmem:[#allocation130_spill] sm:$0xff] }
 0x899   :  { %vm5164_vm11 = vcmp.eq.f32.partialorder %v5163_v59, 8.507059e+37  ;;  %v5292_v33 = vmul.f32 %v13339_v14, %v5291_v28  ;;  %vm5294_vm12 = vweird.f32 %v13283_v55  ;;  %vm5295_vm14 = vweird.f32 %v13339_v14  ;;  %v17804_v59 = vld [vmem:[#allocation114_spill] sm:$0xff] }
 0x89a   :  { %v5158_v23 = vadd.f32 %v13166_v20, %v5157_v58  ;;  %5426 = vperm.xlu2 %9435, %v5258_v63   ;;  %v5317_v26 = vsel %vm5314_vm10, %v5316_v22, %v5312_v48  ;;  %v5166_v42 = vor.u32 1.1754944e-38, %v5165_v15  ;;  %v5298_v47 = vand.u32 2147483647, %v13283_v55  ;;  %vm13516_vm15 = vmor %vm5294_vm12, %vm5295_vm14  ;;  %v17803_v58 = vld [vmem:[#allocation129_spill] sm:$0xff] }
 0x89b   :  { %v5318_v56 = vmul.f32 %v12790_v29, %v5317_v26  ;;  %v5293_v17 = vadd.f32 %v13339_v14, %v5292_v33  ;;  %v5300_v32 = vand.u32 2147483648, %v13283_v55  ;;  %v5352_v51 = vmul.f32 %v13411_v27, %v5351_v30  ;;  %v17807_v26 = vld [vmem:[#allocation118_spill] sm:$0xff] }
 0x89c   :  { %v5162_v31 = vsel %vm5161_vm13, %v13166_v20, %v5158_v23  ;;  %vm5299_vm1 = vcmp.eq.f32.partialorder %v5298_v47, 8.507059e+37  ;;  %vm5354_vm3 = vweird.f32 %v13372_v5  ;;  %vm5355_vm0 = vweird.f32 %v13411_v27 }
 0x89d   :  { %v5167_v28 = vsel %vm5164_vm11, %v5166_v42, %v5162_v31  ;;  %5446 = vperm.xlu1 %9437, %v5318_v56   ;;  %v5297_v29 = vsel %vm13516_vm15, %v13339_v14, %v5293_v17  ;;  %v5301_v55 = vor.u32 1.1754944e-38, %v5300_v32  ;;  %v5353_v30 = vadd.f32 %v13411_v27, %v5352_v51  ;;  %vm13527_vm6 = vmor %vm5354_vm3, %vm5355_vm0 }
 0x89e   :  { %v5168_v20 = vmul.f32 %v12752_v41, %v5167_v28  ;;  %v5358_v8 = vand.u32 2147483647, %v13372_v5  ;;  %v5360_v21 = vand.u32 2147483648, %v13372_v5  ;;  %v17794_v61 = vsub.f32 1.0, %v13257_v44 }
 0x89f   :  { %vm5204_vm4 = vweird.f32 %v13170_v60  ;;  %v5302_v41 = vsel %vm5299_vm1, %v5301_v55, %v5297_v29  ;;  %v5357_v14 = vsel %vm13527_vm6, %v13411_v27, %v5353_v30  ;;  %vm5205_vm7 = vweird.f32 %v13236_v50  ;;  %v17808_v30 = vld [vmem:[#allocation113_spill] sm:$0xff] }
 0x8a0   :  { %v5202_v1 = vmul.f32 %v13236_v50, %v17794_v61  ;;  %5396 = vperm.xlu0 %9436, %v5168_v20   ;;  %v5208_v38 = vand.u32 2147483647, %v13170_v60  ;;  %v5303_v12 = vmul.f32 %v12800_v9, %v5302_v41  ;;  %vm5359_vm10 = vcmp.eq.f32.partialorder %v5358_v8, 8.507059e+37  ;;  %vm13544_vm13 = vmor %vm5204_vm4, %vm5205_vm7 }
 0x8a1   :  { %v5361_v5 = vor.u32 1.1754944e-38, %v5360_v21  ;;  %v5210_v27 = vand.u32 2147483648, %v13170_v60  ;;  %v5337_v25 = vmul.f32 %v13407_v24, %v5336_v7  ;;  %vm5339_vm12 = vweird.f32 %v13370_v53  ;;  %v13628_v7 = vpop.permute.xlu2 %6607 }
 0x8a2   :  { %v5203_v44 = vadd.f32 %v13236_v50, %v5202_v1  ;;  %vm13548_vm11 = vcmp.eq.f32.partialorder %v5208_v38, 8.507059e+37  ;;  %5441 = vperm.xlu2 %9435, %v5303_v12   ;;  %vm5340_vm14 = vweird.f32 %v13407_v24  ;;  %v5343_v46 = vand.u32 2147483647, %v13370_v53  ;;  %v17810_v12 = vld [vmem:[#allocation115_spill] sm:$0xff]  ;;  %17813 = vst [vmem:[#allocation130_spill] sm:$0xff] %v13628_v7 }
 0x8a3   :  { %v5362_v9 = vsel %vm5359_vm10, %v5361_v5, %v5357_v14  ;;  %v5211_v6 = vor.u32 1.1754944e-38, %v5210_v27  ;;  %v5338_v60 = vadd.f32 %v13407_v24, %v5337_v25  ;;  %v5345_v39 = vand.u32 2147483648, %v13370_v53  ;;  %vm13565_vm15 = vmor %vm5339_vm12, %vm5340_vm14 }
 0x8a4   :  { %v5207_v13 = vsel %vm13544_vm13, %v13236_v50, %v5203_v44  ;;  %v5363_v45 = vmul.f32 %v12798_v37, %v5362_v9  ;;  %vm5344_vm1 = vcmp.eq.f32.partialorder %v5343_v46, 8.507059e+37  ;;  %v17801_v10 = vsub.f32 1.0, %v13228_v2 }
 0x8a5   :  { %vm5234_vm3 = vweird.f32 %v17803_v58  ;;  %vm5235_vm0 = vweird.f32 %v17802_v16  ;;  %v5212_v37 = vsel %vm13548_vm11, %v5211_v6, %v5207_v13  ;;  %v5342_v53 = vsel %vm13565_vm15, %v13407_v24, %v5338_v60  ;;  %v17811_v13 = vld [vmem:[#allocation116_spill] sm:$0xff]  ;;  %v17812_v60 = vld [vmem:[#allocation117_spill] sm:$0xff] }
 0x8a6   :  { %v5232_v50 = vmul.f32 %v17802_v16, %v17801_v10  ;;  %5461 = vperm.xlu1 %9437, %v5363_v45   ;;  %v5346_v49 = vor.u32 1.1754944e-38, %v5345_v39  ;;  %v5238_v48 = vand.u32 2147483647, %v17803_v58  ;;  %v5213_v63 = vmul.f32 %v17804_v59, %v5212_v37  ;;  %vm13589_vm6 = vmor %vm5234_vm3, %vm5235_vm0  ;;  %v13630_v10 = vpop.permute.xlu0 %6603 }
 0x8a7   :  { %v5240_v22 = vand.u32 2147483648, %v17803_v58  ;;  %v5382_v23 = vmul.f32 %v13452_v36, %v5381_v4  ;;  %v5320_v15 = vmul.f32 %v13349_v3, %v13252_v11  ;;  %9710 = vrcp.f32 %v13434_v35  ;;  %17814 = vst [vmem:[#allocation129_spill] sm:$0xff] %v13630_v10 }
 0x8a8   :  { %v5233_v2 = vadd.f32 %v17802_v16, %v5232_v50  ;;  %v5347_v33 = vsel %vm5344_vm1, %v5346_v49, %v5342_v53  ;;  %vm5385_vm4 = vweird.f32 %v13452_v36  ;;  %5411 = vperm.xlu0 %9436, %v5213_v63   ;;  %vm5384_vm7 = vweird.f32 %v13399_v34  ;;  %v17816_v63 = vld [vmem:[#allocation32_spill] sm:$0xff] }
 0x8a9   :  { %v5348_v31 = vmul.f32 %v17807_v26, %v5347_v33  ;;  %v5383_v4 = vadd.f32 %v13452_v36, %v5382_v23  ;;  %v5241_v42 = vor.u32 1.1754944e-38, %v5240_v22  ;;  %vm5386_vm10 = vmor %vm5384_vm7, %vm5385_vm4  ;;  %v5388_v47 = vand.u32 2147483647, %v13399_v34  ;;  %v17817_v23 = vld [vmem:[#allocation34_spill] sm:$0xff]  ;;  %v17818_v26 = vld [vmem:[#allocation36_spill] sm:$0xff] }
 0x8aa   :  { %v5237_v18 = vsel %vm13589_vm6, %v17802_v16, %v5233_v2  ;;  %v5390_v56 = vand.u32 2147483648, %v13399_v34  ;;  %v5277_v17 = vmul.f32 %v13334_v40, %v5276_v0  ;;  %vm5239_vm13 = vcmp.eq.f32.partialorder %v5238_v48, 8.507059e+37  ;;  %v13632_v16 = vpop.permute.xlu1 %6605  ;;  %v2328_v50 = vpop.permute.xlu2 %2327 }
 0x8ab   :  { %5456 = vperm.xlu2 %9435, %v5348_v31   ;;  %v5387_v32 = vsel %vm5386_vm10, %v13452_v36, %v5383_v4  ;;  %v5242_v51 = vsel %vm5239_vm13, %v5241_v42, %v5237_v18  ;;  %v5321_v52 = vsub.f32 1.0, %v5320_v15  ;;  %vm5389_vm11 = vcmp.eq.f32.partialorder %v5388_v47, 8.507059e+37  ;;  %17815 = vst [vmem:[#allocation114_spill] sm:$0xff] %v13632_v16  ;;  %v17819_v18 = vld [vmem:[#allocation19_spill] sm:$0xff] }
 0x8ac   :  { %v5391_v28 = vor.u32 1.1754944e-38, %v5390_v56  ;;  %v5278_v20 = vadd.f32 %v13334_v40, %v5277_v17  ;;  %vm5280_vm12 = vweird.f32 %v13334_v40  ;;  %v5285_v34 = vand.u32 2147483648, %v13281_v57  ;;  %v17820_v56 = vld [vmem:[#allocation31_spill] sm:$0xff] }
 0x8ad   :  { %v9711_v29 = vpop.eup %9710  ;;  %v5243_v43 = vmul.f32 %v17808_v30, %v5242_v51  ;;  %vm5279_vm14 = vweird.f32 %v13281_v57  ;;  %v5283_v0 = vand.u32 2147483647, %v13281_v57  ;;  %v5322_v61 = vmul.f32 %v13349_v3, %v5321_v52 }
 0x8ae   :  { %v5392_v55 = vsel %vm5389_vm11, %v5391_v28, %v5387_v32  ;;  %vm5281_vm15 = vmor %vm5279_vm14, %vm5280_vm12  ;;  %v5365_v36 = vmul.f32 %v9711_v29, %v13434_v35  ;;  %v5286_v1 = vor.u32 1.1754944e-38, %v5285_v34  ;;  %vm5325_vm3 = vweird.f32 %v13349_v3  ;;  %v17821_v32 = vld [vmem:[#allocation33_spill] sm:$0xff] }
 0x8af   :  { %v5393_v8 = vmul.f32 %v17809_v62, %v5392_v55  ;;  %v5282_v21 = vsel %vm5281_vm15, %v13334_v40, %v5278_v20  ;;  %vm5284_vm1 = vcmp.eq.f32.partialorder %v5283_v0, 8.507059e+37  ;;  %v5323_v38 = vadd.f32 %v13349_v3, %v5322_v61  ;;  %v17822_v34 = vld [vmem:[#allocation41_spill] sm:$0xff]  ;;  %v17823_v62 = vld [vmem:[#allocation35_spill] sm:$0xff] }
 0x8b0   :  { %5421 = vperm.xlu0 %9436, %v5243_v43   ;;  %v5287_v41 = vsel %vm5284_vm1, %v5286_v1, %v5282_v21  ;;  %v5366_v14 = vsub.f32 1.0, %v5365_v36  ;;  %v5330_v57 = vand.u32 2147483648, %v13252_v11  ;;  %vm5324_vm0 = vweird.f32 %v13252_v11  ;;  %v17824_v1 = vld [vmem:[#allocation40_spill] sm:$0xff] }
 0x8b1   :  { %v5288_v5 = vmul.f32 %v17810_v12, %v5287_v41  ;;  %v5328_v44 = vand.u32 2147483647, %v13252_v11  ;;  %vm5326_vm6 = vmor %vm5324_vm0, %vm5325_vm3  ;;  %vm5370_vm7 = vweird.f32 %v9711_v29  ;;  %v5375_v9 = vand.u32 2147483648, %v13434_v35  ;;  %v17825_v12 = vld [vmem:[#allocation37_spill] sm:$0xff] }
 0x8b2   :  { %v5327_v40 = vsel %vm5326_vm6, %v13349_v3, %v5323_v38  ;;  %v5367_v54 = vmul.f32 %v9711_v29, %v5366_v14  ;;  %v5331_v19 = vor.u32 1.1754944e-38, %v5330_v57  ;;  %vm5369_vm10 = vweird.f32 %v13434_v35  ;;  %v2348_v53 = vpop.permute.xlu2 %2347 }
 0x8b3   :  { %5471 = vperm.xlu2 %9435, %v5393_v8   ;;  %vm5329_vm4 = vcmp.eq.f32.partialorder %v5328_v44, 8.507059e+37  ;;  %v5373_v45 = vand.u32 2147483647, %v13434_v35  ;;  %vm5371_vm13 = vmor %vm5369_vm10, %vm5370_vm7  ;;  %v5376_v6 = vor.u32 1.1754944e-38, %v5375_v9  ;;  %v2401_v51 = vmul.f32 %v2328_v50, %v17821_v32  ;;  %v17826_v44 = vld [vmem:[#allocation39_spill] sm:$0xff] }
 0x8b4   :  { %v5332_v27 = vsel %vm5329_vm4, %v5331_v19, %v5327_v40  ;;  %v5368_v25 = vadd.f32 %v9711_v29, %v5367_v54  ;;  %v2405_v8 = vmul.f32 %v2348_v53, %v17823_v62 }
 0x8b5   :  { %v5333_v46 = vmul.f32 %v17811_v13, %v5332_v27  ;;  %vm5374_vm11 = vcmp.eq.f32.partialorder %v5373_v45, 8.507059e+37  ;;  %v2431_v36 = vsel %vm875_vm5, %v2401_v51, 0.0  ;;  %v17827_v27 = vld [vmem:[#allocation44_spill] sm:$0xff] }
 0x8b6   :  { %v5372_v11 = vsel %vm5371_vm13, %v9711_v29, %v5368_v25  ;;  %v2434_v57 = vsel %vm875_vm5, %v2405_v8, 0.0 }
 0x8b7   :  { %v5377_v3 = vsel %vm5374_vm11, %v5376_v6, %v5372_v11 }
 0x8b8   :  { %5436 = vperm.xlu0 %9436, %v5288_v5   ;;  %v5378_v39 = vmul.f32 %v17812_v60, %v5377_v3 }
 0x8c0   :  { %5451 = vperm.xlu0 %9436, %v5333_v46   ;;  %v17828_v46 = vld [vmem:[#allocation42_spill] sm:$0xff] }
 0x8c1   :  { %v2323_v58 = vpop.permute.xlu1 %2322 }
 0x8c2   :  { %v2400_v15 = vmul.f32 %v2323_v58, %v17817_v23  ;;  %v17829_v58 = vld [vmem:[#allocation38_spill] sm:$0xff] }
 0x8c4   :  { %v2416_v24 = vsel %vm875_vm5, %v2400_v15, 0.0 }
 0x8c6   :  { %v2363_v48 = vpop.permute.xlu2 %2362 }
 0x8c7   :  { %v2408_v30 = vmul.f32 %v2363_v48, %v17822_v34 }
 0x8c8   :  { %5466 = vperm.xlu0 %9436, %v5378_v39  }
 0x8c9   :  { %v2343_v35 = vpop.permute.xlu1 %2342  ;;  %v2423_v61 = vsel %vm875_vm5, %v2408_v30, 0.0 }
 0x8ca   :  { %v2404_v31 = vmul.f32 %v2343_v35, %v17818_v26 }
 0x8cc   :  { %v2419_v28 = vsel %vm875_vm5, %v2404_v31, 0.0 }
 0x8d1   :  { %v2358_v59 = vpop.permute.xlu1 %2357 }
 0x8d2   :  { %v2333_v37 = vpop.permute.xlu0 %2332  ;;  %v2407_v5 = vmul.f32 %v2358_v59, %v17825_v12  ;;  %v17830_v59 = vld [vmem:[#allocation43_spill] sm:$0xff] }
 0x8d3   :  { %v2402_v2 = vmul.f32 %v2333_v37, %v17816_v63  ;;  %v2378_v42 = vpop.permute.xlu2 %2377 }
 0x8d4   :  { %v2436_v6 = vsel %vm875_vm5, %v2407_v5, 0.0  ;;  %v2411_v37 = vmul.f32 %v2378_v42, %v17829_v58 }
 0x8d5   :  { %v2417_v33 = vsel %vm875_vm5, %v2402_v2, 0.0 }
 0x8d6   :  { %v2418_v47 = vadd.f32 %v2417_v33, %v2416_v24  ;;  %v2440_v48 = vsel %vm875_vm5, %v2411_v37, 0.0 }
 0x8d8   :  { %v2420_v55 = vadd.f32 %v2419_v28, %v2418_v47 }
 0x8d9   :  { %v2373_v52 = vpop.permute.xlu1 %2372 }
 0x8da   :  { %v2338_v49 = vpop.permute.xlu0 %2337  ;;  %v2410_v41 = vmul.f32 %v2373_v52, %v17824_v1 }
 0x8db   :  { %v2403_v17 = vmul.f32 %v2338_v49, %v17820_v56 }
 0x8dc   :  { %v2425_v9 = vsel %vm875_vm5, %v2410_v41, 0.0 }
 0x8dd   :  { %v2432_v43 = vsel %vm875_vm5, %v2403_v17, 0.0 }
 0x8de   :  { %v2433_v21 = vadd.f32 %v2432_v43, %v2431_v36 }
 0x8df   :  { %v2393_v14 = vpop.permute.xlu2 %2392 }
 0x8e0   :  { %v2435_v54 = vadd.f32 %v2434_v57, %v2433_v21  ;;  %v2414_v25 = vmul.f32 %v2393_v14, %v17827_v27 }
 0x8e2   :  { %v2437_v39 = vadd.f32 %v2436_v6, %v2435_v54  ;;  %v2429_v53 = vsel %vm875_vm5, %v2414_v25, 0.0 }
 0x8e3   :  { %v2388_v13 = vpop.permute.xlu1 %2387 }
 0x8e4   :  { %v2413_v2 = vmul.f32 %v2388_v13, %v17830_v59 }
 0x8e6   :  { %v2353_v22 = vpop.permute.xlu0 %2352  ;;  %v2442_v31 = vsel %vm875_vm5, %v2413_v2, 0.0 }
 0x8e7   :  { %v2406_v4 = vmul.f32 %v2353_v22, %v17819_v18 }
 0x8e9   :  { %v2421_v20 = vsel %vm875_vm5, %v2406_v4, 0.0  ;;  %v5407_v24 = vpop.permute.xlu2 %5406  ;;  %v17831_v4 = vld [vmem:[#allocation45_spill] sm:$0xff] }
 0x8ea   :  { %v2422_v0 = vadd.f32 %v2421_v20, %v2420_v55 }
 0x8ec   :  { %v2424_v38 = vadd.f32 %v2423_v61, %v2422_v0 }
 0x8ed   :  { %v5402_v15 = vpop.permute.xlu1 %5401 }
 0x8ee   :  { %v2426_v11 = vadd.f32 %v2425_v9, %v2424_v38 }
 0x8f3   :  { %v2368_v29 = vpop.permute.xlu0 %2367 }
 0x8f4   :  { %v2409_v40 = vmul.f32 %v2368_v29, %v17826_v44  ;;  %v5427_v8 = vpop.permute.xlu2 %5426 }
 0x8f6   :  { %v2438_v3 = vsel %vm875_vm5, %v2409_v40, 0.0 }
 0x8f7   :  { %v2439_v35 = vadd.f32 %v2438_v3, %v2437_v39 }
 0x8f9   :  { %v2441_v22 = vadd.f32 %v2440_v48, %v2439_v35  ;;  %v5417_v43 = vpop.permute.xlu1 %5416  ;;  %v17834_v35 = vld [vmem:[#allocation61_spill] sm:$0xff]  ;;  %v17835_v48 = vld [vmem:[#allocation55_spill] sm:$0xff] }
 0x8fa   :  { %v5475_v2 = vmul.f32 %v5402_v15, %v17835_v48 }
 0x8fb   :  { %v2443_v42 = vadd.f32 %v2442_v31, %v2441_v22  ;;  %v17836_v22 = vld [vmem:[#allocation57_spill] sm:$0xff] }
 0x8fc   :  { %v5442_v25 = vpop.permute.xlu2 %5441  ;;  %v5505_v15 = vsel %vm875_vm5, %v5475_v2, 0.0 }
 0x8fd   :  { %v2383_v19 = vpop.permute.xlu0 %2382 }
 0x8fe   :  { %v2412_v45 = vmul.f32 %v2383_v19, %v17828_v46 }
 0x900   :  { %v2427_v60 = vsel %vm875_vm5, %v2412_v45, 0.0 }
 0x901   :  { %v2428_v50 = vadd.f32 %v2427_v60, %v2426_v11  ;;  %v17832_v60 = vld [vmem:[#allocation56_spill] sm:$0xff] }
 0x903   :  { %v2430_v49 = vadd.f32 %v2429_v53, %v2428_v50  ;;  %v17833_v50 = vld [vmem:[#allocation58_spill] sm:$0xff] }
 0x905   :  { %9712 = vtanh.f32 %v2430_v49  ;;  %v5432_v54 = vpop.permute.xlu1 %5431  ;;  %v5476_v49 = vmul.f32 %v5407_v24, %v17834_v35 }
 0x907   :  { %v5491_v24 = vsel %vm875_vm5, %v5476_v49, 0.0 }
 0x909   :  { %v2398_v33 = vpop.permute.xlu0 %2397 }
 0x90a   :  { %v2415_v47 = vmul.f32 %v2398_v33, %v17831_v4 }
 0x90b   :  { %v13665_v17 = vpop.eup %9712 }
 0x90c   :  { %v2444_v51 = vsel %vm875_vm5, %v2415_v47, 0.0  ;;  %v2450_v28 = vmul.f32 %v13665_v17, %v17816_v63  ;;  %v2448_v52 = vmul.f32 %v13665_v17, %v17817_v23  ;;  %v2454_v0 = vmul.f32 %v13665_v17, %v17819_v18  ;;  %v17885_v18 = vld [vmem:[#allocation53_spill] sm:$0xff] }
 0x90d   :  { %v2445_v20 = vadd.f32 %v2444_v51, %v2443_v42  ;;  %v2452_v36 = vmul.f32 %v13665_v17, %v17818_v26  ;;  %v2460_v6 = vmul.f32 %v13665_v17, %v17828_v46  ;;  %v2458_v3 = vmul.f32 %v13665_v17, %v17824_v1  ;;  %v17876_v1 = vld [vmem:[#allocation26_spill] sm:$0xff]  ;;  %v17891_v26 = vld [vmem:[#allocation76_spill] sm:$0xff] }
 0x90e   :  { %v2470_v29 = vsel %vm875_vm5, %v2450_v28, 0.0  ;;  %v2464_v55 = vsel %vm875_vm5, %v2448_v52, 0.0  ;;  %v2482_v41 = vsel %vm875_vm5, %v2454_v0, 0.0  ;;  %v5457_v52 = vpop.permute.xlu2 %5456 }
 0x90f   :  { %9714 = vtanh.f32 %v2445_v20  ;;  %2471 = vadd.xlane.f32.xlu0 %v2470_v29  ;;  %2465 = vadd.xlane.f32.xlu1 %v2464_v55  ;;  %v2476_v14 = vsel %vm875_vm5, %v2452_v36, 0.0  ;;  %v5447_v31 = vpop.permute.xlu1 %5446  ;;  %v2500_v47 = vsel %vm875_vm5, %v2460_v6, 0.0  ;;  %v2494_v42 = vsel %vm875_vm5, %v2458_v3, 0.0  ;;  %v17837_v29 = vld [vmem:[#allocation60_spill] sm:$0xff] }
 0x910   :  { %v5478_v55 = vmul.f32 %v5417_v43, %v17837_v29 }
 0x912   :  { %v5397_v30 = vpop.permute.xlu0 %5396 }
 0x913   :  { %v5474_v39 = vmul.f32 %v5397_v30, %v17832_v60 }
 0x915   :  { %v13678_v21 = vpop.eup %9714  ;;  %v5490_v51 = vsel %vm875_vm5, %v5474_v39, 0.0  ;;  %v17841_v39 = vld [vmem:[#allocation64_spill] sm:$0xff] }
 0x916   :  { %v2449_v61 = vmul.f32 %v13678_v21, %v17821_v32  ;;  %v2457_v5 = vmul.f32 %v13678_v21, %v17826_v44  ;;  %v2455_v40 = vmul.f32 %v13678_v21, %v17825_v12  ;;  %v2451_v19 = vmul.f32 %v13678_v21, %v17820_v56 }
 0x917   :  { %2483 = vadd.xlane.f32.xlu0 %v2482_v41  ;;  %2477 = vadd.xlane.f32.xlu1 %v2476_v14  ;;  %v2453_v53 = vmul.f32 %v13678_v21, %v17823_v62  ;;  %v5492_v0 = vadd.f32 %v5491_v24, %v5490_v51  ;;  %v2463_v41 = vmul.f32 %v13678_v21, %v17831_v4  ;;  %v17843_v24 = vld [vmem:[#allocation67_spill] sm:$0xff] }
 0x918   :  { %v2467_v38 = vsel %vm875_vm5, %v2449_v61, 0.0  ;;  %v2491_v9 = vsel %vm875_vm5, %v2457_v5, 0.0  ;;  %v2485_v13 = vsel %vm875_vm5, %v2455_v40, 0.0  ;;  %v2473_v45 = vsel %vm875_vm5, %v2451_v19, 0.0  ;;  %v17839_v19 = vld [vmem:[#allocation62_spill] sm:$0xff]  ;;  %v17871_v4 = vld [vmem:[#allocation47_spill] sm:$0xff] }
 0x919   :  { %2468 = vadd.xlane.f32.xlu2 %v2467_v38  ;;  %v2479_v20 = vsel %vm875_vm5, %v2453_v53, 0.0  ;;  %v2461_v14 = vmul.f32 %v13678_v21, %v17830_v59  ;;  %v17838_v38 = vld [vmem:[#allocation59_spill] sm:$0xff]  ;;  %v2456_v40 = vmul.f32 %v13665_v17, %v17822_v34  ;;  %v5480_v43 = vmul.f32 %v5427_v8, %v17839_v19 }
 0x91a   :  { %v5412_v57 = vpop.permute.xlu0 %5411  ;;  %v2509_v6 = vsel %vm875_vm5, %v2463_v41, 0.0  ;;  %v17845_v41 = vld [vmem:[#allocation69_spill] sm:$0xff] }
 0x91b   :  { %v5477_v37 = vmul.f32 %v5412_v57, %v17833_v50  ;;  %v5481_v57 = vmul.f32 %v5432_v54, %v17838_v38  ;;  %v2503_v3 = vsel %vm875_vm5, %v2461_v14, 0.0  ;;  %v5462_v54 = vpop.permute.xlu1 %5461  ;;  %v2488_v2 = vsel %vm875_vm5, %v2456_v40, 0.0  ;;  %v17846_v40 = vld [vmem:[#allocation68_spill] sm:$0xff] }
 0x91c   :  { %v5495_v8 = vsel %vm875_vm5, %v5480_v43, 0.0  ;;  %v5486_v43 = vmul.f32 %v5457_v52, %v17846_v40  ;;  %v2462_v52 = vmul.f32 %v13665_v17, %v17827_v27 }
 0x91d   :  { %v5506_v28 = vsel %vm875_vm5, %v5477_v37, 0.0  ;;  %v5483_v37 = vmul.f32 %v5442_v25, %v17841_v39  ;;  %v5510_v53 = vsel %vm875_vm5, %v5481_v57, 0.0 }
 0x91e   :  { %v5507_v36 = vadd.f32 %v5506_v28, %v5505_v15  ;;  %v5487_v15 = vmul.f32 %v5462_v54, %v17843_v24  ;;  %v17847_v54 = vld [vmem:[#allocation70_spill] sm:$0xff] }
 0x91f   :  { %2492 = vadd.xlane.f32.xlu0 %v2491_v9  ;;  %2486 = vadd.xlane.f32.xlu1 %v2485_v13  ;;  %v5493_v9 = vsel %vm875_vm5, %v5478_v55, 0.0  ;;  %v17840_v13 = vld [vmem:[#allocation65_spill] sm:$0xff]  ;;  %v5512_v28 = vsel %vm875_vm5, %v5483_v37, 0.0  ;;  %v17844_v55 = vld [vmem:[#allocation63_spill] sm:$0xff] }
 0x921   :  { %2474 = vadd.xlane.f32.xlu2 %v2473_v45 }
 0x922   :  { %v5422_v11 = vpop.permute.xlu0 %5421 }
 0x923   :  { %v5479_v33 = vmul.f32 %v5422_v11, %v17836_v22  ;;  %v5494_v11 = vadd.f32 %v5493_v9, %v5492_v0 }
 0x925   :  { %v5508_v30 = vsel %vm875_vm5, %v5479_v33, 0.0 }
 0x926   :  { %v5509_v5 = vadd.f32 %v5508_v30, %v5507_v36 }
 0x927   :  { %2501 = vadd.xlane.f32.xlu0 %v2500_v47  ;;  %2495 = vadd.xlane.f32.xlu1 %v2494_v42  ;;  %v5472_v47 = vpop.permute.xlu2 %5471  ;;  %v5496_v42 = vadd.f32 %v5495_v8, %v5494_v11 }
 0x928   :  { %v5511_v49 = vadd.f32 %v5510_v53, %v5509_v5  ;;  %v5489_v14 = vmul.f32 %v5472_v47, %v17845_v41  ;;  %v5501_v53 = vsel %vm875_vm5, %v5486_v43, 0.0  ;;  %v2506_v47 = vsel %vm875_vm5, %v2462_v52, 0.0 }
 0x929   :  { %2480 = vadd.xlane.f32.xlu2 %v2479_v20  ;;  %v17842_v20 = vld [vmem:[#allocation66_spill] sm:$0xff] }
 0x92a   :  { %v5437_v61 = vpop.permute.xlu0 %5436  ;;  %v5484_v25 = vmul.f32 %v5447_v31, %v17842_v20  ;;  %v5513_v36 = vadd.f32 %v5512_v28, %v5511_v49  ;;  %v5516_v31 = vsel %vm875_vm5, %v5487_v15, 0.0 }
 0x92b   :  { %v5482_v45 = vmul.f32 %v5437_v61, %v17840_v13  ;;  %v2459_v61 = vmul.f32 %v13678_v21, %v17829_v58  ;;  %v17873_v58 = vld [vmem:[#allocation54_spill] sm:$0xff] }
 0x92c   :  { %v5499_v9 = vsel %vm875_vm5, %v5484_v25, 0.0 }
 0x92d   :  { %v5497_v33 = vsel %vm875_vm5, %v5482_v45, 0.0 }
 0x92e   :  { %v5498_v0 = vadd.f32 %v5497_v33, %v5496_v42 }
 0x92f   :  { %2510 = vadd.xlane.f32.xlu0 %v2509_v6  ;;  %2504 = vadd.xlane.f32.xlu1 %v2503_v3  ;;  %v2497_v6 = vsel %vm875_vm5, %v2459_v61, 0.0  ;;  %v5518_v3 = vsel %vm875_vm5, %v5489_v14, 0.0 }
 0x930   :  { %v5500_v45 = vadd.f32 %v5499_v9, %v5498_v0 }
 0x931   :  { %2489 = vadd.xlane.f32.xlu2 %v2488_v2 }
 0x932   :  { %v5452_v51 = vpop.permute.xlu0 %5451  ;;  %v5502_v2 = vadd.f32 %v5501_v53, %v5500_v45 }
 0x933   :  { %v5485_v30 = vmul.f32 %v5452_v51, %v17844_v55 }
 0x935   :  { %v5514_v57 = vsel %vm875_vm5, %v5485_v30, 0.0 }
 0x936   :  { %v5515_v5 = vadd.f32 %v5514_v57, %v5513_v36 }
 0x938   :  { %v5517_v11 = vadd.f32 %v5516_v31, %v5515_v5 }
 0x939   :  { %2498 = vadd.xlane.f32.xlu2 %v2497_v6 }
 0x93a   :  { %v5519_v37 = vadd.f32 %v5518_v3, %v5517_v11  ;;  %v5467_v21 = vpop.permute.xlu0 %5466 }
 0x93b   :  { %v5488_v49 = vmul.f32 %v5467_v21, %v17847_v54 }
 0x93c   :  { %9716 = vtanh.f32 %v5519_v37 }
 0x93d   :  { %v5503_v8 = vsel %vm875_vm5, %v5488_v49, 0.0 }
 0x93e   :  { %v5504_v33 = vadd.f32 %v5503_v8, %v5502_v2 }
 0x940   :  { %9718 = vtanh.f32 %v5504_v33 }
 0x941   :  { %2507 = vadd.xlane.f32.xlu2 %v2506_v47 }
 0x942   :  { %v9717_v42 = vpop.eup %9716 }
 0x943   :  { %v5523_v51 = vmul.f32 %v9717_v42, %v17835_v48  ;;  %v5527_v14 = vmul.f32 %v9717_v42, %v17836_v22  ;;  %v5525_v57 = vmul.f32 %v9717_v42, %v17833_v50  ;;  %v5529_v9 = vmul.f32 %v9717_v42, %v17838_v38 }
 0x944   :  { %v5533_v53 = vmul.f32 %v9717_v42, %v17844_v55  ;;  %v5531_v49 = vmul.f32 %v9717_v42, %v17841_v39  ;;  %v5535_v8 = vmul.f32 %v9717_v42, %v17843_v24 }
 0x945   :  { %v5541_v28 = vsel %vm875_vm5, %v5523_v51, 0.0  ;;  %v5553_v5 = vsel %vm875_vm5, %v5527_v14, 0.0  ;;  %v5547_v43 = vsel %vm875_vm5, %v5525_v57, 0.0  ;;  %v5559_v31 = vsel %vm875_vm5, %v5529_v9, 0.0 }
 0x946   :  { %v9719_v25 = vpop.eup %9718  ;;  %5542 = vadd.xlane.f32.xlu0 %v5541_v28  ;;  %v5571_v2 = vsel %vm875_vm5, %v5533_v53, 0.0  ;;  %v5565_v52 = vsel %vm875_vm5, %v5531_v49, 0.0  ;;  %v5577_v33 = vsel %vm875_vm5, %v5535_v8, 0.0  ;;  %v17848_v28 = vld [vmem:[#allocation87_spill] sm:$0xff] }
 0x947   :  { %v5524_v15 = vmul.f32 %v9719_v25, %v17834_v35  ;;  %v5522_v30 = vmul.f32 %v9719_v25, %v17832_v60  ;;  %v5526_v36 = vmul.f32 %v9719_v25, %v17837_v29  ;;  %v5530_v45 = vmul.f32 %v9719_v25, %v17840_v13 }
 0x948   :  { %v5528_v11 = vmul.f32 %v9719_v25, %v17839_v19  ;;  %v5532_v37 = vmul.f32 %v9719_v25, %v17842_v20  ;;  %v5534_v47 = vmul.f32 %v9719_v25, %v17846_v40  ;;  %v5536_v14 = vmul.f32 %v9719_v25, %v17847_v54 }
 0x949   :  { %v5544_v17 = vsel %vm875_vm5, %v5524_v15, 0.0  ;;  %v5538_v0 = vsel %vm875_vm5, %v5522_v30, 0.0  ;;  %v5550_v61 = vsel %vm875_vm5, %v5526_v36, 0.0  ;;  %v5562_v6 = vsel %vm875_vm5, %v5530_v45, 0.0  ;;  %v17849_v15 = vld [vmem:[#allocation92_spill] sm:$0xff]  ;;  %v17853_v36 = vld [vmem:[#allocation89_spill] sm:$0xff] }
 0x94a   :  { %5545 = vadd.xlane.f32.xlu2 %v5544_v17  ;;  %5539 = vadd.xlane.f32.xlu1 %v5538_v0  ;;  %v5556_v3 = vsel %vm875_vm5, %v5528_v11, 0.0  ;;  %v5568_v21 = vsel %vm875_vm5, %v5532_v37, 0.0  ;;  %v5574_v51 = vsel %vm875_vm5, %v5534_v47, 0.0  ;;  %v17850_v30 = vld [vmem:[#allocation88_spill] sm:$0xff]  ;;  %v17851_v17 = vld [vmem:[#allocation94_spill] sm:$0xff]  ;;  %v17852_v0 = vld [vmem:[#allocation91_spill] sm:$0xff] }
 0x94e   :  { %5551 = vadd.xlane.f32.xlu0 %v5550_v61 }
 0x952   :  { %5554 = vadd.xlane.f32.xlu2 %v5553_v5  ;;  %5548 = vadd.xlane.f32.xlu1 %v5547_v43  ;;  %v17854_v5 = vld [vmem:[#allocation93_spill] sm:$0xff]  ;;  %v5580_v43 = vsel %vm875_vm5, %v5536_v14, 0.0 }
 0x953   :  { %v17856_v14 = vld [vmem:[#allocation21_spill] sm:$0xff] }
 0x956   :  { %5560 = vadd.xlane.f32.xlu0 %v5559_v31  ;;  %v5537_v31 = vmul.f32 %v9717_v42, %v17845_v41  ;;  %v17858_v41 = vld [vmem:[#allocation48_spill] sm:$0xff] }
 0x958   :  { %v5583_v11 = vsel %vm875_vm5, %v5537_v31, 0.0 }
 0x95a   :  { %5563 = vadd.xlane.f32.xlu2 %v5562_v6  ;;  %5557 = vadd.xlane.f32.xlu1 %v5556_v3  ;;  %v17855_v6 = vld [vmem:[#allocation90_spill] sm:$0xff] }
 0x95e   :  { %5569 = vadd.xlane.f32.xlu0 %v5568_v21 }
 0x962   :  { %5572 = vadd.xlane.f32.xlu2 %v5571_v2  ;;  %5566 = vadd.xlane.f32.xlu1 %v5565_v52 }
 0x966   :  { %5578 = vadd.xlane.f32.xlu0 %v5577_v33 }
 0x96a   :  { %5575 = vadd.xlane.f32.xlu1 %v5574_v51 }
 0x97a   :  { %6621 = vrot.lane.b32.xlu2 %v17848_v28, %s10256_s7  ;;  %6609 = vrot.lane.b32.xlu0 %v17849_v15, %s10255_s28 }
 0x982   :  { %6623 = vrot.lane.b32.xlu0 %v17850_v30, %s10256_s7  ;;  %v13792_v61 = vpop.xlane.xlu1 %2465  ;;  %v13795_v57 = vpop.xlane.xlu0 %2471 }
 0x983   :  { %6611 = vrot.lane.b32.xlu1 %v17851_v17, %s10255_s28 }
 0x98a   :  { %6629 = vrot.lane.b32.xlu0 %v17852_v0, %s10256_s7  ;;  %v2478_v9 = vpop.xlane.xlu1 %2477  ;;  %v13801_v45 = vpop.xlane.xlu0 %2483 }
 0x98c   :  { %v13812_v37 = vpop.xlane.xlu2 %2468 }
 0x992   :  { %6635 = vrot.lane.b32.xlu0 %v17851_v17, %s10256_s7  ;;  %v13806_v25 = vpop.xlane.xlu1 %2486  ;;  %v13810_v3 = vpop.xlane.xlu0 %2492 }
 0x994   :  { %v13820_v53 = vpop.xlane.xlu2 %2474 }
 0x99a   :  { %6649 = vrot.lane.b32.xlu0 %v17853_v36, %s10247_s15  ;;  %v2496_v42 = vpop.xlane.xlu1 %2495  ;;  %v13818_v21 = vpop.xlane.xlu0 %2501 }
 0x99c   :  { %v2481_v52 = vpop.xlane.xlu2 %2480 }
 0x9a2   :  { %6655 = vrot.lane.b32.xlu0 %v17854_v5, %s10247_s15  ;;  %v13824_v49 = vpop.xlane.xlu1 %2504  ;;  %v13828_v2 = vpop.xlane.xlu0 %2510 }
 0x9a3   :  { %5581 = vadd.xlane.f32.xlu2 %v5580_v43  ;;  %v13841_v43 = vadd.f32 %v2481_v52, %v17856_v14  ;;  %v17859_v52 = vld [vmem:[#allocation51_spill] sm:$0xff] }
 0x9a4   :  { %v2490_v47 = vpop.xlane.xlu2 %2489 }
 0x9a5   :  { %v2549_v55 = vperm.slane %v13841_v43, %v17858_v41 }
 0x9aa   :  { %6669 = vrot.lane.b32.xlu0 %v17848_v28, %s10257_s8 }
 0x9ac   :  { %v2499_v54 = vpop.xlane.xlu2 %2498 }
 0x9ad   :  { %5584 = vadd.xlane.f32.xlu1 %v5583_v11  ;;  %v17857_v11 = vld [vmem:[#allocation24_spill] sm:$0xff]  ;;  %v13857_v14 = vadd.f32 %v2499_v54, %v17859_v52  ;;  %v17862_v52 = vld [vmem:[#allocation71_spill] sm:$0xff] }
 0x9ae   :  { %v13846_v24 = vadd.f32 %v2478_v9, %v17857_v11  ;;  %v17860_v11 = vld [vmem:[#allocation50_spill] sm:$0xff] }
 0x9af   :  { %v13861_v39 = vadd.f32 %v2496_v42, %v17860_v11  ;;  %v2555_v22 = vperm.slane %v13857_v14, %v17858_v41 }
 0x9b0   :  { %v2548_v20 = vperm.slane %v13846_v24, %v17858_v41 }
 0x9b1   :  { %v2554_v54 = vperm.slane %v13861_v39, %v17858_v41 }
 0x9b2   :  { %6675 = vrot.lane.b32.xlu0 %v17855_v6, %s10257_s8  ;;  %v2562_v40 = vsel %vm1022_vm8, %v2549_v55, %v2548_v20  ;;  %v17861_v20 = vld [vmem:[#allocation72_spill] sm:$0xff] }
 0x9b3   :  { %v2582_v38 = vsel %vm1039_vm9, %v2562_v40, -inf  ;;  %v2565_v42 = vsel %vm1022_vm8, %v2555_v22, %v2554_v54  ;;  %v17863_v22 = vld [vmem:[#allocation78_spill] sm:$0xff] }
 0x9b4   :  { %v2508_v50 = vpop.xlane.xlu2 %2507 }
 0x9b5   :  { %v13948_v59 = vadd.f32 %v2508_v50, %v17873_v58  ;;  %v13964_v58 = vadd.f32 %v13792_v61, %v17876_v1  ;;  %v17879_v61 = vld [vmem:[#allocation23_spill] sm:$0xff] }
 0x9b9   :  { %v5543_v33 = vpop.xlane.xlu0 %5542 }
 0x9ba   :  { %6681 = vrot.lane.b32.xlu0 %v17849_v15, %s10257_s8  ;;  %v13877_v11 = vadd.f32 %v5543_v33, %v17862_v52 }
 0x9bb   :  { %6627 = vrot.lane.b32.xlu2 %v17855_v6, %s10256_s7 }
 0x9bd   :  { %v5540_v8 = vpop.xlane.xlu1 %5539  ;;  %v5546_v27 = vpop.xlane.xlu2 %5545 }
 0x9be   :  { %v13873_v55 = vadd.f32 %v5540_v8, %v17861_v20  ;;  %v5619_v8 = vperm.slane %v13877_v11, %v17858_v41  ;;  %v17864_v20 = vld [vmem:[#allocation77_spill] sm:$0xff] }
 0x9c0   :  { %v5618_v40 = vperm.slane %v13873_v55, %v17858_v41 }
 0x9c1   :  { %v13843_v31 = vpop.xlane.xlu0 %5551 }
 0x9c2   :  { %v5634_v54 = vsel %vm1022_vm8, %v5619_v8, %v5618_v40  ;;  %v17867_v8 = vld [vmem:[#allocation83_spill] sm:$0xff] }
 0x9c3   :  { %6633 = vrot.lane.b32.xlu2 %v17849_v15, %s10256_s7 }
 0x9c5   :  { %v13838_v51 = vpop.xlane.xlu1 %5548 }
 0x9c6   :  { %6625 = vrot.lane.b32.xlu1 %v17853_v36, %s10256_s7 }
 0x9c9   :  { %v5561_v13 = vpop.xlane.xlu0 %5560 }
 0x9ca   :  { %v13897_v52 = vadd.f32 %v5561_v13, %v17864_v20 }
 0x9cb   :  { %6647 = vrot.lane.b32.xlu2 %v17850_v30, %s10247_s15 }
 0x9cc   :  { %v5625_v60 = vperm.slane %v13897_v52, %v17858_v41 }
 0x9cd   :  { %v5558_v9 = vpop.xlane.xlu1 %5557 }
 0x9ce   :  { %6631 = vrot.lane.b32.xlu1 %v17854_v5, %s10256_s7  ;;  %v13893_v33 = vadd.f32 %v5558_v9, %v17863_v22  ;;  %v17865_v22 = vld [vmem:[#allocation84_spill] sm:$0xff] }
 0x9d1   :  { %v13886_v48 = vpop.xlane.xlu0 %5569 }
 0x9d3   :  { %6653 = vrot.lane.b32.xlu2 %v17852_v0, %s10247_s15 }
 0x9d5   :  { %v13879_v19 = vpop.xlane.xlu1 %5566 }
 0x9d6   :  { %6645 = vrot.lane.b32.xlu1 %v17848_v28, %s10247_s15 }
 0x9d9   :  { %v5579_v9 = vpop.xlane.xlu0 %5578 }
 0x9db   :  { %6659 = vrot.lane.b32.xlu2 %v17851_v17, %s10247_s15 }
 0x9dd   :  { %v5576_v29 = vpop.xlane.xlu1 %5575 }
 0x9de   :  { %6651 = vrot.lane.b32.xlu1 %v17855_v6, %s10247_s15  ;;  %v13907_v40 = vadd.f32 %v5576_v29, %v17865_v22  ;;  %v5555_v22 = vpop.xlane.xlu2 %5554 }
 0x9df   :  { %v14039_v23 = vadd.f32 %v5555_v22, %v17891_v26 }
 0x9e0   :  { %17866 = vst [vmem:[#allocation118_spill] sm:$0xff] %v13907_v40 }
 0x9e3   :  { %6673 = vrot.lane.b32.xlu2 %v17853_v36, %s10257_s8 }
 0x9e4   :  { %2583 = vmax.xlane.f32.xlu0 %v2582_v38  ;;  %v2591_v38 = vsel %vm1039_vm9, %v2565_v42, -inf  ;;  %v5650_v42 = vsel %vm1039_vm9, %v5634_v54, -inf  ;;  %v13911_v54 = vadd.f32 %v5579_v9, %v17867_v8 }
 0x9e6   :  { %6657 = vrot.lane.b32.xlu1 %v17849_v15, %s10247_s15  ;;  %17868 = vst [vmem:[#allocation113_spill] sm:$0xff] %v13911_v54  ;;  %v5631_v35 = vperm.slane %v13911_v54, %v17858_v41 }
 0x9eb   :  { %6679 = vrot.lane.b32.xlu2 %v17854_v5, %s10257_s8 }
 0x9ec   :  { %2592 = vmax.xlane.f32.xlu0 %v2591_v38  ;;  %v5624_v38 = vperm.slane %v13893_v33, %v17858_v41 }
 0x9ee   :  { %6671 = vrot.lane.b32.xlu1 %v17850_v30, %s10257_s8  ;;  %v5637_v13 = vsel %vm1022_vm8, %v5625_v60, %v5624_v38  ;;  %v17869_v38 = vld [vmem:[#allocation22_spill] sm:$0xff] }
 0x9ef   :  { %v5659_v20 = vsel %vm1039_vm9, %v5637_v13, -inf  ;;  %v13924_v9 = vadd.f32 %v13820_v53, %v17869_v38  ;;  %v17870_v13 = vld [vmem:[#allocation27_spill] sm:$0xff] }
 0x9f0   :  { %v13928_v8 = vadd.f32 %v13795_v57, %v17870_v13 }
 0x9f2   :  { %v2546_v46 = vperm.slane %v13928_v8, %v17858_v41 }
 0x9f4   :  { %5651 = vmax.xlane.f32.xlu0 %v5650_v42  ;;  %v5630_v42 = vperm.slane %v13907_v40, %v17858_v41 }
 0x9f6   :  { %6677 = vrot.lane.b32.xlu1 %v17852_v0, %s10257_s8  ;;  %v5640_v29 = vsel %vm1022_vm8, %v5631_v35, %v5630_v42  ;;  %v13935_v35 = vadd.f32 %v2490_v47, %v17871_v4 }
 0x9f7   :  { %v5668_v60 = vsel %vm1039_vm9, %v5640_v29, -inf  ;;  %v17872_v29 = vld [vmem:[#allocation46_spill] sm:$0xff] }
 0x9f8   :  { %v13940_v53 = vadd.f32 %v13810_v3, %v17872_v29  ;;  %v2552_v57 = vperm.slane %v13935_v35, %v17858_v41  ;;  %v2558_v29 = vperm.slane %v13948_v59, %v17858_v41 }
 0x9fa   :  { %v2553_v13 = vperm.slane %v13940_v53, %v17858_v41 }
 0x9fc   :  { %5660 = vmax.xlane.f32.xlu0 %v5659_v20  ;;  %v2547_v20 = vperm.slane %v13924_v9, %v17858_v41  ;;  %v2564_v4 = vsel %vm1022_vm8, %v2553_v13, %v2552_v57  ;;  %v17877_v57 = vld [vmem:[#allocation75_spill] sm:$0xff] }
 0x9fd   :  { %v2588_v3 = vsel %vm1039_vm9, %v2564_v4, -inf  ;;  %v13972_v13 = vadd.f32 %v13838_v51, %v17877_v57  ;;  %v2544_v4 = vperm.slane %v13964_v58, %v17858_v41  ;;  %v13988_v57 = vpop.permute.xlu1 %6611 }
 0x9fe   :  { %6683 = vrot.lane.b32.xlu1 %v17851_v17, %s10257_s8  ;;  %v2561_v42 = vsel %vm1022_vm8, %v2547_v20, %v2546_v46  ;;  %v17874_v46 = vld [vmem:[#allocation52_spill] sm:$0xff]  ;;  %17880 = vst [vmem:[#allocation119_spill] sm:$0xff] %v13988_v57 }
 0x9ff   :  { %v2579_v38 = vsel %vm1039_vm9, %v2561_v42, -inf  ;;  %v13953_v47 = vadd.f32 %v13828_v2, %v17874_v46  ;;  %v17875_v20 = vld [vmem:[#allocation28_spill] sm:$0xff]  ;;  %v17878_v46 = vld [vmem:[#allocation73_spill] sm:$0xff]  ;;  %v5621_v44 = vperm.slane %v13972_v13, %v17858_v41 }
 0xa00   :  { %v13958_v42 = vadd.f32 %v13812_v37, %v17875_v20  ;;  %v13983_v20 = vadd.f32 %v13806_v25, %v17879_v61  ;;  %v17882_v61 = vld [vmem:[#allocation81_spill] sm:$0xff] }
 0xa01   :  { %v2559_v50 = vperm.slane %v13953_v47, %v17858_v41 }
 0xa02   :  { %v2545_v2 = vperm.slane %v13958_v42, %v17858_v41 }
 0xa03   :  { %v2567_v37 = vsel %vm1022_vm8, %v2559_v50, %v2558_v29  ;;  %v17881_v29 = vld [vmem:[#allocation25_spill] sm:$0xff] }
 0xa04   :  { %5669 = vmax.xlane.f32.xlu0 %v5668_v60  ;;  %v5564_v60 = vpop.xlane.xlu2 %5563  ;;  %v2597_v1 = vsel %vm1039_vm9, %v2567_v37, -inf  ;;  %v2560_v51 = vsel %vm1022_vm8, %v2545_v2, %v2544_v4  ;;  %v13992_v50 = vadd.f32 %v13801_v45, %v17881_v29  ;;  %v17884_v4 = vld [vmem:[#allocation79_spill] sm:$0xff] }
 0xa05   :  { %v2576_v25 = vsel %vm1039_vm9, %v2560_v51, -inf  ;;  %v14009_v29 = vadd.f32 %v5564_v60, %v17884_v4  ;;  %v14014_v51 = vadd.f32 %v13824_v49, %v17885_v18  ;;  %v17887_v49 = vld [vmem:[#allocation86_spill] sm:$0xff] }
 0xa06   :  { %v2550_v45 = vperm.slane %v13992_v50, %v17858_v41 }
 0xa07   :  { %v5626_v60 = vperm.slane %v14009_v29, %v17858_v41  ;;  %v2557_v18 = vperm.slane %v14014_v51, %v17858_v41 }
 0xa14   :  { %2580 = vmax.xlane.f32.xlu2 %v2579_v38  ;;  %v5573_v38 = vpop.xlane.xlu2 %5572 }
 0xa1c   :  { %2589 = vmax.xlane.f32.xlu2 %v2588_v3  ;;  %v13978_v3 = vadd.f32 %v5546_v27, %v17878_v46  ;;  %v13996_v37 = vpop.permute.xlu2 %6621  ;;  %v2551_v46 = vperm.slane %v13983_v20, %v17858_v41 }
 0xa1e   :  { %v5620_v27 = vperm.slane %v13978_v3, %v17858_v41 }
 0xa20   :  { %v5635_v2 = vsel %vm1022_vm8, %v5621_v44, %v5620_v27  ;;  %v17886_v44 = vld [vmem:[#allocation49_spill] sm:$0xff] }
 0xa21   :  { %v5653_v34 = vsel %vm1039_vm9, %v5635_v2, -inf  ;;  %v14021_v27 = vadd.f32 %v13818_v21, %v17886_v44  ;;  %v17889_v21 = vld [vmem:[#allocation85_spill] sm:$0xff] }
 0xa24   :  { %2598 = vmax.xlane.f32.xlu2 %v2597_v1  ;;  %v14003_v1 = vadd.f32 %v13879_v19, %v17882_v61  ;;  %v2563_v19 = vsel %vm1022_vm8, %v2551_v46, %v2550_v45  ;;  %v5582_v61 = vpop.xlane.xlu2 %5581  ;;  %v2556_v46 = vperm.slane %v14021_v27, %v17858_v41 }
 0xa25   :  { %v2585_v2 = vsel %vm1039_vm9, %v2563_v19, -inf  ;;  %v14035_v45 = vadd.f32 %v5582_v61, %v17889_v21  ;;  %v17894_v21 = vld [vmem:[#allocation80_spill] sm:$0xff] }
 0xa26   :  { %17883 = vst [vmem:[#allocation115_spill] sm:$0xff] %v14003_v1  ;;  %v5627_v12 = vperm.slane %v14003_v1, %v17858_v41 }
 0xa27   :  { %17890 = vst [vmem:[#allocation117_spill] sm:$0xff] %v14035_v45 }
 0xa28   :  { %2577 = vmax.xlane.f32.xlu1 %v2576_v25  ;;  %v5585_v25 = vpop.xlane.xlu1 %5584 }
 0xa29   :  { %v14029_v4 = vadd.f32 %v5585_v25, %v17887_v49  ;;  %v2566_v25 = vsel %vm1022_vm8, %v2557_v18, %v2556_v46  ;;  %v5623_v49 = vperm.slane %v14039_v23, %v17858_v41 }
 0xa2a   :  { %v2594_v61 = vsel %vm1039_vm9, %v2566_v25, -inf }
 0xa2b   :  { %17888 = vst [vmem:[#allocation116_spill] sm:$0xff] %v14029_v4  ;;  %v5633_v19 = vperm.slane %v14029_v4, %v17858_v41 }
 0xa2c   :  { %5654 = vmax.xlane.f32.xlu2 %v5653_v34  ;;  %v5638_v34 = vsel %vm1022_vm8, %v5627_v12, %v5626_v60  ;;  %v5632_v60 = vperm.slane %v14035_v45, %v17858_v41 }
 0xa2d   :  { %v5662_v44 = vsel %vm1039_vm9, %v5638_v34, -inf  ;;  %v17893_v34 = vld [vmem:[#allocation82_spill] sm:$0xff] }
 0xa2e   :  { %v5641_v26 = vsel %vm1022_vm8, %v5633_v19, %v5632_v60  ;;  %v14058_v46 = vadd.f32 %v5573_v38, %v17893_v34  ;;  %v14070_v60 = vpop.permute.xlu2 %6627  ;;  %v14072_v38 = vpop.permute.xlu0 %6609 }
 0xa2f   :  { %v5671_v18 = vsel %vm1039_vm9, %v5641_v26, -inf  ;;  %17895 = vst [vmem:[#allocation87_spill] sm:$0xff] %v14072_v38 }
 0xa30   :  { %2586 = vmax.xlane.f32.xlu1 %v2585_v2  ;;  %v17892_v2 = vld [vmem:[#allocation74_spill] sm:$0xff]  ;;  %v5629_v19 = vperm.slane %v14058_v46, %v17858_v41 }
 0xa31   :  { %v14046_v12 = vadd.f32 %v13843_v31, %v17892_v2 }
 0xa33   :  { %v5622_v22 = vperm.slane %v14046_v12, %v17858_v41 }
 0xa34   :  { %5663 = vmax.xlane.f32.xlu2 %v5662_v44  ;;  %v14063_v44 = vadd.f32 %v13886_v48, %v17894_v21 }
 0xa35   :  { %v5636_v31 = vsel %vm1022_vm8, %v5623_v49, %v5622_v22 }
 0xa36   :  { %v5656_v25 = vsel %vm1039_vm9, %v5636_v31, -inf  ;;  %v5628_v2 = vperm.slane %v14063_v44, %v17858_v41  ;;  %v14076_v48 = vpop.permute.xlu2 %6633  ;;  %v14080_v22 = vpop.permute.xlu0 %6623 }
 0xa37   :  { %17896 = vst [vmem:[#allocation92_spill] sm:$0xff] %v14076_v48 }
 0xa38   :  { %2595 = vmax.xlane.f32.xlu1 %v2594_v61  ;;  %v5639_v61 = vsel %vm1022_vm8, %v5629_v19, %v5628_v2  ;;  %v14078_v26 = vpop.permute.xlu1 %6625 }
 0xa39   :  { %v5665_v49 = vsel %vm1039_vm9, %v5639_v61, -inf }
 0xa3c   :  { %5672 = vmax.xlane.f32.xlu2 %v5671_v18 }
 0xa3e   :  { %v14082_v18 = vpop.permute.xlu2 %6647  ;;  %v14086_v31 = vpop.permute.xlu0 %6629 }
 0xa3f   :  { %17898 = vst [vmem:[#allocation91_spill] sm:$0xff] %v14086_v31 }
 0xa40   :  { %5657 = vmax.xlane.f32.xlu1 %v5656_v25  ;;  %v14084_v34 = vpop.permute.xlu1 %6631 }
 0xa41   :  { %17897 = vst [vmem:[#allocation88_spill] sm:$0xff] %v14084_v34 }
 0xa46   :  { %v14088_v21 = vpop.permute.xlu2 %6653  ;;  %v14092_v19 = vpop.permute.xlu0 %6635 }
 0xa47   :  { %17899 = vst [vmem:[#allocation89_spill] sm:$0xff] %v14088_v21 }
 0xa48   :  { %5666 = vmax.xlane.f32.xlu1 %v5665_v49  ;;  %v14090_v25 = vpop.permute.xlu1 %6645  ;;  %17900 = vst [vmem:[#allocation93_spill] sm:$0xff] %v14092_v19 }
 0xa4e   :  { %v14094_v2 = vpop.permute.xlu2 %6659  ;;  %v14098_v49 = vpop.permute.xlu0 %6649 }
 0xa4f   :  { %17901 = vst [vmem:[#allocation90_spill] sm:$0xff] %v14094_v2 }
 0xa50   :  { %v14096_v61 = vpop.permute.xlu1 %6651 }
 0xa56   :  { %v14100_v62 = vpop.permute.xlu2 %6673  ;;  %v14104_v56 = vpop.permute.xlu0 %6655 }
 0xa57   :  { %17903 = vst [vmem:[#allocation24_spill] sm:$0xff] %v14104_v56 }
 0xa58   :  { %v14102_v63 = vpop.permute.xlu1 %6657 }
 0xa59   :  { %17902 = vst [vmem:[#allocation21_spill] sm:$0xff] %v14102_v63 }
 0xa5e   :  { %v14106_v32 = vpop.permute.xlu2 %6679  ;;  %v14110_v17 = vpop.permute.xlu0 %6669 }
 0xa5f   :  { %17904 = vst [vmem:[#allocation51_spill] sm:$0xff] %v14106_v32 }
 0xa60   :  { %v14108_v41 = vpop.permute.xlu1 %6671 }
 0xa66   :  { %v14114_v40 = vpop.permute.xlu0 %6675 }
 0xa68   :  { %v14112_v38 = vpop.permute.xlu1 %6677 }
 0xa6e   :  { %v14121_v7 = vpop.permute.xlu0 %6681 }
 0xa6f   :  { %17907 = vst [vmem:[#allocation71_spill] sm:$0xff] %v14121_v7 }
 0xa70   :  { %v14117_v19 = vpop.permute.xlu1 %6683 }
 0xa71   :  { %17905 = vst [vmem:[#allocation50_spill] sm:$0xff] %v14117_v19 }
 0xa76   :  { %v2584_v54 = vpop.xlane.xlu0 %2583 }
 0xa77   :  { %v2613_v21 = vperm.slane %v2584_v54, 1 }
 0xa87   :  { %v2581_v4 = vpop.xlane.xlu2 %2580 }
 0xa88   :  { %v2610_v57 = vperm.slane %v2581_v4, 0  ;;  %v2611_v45 = vperm.slane %v2581_v4, 1 }
 0xa8a   :  { %v2642_v2 = vsub.f32 %v13928_v8, %v2610_v57  ;;  %v2612_v8 = vperm.slane %v2584_v54, 0 }
 0xa8c   :  { %v2660_v48 = vmul.f32 1.442695, %v2642_v2  ;;  %v2643_v2 = vsub.f32 %v13924_v9, %v2611_v45  ;;  %v2644_v19 = vsub.f32 %v13846_v24, %v2612_v8  ;;  %v2645_v9 = vsub.f32 %v13841_v43, %v2613_v21 }
 0xa8e   :  { %9720 = vpow2.f32 %v2660_v48  ;;  %v2662_v31 = vmul.f32 1.442695, %v2643_v2 }
 0xa8f   :  { %v2590_v7 = vpop.xlane.xlu2 %2589 }
 0xa94   :  { %v14119_v63 = vpop.eup %9720 }
 0xa95   :  { %17906 = vst [vmem:[#allocation72_spill] sm:$0xff] %v14119_v63  ;;  %2711 = vperm.xlu2 %9435, %v14119_v63  }
 0xa9b   :  { %v2578_v34 = vpop.xlane.xlu1 %2577 }
 0xa9c   :  { %v2608_v16 = vperm.slane %v2578_v34, 0  ;;  %v2609_v56 = vperm.slane %v2578_v34, 1  ;;  %v2617_v34 = vperm.slane %v2590_v7, 1 }
 0xa9e   :  { %v2640_v10 = vsub.f32 %v13964_v58, %v2608_v16  ;;  %v2641_v1 = vsub.f32 %v13958_v42, %v2609_v56  ;;  %v2664_v16 = vmul.f32 1.442695, %v2644_v19  ;;  %v2649_v24 = vsub.f32 %v13940_v53, %v2617_v34 }
 0xaa0   :  { %v2656_v57 = vmul.f32 1.442695, %v2640_v10  ;;  %v2658_v48 = vmul.f32 1.442695, %v2641_v1  ;;  %v2616_v1 = vperm.slane %v2590_v7, 0 }
 0xaa1   :  { %v2674_v45 = vmul.f32 1.442695, %v2649_v24 }
 0xaa2   :  { %9722 = vpow2.f32 %v2656_v57  ;;  %v2648_v53 = vsub.f32 %v13935_v35, %v2616_v1 }
 0xaa3   :  { %9724 = vpow2.f32 %v2658_v48  ;;  %v2587_v63 = vpop.xlane.xlu1 %2586  ;;  %v2599_v48 = vpop.xlane.xlu2 %2598 }
 0xaa4   :  { %v2614_v32 = vperm.slane %v2587_v63, 0  ;;  %v2615_v58 = vperm.slane %v2587_v63, 1  ;;  %9726 = vpow2.f32 %v2662_v31  ;;  %v2593_v63 = vpop.xlane.xlu0 %2592  ;;  %v2672_v34 = vmul.f32 1.442695, %v2648_v53 }
 0xaa5   :  { %v2618_v43 = vperm.slane %v2593_v63, 0  ;;  %v2619_v2 = vperm.slane %v2593_v63, 1 }
 0xaa6   :  { %v2646_v4 = vsub.f32 %v13992_v50, %v2614_v32  ;;  %v2647_v32 = vsub.f32 %v13983_v20, %v2615_v58  ;;  %v2666_v50 = vmul.f32 1.442695, %v2645_v9 }
 0xaa7   :  { %v2650_v20 = vsub.f32 %v13861_v39, %v2618_v43  ;;  %v17912_v39 = vld [vmem:[#allocation102_spill] sm:$0xff]  ;;  %v2622_v43 = vperm.slane %v2599_v48, 0 }
 0xaa8   :  { %v14129_v56 = vpop.eup %9722  ;;  %v2668_v10 = vmul.f32 1.442695, %v2646_v4  ;;  %v2670_v31 = vmul.f32 1.442695, %v2647_v32  ;;  %v2623_v4 = vperm.slane %v2599_v48, 1  ;;  %v2651_v32 = vsub.f32 %v13857_v14, %v2619_v2  ;;  %v17915_v2 = vld [vmem:[#allocation111_spill] sm:$0xff] }
 0xaa9   :  { %v14131_v42 = vpop.eup %9724  ;;  %2705 = vperm.xlu0 %9436, %v14129_v56   ;;  %v2676_v35 = vmul.f32 1.442695, %v2650_v20  ;;  %v17917_v48 = vld [vmem:[#allocation110_spill] sm:$0xff] }
 0xaaa   :  { %9728 = vpow2.f32 %v2668_v10  ;;  %2708 = vperm.xlu1 %9437, %v14131_v42   ;;  %v14138_v8 = vpop.eup %9726  ;;  %v2655_v63 = vsub.f32 %v13953_v47, %v2623_v4 }
 0xaab   :  { %9730 = vpow2.f32 %v2664_v16  ;;  %v2596_v54 = vpop.xlane.xlu1 %2595  ;;  %v14163_v1 = vpop.xlane.xlu2 %5654 }
 0xaac   :  { %v2620_v19 = vperm.slane %v2596_v54, 0  ;;  %9732 = vpow2.f32 %v2666_v50  ;;  %v2621_v10 = vperm.slane %v2596_v54, 1  ;;  %v17913_v50 = vld [vmem:[#allocation105_spill] sm:$0xff]  ;;  %v5652_v14 = vpop.xlane.xlu0 %5651  ;;  %v2686_v53 = vmul.f32 1.442695, %v2655_v63 }
 0xaad   :  { %9734 = vpow2.f32 %v2674_v45  ;;  %v6813_v54 = vrot.slane %v17913_v50, 4  ;;  %v5684_v47 = vperm.slane %v14163_v1, 0  ;;  %v5682_v4 = vperm.slane %v5652_v14, 0  ;;  %v17925_v50 = vld [vmem:[#allocation109_spill] sm:$0xff] }
 0xaae   :  { %v2652_v7 = vsub.f32 %v14021_v27, %v2620_v19  ;;  %9736 = vpow2.f32 %v2670_v31  ;;  %v6693_v27 = vrot.slane %v17912_v39, 4  ;;  %v2653_v45 = vsub.f32 %v14014_v51, %v2621_v10  ;;  %v17918_v10 = vld [vmem:[#allocation121_spill] sm:$0xff]  ;;  %v17920_v39 = vld [vmem:[#allocation120_spill] sm:$0xff] }
 0xaaf   :  { %9738 = vpow2.f32 %v2672_v34  ;;  %v2678_v19 = vmul.f32 1.442695, %v2651_v32  ;;  %v14175_v20 = vsel %vm520_vm2, %v6813_v54, %v17855_v6  ;;  %v6739_v34 = vrot.slane %v17915_v2, 4  ;;  %v17921_v6 = vld [vmem:[#allocation29_spill] sm:$0xff]  ;;  %v17922_v2 = vld [vmem:[#allocation106_spill] sm:$0xff]  ;;  %v17927_v54 = vld [vmem:[#allocation96_spill] sm:$0xff] }
 0xab0   :  { %v14140_v21 = vpop.eup %9728  ;;  %v2680_v16 = vmul.f32 1.442695, %v2652_v7  ;;  %v14168_v31 = vsel %vm520_vm2, %v6693_v27, %v17848_v28  ;;  %v2682_v51 = vmul.f32 1.442695, %v2653_v45  ;;  %v6779_v28 = vrot.slane %v17918_v10, 4 }
 0xab1   :  { %17908 = vst [vmem:[#allocation78_spill] sm:$0xff] %v14140_v21  ;;  %v14142_v57 = vpop.eup %9730  ;;  %2714 = vperm.xlu0 %9436, %v14138_v8   ;;  %2723 = vperm.xlu2 %9435, %v14140_v21   ;;  %v6859_v27 = vrot.slane %v17920_v39, 4  ;;  %v2654_v63 = vsub.f32 %v13948_v59, %v2622_v43  ;;  %v5716_v45 = vsub.f32 %v13978_v3, %v5684_v47  ;;  %v17924_v39 = vld [vmem:[#allocation104_spill] sm:$0xff]  ;;  %v17928_v47 = vld [vmem:[#allocation98_spill] sm:$0xff] }
 0xab2   :  { %2717 = vperm.xlu1 %9437, %v14142_v57   ;;  %v14150_v58 = vpop.eup %9732  ;;  %9740 = vpow2.f32 %v2680_v16  ;;  %v5714_v43 = vsub.f32 %v13873_v55, %v5682_v4  ;;  %v6780_v3 = vsel %vm520_vm2, %v6779_v28, %v17927_v54  ;;  %v17930_v4 = vld [vmem:[#allocation107_spill] sm:$0xff] }
 0xab3   :  { %17909 = vst [vmem:[#allocation77_spill] sm:$0xff] %v14150_v58  ;;  %v14152_v9 = vpop.eup %9734  ;;  %9742 = vpow2.f32 %v2676_v35  ;;  %v6699_v35 = vrot.slane %v17917_v48, 4  ;;  %v6733_v48 = vrot.slane %v17922_v2, 4  ;;  %v5658_v10 = vpop.xlane.xlu1 %5657  ;;  %v6860_v2 = vsel %vm520_vm2, %v6859_v27, %v17928_v47 }
 0xab4   :  { %17910 = vst [vmem:[#allocation84_spill] sm:$0xff] %v14152_v9  ;;  %v14154_v24 = vpop.eup %9736  ;;  %9744 = vpow2.f32 %v2678_v19  ;;  %v17923_v19 = vld [vmem:[#allocation95_spill] sm:$0xff]  ;;  %v5687_v21 = vperm.slane %v5658_v10, 1  ;;  %v5730_v28 = vmul.f32 1.442695, %v5714_v43  ;;  %v5686_v54 = vperm.slane %v5658_v10, 0 }
 0xab5   :  { %17911 = vst [vmem:[#allocation83_spill] sm:$0xff] %v14154_v24  ;;  %v14171_v7 = vpop.eup %9738  ;;  %9746 = vpow2.f32 %v2686_v53  ;;  %v6740_v59 = vsel %vm520_vm2, %v6739_v34, %v17923_v19  ;;  %v5683_v34 = vperm.slane %v5652_v14, 1  ;;  %v2684_v19 = vmul.f32 1.442695, %v2654_v63 }
 0xab6   :  { %17914 = vst [vmem:[#allocation22_spill] sm:$0xff] %v14171_v7  ;;  %9748 = vpow2.f32 %v2682_v51  ;;  %v6744_v55 = vperm.slane %v6740_v59, %v17921_v6  ;;  %v6893_v51 = vrot.slane %v17930_v4, 4  ;;  %v6734_v14 = vsel %vm520_vm2, %v6733_v48, %v17850_v30 }
 0xab7   :  { %v5715_v10 = vsub.f32 %v13877_v11, %v5683_v34  ;;  %9750 = vpow2.f32 %v2684_v19  ;;  %v5718_v11 = vsub.f32 %v14046_v12, %v5686_v54  ;;  %v6738_v48 = vperm.slane %v6734_v14, %v17921_v6  ;;  %v5661_v34 = vpop.xlane.xlu0 %5660 }
 0xab8   :  { %v14178_v16 = vpop.eup %9740  ;;  %v6757_v30 = vrot.slane %v6744_v55, 4  ;;  %v5685_v55 = vperm.slane %v14163_v1, 1  ;;  %v5689_v54 = vperm.slane %v5661_v34, 1 }
 0xab9   :  { %2720 = vperm.xlu0 %9436, %v14150_v58   ;;  %2732 = vperm.xlu2 %9435, %v14152_v9   ;;  %17916 = vst [vmem:[#allocation27_spill] sm:$0xff] %v14178_v16  ;;  %v14182_v32 = vpop.eup %9742  ;;  %v17926_v9 = vld [vmem:[#allocation97_spill] sm:$0xff]  ;;  %v5732_v19 = vmul.f32 1.442695, %v5715_v10  ;;  %v5738_v14 = vmul.f32 1.442695, %v5718_v11 }
 0xaba   :  { %2726 = vperm.xlu1 %9437, %v14154_v24   ;;  %17919 = vst [vmem:[#allocation47_spill] sm:$0xff] %v14182_v32  ;;  %v6700_v53 = vsel %vm520_vm2, %v6699_v35, %v17926_v9  ;;  %v6784_v35 = vperm.slane %v6780_v3, %v17921_v6  ;;  %v17932_v3 = vld [vmem:[#allocation100_spill] sm:$0xff]  ;;  %v6758_v4 = vsel %vm520_vm2, %v6757_v30, %v6738_v48  ;;  %v17983_v10 = vld [vmem:[#allocation94_spill] sm:$0xff] }
 0xabb   :  { %v6704_v9 = vperm.slane %v6700_v53, %v17921_v6  ;;  %v5717_v30 = vsub.f32 %v13972_v13, %v5685_v55  ;;  %v5721_v13 = vsub.f32 %v13897_v52, %v5689_v54  ;;  %v5667_v48 = vpop.xlane.xlu1 %5666  ;;  %v6745_v55 = vrot.slane %v14082_v18, 4 }
 0xabc   :  { %v6791_v52 = vrot.slane %v14100_v62, 4  ;;  %v5692_v18 = vperm.slane %v5667_v48, 0  ;;  %v17943_v62 = vld [vmem:[#allocation103_spill] sm:$0xff] }
 0xac1   :  { %2729 = vperm.xlu0 %9436, %v14171_v7   ;;  %2741 = vperm.xlu2 %9435, %v14178_v16   ;;  %v6773_v16 = vrot.slane %v17924_v39, 4  ;;  %v6853_v7 = vrot.slane %v17925_v50, 4  ;;  %v5734_v39 = vmul.f32 1.442695, %v5716_v45  ;;  %v14209_v50 = vpop.eup %9744  ;;  %v6864_v45 = vperm.slane %v6860_v2, %v17921_v6 }
 0xac2   :  { %2735 = vperm.xlu1 %9437, %v14182_v32   ;;  %v17929_v32 = vld [vmem:[#allocation122_spill] sm:$0xff]  ;;  %v14213_v24 = vpop.eup %9746 }
 0xac3   :  { %v6819_v58 = vrot.slane %v17929_v32, 4  ;;  %v17931_v32 = vld [vmem:[#allocation108_spill] sm:$0xff]  ;;  %v6774_v63 = vsel %vm520_vm2, %v6773_v16, %v17853_v36  ;;  %v14221_v59 = vpop.eup %9748  ;;  %v6854_v53 = vsel %vm520_vm2, %v6853_v7, %v17852_v0  ;;  %v14232_v36 = vsel %vm520_vm2, %v6893_v51, %v17854_v5 }
 0xac4   :  { %v6933_v27 = vrot.slane %v17931_v32, 4  ;;  %9752 = vpow2.f32 %v5734_v39  ;;  %v5719_v16 = vsub.f32 %v14039_v23, %v5687_v21  ;;  %v6717_v0 = vrot.slane %v6704_v9, 4  ;;  %v14252_v39 = vpop.eup %9750 }
 0xac5   :  { %v6820_v43 = vsel %vm520_vm2, %v6819_v58, %v17932_v3  ;;  %v6797_v7 = vrot.slane %v6784_v35, 4  ;;  %9754 = vpow2.f32 %v5730_v28  ;;  %v14236_v58 = vpop.xlane.xlu2 %5663  ;;  %v6877_v5 = vrot.slane %v6864_v45, 4  ;;  %v17936_v3 = vld [vmem:[#allocation30_spill] sm:$0xff] }
 0xac6   :  { %v14242_v47 = vsel %vm520_vm2, %v6933_v27, %v17849_v15  ;;  %v6824_v2 = vperm.slane %v6820_v43, %v17921_v6  ;;  %v6778_v23 = vperm.slane %v6774_v63, %v17921_v6  ;;  %v6858_v21 = vperm.slane %v6854_v53, %v17921_v6 }
 0xac7   :  { %v5690_v51 = vperm.slane %v14236_v58, 0  ;;  %v5740_v15 = vmul.f32 1.442695, %v5719_v16  ;;  %v17933_v9 = vperm.slane %v14168_v31, %v17921_v6  ;;  %v6711_v63 = vrot.slane %v14110_v17, 4  ;;  %v17937_v31 = vld [vmem:[#allocation112_spill] sm:$0xff]  ;;  %v17938_v17 = vld [vmem:[#allocation123_spill] sm:$0xff] }
 0xac8   :  { %v6798_v28 = vsel %vm520_vm2, %v6797_v7, %v6778_v23  ;;  %v6878_v32 = vsel %vm520_vm2, %v6877_v5, %v6858_v21  ;;  %v6837_v27 = vrot.slane %v6824_v2, 4  ;;  %v6751_v45 = vrot.slane %v14108_v41, 4 }
 0xac9   :  { %2738 = vperm.xlu0 %9436, %v14209_v50   ;;  %2750 = vperm.xlu2 %9435, %v14213_v24   ;;  %v6718_v35 = vsel %vm520_vm2, %v6717_v0, %v17933_v9  ;;  %v14267_v43 = vperm.slane %v6758_v4, %v17936_v3  ;;  %9756 = vpow2.f32 %v5732_v19  ;;  %v6979_v0 = vrot.slane %v17938_v17, 4  ;;  %v17945_v17 = vld [vmem:[#allocation126_spill] sm:$0xff] }
 0xaca   :  { %2744 = vperm.xlu1 %9437, %v14221_v59   ;;  %v14259_v1 = vpop.eup %9752  ;;  %v14274_v16 = vperm.slane %v6718_v35, %v17936_v3  ;;  %v5722_v41 = vsub.f32 %v14009_v29, %v5690_v51  ;;  %9758 = vpow2.f32 %v5740_v15  ;;  %v14280_v7 = vperm.slane %v6798_v28, %v17936_v3  ;;  %v17940_v29 = vld [vmem:[#allocation124_spill] sm:$0xff]  ;;  %v17941_v15 = vld [vmem:[#allocation101_spill] sm:$0xff] }
 0xacb   :  { %17934 = vst [vmem:[#allocation46_spill] sm:$0xff] %v14259_v1  ;;  %v14264_v53 = vpop.eup %9754  ;;  %v14283_v11 = vperm.slane %v6878_v32, %v17936_v3  ;;  %9760 = vpow2.f32 %v5738_v14  ;;  %v17939_v5 = vperm.slane %v14175_v20, %v17921_v6  ;;  %v6939_v23 = vrot.slane %v17940_v29, 4  ;;  %v17947_v29 = vld [vmem:[#allocation99_spill] sm:$0xff] }
 0xacc   :  { %17935 = vst [vmem:[#allocation54_spill] sm:$0xff] %v14264_v53  ;;  %v6712_v21 = vsel %vm520_vm2, %v6711_v63, %v13996_v37  ;;  %v6752_v19 = vsel %vm520_vm2, %v6751_v45, %v14080_v22  ;;  %v5688_v4 = vperm.slane %v5661_v34, 0  ;;  %v5736_v51 = vmul.f32 1.442695, %v5717_v30  ;;  %v17942_v37 = vld [vmem:[#allocation127_spill] sm:$0xff] }
 0xacd   :  { %v14290_v2 = vsel %vm520_vm2, %v6837_v27, %v17939_v5  ;;  %v14301_v20 = vsel %vm520_vm2, %v6979_v0, %v17941_v15  ;;  %v6705_v9 = vrot.slane %v14090_v25, 4  ;;  %v5746_v35 = vmul.f32 1.442695, %v5722_v41 }
 0xace   :  { %v5693_v28 = vperm.slane %v5667_v48, 1  ;;  %v6899_v14 = vrot.slane %v17942_v37, 4  ;;  %v6756_v22 = vperm.slane %v6752_v19, %v17921_v6  ;;  %v5744_v32 = vmul.f32 1.442695, %v5721_v13  ;;  %v17948_v19 = vld [vmem:[#allocation125_spill] sm:$0xff] }
 0xacf   :  { %v14304_v54 = vpop.eup %9756  ;;  %v14312_v34 = vsel %vm520_vm2, %v6939_v23, %v17943_v62  ;;  %v6785_v63 = vrot.slane %v14098_v49, 4  ;;  %v6716_v25 = vperm.slane %v6712_v21, %v17921_v6  ;;  %v6831_v45 = vrot.slane %v14114_v40, 4  ;;  %v17946_v49 = vld [vmem:[#allocation128_spill] sm:$0xff]  ;;  %v14335_v23 = vpop.xlane.xlu2 %5672 }
 0xad0   :  { %v14308_v27 = vpop.eup %9758  ;;  %v6746_v0 = vsel %vm520_vm2, %v6745_v55, %v17945_v17  ;;  %v6792_v41 = vsel %vm520_vm2, %v6791_v52, %v14078_v26  ;;  %v5720_v13 = vsub.f32 %v13893_v33, %v5688_v4  ;;  %9762 = vpow2.f32 %v5736_v51  ;;  %v14343_v4 = vpop.xlane.xlu0 %5669 }
 0xad1   :  { %2747 = vperm.xlu0 %9436, %v14252_v39   ;;  %5785 = vperm.xlu2 %9435, %v14259_v1   ;;  %v14317_v30 = vpop.eup %9760  ;;  %v6706_v48 = vsel %vm520_vm2, %v6705_v9, %v17946_v49  ;;  %v6871_v40 = vrot.slane %v14112_v38, 4  ;;  %9764 = vpow2.f32 %v5746_v35  ;;  %v5725_v5 = vsub.f32 %v14058_v46, %v5693_v28  ;;  %v17949_v28 = vld [vmem:[#allocation91_spill] sm:$0xff] }
 0xad2   :  { %5779 = vperm.xlu1 %9437, %v14264_v53   ;;  %17944 = vst [vmem:[#allocation52_spill] sm:$0xff] %v14317_v30  ;;  %v14333_v26 = vsel %vm520_vm2, %v6899_v14, %v17947_v29  ;;  %v6763_v33 = vrot.slane %v6756_v22, 4  ;;  %9766 = vpow2.f32 %v5744_v32  ;;  %v5724_v21 = vsub.f32 %v14063_v44, %v5692_v18  ;;  %v17951_v32 = vld [vmem:[#allocation89_spill] sm:$0xff] }
 0xad3   :  { %v6786_v55 = vsel %vm520_vm2, %v6785_v63, %v17948_v19  ;;  %v6723_v52 = vrot.slane %v6716_v25, 4  ;;  %v6832_v38 = vsel %vm520_vm2, %v6831_v45, %v14070_v60  ;;  %v6796_v46 = vperm.slane %v6792_v41, %v17921_v6  ;;  %v17956_v29 = vld [vmem:[#allocation129_spill] sm:$0xff] }
 0xad4   :  { %v6750_v51 = vperm.slane %v6746_v0, %v17921_v6  ;;  %v6710_v15 = vperm.slane %v6706_v48, %v17921_v6  ;;  %v5742_v9 = vmul.f32 1.442695, %v5720_v13  ;;  %v5691_v35 = vperm.slane %v14236_v58, 1  ;;  %v17953_v0 = vld [vmem:[#allocation51_spill] sm:$0xff]  ;;  %v17957_v19 = vld [vmem:[#allocation117_spill] sm:$0xff] }
 0xad5   :  { %v6825_v44 = vrot.slane %v14096_v61, 4  ;;  %v6872_v37 = vsel %vm520_vm2, %v6871_v40, %v17949_v28  ;;  %v5696_v14 = vperm.slane %v14335_v23, 0  ;;  %v5752_v22 = vmul.f32 1.442695, %v5725_v5  ;;  %v17955_v40 = vld [vmem:[#allocation115_spill] sm:$0xff]  ;;  %v17961_v28 = vld [vmem:[#allocation88_spill] sm:$0xff] }
 0xad6   :  { %v14352_v60 = vpop.eup %9762  ;;  %v6865_v18 = vrot.slane %v17951_v32, 4  ;;  %v6764_v62 = vsel %vm520_vm2, %v6763_v33, %v6750_v51  ;;  %v5695_v63 = vperm.slane %v14343_v4, 1  ;;  %v5750_v25 = vmul.f32 1.442695, %v5724_v21  ;;  %v17963_v32 = vld [vmem:[#allocation71_spill] sm:$0xff] }
 0xad7   :  { %17950 = vst [vmem:[#allocation28_spill] sm:$0xff] %v14352_v60  ;;  %v14357_v45 = vpop.eup %9764  ;;  %v6790_v58 = vperm.slane %v6786_v55, %v17921_v6  ;;  %v6836_v61 = vperm.slane %v6832_v38, %v17921_v6  ;;  %v6803_v17 = vrot.slane %v6796_v46, 4  ;;  %v6911_v41 = vrot.slane %v17953_v0, 4  ;;  %v17959_v46 = vld [vmem:[#allocation114_spill] sm:$0xff] }
 0xad8   :  { %17952 = vst [vmem:[#allocation26_spill] sm:$0xff] %v14357_v45  ;;  %v14362_v13 = vpop.eup %9766  ;;  %v6724_v49 = vsel %vm520_vm2, %v6723_v52, %v6710_v15  ;;  %v6876_v48 = vperm.slane %v6872_v37, %v17921_v6  ;;  %9768 = vpow2.f32 %v5742_v9  ;;  %v5723_v5 = vsub.f32 %v17955_v40, %v5691_v35  ;;  %v17958_v52 = vld [vmem:[#allocation24_spill] sm:$0xff]  ;;  %v17960_v15 = vld [vmem:[#allocation113_spill] sm:$0xff] }
 0xad9   :  { %5782 = vperm.xlu0 %9436, %v14304_v54   ;;  %5794 = vperm.xlu2 %9435, %v14308_v27   ;;  %17954 = vst [vmem:[#allocation75_spill] sm:$0xff] %v14362_v13  ;;  %v6826_v33 = vsel %vm520_vm2, %v6825_v44, %v17956_v29  ;;  %v14372_v21 = vperm.slane %v6764_v62, %v17936_v3  ;;  %9770 = vpow2.f32 %v5752_v22  ;;  %v6905_v38 = vrot.slane %v17958_v52, 4 }
 0xada   :  { %5791 = vperm.xlu1 %9437, %v14317_v30   ;;  %v5728_v55 = vsub.f32 %v17957_v19, %v5696_v14  ;;  %v6866_v51 = vsel %vm520_vm2, %v6865_v18, %v17959_v46  ;;  %v5727_v9 = vsub.f32 %v17960_v15, %v5695_v63  ;;  %9772 = vpow2.f32 %v5750_v25  ;;  %v17962_v14 = vld [vmem:[#allocation50_spill] sm:$0xff] }
 0xadb   :  { %v6804_v35 = vsel %vm520_vm2, %v6803_v17, %v6790_v58  ;;  %v14382_v44 = vperm.slane %v6724_v49, %v17936_v3  ;;  %v6912_v37 = vsel %vm520_vm2, %v6911_v41, %v17961_v28  ;;  %v6991_v22 = vrot.slane %v17962_v14, 4 }
 0xadc   :  { %v6951_v62 = vrot.slane %v17963_v32, 4  ;;  %v6830_v0 = vperm.slane %v6826_v33, %v17921_v6  ;;  %v6883_v40 = vrot.slane %v6876_v48, 4  ;;  %v5748_v29 = vmul.f32 1.442695, %v5723_v5  ;;  %v17966_v48 = vld [vmem:[#allocation130_spill] sm:$0xff]  ;;  %v17967_v33 = vld [vmem:[#allocation21_spill] sm:$0xff] }
 0xadd   :  { %v6843_v18 = vrot.slane %v6836_v61, 4  ;;  %v6769_v63 = vrot.slane %v14372_v21, 4  ;;  %v5694_v25 = vperm.slane %v14343_v4, 0  ;;  %v5758_v58 = vmul.f32 1.442695, %v5728_v55  ;;  %v17968_v55 = vld [vmem:[#allocation93_spill] sm:$0xff] }
 0xade   :  { %v14391_v17 = vpop.eup %9768  ;;  %v6870_v49 = vperm.slane %v6866_v51, %v17921_v6  ;;  %v14395_v41 = vperm.slane %v6804_v35, %v17936_v3  ;;  %v6916_v19 = vperm.slane %v6912_v37, %v17921_v6  ;;  %v5756_v52 = vmul.f32 1.442695, %v5727_v9  ;;  %v17970_v51 = vld [vmem:[#allocation92_spill] sm:$0xff] }
 0xadf   :  { %17964 = vst [vmem:[#allocation73_spill] sm:$0xff] %v14391_v17  ;;  %v14398_v46 = vpop.eup %9770  ;;  %v6906_v61 = vsel %vm520_vm2, %v6905_v38, %v17966_v48  ;;  %v6729_v5 = vrot.slane %v14382_v44, 4  ;;  %v6945_v4 = vrot.slane %v17967_v33, 4  ;;  %v6992_v15 = vsel %vm520_vm2, %v6991_v22, %v17968_v55  ;;  %v17971_v38 = vld [vmem:[#allocation90_spill] sm:$0xff]  ;;  %v17976_v33 = vld [vmem:[#allocation20_spill] sm:$0xff] }
 0xae0   :  { %17965 = vst [vmem:[#allocation23_spill] sm:$0xff] %v14398_v46  ;;  %v14406_v28 = vpop.eup %9772  ;;  %v6952_v35 = vsel %vm520_vm2, %v6951_v62, %v17970_v51  ;;  %v6844_v37 = vsel %vm520_vm2, %v6843_v18, %v6830_v0  ;;  %v6884_v9 = vsel %vm520_vm2, %v6883_v40, %v6870_v49  ;;  %9774 = vpow2.f32 %v5748_v29  ;;  %v17973_v22 = vld [vmem:[#allocation118_spill] sm:$0xff]  ;;  %v17974_v18 = vld [vmem:[#allocation87_spill] sm:$0xff] }
 0xae1   :  { %5788 = vperm.xlu0 %9436, %v14352_v60   ;;  %5803 = vperm.xlu2 %9435, %v14357_v45   ;;  %17969 = vst [vmem:[#allocation25_spill] sm:$0xff] %v14406_v28  ;;  %v6985_v14 = vrot.slane %v17971_v38, 4  ;;  %v14417_v32 = vsel %vm520_vm2, %v6769_v63, %v14267_v43  ;;  %v5726_v48 = vsub.f32 %v17973_v22, %v5694_v25  ;;  %9776 = vpow2.f32 %v5758_v58 }
 0xae2   :  { %5800 = vperm.xlu1 %9437, %v14362_v13   ;;  %17972 = vst [vmem:[#allocation81_spill] sm:$0xff] %v14417_v32  ;;  %v6809_v62 = vrot.slane %v14395_v41, 4  ;;  %v6923_v0 = vrot.slane %v6916_v19, 4  ;;  %v6996_v40 = vperm.slane %v6992_v15, %v17921_v6  ;;  %9778 = vpow2.f32 %v5756_v52  ;;  %v17977_v15 = vld [vmem:[#allocation119_spill] sm:$0xff] }
 0xae3   :  { %v14424_v29 = vperm.slane %v6844_v37, %v17936_v3  ;;  %v6946_v49 = vsel %vm520_vm2, %v6945_v4, %v17974_v18  ;;  %v14429_v63 = vperm.slane %v6884_v9, %v17936_v3  ;;  %v14433_v25 = vsel %vm520_vm2, %v6729_v5, %v14274_v16 }
 0xae4   :  { %17975 = vst [vmem:[#allocation79_spill] sm:$0xff] %v14433_v25  ;;  %v6904_v58 = vperm.slane %v14333_v26, %v17921_v6  ;;  %v6910_v19 = vperm.slane %v6906_v61, %v17921_v6  ;;  %v6956_v52 = vperm.slane %v6952_v35, %v17921_v6  ;;  %v7015_v55 = vmul.f32 %v14417_v32, %v17976_v33 }
 0xae5   :  { %v6984_v4 = vperm.slane %v14301_v20, %v17921_v6  ;;  %v6986_v51 = vsel %vm520_vm2, %v6985_v14, %v17977_v15  ;;  %v5754_v37 = vmul.f32 1.442695, %v5726_v48  ;;  %v5697_v5 = vperm.slane %v14335_v23, 1  ;;  %v17982_v15 = vld [vmem:[#allocation116_spill] sm:$0xff] }
 0xae6   :  { %v14446_v9 = vpop.eup %9774  ;;  %v6924_v26 = vsel %vm520_vm2, %v6923_v0, %v6910_v19  ;;  %v6950_v61 = vperm.slane %v6946_v49, %v17921_v6  ;;  %v7003_v38 = vrot.slane %v6996_v40, 4  ;;  %v7013_v35 = vmul.f32 %v14433_v25, %v17976_v33 }
 0xae7   :  { %17978 = vst [vmem:[#allocation53_spill] sm:$0xff] %v14446_v9  ;;  %v14452_v22 = vpop.eup %9776  ;;  %v6944_v20 = vperm.slane %v14312_v34, %v17921_v6  ;;  %v14458_v14 = vsel %vm520_vm2, %v6809_v62, %v14280_v7  ;;  %v6849_v23 = vrot.slane %v14424_v29, 4  ;;  %v6889_v48 = vrot.slane %v14429_v63, 4 }
 0xae8   :  { %17979 = vst [vmem:[#allocation49_spill] sm:$0xff] %v14452_v22  ;;  %v14462_v0 = vpop.eup %9778  ;;  %v6917_v18 = vrot.slane %v6904_v58, 4  ;;  %v6963_v40 = vrot.slane %v6956_v52, 4  ;;  %v6990_v49 = vperm.slane %v6986_v51, %v17921_v6  ;;  %v7030_v34 = vsel %vm875_vm5, %v7015_v55, 0.0 }
 0xae9   :  { %5797 = vperm.xlu0 %9436, %v14391_v17   ;;  %5812 = vperm.xlu2 %9435, %v14398_v46   ;;  %17980 = vst [vmem:[#allocation86_spill] sm:$0xff] %v14458_v14  ;;  %v14470_v62 = vperm.slane %v14290_v2, %v17936_v3  ;;  %v14473_v19 = vperm.slane %v6924_v26, %v17936_v3  ;;  %9780 = vpow2.f32 %v5754_v37  ;;  %v7029_v55 = vsel %vm875_vm5, %v7013_v35, 0.0 }
 0xaea   :  { %5809 = vperm.xlu1 %9437, %v14406_v28   ;;  %17981 = vst [vmem:[#allocation85_spill] sm:$0xff] %v14462_v0  ;;  %v5729_v12 = vsub.f32 %v17982_v15, %v5697_v5  ;;  %v7017_v58 = vmul.f32 %v14458_v14, %v17976_v33  ;;  %v6964_v52 = vsel %vm520_vm2, %v6963_v40, %v6950_v61  ;;  %v17984_v2 = vrot.slane %v17937_v31, 4 }
 0xaeb   :  { %v7004_v51 = vsel %vm520_vm2, %v7003_v38, %v6990_v49  ;;  %v14488_v37 = vsel %vm520_vm2, %v6849_v23, %v14470_v62  ;;  %v14492_v5 = vsel %vm520_vm2, %v6889_v48, %v14283_v11  ;;  %v7031_v15 = vadd.f32 %v7030_v34, %v7029_v55 }
 0xaec   :  { %v6974_v26 = vsel %vm520_vm2, %v17984_v2, %v17983_v10  ;;  %17985 = vst [vmem:[#allocation76_spill] sm:$0xff] %v14488_v37  ;;  %v6938_v61 = vperm.slane %v14242_v47, %v17921_v6  ;;  %v6997_v38 = vrot.slane %v6984_v4, 4  ;;  %v6957_v40 = vrot.slane %v6944_v20, 4 }
 0xaed   :  { %17986 = vst [vmem:[#allocation74_spill] sm:$0xff] %v14492_v5  ;;  %v17987_v35 = vperm.slane %v14232_v36, %v17921_v6  ;;  %v6929_v10 = vrot.slane %v14473_v19, 4  ;;  %v14502_v23 = vperm.slane %v6964_v52, %v17936_v3  ;;  %v14505_v49 = vperm.slane %v7004_v51, %v17936_v3 }
 0xaee   :  { %v5760_v48 = vmul.f32 1.442695, %v5729_v12  ;;  %v6978_v34 = vperm.slane %v6974_v26, %v17921_v6  ;;  %v7032_v47 = vsel %vm875_vm5, %v7017_v58, 0.0  ;;  %v7019_v4 = vmul.f32 %v14488_v37, %v17976_v33 }
 0xaef   :  { %v6918_v31 = vsel %vm520_vm2, %v6917_v18, %v17987_v35  ;;  %v7021_v36 = vmul.f32 %v14492_v5, %v17976_v33  ;;  %v14513_v20 = vpop.eup %9780  ;;  %v7033_v52 = vadd.f32 %v7032_v47, %v7031_v15  ;;  %v6958_v12 = vsel %vm520_vm2, %v6957_v40, %v6938_v61 }
 0xaf0   :  { %17988 = vst [vmem:[#allocation82_spill] sm:$0xff] %v14513_v20  ;;  %v14516_v18 = vperm.slane %v6918_v31, %v17936_v3  ;;  %v6998_v51 = vsel %vm520_vm2, %v6997_v38, %v6978_v34  ;;  %v6969_v58 = vrot.slane %v14502_v23, 4  ;;  %v7009_v55 = vrot.slane %v14505_v49, 4 }
 0xaf1   :  { %5806 = vperm.xlu0 %9436, %v14446_v9   ;;  %5821 = vperm.xlu2 %9435, %v14452_v22   ;;  %9782 = vpow2.f32 %v5760_v48  ;;  %v7034_v2 = vsel %vm875_vm5, %v7019_v4, 0.0  ;;  %v7036_v26 = vsel %vm875_vm5, %v7021_v36, 0.0  ;;  %v14530_v15 = vperm.slane %v6998_v51, %v17936_v3 }
 0xaf2   :  { %5818 = vperm.xlu1 %9437, %v14462_v0   ;;  %v14523_v6 = vsel %vm520_vm2, %v6929_v10, %v14516_v18  ;;  %v14533_v61 = vperm.slane %v6958_v12, %v17936_v3  ;;  %v7035_v38 = vadd.f32 %v7034_v2, %v7033_v52 }
 0xaf3   :  { %17989 = vst [vmem:[#allocation80_spill] sm:$0xff] %v14523_v6  ;;  %v7023_v40 = vmul.f32 %v14523_v6, %v17976_v33  ;;  %v14543_v31 = vsel %vm520_vm2, %v7009_v55, %v14530_v15 }
 0xaf4   :  { %v14539_v35 = vsel %vm520_vm2, %v6969_v58, %v14533_v61  ;;  %17991 = vst [vmem:[#allocation105_spill] sm:$0xff] %v14543_v31  ;;  %v7037_v10 = vadd.f32 %v7036_v26, %v7035_v38  ;;  %v7027_v47 = vmul.f32 %v14543_v31, %v17976_v33  ;;  %v2712_v58 = vpop.permute.xlu2 %2711 }
 0xaf5   :  { %17990 = vst [vmem:[#allocation102_spill] sm:$0xff] %v14539_v35  ;;  %v7038_v34 = vsel %vm875_vm5, %v7023_v40, 0.0  ;;  %v7025_v3 = vmul.f32 %v14539_v35, %v17976_v33 }
 0xaf6   :  { %v7039_v4 = vadd.f32 %v7038_v34, %v7037_v10  ;;  %v7042_v52 = vsel %vm875_vm5, %v7027_v47, 0.0 }
 0xaf7   :  { %v14545_v48 = vpop.eup %9782  ;;  %v7040_v36 = vsel %vm875_vm5, %v7025_v3, 0.0 }
 0xaf8   :  { %17992 = vst [vmem:[#allocation111_spill] sm:$0xff] %v14545_v48  ;;  %v7041_v51 = vadd.f32 %v7040_v36, %v7039_v4 }
 0xaf9   :  { %5815 = vperm.xlu0 %9436, %v14513_v20  }
 0xafa   :  { %v7043_v12 = vadd.f32 %v7042_v52, %v7041_v51 }
 0xafc   :  { %9784 = vtanh.f32 %v7043_v12 }
 0xb01   :  { %5824 = vperm.xlu0 %9436, %v14545_v48   ;;  %v17993_v48 = vld [vmem:[#allocation48_spill] sm:$0xff] }
 0xb02   :  { %v14555_v55 = vpop.eup %9784 }
 0xb03   :  { %v7061_v26 = vmul.f32 %v14555_v55, %v14433_v25  ;;  %v2754_v25 = vperm.slane %v2712_v58, %v17993_v48 }
 0xb05   :  { %v7077_v38 = vsel %vm875_vm5, %v7061_v26, 0.0 }
 0xb0b   :  { %v2724_v2 = vpop.permute.xlu2 %2723 }
 0xb13   :  { %v2733_v47 = vpop.permute.xlu2 %2732 }
 0xb1a   :  { %7078 = vadd.xlane.f32.xlu2 %v7077_v38 }
 0xb1b   :  { %v2706_v40 = vpop.permute.xlu0 %2705  ;;  %v2742_v38 = vpop.permute.xlu2 %2741 }
 0xb1c   :  { %v2752_v10 = vperm.slane %v2706_v40, %v17993_v48  ;;  %v2709_v34 = vpop.permute.xlu1 %2708 }
 0xb1d   :  { %v2753_v3 = vperm.slane %v2709_v34, %v17993_v48 }
 0xb1f   :  { %v2768_v4 = vsel %vm1022_vm8, %v2753_v3, %v2752_v10 }
 0xb20   :  { %v2784_v36 = vsel %vm1039_vm9, %v2768_v4, 0.0  ;;  %v2758_v4 = vperm.slane %v2724_v2, %v17993_v48 }
 0xb21   :  { %2785 = vadd.xlane.f32.xlu1 %v2784_v36 }
 0xb23   :  { %v2715_v52 = vpop.permute.xlu0 %2714 }
 0xb24   :  { %v2755_v51 = vperm.slane %v2715_v52, %v17993_v48  ;;  %v2718_v12 = vpop.permute.xlu1 %2717 }
 0xb25   :  { %v2756_v34 = vperm.slane %v2718_v12, %v17993_v48  ;;  %v2761_v12 = vperm.slane %v2733_v47, %v17993_v48 }
 0xb26   :  { %v2769_v26 = vsel %vm1022_vm8, %v2755_v51, %v2754_v25 }
 0xb27   :  { %v2787_v40 = vsel %vm1039_vm9, %v2769_v26, 0.0  ;;  %v2751_v26 = vpop.permute.xlu2 %2750 }
 0xb2b   :  { %2788 = vadd.xlane.f32.xlu0 %v2787_v40  ;;  %v2721_v0 = vpop.permute.xlu0 %2720 }
 0xb2c   :  { %v2757_v10 = vperm.slane %v2721_v0, %v17993_v48  ;;  %v2727_v3 = vpop.permute.xlu1 %2726 }
 0xb2d   :  { %v2759_v36 = vperm.slane %v2727_v3, %v17993_v48  ;;  %v6771_v3 = vrot.slane %v14267_v43, 4 }
 0xb2e   :  { %v2770_v52 = vsel %vm1022_vm8, %v2757_v10, %v2756_v34  ;;  %v6731_v10 = vrot.slane %v14274_v16, 4  ;;  %v6811_v16 = vrot.slane %v14280_v7, 4 }
 0xb2f   :  { %v2790_v58 = vsel %vm1039_vm9, %v2770_v52, 0.0  ;;  %v2771_v25 = vsel %vm1022_vm8, %v2759_v36, %v2758_v4  ;;  %v14584_v4 = vsel %vm520_vm2, %v14372_v21, %v6771_v3  ;;  %v2764_v21 = vperm.slane %v2742_v38, %v17993_v48 }
 0xb30   :  { %2791 = vadd.xlane.f32.xlu2 %v2790_v58  ;;  %v2793_v51 = vsel %vm1039_vm9, %v2771_v25, 0.0  ;;  %17994 = vst [vmem:[#allocation110_spill] sm:$0xff] %v14584_v4  ;;  %v14588_v47 = vsel %vm520_vm2, %v14382_v44, %v6731_v10  ;;  %v7016_v52 = vmul.f32 %v14584_v4, %v17976_v33  ;;  %v14592_v58 = vpop.permute.xlu2 %5785  ;;  %v6891_v38 = vrot.slane %v14283_v11, 4 }
 0xb31   :  { %2794 = vadd.xlane.f32.xlu1 %v2793_v51  ;;  %17995 = vst [vmem:[#allocation121_spill] sm:$0xff] %v14588_v47  ;;  %v7014_v44 = vmul.f32 %v14588_v47, %v17976_v33  ;;  %v2767_v11 = vperm.slane %v2751_v26, %v17993_v48 }
 0xb32   :  { %v7045_v3 = vsel %vm875_vm5, %v7016_v52, 0.0  ;;  %v14621_v52 = vsel %vm520_vm2, %v14429_v63, %v6891_v38  ;;  %v6931_v63 = vrot.slane %v14516_v18, 4  ;;  %v7011_v38 = vrot.slane %v14530_v15, 4 }
 0xb33   :  { %v2730_v40 = vpop.permute.xlu0 %2729  ;;  %17998 = vst [vmem:[#allocation106_spill] sm:$0xff] %v14621_v52 }
 0xb34   :  { %v2760_v0 = vperm.slane %v2730_v40, %v17993_v48  ;;  %v2736_v20 = vpop.permute.xlu1 %2735  ;;  %v14635_v26 = vsel %vm520_vm2, %v14473_v19, %v6931_v63 }
 0xb35   :  { %v2762_v43 = vperm.slane %v2736_v20, %v17993_v48  ;;  %17999 = vst [vmem:[#allocation95_spill] sm:$0xff] %v14635_v26  ;;  %v7024_v18 = vmul.f32 %v14635_v26, %v17976_v33 }
 0xb36   :  { %v2772_v2 = vsel %vm1022_vm8, %v2761_v12, %v2760_v0  ;;  %v14604_v0 = vsel %vm520_vm2, %v14395_v41, %v6811_v16  ;;  %v7044_v41 = vsel %vm875_vm5, %v7014_v44, 0.0 }
 0xb37   :  { %v2796_v34 = vsel %vm1039_vm9, %v2772_v2, 0.0  ;;  %17996 = vst [vmem:[#allocation120_spill] sm:$0xff] %v14604_v0  ;;  %v7018_v10 = vmul.f32 %v14604_v0, %v17976_v33 }
 0xb38   :  { %2797 = vadd.xlane.f32.xlu0 %v2796_v34  ;;  %v6851_v34 = vrot.slane %v14470_v62, 4 }
 0xb39   :  { %v7047_v16 = vsel %vm875_vm5, %v7018_v10, 0.0 }
 0xb3b   :  { %v2739_v36 = vpop.permute.xlu0 %2738 }
 0xb3c   :  { %v2763_v25 = vperm.slane %v2739_v36, %v17993_v48  ;;  %v2745_v51 = vpop.permute.xlu1 %2744  ;;  %v14617_v36 = vsel %vm520_vm2, %v14424_v29, %v6851_v34  ;;  %v7022_v29 = vmul.f32 %v14621_v52, %v17976_v33 }
 0xb3d   :  { %v2765_v40 = vperm.slane %v2745_v51, %v17993_v48  ;;  %17997 = vst [vmem:[#allocation29_spill] sm:$0xff] %v14617_v36 }
 0xb3e   :  { %v2773_v12 = vsel %vm1022_vm8, %v2763_v25, %v2762_v43  ;;  %v7046_v25 = vadd.f32 %v7045_v3, %v7044_v41 }
 0xb3f   :  { %v2799_v20 = vsel %vm1039_vm9, %v2773_v12, 0.0  ;;  %v2774_v2 = vsel %vm1022_vm8, %v2765_v40, %v2764_v21  ;;  %v7020_v21 = vmul.f32 %v14617_v36, %v17976_v33  ;;  %v5795_v40 = vpop.permute.xlu2 %5794 }
 0xb40   :  { %2800 = vadd.xlane.f32.xlu2 %v2799_v20  ;;  %v2802_v7 = vsel %vm1039_vm9, %v2774_v2, 0.0  ;;  %v7048_v20 = vadd.f32 %v7047_v16, %v7046_v25  ;;  %v6971_v2 = vrot.slane %v14533_v61, 4  ;;  %v14651_v25 = vsel %vm520_vm2, %v14505_v49, %v7011_v38 }
 0xb41   :  { %2803 = vadd.xlane.f32.xlu1 %v2802_v7  ;;  %v7049_v3 = vsel %vm875_vm5, %v7020_v21, 0.0  ;;  %v7051_v7 = vsel %vm875_vm5, %v7022_v29, 0.0  ;;  %18001 = vst [vmem:[#allocation109_spill] sm:$0xff] %v14651_v25  ;;  %v5831_v15 = vperm.slane %v5795_v40, %v17993_v48  ;;  %v7028_v49 = vmul.f32 %v14651_v25, %v17976_v33 }
 0xb42   :  { %v7050_v10 = vadd.f32 %v7049_v3, %v7048_v20  ;;  %v14645_v41 = vsel %vm520_vm2, %v14502_v23, %v6971_v2  ;;  %v5828_v3 = vperm.slane %v14592_v58, %v17993_v48 }
 0xb43   :  { %v2748_v43 = vpop.permute.xlu0 %2747  ;;  %18000 = vst [vmem:[#allocation104_spill] sm:$0xff] %v14645_v41  ;;  %v7026_v29 = vmul.f32 %v14645_v41, %v17976_v33  ;;  %v7057_v2 = vsel %vm875_vm5, %v7028_v49, 0.0 }
 0xb44   :  { %v2766_v62 = vperm.slane %v2748_v43, %v17993_v48  ;;  %v5780_v51 = vpop.permute.xlu1 %5779 }
 0xb45   :  { %v5826_v19 = vperm.slane %v5780_v51, %v17993_v48  ;;  %v7053_v51 = vsel %vm875_vm5, %v7024_v18, 0.0  ;;  %v7055_v20 = vsel %vm875_vm5, %v7026_v29, 0.0 }
 0xb46   :  { %v2775_v12 = vsel %vm1022_vm8, %v2767_v11, %v2766_v62  ;;  %v7052_v62 = vadd.f32 %v7051_v7, %v7050_v10 }
 0xb47   :  { %v2805_v44 = vsel %vm1039_vm9, %v2775_v12, 0.0  ;;  %v5804_v12 = vpop.permute.xlu2 %5803 }
 0xb48   :  { %2806 = vadd.xlane.f32.xlu0 %v2805_v44  ;;  %v7054_v63 = vadd.f32 %v7053_v51, %v7052_v62 }
 0xb4b   :  { %v5783_v34 = vpop.permute.xlu0 %5782 }
 0xb4c   :  { %v5827_v43 = vperm.slane %v5783_v34, %v17993_v48  ;;  %v5792_v61 = vpop.permute.xlu1 %5791  ;;  %v7056_v34 = vadd.f32 %v7055_v20, %v7054_v63 }
 0xb4d   :  { %v5830_v11 = vperm.slane %v5792_v61, %v17993_v48 }
 0xb4e   :  { %v5842_v16 = vsel %vm1022_vm8, %v5827_v43, %v5826_v19  ;;  %v7058_v18 = vadd.f32 %v7057_v2, %v7056_v34 }
 0xb4f   :  { %v5858_v21 = vsel %vm1039_vm9, %v5842_v16, 0.0  ;;  %v5844_v23 = vsel %vm1022_vm8, %v5831_v15, %v5830_v11  ;;  %v5813_v19 = vpop.permute.xlu2 %5812 }
 0xb50   :  { %5859 = vadd.xlane.f32.xlu1 %v5858_v21  ;;  %v5864_v40 = vsel %vm1039_vm9, %v5844_v23, 0.0  ;;  %9786 = vtanh.f32 %v7058_v18  ;;  %v5837_v58 = vperm.slane %v5813_v19, %v17993_v48 }
 0xb51   :  { %5865 = vadd.xlane.f32.xlu0 %v5864_v40  ;;  %v5834_v40 = vperm.slane %v5804_v12, %v17993_v48 }
 0xb53   :  { %v5789_v44 = vpop.permute.xlu0 %5788 }
 0xb54   :  { %v5829_v7 = vperm.slane %v5789_v44, %v17993_v48  ;;  %v5801_v38 = vpop.permute.xlu1 %5800 }
 0xb55   :  { %v5833_v61 = vperm.slane %v5801_v38, %v17993_v48 }
 0xb56   :  { %v5843_v33 = vsel %vm1022_vm8, %v5829_v7, %v5828_v3  ;;  %v9787_v29 = vpop.eup %9786 }
 0xb57   :  { %v5861_v10 = vsel %vm1039_vm9, %v5843_v33, 0.0  ;;  %v7062_v44 = vmul.f32 %v9787_v29, %v14588_v47  ;;  %v7064_v34 = vmul.f32 %v9787_v29, %v14584_v4 }
 0xb58   :  { %5862 = vadd.xlane.f32.xlu2 %v5861_v10  ;;  %v7066_v10 = vmul.f32 %v9787_v29, %v14604_v0 }
 0xb59   :  { %v7080_v3 = vsel %vm875_vm5, %v7062_v44, 0.0  ;;  %v7086_v19 = vsel %vm875_vm5, %v7064_v34, 0.0  ;;  %v7067_v44 = vmul.f32 %v14555_v55, %v14488_v37  ;;  %v7070_v34 = vmul.f32 %v9787_v29, %v14621_v52 }
 0xb5b   :  { %v5798_v43 = vpop.permute.xlu0 %5797 }
 0xb5c   :  { %v5832_v15 = vperm.slane %v5798_v43, %v17993_v48  ;;  %v5810_v11 = vpop.permute.xlu1 %5809 }
 0xb5d   :  { %v5836_v62 = vperm.slane %v5810_v11, %v17993_v48 }
 0xb5e   :  { %v5845_v16 = vsel %vm1022_vm8, %v5833_v61, %v5832_v15  ;;  %v7092_v61 = vsel %vm875_vm5, %v7066_v10, 0.0  ;;  %v5822_v15 = vpop.permute.xlu2 %5821  ;;  %v7104_v10 = vsel %vm875_vm5, %v7070_v34, 0.0 }
 0xb5f   :  { %v5867_v21 = vsel %vm1039_vm9, %v5845_v16, 0.0  ;;  %v5847_v23 = vsel %vm1022_vm8, %v5837_v58, %v5836_v62  ;;  %v7063_v58 = vmul.f32 %v14555_v55, %v14417_v32  ;;  %v5840_v62 = vperm.slane %v5822_v15, %v17993_v48 }
 0xb60   :  { %5868 = vadd.xlane.f32.xlu1 %v5867_v21  ;;  %v5873_v51 = vsel %vm1039_vm9, %v5847_v23, 0.0  ;;  %v7069_v21 = vmul.f32 %v14555_v55, %v14492_v5 }
 0xb61   :  { %5874 = vadd.xlane.f32.xlu0 %v5873_v51 }
 0xb63   :  { %v5807_v49 = vpop.permute.xlu0 %5806 }
 0xb64   :  { %v5835_v63 = vperm.slane %v5807_v49, %v17993_v48  ;;  %v5819_v7 = vpop.permute.xlu1 %5818  ;;  %v7083_v49 = vsel %vm875_vm5, %v7063_v58, 0.0  ;;  %v7076_v58 = vmul.f32 %v9787_v29, %v14651_v25 }
 0xb65   :  { %v5839_v33 = vperm.slane %v5819_v7, %v17993_v48 }
 0xb66   :  { %v5846_v20 = vsel %vm1022_vm8, %v5835_v63, %v5834_v40  ;;  %v7101_v40 = vsel %vm875_vm5, %v7069_v21, 0.0  ;;  %v7065_v63 = vmul.f32 %v14555_v55, %v14458_v14 }
 0xb67   :  { %v5870_v2 = vsel %vm1039_vm9, %v5846_v20, 0.0  ;;  %v7072_v20 = vmul.f32 %v9787_v29, %v14635_v26 }
 0xb68   :  { %5871 = vadd.xlane.f32.xlu2 %v5870_v2  ;;  %v7089_v2 = vsel %vm875_vm5, %v7065_v63, 0.0 }
 0xb69   :  { %7081 = vadd.xlane.f32.xlu0 %v7080_v3  ;;  %v7095_v3 = vsel %vm875_vm5, %v7067_v44, 0.0  ;;  %v7110_v7 = vsel %vm875_vm5, %v7072_v20, 0.0 }
 0xb6b   :  { %v5816_v38 = vpop.permute.xlu0 %5815 }
 0xb6c   :  { %v5838_v12 = vperm.slane %v5816_v38, %v17993_v48  ;;  %v7068_v38 = vmul.f32 %v9787_v29, %v14617_v36 }
 0xb6e   :  { %v5848_v18 = vsel %vm1022_vm8, %v5839_v33, %v5838_v12  ;;  %v7075_v33 = vmul.f32 %v14555_v55, %v14543_v31  ;;  %v7098_v12 = vsel %vm875_vm5, %v7068_v38, 0.0 }
 0xb6f   :  { %v5876_v43 = vsel %vm1039_vm9, %v5848_v18, 0.0 }
 0xb70   :  { %7087 = vadd.xlane.f32.xlu2 %v7086_v19  ;;  %5877 = vadd.xlane.f32.xlu1 %v5876_v43  ;;  %v7119_v18 = vsel %vm875_vm5, %v7075_v33, 0.0  ;;  %v7071_v19 = vmul.f32 %v14555_v55, %v14523_v6  ;;  %v7073_v43 = vmul.f32 %v14555_v55, %v14539_v35 }
 0xb71   :  { %7093 = vadd.xlane.f32.xlu0 %v7092_v61 }
 0xb72   :  { %v7107_v61 = vsel %vm875_vm5, %v7071_v19, 0.0  ;;  %v7113_v15 = vsel %vm875_vm5, %v7073_v43, 0.0 }
 0xb73   :  { %v5825_v11 = vpop.permute.xlu0 %5824 }
 0xb74   :  { %v5841_v16 = vperm.slane %v5825_v11, %v17993_v48  ;;  %v7074_v11 = vmul.f32 %v9787_v29, %v14645_v41 }
 0xb76   :  { %v5849_v23 = vsel %vm1022_vm8, %v5841_v16, %v5840_v62  ;;  %v7116_v62 = vsel %vm875_vm5, %v7074_v11, 0.0  ;;  %v7122_v16 = vsel %vm875_vm5, %v7076_v58, 0.0 }
 0xb77   :  { %v5879_v51 = vsel %vm1039_vm9, %v5849_v23, 0.0 }
 0xb78   :  { %5880 = vadd.xlane.f32.xlu2 %v5879_v51  ;;  %7084 = vadd.xlane.f32.xlu1 %v7083_v49 }
 0xb79   :  { %7102 = vadd.xlane.f32.xlu0 %v7101_v40 }
 0xb80   :  { %7090 = vadd.xlane.f32.xlu2 %v7089_v2  ;;  %7096 = vadd.xlane.f32.xlu1 %v7095_v3 }
 0xb81   :  { %7111 = vadd.xlane.f32.xlu0 %v7110_v7 }
 0xb88   :  { %7099 = vadd.xlane.f32.xlu2 %v7098_v12  ;;  %7105 = vadd.xlane.f32.xlu1 %v7104_v10 }
 0xb89   :  { %7120 = vadd.xlane.f32.xlu0 %v7119_v18 }
 0xb8d   :  { %v14730_v55 = vpop.xlane.xlu2 %7078 }
 0xb8e   :  { %18002 = vst [vmem:[#allocation97_spill] sm:$0xff] %v14730_v55  ;;  %v7157_v12 = vperm.slane %v14730_v55, %v17993_v48 }
 0xb90   :  { %7108 = vadd.xlane.f32.xlu2 %v7107_v61  ;;  %7114 = vadd.xlane.f32.xlu1 %v7113_v15 }
 0xb94   :  { %v2786_v51 = vpop.xlane.xlu1 %2785 }
 0xb95   :  { %v14778_v25 = vperm.slane %v2786_v51, 1 }
 0xb97   :  { %vm2868_vm4 = vweird.f32 %v14778_v25 }
 0xb98   :  { %7117 = vadd.xlane.f32.xlu2 %v7116_v62  ;;  %7123 = vadd.xlane.f32.xlu1 %v7122_v16  ;;  %v14770_v16 = vperm.slane %v2786_v51, 0 }
 0xb9a   :  { %9788 = vrcp.f32 %v14770_v16  ;;  %vm2853_vm2 = vweird.f32 %v14770_v16 }
 0xb9e   :  { %v2789_v21 = vpop.xlane.xlu0 %2788 }
 0xb9f   :  { %v14787_v35 = vperm.slane %v2789_v21, 1 }
 0xba0   :  { %v14798_v31 = vpop.eup %9788 }
 0xba1   :  { %vm2854_vm14 = vweird.f32 %v14798_v31  ;;  %vm2898_vm10 = vweird.f32 %v14787_v35 }
 0xba2   :  { %vm14927_vm0 = vmor %vm2853_vm2, %vm2854_vm14 }
 0xba3   :  { %v2792_v40 = vpop.xlane.xlu2 %2791 }
 0xba4   :  { %v2795_v63 = vpop.xlane.xlu1 %2794 }
 0xba5   :  { %v14800_v52 = vperm.slane %v2795_v63, 0 }
 0xbab   :  { %v14728_v23 = vpop.xlane.xlu0 %2797 }
 0xbac   :  { %v14839_v32 = vperm.slane %v14728_v23, 0  ;;  %v14850_v13 = vperm.slane %v14728_v23, 1  ;;  %v2874_v23 = vand.u32 2147483648, %v14778_v25 }
 0xbb3   :  { %v14734_v44 = vpop.xlane.xlu2 %2800 }
 0xbb4   :  { %v14736_v20 = vpop.xlane.xlu1 %2803  ;;  %v14894_v53 = vperm.slane %v14734_v44, 0 }
 0xbbb   :  { %v14732_v49 = vpop.xlane.xlu0 %2806 }
 0xbc3   :  { %v14740_v2 = vpop.xlane.xlu1 %5859 }
 0xbc4   :  { %v14738_v29 = vpop.xlane.xlu0 %5865 }
 0xbcb   :  { %v14742_v3 = vpop.xlane.xlu2 %5862 }
 0xbd3   :  { %v14746_v38 = vpop.xlane.xlu1 %5868 }
 0xbd4   :  { %v14744_v7 = vpop.xlane.xlu0 %5874  ;;  %18003 = vst [vmem:[#allocation96_spill] sm:$0xff] %v14746_v38 }
 0xbdb   :  { %v14748_v34 = vpop.xlane.xlu2 %5871 }
 0xbdc   :  { %v14750_v33 = vpop.xlane.xlu0 %7081 }
 0xbdd   :  { %18004 = vst [vmem:[#allocation98_spill] sm:$0xff] %v14750_v33  ;;  %v7158_v10 = vperm.slane %v14750_v33, %v17993_v48 }
 0xbdf   :  { %v7173_v18 = vsel %vm1022_vm8, %v7158_v10, %v7157_v12  ;;  %v14774_v10 = vperm.slane %v2789_v21, 0 }
 0xbe0   :  { %v7189_v19 = vsel %vm1039_vm9, %v7173_v18, -inf }
 0xbe1   :  { %7190 = vmax.xlane.f32.xlu2 %v7189_v19  ;;  %9790 = vrcp.f32 %v14774_v10  ;;  %vm2883_vm3 = vweird.f32 %v14774_v10 }
 0xbe2   :  { %9792 = vrcp.f32 %v14778_v25 }
 0xbe3   :  { %v14758_v43 = vpop.xlane.xlu2 %7087  ;;  %v14760_v61 = vpop.xlane.xlu1 %5877  ;;  %9794 = vrcp.f32 %v14787_v35 }
 0xbe4   :  { %18005 = vst [vmem:[#allocation122_spill] sm:$0xff] %v14758_v43  ;;  %v7160_v58 = vperm.slane %v14758_v43, %v17993_v48  ;;  %v14772_v12 = vpop.xlane.xlu0 %7093 }
 0xbe5   :  { %18006 = vst [vmem:[#allocation107_spill] sm:$0xff] %v14760_v61 }
 0xbe6   :  { %18008 = vst [vmem:[#allocation100_spill] sm:$0xff] %v14772_v12 }
 0xbe7   :  { %v14805_v36 = vpop.eup %9790 }
 0xbe8   :  { %v14809_v5 = vpop.eup %9792  ;;  %vm2884_vm15 = vweird.f32 %v14805_v36 }
 0xbe9   :  { %v14833_v4 = vmul.f32 %v14809_v5, %v14778_v25  ;;  %v14835_v14 = vpop.eup %9794  ;;  %vm2869_vm1 = vweird.f32 %v14809_v5  ;;  %vm14938_vm6 = vmor %vm2883_vm3, %vm2884_vm15 }
 0xbea   :  { %vm2899_vm14 = vweird.f32 %v14835_v14 }
 0xbeb   :  { %v14762_v15 = vpop.xlane.xlu2 %5880  ;;  %v14764_v11 = vpop.xlane.xlu1 %7084 }
 0xbec   :  { %18007 = vst [vmem:[#allocation108_spill] sm:$0xff] %v14764_v11  ;;  %v7159_v62 = vperm.slane %v14764_v11, %v17993_v48  ;;  %v14802_v6 = vpop.xlane.xlu0 %7102 }
 0xbed   :  { %18011 = vst [vmem:[#allocation123_spill] sm:$0xff] %v14802_v6 }
 0xbee   :  { %v7174_v18 = vsel %vm1022_vm8, %v7160_v58, %v7159_v62  ;;  %v7162_v58 = vperm.slane %v14772_v12, %v17993_v48  ;;  %v14793_v62 = vperm.slane %v2792_v40, 0 }
 0xbef   :  { %v7192_v19 = vsel %vm1039_vm9, %v7174_v18, -inf  ;;  %v14795_v18 = vperm.slane %v2792_v40, 1  ;;  %v14812_v40 = vperm.slane %v2795_v63, 1 }
 0xbf0   :  { %7193 = vmax.xlane.f32.xlu0 %v7192_v19  ;;  %9796 = vrcp.f32 %v14793_v62  ;;  %vm2913_vm13 = vweird.f32 %v14793_v62 }
 0xbf1   :  { %9798 = vrcp.f32 %v14795_v18 }
 0xbf2   :  { %9800 = vrcp.f32 %v14800_v52 }
 0xbf3   :  { %v14782_v41 = vpop.xlane.xlu2 %7090  ;;  %v14784_v26 = vpop.xlane.xlu1 %7096  ;;  %9802 = vrcp.f32 %v14812_v40 }
 0xbf4   :  { %18009 = vst [vmem:[#allocation30_spill] sm:$0xff] %v14782_v41  ;;  %v7161_v51 = vperm.slane %v14782_v41, %v17993_v48  ;;  %v7163_v47 = vperm.slane %v14784_v26, %v17993_v48  ;;  %9804 = vrcp.f32 %v14839_v32 }
 0xbf5   :  { %18010 = vst [vmem:[#allocation112_spill] sm:$0xff] %v14784_v26  ;;  %9806 = vrcp.f32 %v14850_v13 }
 0xbf6   :  { %v7175_v19 = vsel %vm1022_vm8, %v7162_v58, %v7161_v51  ;;  %v2849_v58 = vmul.f32 %v14798_v31, %v14770_v16  ;;  %v2879_v51 = vmul.f32 %v14805_v36, %v14774_v10  ;;  %v14843_v41 = vpop.eup %9796  ;;  %9808 = vrcp.f32 %v14894_v53 }
 0xbf7   :  { %v7195_v21 = vsel %vm1039_vm9, %v7175_v19, -inf  ;;  %v14847_v28 = vpop.eup %9798  ;;  %vm2914_vm2 = vweird.f32 %v14843_v41 }
 0xbf8   :  { %7196 = vmax.xlane.f32.xlu1 %v7195_v21  ;;  %v7165_v21 = vperm.slane %v14802_v6, %v17993_v48  ;;  %v2880_v9 = vsub.f32 1.0, %v2879_v51  ;;  %v14852_v17 = vpop.eup %9800  ;;  %vm15003_vm3 = vmor %vm2913_vm13, %vm2914_vm2 }
 0xbfa   :  { %v2881_v1 = vmul.f32 %v14805_v36, %v2880_v9 }
 0xbfb   :  { %v14819_v19 = vpop.xlane.xlu2 %7099  ;;  %v14821_v0 = vpop.xlane.xlu1 %7105 }
 0xbfc   :  { %18012 = vst [vmem:[#allocation124_spill] sm:$0xff] %v14819_v19  ;;  %v7164_v63 = vperm.slane %v14819_v19, %v17993_v48  ;;  %v7166_v37 = vperm.slane %v14821_v0, %v17993_v48  ;;  %v2850_v19 = vsub.f32 1.0, %v2849_v58  ;;  %v2859_v58 = vand.u32 2147483648, %v14770_v16 }
 0xbfd   :  { %18013 = vst [vmem:[#allocation101_spill] sm:$0xff] %v14821_v0  ;;  %v14882_v0 = vmul.f32 %v14847_v28, %v14795_v18 }
 0xbfe   :  { %v7176_v6 = vsel %vm1022_vm8, %v7164_v63, %v7163_v47  ;;  %v7177_v12 = vsel %vm1022_vm8, %v7166_v37, %v7165_v21  ;;  %v14854_v47 = vpop.xlane.xlu0 %7111  ;;  %v2857_v37 = vand.u32 2147483647, %v14770_v16  ;;  %v2851_v51 = vmul.f32 %v14798_v31, %v2850_v19 }
 0xbff   :  { %v7198_v33 = vsel %vm1039_vm9, %v7176_v6, -inf  ;;  %v7201_v11 = vsel %vm1039_vm9, %v7177_v12, -inf  ;;  %18014 = vst [vmem:[#allocation127_spill] sm:$0xff] %v14854_v47  ;;  %v2865_v6 = vsub.f32 1.0, %v14833_v4  ;;  %v14861_v12 = vmul.f32 %v14835_v14, %v14787_v35  ;;  %v14872_v4 = vpop.eup %9802 }
 0xc00   :  { %7199 = vmax.xlane.f32.xlu2 %v7198_v33  ;;  %7202 = vmax.xlane.f32.xlu0 %v7201_v11  ;;  %v2909_v33 = vmul.f32 %v14843_v41, %v14793_v62  ;;  %v2872_v21 = vand.u32 2147483647, %v14778_v25  ;;  %v7168_v63 = vperm.slane %v14854_v47, %v17993_v48  ;;  %v14886_v19 = vmul.f32 %v14852_v17, %v14800_v52  ;;  %v14904_v22 = vpop.eup %9804 }
 0xc01   :  { %vm14888_vm12 = vcmp.eq.f32.partialorder %v2857_v37, 8.507059e+37  ;;  %v2860_v26 = vor.u32 1.1754944e-38, %v2859_v58  ;;  %v2895_v47 = vsub.f32 1.0, %v14861_v12  ;;  %v2954_v61 = vmul.f32 %v14872_v4, %v14812_v40  ;;  %v14916_v55 = vpop.eup %9806 }
 0xc02   :  { %v2852_v37 = vadd.f32 %v14798_v31, %v2851_v51  ;;  %v2910_v58 = vsub.f32 1.0, %v2909_v33  ;;  %v2882_v12 = vadd.f32 %v14805_v36, %v2881_v1  ;;  %v2889_v51 = vand.u32 2147483648, %v14774_v10 }
 0xc03   :  { %v14867_v11 = vpop.xlane.xlu2 %7108  ;;  %v14920_v1 = vperm.slane %v14736_v20, 0  ;;  %v2955_v33 = vsub.f32 1.0, %v2954_v61  ;;  %v14948_v61 = vperm.slane %v14736_v20, 1  ;;  %v14956_v45 = vmul.f32 %v14916_v55, %v14850_v13 }
 0xc04   :  { %18015 = vst [vmem:[#allocation103_spill] sm:$0xff] %v14867_v11  ;;  %v7167_v30 = vperm.slane %v14867_v11, %v17993_v48  ;;  %v14897_v11 = vor.u32 1.1754944e-38, %v2874_v23  ;;  %v14934_v23 = vmul.f32 %v14904_v22, %v14839_v32  ;;  %v2856_v16 = vsel %vm14927_vm0, %v14798_v31, %v2852_v37 }
 0xc05   :  { %v2886_v38 = vsel %vm14938_vm6, %v14805_v36, %v2882_v12  ;;  %v2911_v46 = vmul.f32 %v14843_v41, %v2910_v58  ;;  %v2890_v31 = vor.u32 1.1754944e-38, %v2889_v51  ;;  %v2866_v37 = vmul.f32 %v14809_v5, %v2865_v6  ;;  %v14974_v51 = vpop.eup %9808  ;;  %vm15022_vm6 = vmor %vm2868_vm4, %vm2869_vm1 }
 0xc06   :  { %v7178_v9 = vsel %vm1022_vm8, %v7168_v63, %v7167_v30  ;;  %v2887_v30 = vand.u32 2147483647, %v14774_v10  ;;  %v2902_v10 = vand.u32 2147483647, %v14787_v35  ;;  %v2861_v20 = vsel %vm14888_vm12, %v2860_v26, %v2856_v16  ;;  %vm15054_vm4 = vmor %vm2898_vm10, %vm2899_vm14 }
 0xc07   :  { %v7204_v43 = vsel %vm1039_vm9, %v7178_v9, -inf  ;;  %v14912_v9 = vperm.slane %v14734_v44, 1  ;;  %v2917_v63 = vand.u32 2147483647, %v14793_v62  ;;  %vm14970_vm11 = vcmp.eq.f32.partialorder %v2872_v21, 8.507059e+37 }
 0xc08   :  { %7205 = vmax.xlane.f32.xlu1 %v7204_v43  ;;  %v2904_v43 = vand.u32 2147483648, %v14787_v35  ;;  %vm2888_vm7 = vcmp.eq.f32.partialorder %v2887_v30, 8.507059e+37  ;;  %v2919_v30 = vand.u32 2147483648, %v14793_v62  ;;  %v2912_v60 = vadd.f32 %v14843_v41, %v2911_v46  ;;  %v18043_v35 = vld [vmem:[#allocation83_spill] sm:$0xff] }
 0xc09   :  { %9810 = vrcp.f32 %v14912_v9  ;;  %v2891_v12 = vsel %vm2888_vm7, %v2890_v31, %v2886_v38  ;;  %v2896_v26 = vmul.f32 %v14835_v14, %v2895_v47  ;;  %v2985_v38 = vsub.f32 1.0, %v14956_v45  ;;  %v18024_v31 = vld [vmem:[#allocation72_spill] sm:$0xff] }
 0xc0a   :  { %9812 = vrcp.f32 %v14920_v1  ;;  %v14965_v36 = vor.u32 1.1754944e-38, %v2904_v43  ;;  %v2862_v44 = vmul.f32 %v14129_v56, %v2861_v20  ;;  %v2867_v43 = vadd.f32 %v14809_v5, %v2866_v37 }
 0xc0b   :  { %9814 = vrcp.f32 %v14948_v61  ;;  %v2956_v21 = vmul.f32 %v14872_v4, %v2955_v33  ;;  %v14985_v16 = vperm.slane %v14732_v49, 0  ;;  %v2892_v58 = vmul.f32 %v18024_v31, %v2891_v12 }
 0xc0c   :  { %vm14988_vm12 = vcmp.eq.f32.partialorder %v2917_v63, 8.507059e+37  ;;  %vm14993_vm15 = vcmp.eq.f32.partialorder %v2902_v10, 8.507059e+37  ;;  %v2999_v47 = vmul.f32 %v14974_v51, %v14894_v53  ;;  %v2920_v37 = vor.u32 1.1754944e-38, %v2919_v30 }
 0xc0d   :  { %vm2958_vm0 = vweird.f32 %v14812_v40  ;;  %v2962_v20 = vand.u32 2147483647, %v14812_v40  ;;  %v15012_v63 = vperm.slane %v14732_v49, 1  ;;  %v2916_v12 = vsel %vm15003_vm3, %v14843_v41, %v2912_v60 }
 0xc0e   :  { %v2897_v62 = vadd.f32 %v14835_v14, %v2896_v26  ;;  %v2964_v31 = vand.u32 2147483648, %v14812_v40  ;;  %v2871_v49 = vsel %vm15022_vm6, %v14809_v5, %v2867_v43  ;;  %vm2959_vm7 = vweird.f32 %v14872_v4 }
 0xc0f   :  { %v14997_v56 = vpop.eup %9810  ;;  %v18033_v41 = vsub.f32 1.0, %v14886_v19  ;;  %9816 = vrcp.f32 %v14985_v16  ;;  %vm2943_vm1 = vweird.f32 %v14800_v52  ;;  %v2947_v5 = vand.u32 2147483647, %v14800_v52  ;;  %vm15073_vm10 = vmor %vm2958_vm0, %vm2959_vm7 }
 0xc10   :  { %v15009_v10 = vpop.eup %9812  ;;  %v15039_v25 = vmul.f32 %v14997_v56, %v14912_v9  ;;  %v3000_v43 = vsub.f32 1.0, %v2999_v47  ;;  %v2921_v19 = vsel %vm14988_vm12, %v2920_v37, %v2916_v12  ;;  %vm15058_vm13 = vcmp.eq.f32.partialorder %v2962_v20, 8.507059e+37 }
 0xc11   :  { %v2941_v60 = vmul.f32 %v14852_v17, %v18033_v41  ;;  %v15035_v26 = vpop.eup %9814  ;;  %9818 = vrcp.f32 %v15012_v63  ;;  %v2901_v48 = vsel %vm15054_vm4, %v14835_v14, %v2897_v62  ;;  %v2876_v47 = vsel %vm14970_vm11, %v14897_v11, %v2871_v49 }
 0xc12   :  { %v18040_v37 = vsub.f32 1.0, %v14882_v0  ;;  %v3044_v20 = vmul.f32 %v15035_v26, %v14948_v61  ;;  %vm2944_vm11 = vweird.f32 %v14852_v17  ;;  %v3015_v40 = vsub.f32 1.0, %v15039_v25 }
 0xc13   :  { %v2942_v11 = vadd.f32 %v14852_v17, %v2941_v60  ;;  %v2922_v6 = vmul.f32 %v14142_v57, %v2921_v19  ;;  %v2965_v12 = vor.u32 1.1754944e-38, %v2964_v31  ;;  %v2949_v0 = vand.u32 2147483648, %v14800_v52  ;;  %vm15102_vm2 = vmor %vm2943_vm1, %vm2944_vm11 }
 0xc14   :  { %3100 = vperm.xlu0 %9436, %v2892_v58   ;;  %v2957_v58 = vadd.f32 %v14872_v4, %v2956_v21  ;;  %v15046_v21 = vmul.f32 %v15009_v10, %v14920_v1  ;;  %v2906_v49 = vsel %vm14993_vm15, %v14965_v36, %v2901_v48  ;;  %v2877_v41 = vmul.f32 %v14131_v42, %v2876_v47 }
 0xc15   :  { %vm2929_vm12 = vweird.f32 %v14847_v28  ;;  %v3001_v42 = vmul.f32 %v14974_v51, %v3000_v43  ;;  %v3045_v36 = vsub.f32 1.0, %v3044_v20  ;;  %v15110_v46 = vperm.slane %v14740_v2, 1 }
 0xc16   :  { %v2961_v14 = vsel %vm15073_vm10, %v14872_v4, %v2957_v58  ;;  %v3030_v62 = vsub.f32 1.0, %v15046_v21  ;;  %v2934_v4 = vand.u32 2147483648, %v14795_v18  ;;  %v15096_v58 = vpop.eup %9816  ;;  %v2946_v19 = vsel %vm15102_vm2, %v14852_v17, %v2942_v11 }
 0xc17   :  { %v2966_v60 = vsel %vm15058_vm13, %v2965_v12, %v2961_v14  ;;  %v2986_v52 = vmul.f32 %v14916_v55, %v2985_v38  ;;  %v15118_v33 = vpop.eup %9818  ;;  %v2907_v30 = vmul.f32 %v14138_v8, %v2906_v49  ;;  %v2950_v48 = vor.u32 1.1754944e-38, %v2949_v0  ;;  %v18049_v49 = vld [vmem:[#allocation78_spill] sm:$0xff] }
 0xc18   :  { %3090 = vperm.xlu2 %9435, %v2862_v44   ;;  %v2926_v44 = vmul.f32 %v14847_v28, %v18040_v37  ;;  %vm2928_vm14 = vweird.f32 %v14795_v18  ;;  %v2932_v43 = vand.u32 2147483647, %v14795_v18  ;;  %v15125_v47 = vmul.f32 %v15096_v58, %v14985_v16  ;;  %v18059_v0 = vld [vmem:[#allocation22_spill] sm:$0xff] }
 0xc19   :  { %v2967_v37 = vmul.f32 %v18043_v35, %v2966_v60  ;;  %vm2948_vm15 = vcmp.eq.f32.partialorder %v2947_v5, 8.507059e+37  ;;  %vm15128_vm3 = vmor %vm2928_vm14, %vm2929_vm12  ;;  %v2935_v17 = vor.u32 1.1754944e-38, %v2934_v4  ;;  %v3002_v18 = vadd.f32 %v14974_v51, %v3001_v42  ;;  %v18052_v42 = vld [vmem:[#allocation77_spill] sm:$0xff] }
 0xc1a   :  { %v2927_v31 = vadd.f32 %v14847_v28, %v2926_v44  ;;  %v2951_v38 = vsel %vm2948_vm15, %v2950_v48, %v2946_v19  ;;  %vm3004_vm0 = vweird.f32 %v14974_v51  ;;  %v3009_v44 = vand.u32 2147483648, %v14894_v53 }
 0xc1b   :  { %v2987_v5 = vadd.f32 %v14916_v55, %v2986_v52  ;;  %vm2989_vm6 = vweird.f32 %v14916_v55  ;;  %v18046_v20 = vsub.f32 1.0, %v14934_v23  ;;  %vm2933_vm7 = vcmp.eq.f32.partialorder %v2932_v43, 8.507059e+37 }
 0xc1c   :  { %3110 = vperm.xlu0 %9436, %v2922_v6   ;;  %v2931_v8 = vsel %vm15128_vm3, %v14847_v28, %v2927_v31  ;;  %vm3003_vm1 = vweird.f32 %v14894_v53  ;;  %v3007_v28 = vand.u32 2147483647, %v14894_v53  ;;  %v2994_v11 = vand.u32 2147483648, %v14850_v13 }
 0xc1d   :  { %v2971_v14 = vmul.f32 %v14904_v22, %v18046_v20  ;;  %v15148_v6 = vmul.f32 %v15118_v33, %v15012_v63  ;;  %v2936_v12 = vsel %vm2933_vm7, %v2935_v17, %v2931_v8  ;;  %vm15150_vm4 = vmor %vm3003_vm1, %vm3004_vm0  ;;  %vm2988_vm13 = vweird.f32 %v14850_v13  ;;  %v18055_v8 = vld [vmem:[#allocation47_spill] sm:$0xff] }
 0xc1e   :  { %v2992_v23 = vand.u32 2147483647, %v14850_v13  ;;  %9820 = vrcp.f32 %v15110_v46  ;;  %v2952_v53 = vmul.f32 %v18049_v49, %v2951_v38  ;;  %vm15163_vm10 = vmor %vm2988_vm13, %vm2989_vm6  ;;  %v3046_v60 = vmul.f32 %v15035_v26, %v3045_v36 }
 0xc1f   :  { %v3010_v57 = vor.u32 1.1754944e-38, %v3009_v44  ;;  %v2991_v13 = vsel %vm15163_vm10, %v14916_v55, %v2987_v5  ;;  %v2972_v31 = vadd.f32 %v14904_v22, %v2971_v14  ;;  %vm2974_vm11 = vweird.f32 %v14904_v22 }
 0xc20   :  { %3105 = vperm.xlu2 %9435, %v2907_v30   ;;  %v2937_v19 = vmul.f32 %v18052_v42, %v2936_v12  ;;  %vm3008_vm2 = vcmp.eq.f32.partialorder %v3007_v28, 8.507059e+37  ;;  %v2979_v52 = vand.u32 2147483648, %v14839_v32  ;;  %vm2993_vm12 = vcmp.eq.f32.partialorder %v2992_v23, 8.507059e+37 }
 0xc21   :  { %3095 = vperm.xlu1 %9437, %v2877_v41   ;;  %v3006_v41 = vsel %vm15150_vm4, %v14974_v51, %v3002_v18  ;;  %v2995_v51 = vor.u32 1.1754944e-38, %v2994_v11  ;;  %vm2973_vm14 = vweird.f32 %v14839_v32  ;;  %v2977_v36 = vand.u32 2147483647, %v14839_v32 }
 0xc22   :  { %v3011_v30 = vsel %vm3008_vm2, %v3010_v57, %v3006_v41  ;;  %vm15177_vm15 = vmor %vm2973_vm14, %vm2974_vm11  ;;  %v3047_v43 = vadd.f32 %v15035_v26, %v3046_v60  ;;  %vm3049_vm3 = vweird.f32 %v15035_v26  ;;  %v3031_v35 = vmul.f32 %v15009_v10, %v3030_v62 }
 0xc23   :  { %v2996_v48 = vsel %vm2993_vm12, %v2995_v51, %v2991_v13  ;;  %v2976_v32 = vsel %vm15177_vm15, %v14904_v22, %v2972_v31  ;;  %v3054_v45 = vand.u32 2147483648, %v14948_v61  ;;  %v3016_v17 = vmul.f32 %v14997_v56, %v3015_v40  ;;  %v18056_v22 = vld [vmem:[#allocation84_spill] sm:$0xff] }
 0xc24   :  { %3125 = vperm.xlu0 %9436, %v2967_v37   ;;  %v15187_v37 = vperm.slane %v14738_v29, 1  ;;  %v15196_v38 = vpop.eup %9820  ;;  %v3012_v21 = vmul.f32 %v18055_v8, %v3011_v30  ;;  %v2980_v18 = vor.u32 1.1754944e-38, %v2979_v52  ;;  %vm3048_vm0 = vweird.f32 %v14948_v61 }
 0xc25   :  { %v3052_v62 = vand.u32 2147483647, %v14948_v61  ;;  %v3060_v44 = vsub.f32 1.0, %v15125_v47  ;;  %v3075_v5 = vsub.f32 1.0, %v15148_v6  ;;  %v2997_v20 = vmul.f32 %v18056_v22, %v2996_v48  ;;  %vm15206_vm7 = vmor %vm3048_vm0, %vm3049_vm3 }
 0xc26   :  { %vm2978_vm6 = vcmp.eq.f32.partialorder %v2977_v36, 8.507059e+37  ;;  %v3051_v14 = vsel %vm15206_vm7, %v15035_v26, %v3047_v43  ;;  %v3032_v61 = vadd.f32 %v15009_v10, %v3031_v35  ;;  %vm3034_vm1 = vweird.f32 %v15009_v10  ;;  %v18062_v36 = vld [vmem:[#allocation27_spill] sm:$0xff] }
 0xc27   :  { %v2981_v40 = vsel %vm2978_vm6, %v2980_v18, %v2976_v32  ;;  %v3055_v47 = vor.u32 1.1754944e-38, %v3054_v45  ;;  %v3039_v28 = vand.u32 2147483648, %v14920_v1  ;;  %v3017_v11 = vadd.f32 %v14997_v56, %v3016_v17 }
 0xc28   :  { %3120 = vperm.xlu2 %9435, %v2952_v53   ;;  %vm3019_vm4 = vweird.f32 %v14997_v56  ;;  %vm3053_vm13 = vcmp.eq.f32.partialorder %v3052_v62, 8.507059e+37  ;;  %vm3033_vm10 = vweird.f32 %v14920_v1  ;;  %v3037_v6 = vand.u32 2147483647, %v14920_v1 }
 0xc29   :  { %3115 = vperm.xlu1 %9437, %v2937_v19   ;;  %v3024_v12 = vand.u32 2147483648, %v14912_v9  ;;  %v2982_v26 = vmul.f32 %v18059_v0, %v2981_v40  ;;  %v3056_v23 = vsel %vm3053_vm13, %v3055_v47, %v3051_v14  ;;  %vm15222_vm11 = vmor %vm3033_vm10, %vm3034_vm1  ;;  %vm3018_vm2 = vweird.f32 %v14912_v9 }
 0xc2a   :  { %v3022_v53 = vand.u32 2147483647, %v14912_v9  ;;  %9822 = vrcp.f32 %v15187_v37  ;;  %v3036_v1 = vsel %vm15222_vm11, %v15009_v10, %v3032_v61  ;;  %vm3020_vm12 = vmor %vm3018_vm2, %vm3019_vm4  ;;  %v3076_v41 = vmul.f32 %v15118_v33, %v3075_v5 }
 0xc2b   :  { %v5938_v4 = vmul.f32 %v15196_v38, %v15110_v46  ;;  %v3040_v60 = vor.u32 1.1754944e-38, %v3039_v28  ;;  %v3021_v57 = vsel %vm3020_vm12, %v14997_v56, %v3017_v11  ;;  %v3061_v13 = vmul.f32 %v15096_v58, %v3060_v44 }
 0xc2c   :  { %3140 = vperm.xlu0 %9436, %v3012_v21   ;;  %v3057_v9 = vmul.f32 %v14221_v59, %v3056_v23  ;;  %vm3038_vm14 = vcmp.eq.f32.partialorder %v3037_v6, 8.507059e+37  ;;  %v3025_v31 = vor.u32 1.1754944e-38, %v3024_v12  ;;  %vm3023_vm15 = vcmp.eq.f32.partialorder %v3022_v53, 8.507059e+37 }
 0xc2d   :  { %v3041_v42 = vsel %vm3038_vm14, %v3040_v60, %v3036_v1  ;;  %v15239_v10 = vperm.slane %v14748_v34, 0  ;;  %v3077_v51 = vadd.f32 %v15118_v33, %v3076_v41  ;;  %vm3079_vm3 = vweird.f32 %v15118_v33 }
 0xc2e   :  { %v3026_v19 = vsel %vm3023_vm15, %v3025_v31, %v3021_v57  ;;  %v5939_v52 = vsub.f32 1.0, %v5938_v4  ;;  %v3084_v56 = vand.u32 2147483648, %v15012_v63  ;;  %v3062_v30 = vadd.f32 %v15096_v58, %v3061_v13 }
 0xc2f   :  { %vm3064_vm0 = vweird.f32 %v15096_v58  ;;  %v3042_v48 = vmul.f32 %v18062_v36, %v3041_v42  ;;  %vm3078_vm6 = vweird.f32 %v15012_v63  ;;  %v3082_v55 = vand.u32 2147483647, %v15012_v63 }
 0xc30   :  { %3135 = vperm.xlu2 %9435, %v2997_v20   ;;  %v15246_v59 = vpop.eup %9822  ;;  %v3069_v43 = vand.u32 2147483648, %v14985_v16  ;;  %v3027_v35 = vmul.f32 %v14209_v50, %v3026_v19  ;;  %vm3080_vm7 = vmor %vm3078_vm6, %vm3079_vm3  ;;  %vm3063_vm1 = vweird.f32 %v14985_v16  ;;  %v3067_v32 = vand.u32 2147483647, %v14985_v16  ;;  %v15301_v19 = vpop.xlane.xlu2 %7117 }
 0xc31   :  { %3130 = vperm.xlu1 %9437, %v2982_v26   ;;  %9824 = vrcp.f32 %v15239_v10  ;;  %v3081_v45 = vsel %vm3080_vm7, %v15118_v33, %v3077_v51  ;;  %vm3065_vm4 = vmor %vm3063_vm1, %vm3064_vm0  ;;  %v5998_v17 = vmul.f32 %v15246_v59, %v15187_v37  ;;  %v3085_v63 = vor.u32 1.1754944e-38, %v3084_v56  ;;  %v15286_v26 = vpop.xlane.xlu1 %7114  ;;  %18063 = vst [vmem:[#allocation126_spill] sm:$0xff] %v15301_v19  ;;  %v15308_v56 = vpop.xlane.xlu0 %7120 }
 0xc32   :  { %v3066_v8 = vsel %vm3065_vm4, %v15096_v58, %v3062_v30  ;;  %v5940_v50 = vmul.f32 %v15196_v38, %v5939_v52  ;;  %vm3083_vm13 = vcmp.eq.f32.partialorder %v3082_v55, 8.507059e+37  ;;  %v3070_v21 = vor.u32 1.1754944e-38, %v3069_v43  ;;  %v18066_v43 = vld [vmem:[#allocation26_spill] sm:$0xff] }
 0xc33   :  { %v3086_v18 = vsel %vm3083_vm13, %v3085_v63, %v3081_v45  ;;  %vm3068_vm10 = vcmp.eq.f32.partialorder %v3067_v32, 8.507059e+37  ;;  %v15262_v16 = vperm.slane %v14744_v7, 1  ;;  %v5999_v44 = vsub.f32 1.0, %v5998_v17 }
 0xc34   :  { %3155 = vperm.xlu0 %9436, %v3057_v9   ;;  %v3071_v62 = vsel %vm3068_vm10, %v3070_v21, %v3066_v8  ;;  %v5941_v33 = vadd.f32 %v15196_v38, %v5940_v50  ;;  %vm5943_vm11 = vweird.f32 %v15196_v38  ;;  %v3087_v22 = vmul.f32 %v14213_v24, %v3086_v18 }
 0xc35   :  { %v5948_v58 = vand.u32 2147483648, %v15110_v46  ;;  %v3072_v20 = vmul.f32 %v14252_v39, %v3071_v62  ;;  %vm5942_vm2 = vweird.f32 %v15110_v46  ;;  %v5946_v25 = vand.u32 2147483647, %v15110_v46 }
 0xc36   :  { %9826 = vrcp.f32 %v15262_v16  ;;  %vm5944_vm12 = vmor %vm5942_vm2, %vm5943_vm11  ;;  %v6000_v61 = vmul.f32 %v15246_v59, %v5999_v44  ;;  %v15276_v47 = vperm.slane %v14762_v15, 0  ;;  %vm6003_vm15 = vweird.f32 %v15246_v59 }
 0xc37   :  { %v9825_v5 = vpop.eup %9824  ;;  %v5945_v14 = vsel %vm5944_vm12, %v15196_v38, %v5941_v33  ;;  %v5949_v24 = vor.u32 1.1754944e-38, %v5948_v58  ;;  %vm5947_vm14 = vcmp.eq.f32.partialorder %v5946_v25, 8.507059e+37  ;;  %v6008_v6 = vand.u32 2147483648, %v15187_v37  ;;  %v18067_v25 = vld [vmem:[#allocation23_spill] sm:$0xff] }
 0xc38   :  { %3150 = vperm.xlu2 %9435, %v3042_v48   ;;  %v6043_v40 = vmul.f32 %v9825_v5, %v15239_v10  ;;  %v6001_v46 = vadd.f32 %v15246_v59, %v6000_v61  ;;  %vm6002_vm3 = vweird.f32 %v15187_v37  ;;  %v6006_v38 = vand.u32 2147483647, %v15187_v37 }
 0xc39   :  { %3145 = vperm.xlu1 %9437, %v3027_v35   ;;  %v5950_v39 = vsel %vm5947_vm14, %v5949_v24, %v5945_v14  ;;  %9828 = vrcp.f32 %v15276_v47  ;;  %vm6004_vm0 = vmor %vm6002_vm3, %vm6003_vm15  ;;  %v6009_v53 = vor.u32 1.1754944e-38, %v6008_v6  ;;  %vm6048_vm7 = vweird.f32 %v9825_v5  ;;  %v15303_v51 = vpop.xlane.xlu1 %7123  ;;  %v18068_v14 = vld [vmem:[#allocation96_spill] sm:$0xff] }
 0xc3a   :  { %v6044_v28 = vsub.f32 1.0, %v6043_v40  ;;  %v5951_v12 = vmul.f32 %v14304_v54, %v5950_v39  ;;  %v6005_v23 = vsel %vm6004_vm0, %v15246_v59, %v6001_v46  ;;  %vm6007_vm6 = vcmp.eq.f32.partialorder %v6006_v38, 8.507059e+37  ;;  %18064 = vst [vmem:[#allocation128_spill] sm:$0xff] %v15303_v51  ;;  %v18065_v59 = vld [vmem:[#allocation48_spill] sm:$0xff] }
 0xc3b   :  { %v6010_v1 = vsel %vm6007_vm6, %v6009_v53, %v6005_v23  ;;  %v15290_v54 = vperm.slane %v14740_v2, 0  ;;  %v6053_v60 = vand.u32 2147483648, %v15239_v10  ;;  %vm6047_vm1 = vweird.f32 %v15239_v10 }
 0xc3c   :  { %v9827_v11 = vpop.eup %9826  ;;  %v6045_v49 = vmul.f32 %v9825_v5, %v6044_v28  ;;  %v6011_v57 = vmul.f32 %v14308_v27, %v6010_v1  ;;  %v6051_v13 = vand.u32 2147483647, %v15239_v10  ;;  %vm6049_vm4 = vmor %vm6047_vm1, %vm6048_vm7  ;;  %v15306_v27 = vperm.slane %v14742_v3, 1 }
 0xc3d   :  { %v6088_v0 = vmul.f32 %v9827_v11, %v15262_v16  ;;  %9830 = vrcp.f32 %v15290_v54  ;;  %v6054_v42 = vor.u32 1.1754944e-38, %v6053_v60  ;;  %vm6093_vm10 = vweird.f32 %v9827_v11 }
 0xc3e   :  { %v6046_v4 = vadd.f32 %v9825_v5, %v6045_v49  ;;  %vm6052_vm13 = vcmp.eq.f32.partialorder %v6051_v13, 8.507059e+37  ;;  %v7172_v36 = vperm.slane %v15303_v51, %v18065_v59  ;;  %v6098_v48 = vand.u32 2147483648, %v15262_v16 }
 0xc3f   :  { %v6089_v41 = vsub.f32 1.0, %v6088_v0  ;;  %v15292_v37 = vpop.eup %9828  ;;  %vm6092_vm11 = vweird.f32 %v15262_v16  ;;  %v6096_v32 = vand.u32 2147483647, %v15262_v16  ;;  %9832 = vrcp.f32 %v15306_v27 }
 0xc40   :  { %3165 = vperm.xlu2 %9435, %v3087_v22   ;;  %v6133_v2 = vmul.f32 %v15292_v37, %v15276_v47  ;;  %v6050_v9 = vsel %vm6049_vm4, %v9825_v5, %v6046_v4  ;;  %v7171_v45 = vperm.slane %v15308_v56, %v18065_v59  ;;  %vm6094_vm2 = vmor %vm6092_vm11, %vm6093_vm10  ;;  %v6099_v21 = vor.u32 1.1754944e-38, %v6098_v48 }
 0xc41   :  { %3160 = vperm.xlu1 %9437, %v3072_v20   ;;  %v6090_v31 = vmul.f32 %v9827_v11, %v6089_v41  ;;  %v6055_v52 = vsel %vm6052_vm13, %v6054_v42, %v6050_v9  ;;  %v15326_v18 = vperm.slane %v14738_v29, 0  ;;  %vm6097_vm12 = vcmp.eq.f32.partialorder %v6096_v32, 8.507059e+37 }
 0xc42   :  { %v6134_v10 = vsub.f32 1.0, %v6133_v2  ;;  %v6056_v35 = vmul.f32 %v18066_v43, %v6055_v52  ;;  %v7180_v50 = vsel %vm1022_vm8, %v7172_v36, %v7171_v45  ;;  %v15331_v62 = vperm.slane %v14742_v3, 0  ;;  %v18070_v2 = vld [vmem:[#allocation49_spill] sm:$0xff] }
 0xc43   :  { %v6091_v30 = vadd.f32 %v9827_v11, %v6090_v31  ;;  %v15313_v55 = vpop.eup %9830  ;;  %v7210_v33 = vsel %vm1039_vm9, %v7180_v50, -inf  ;;  %vm6138_vm14 = vweird.f32 %v15292_v37  ;;  %v6143_v29 = vand.u32 2147483648, %v15276_v47 }
 0xc44   :  { %v6135_v63 = vmul.f32 %v15292_v37, %v6134_v10  ;;  %v5923_v8 = vmul.f32 %v15313_v55, %v15290_v54  ;;  %9834 = vrcp.f32 %v15326_v18  ;;  %vm6137_vm15 = vweird.f32 %v15276_v47 }
 0xc45   :  { %v6095_v17 = vsel %vm6094_vm2, %v9827_v11, %v6091_v30  ;;  %v15336_v22 = vpop.eup %9832  ;;  %v6141_v40 = vand.u32 2147483647, %v15276_v47  ;;  %9836 = vrcp.f32 %v15331_v62  ;;  %v15346_v61 = vperm.slane %v18068_v14, 0  ;;  %vm6139_vm3 = vmor %vm6137_vm15, %vm6138_vm14  ;;  %v18069_v11 = vld [vmem:[#allocation97_spill] sm:$0xff]  ;;  %v18071_v30 = vld [vmem:[#allocation122_spill] sm:$0xff] }
 0xc46   :  { %v6100_v44 = vsel %vm6097_vm12, %v6099_v21, %v6095_v17  ;;  %v6136_v5 = vadd.f32 %v15292_v37, %v6135_v63  ;;  %v5924_v58 = vsub.f32 1.0, %v5923_v8  ;;  %v5968_v24 = vmul.f32 %v15336_v22, %v15306_v27 }
 0xc47   :  { %v6101_v3 = vmul.f32 %v18067_v25, %v6100_v44  ;;  %v15351_v39 = vperm.slane %v18068_v14, 1  ;;  %v7170_v28 = vperm.slane %v15301_v19, %v18065_v59  ;;  %v6144_v6 = vor.u32 1.1754944e-38, %v6143_v29 }
 0xc48   :  { %v6140_v46 = vsel %vm6139_vm3, %v15292_v37, %v6136_v5  ;;  %v7169_v38 = vperm.slane %v15286_v26, %v18065_v59  ;;  %vm6142_vm0 = vcmp.eq.f32.partialorder %v6141_v40, 8.507059e+37  ;;  %9838 = vrcp.f32 %v15346_v61  ;;  %v18072_v5 = vld [vmem:[#allocation107_spill] sm:$0xff] }
 0xc49   :  { %6169 = vperm.xlu1 %9437, %v5951_v12   ;;  %v5925_v12 = vmul.f32 %v15313_v55, %v5924_v58  ;;  %v6145_v23 = vsel %vm6142_vm0, %v6144_v6, %v6140_v46  ;;  %v5969_v53 = vsub.f32 1.0, %v5968_v24  ;;  %v15366_v1 = vperm.slane %v14744_v7, 0 }
 0xc4a   :  { %v15363_v49 = vpop.eup %9834  ;;  %9840 = vrcp.f32 %v15351_v39  ;;  %v7179_v41 = vsel %vm1022_vm8, %v7170_v28, %v7169_v38  ;;  %vm5928_vm6 = vweird.f32 %v15313_v55  ;;  %v15376_v13 = vperm.slane %v14748_v34, 1 }
 0xc4b   :  { %v15370_v4 = vpop.eup %9836  ;;  %v6146_v9 = vmul.f32 %v18070_v2, %v6145_v23  ;;  %v5933_v7 = vand.u32 2147483648, %v15290_v54  ;;  %v7207_v31 = vsel %vm1039_vm9, %v7179_v41, -inf  ;;  %vm5927_vm7 = vweird.f32 %v15290_v54 }
 0xc4c   :  { %v5931_v42 = vand.u32 2147483647, %v15290_v54  ;;  %v5983_v52 = vmul.f32 %v15363_v49, %v15326_v18  ;;  %v5953_v10 = vmul.f32 %v15370_v4, %v15331_v62  ;;  %9842 = vrcp.f32 %v15366_v1  ;;  %vm5929_vm1 = vmor %vm5927_vm7, %vm5928_vm6 }
 0xc4d   :  { %v5970_v54 = vmul.f32 %v15336_v22, %v5969_v53  ;;  %vm5973_vm13 = vweird.f32 %v15336_v22  ;;  %v5978_v44 = vand.u32 2147483648, %v15306_v27  ;;  %v15408_v58 = vperm.slane %v18072_v5, 0 }
 0xc4e   :  { %v15388_v34 = vpop.eup %9838  ;;  %vm5932_vm4 = vcmp.eq.f32.partialorder %v5931_v42, 8.507059e+37  ;;  %v5954_v32 = vsub.f32 1.0, %v5953_v10  ;;  %v5984_v17 = vsub.f32 1.0, %v5983_v52  ;;  %vm5972_vm10 = vweird.f32 %v15306_v27 }
 0xc4f   :  { %v5971_v8 = vadd.f32 %v15336_v22, %v5970_v54  ;;  %v5976_v25 = vand.u32 2147483647, %v15306_v27  ;;  %vm15416_vm11 = vmor %vm5972_vm10, %vm5973_vm13  ;;  %v15430_v6 = vperm.slane %v18072_v5, 1  ;;  %v5979_v23 = vor.u32 1.1754944e-38, %v5978_v44 }
 0xc50   :  { %v15393_v43 = vpop.eup %9840  ;;  %v5955_v14 = vmul.f32 %v15370_v4, %v5954_v32  ;;  %v5985_v28 = vmul.f32 %v15363_v49, %v5984_v17  ;;  %vm5958_vm12 = vweird.f32 %v15370_v4  ;;  %vm5988_vm14 = vweird.f32 %v15363_v49 }
 0xc51   :  { %6189 = vperm.xlu1 %9437, %v6011_v57   ;;  %v5926_v57 = vadd.f32 %v15313_v55, %v5925_v12  ;;  %v6028_v21 = vmul.f32 %v15393_v43, %v15351_v39  ;;  %v5975_v27 = vsel %vm15416_vm11, %v15336_v22, %v5971_v8  ;;  %vm5977_vm2 = vcmp.eq.f32.partialorder %v5976_v25, 8.507059e+37  ;;  %v18082_v8 = vld [vmem:[#allocation101_spill] sm:$0xff] }
 0xc52   :  { %v15398_v50 = vpop.eup %9842  ;;  %v5980_v41 = vsel %vm5977_vm2, %v5979_v23, %v5975_v27  ;;  %vm5957_vm15 = vweird.f32 %v15331_v62  ;;  %v5993_v42 = vand.u32 2147483648, %v15326_v18  ;;  %vm5987_vm0 = vweird.f32 %v15326_v18 }
 0xc53   :  { %v5930_v48 = vsel %vm5929_vm1, %v15313_v55, %v5926_v57  ;;  %v6013_v55 = vmul.f32 %v15388_v34, %v15346_v61  ;;  %v15423_v24 = vmul.f32 %v15398_v50, %v15366_v1  ;;  %v18076_v57 = vld [vmem:[#allocation112_spill] sm:$0xff]  ;;  %vm15456_vm3 = vmor %vm5957_vm15, %vm5958_vm12  ;;  %vm6033_vm13 = vweird.f32 %v15393_v43 }
 0xc54   :  { %v15328_v16 = vpop.xlane.xlu2 %7190  ;;  %vm15466_vm6 = vmor %vm5987_vm0, %vm5988_vm14  ;;  %v5994_v5 = vor.u32 1.1754944e-38, %v5993_v42  ;;  %vm6017_vm10 = vweird.f32 %v15346_v61  ;;  %v6021_v23 = vand.u32 2147483647, %v15346_v61  ;;  %vm6032_vm2 = vweird.f32 %v15351_v39 }
 0xc55   :  { %v7221_v20 = vperm.slane %v15328_v16, 0  ;;  %v6014_v46 = vsub.f32 1.0, %v6013_v55  ;;  %vm6034_vm12 = vmor %vm6032_vm2, %vm6033_vm13  ;;  %vm6078_vm0 = vweird.f32 %v15398_v50  ;;  %vm6107_vm2 = vweird.f32 %v15408_v58 }
 0xc56   :  { %vm6022_vm14 = vcmp.eq.f32.partialorder %v6021_v23, 8.507059e+37 }
 0xc57   :  { %v7253_v47 = vsub.f32 %v18069_v11, %v7221_v20  ;;  %v18073_v20 = vld [vmem:[#allocation54_spill] sm:$0xff]  ;;  %v6015_v17 = vmul.f32 %v15388_v34, %v6014_v46 }
 0xc59   :  { %6204 = vperm.xlu1 %9437, %v6056_v35   ;;  %v7269_v37 = vmul.f32 1.442695, %v7253_v47  ;;  %v5934_v35 = vor.u32 1.1754944e-38, %v5933_v7  ;;  %v6029_v47 = vsub.f32 1.0, %v6028_v21  ;;  %v5986_v7 = vadd.f32 %v15363_v49, %v5985_v28 }
 0xc5a   :  { %v6016_v27 = vadd.f32 %v15388_v34, %v6015_v17  ;;  %v6023_v28 = vand.u32 2147483648, %v15346_v61  ;;  %v6068_v17 = vand.u32 2147483648, %v15376_v13 }
 0xc5b   :  { %9844 = vpow2.f32 %v7269_v37  ;;  %v5935_v45 = vsel %vm5932_vm4, %v5934_v35, %v5930_v48  ;;  %v5956_v37 = vadd.f32 %v15370_v4, %v5955_v14  ;;  %v5991_v35 = vand.u32 2147483647, %v15326_v18 }
 0xc5c   :  { %9846 = vrcp.f32 %v15376_v13  ;;  %v5936_v29 = vmul.f32 %v18073_v20, %v5935_v45  ;;  %v5990_v18 = vsel %vm15466_vm6, %v15363_v49, %v5986_v7  ;;  %v6030_v21 = vmul.f32 %v15393_v43, %v6029_v47 }
 0xc5d   :  { %vm5992_vm1 = vcmp.eq.f32.partialorder %v5991_v35, 8.507059e+37  ;;  %vm6018_vm4 = vweird.f32 %v15388_v34  ;;  %vm6062_vm6 = vweird.f32 %v15376_v13 }
 0xc5e   :  { %7211 = vmax.xlane.f32.xlu0 %v7210_v33  ;;  %v5995_v14 = vsel %vm5992_vm1, %v5994_v5, %v5990_v18  ;;  %v6031_v46 = vadd.f32 %v15393_v43, %v6030_v21  ;;  %vm15502_vm11 = vmor %vm6017_vm10, %vm6018_vm4  ;;  %v18087_v18 = vld [vmem:[#allocation73_spill] sm:$0xff]  ;;  %v6083_v5 = vand.u32 2147483648, %v15366_v1  ;;  %vm6077_vm1 = vweird.f32 %v15366_v1 }
 0xc5f   :  { %v6020_v61 = vsel %vm15502_vm11, %v15388_v34, %v6016_v27  ;;  %v6081_v27 = vand.u32 2147483647, %v15366_v1  ;;  %vm6079_vm4 = vmor %vm6077_vm1, %vm6078_vm0 }
 0xc60   :  { %v6084_v23 = vor.u32 1.1754944e-38, %v6083_v5 }
 0xc61   :  { %6219 = vperm.xlu1 %9437, %v6101_v3   ;;  %v15405_v33 = vpop.eup %9844  ;;  %vm6082_vm10 = vcmp.eq.f32.partialorder %v6081_v27, 8.507059e+37  ;;  %v18094_v27 = vld [vmem:[#allocation82_spill] sm:$0xff] }
 0xc62   :  { %v15413_v3 = vpop.eup %9846 }
 0xc63   :  { %v15360_v0 = vpop.xlane.xlu0 %7193  ;;  %v15438_v53 = vmul.f32 %v15413_v3, %v15376_v13 }
 0xc64   :  { %v7224_v60 = vperm.slane %v15360_v0, 1 }
 0xc65   :  { %v6059_v20 = vsub.f32 1.0, %v15438_v53  ;;  %v6038_v53 = vand.u32 2147483648, %v15351_v39 }
 0xc66   :  { %v7256_v36 = vsub.f32 %v18071_v30, %v7224_v60  ;;  %v5963_v60 = vand.u32 2147483648, %v15331_v62 }
 0xc67   :  { %v6060_v7 = vmul.f32 %v15413_v3, %v6059_v20 }
 0xc68   :  { %v7275_v63 = vmul.f32 1.442695, %v7256_v36  ;;  %v18077_v36 = vld [vmem:[#allocation28_spill] sm:$0xff]  ;;  %v5964_v32 = vor.u32 1.1754944e-38, %v5963_v60 }
 0xc69   :  { %6234 = vperm.xlu1 %9437, %v6146_v9   ;;  %7208 = vmax.xlane.f32.xlu2 %v7207_v31  ;;  %v5961_v31 = vand.u32 2147483647, %v15331_v62  ;;  %v5981_v48 = vmul.f32 %v18077_v36, %v5980_v41  ;;  %v5960_v62 = vsel %vm15456_vm3, %v15370_v4, %v5956_v37  ;;  %v6074_v4 = vsub.f32 1.0, %v15423_v24  ;;  %v18084_v41 = vld [vmem:[#allocation52_spill] sm:$0xff] }
 0xc6a   :  { %9848 = vpow2.f32 %v7275_v63  ;;  %v5996_v37 = vmul.f32 %v18084_v41, %v5995_v14  ;;  %vm6063_vm3 = vweird.f32 %v15413_v3 }
 0xc6b   :  { %9850 = vrcp.f32 %v15408_v58  ;;  %vm5962_vm7 = vcmp.eq.f32.partialorder %v5961_v31, 8.507059e+37  ;;  %v6024_v31 = vor.u32 1.1754944e-38, %v6023_v28  ;;  %v6075_v42 = vmul.f32 %v15398_v50, %v6074_v4 }
 0xc6c   :  { %9852 = vrcp.f32 %v15430_v6  ;;  %v5965_v25 = vsel %vm5962_vm7, %v5964_v32, %v5960_v62  ;;  %v6061_v62 = vadd.f32 %v15413_v3, %v6060_v7  ;;  %v6066_v4 = vand.u32 2147483647, %v15376_v13  ;;  %vm15539_vm7 = vmor %vm6062_vm6, %vm6063_vm3  ;;  %v18091_v7 = vld [vmem:[#allocation53_spill] sm:$0xff] }
 0xc6d   :  { %v6025_v54 = vsel %vm6022_vm14, %v6024_v31, %v6020_v61  ;;  %v7223_v61 = vperm.slane %v15360_v0, 0 }
 0xc6e   :  { %v6026_v21 = vmul.f32 %v18087_v18, %v6025_v54  ;;  %v6065_v13 = vsel %vm15539_vm7, %v15413_v3, %v6061_v62  ;;  %vm6067_vm13 = vcmp.eq.f32.partialorder %v6066_v4, 8.507059e+37  ;;  %v7222_v4 = vperm.slane %v15328_v16, 1 }
 0xc70   :  { %v15453_v52 = vpop.eup %9848 }
 0xc71   :  { %7318 = vperm.xlu1 %9437, %v15405_v33   ;;  %v15471_v63 = vpop.eup %9850 }
 0xc72   :  { %6164 = vperm.xlu0 %9436, %v5936_v29   ;;  %v15483_v29 = vperm.slane %v14762_v15, 1  ;;  %v15485_v40 = vpop.eup %9852  ;;  %v6103_v49 = vmul.f32 %v15471_v63, %v15408_v58  ;;  %v18083_v15 = vld [vmem:[#allocation46_spill] sm:$0xff]  ;;  %vm6108_vm11 = vweird.f32 %v15471_v63 }
 0xc73   :  { %v15432_v12 = vpop.xlane.xlu2 %7199  ;;  %v15434_v38 = vpop.xlane.xlu0 %7202  ;;  %v5966_v47 = vmul.f32 %v18083_v15, %v5965_v25  ;;  %v18088_v25 = vld [vmem:[#allocation75_spill] sm:$0xff]  ;;  %vm6109_vm14 = vmor %vm6107_vm2, %vm6108_vm11 }
 0xc74   :  { %v7227_v22 = vperm.slane %v15432_v12, 0  ;;  %v7230_v9 = vperm.slane %v15434_v38, 1  ;;  %v6104_v34 = vsub.f32 1.0, %v6103_v49  ;;  %vm6152_vm1 = vweird.f32 %v15483_v29 }
 0xc76   :  { %v7259_v2 = vsub.f32 %v18076_v57, %v7227_v22  ;;  %v7262_v55 = vsub.f32 %v18082_v8, %v7230_v9  ;;  %v6118_v9 = vmul.f32 %v15485_v40, %v15430_v6  ;;  %v6105_v28 = vmul.f32 %v15471_v63, %v6104_v34 }
 0xc77   :  { %v6126_v34 = vand.u32 2147483647, %v15430_v6 }
 0xc78   :  { %v7281_v10 = vmul.f32 1.442695, %v7259_v2  ;;  %v7287_v24 = vmul.f32 1.442695, %v7262_v55  ;;  %v6036_v2 = vand.u32 2147483647, %v15351_v39  ;;  %v6035_v39 = vsel %vm6034_vm12, %v15393_v43, %v6031_v46 }
 0xc79   :  { %7327 = vperm.xlu1 %9437, %v15453_v52   ;;  %v6119_v45 = vsub.f32 1.0, %v6118_v9  ;;  %v6076_v55 = vadd.f32 %v15398_v50, %v6075_v42  ;;  %v6069_v46 = vor.u32 1.1754944e-38, %v6068_v17  ;;  %v6106_v3 = vadd.f32 %v15471_v63, %v6105_v28  ;;  %v18095_v28 = vld [vmem:[#allocation85_spill] sm:$0xff] }
 0xc7a   :  { %9854 = vpow2.f32 %v7281_v10  ;;  %6179 = vperm.xlu0 %9436, %v5981_v48   ;;  %v15519_v10 = vpop.xlane.xlu1 %7196  ;;  %v6039_v48 = vor.u32 1.1754944e-38, %v6038_v53  ;;  %vm6037_vm15 = vcmp.eq.f32.partialorder %v6036_v2, 8.507059e+37  ;;  %vm6123_vm12 = vweird.f32 %v15485_v40 }
 0xc7b   :  { %v15479_v44 = vpop.permute.xlu2 %3090  ;;  %9856 = vrcp.f32 %v15483_v29  ;;  %v6080_v15 = vsel %vm6079_vm4, %v15398_v50, %v6076_v55  ;;  %v6070_v53 = vsel %vm6067_vm13, %v6069_v46, %v6065_v13  ;;  %v6113_v50 = vand.u32 2147483648, %v15408_v58  ;;  %v18096_v46 = vld [vmem:[#allocation98_spill] sm:$0xff] }
 0xc7c   :  { %9858 = vpow2.f32 %v7287_v24  ;;  %v6040_v35 = vsel %vm6037_vm15, %v6039_v48, %v6035_v39  ;;  %v6085_v60 = vsel %vm6082_vm10, %v6084_v23, %v6080_v15  ;;  %v6071_v31 = vmul.f32 %v18091_v7, %v6070_v53  ;;  %v18092_v48 = vld [vmem:[#allocation25_spill] sm:$0xff]  ;;  %v18097_v53 = vld [vmem:[#allocation30_spill] sm:$0xff]  ;;  %v18099_v7 = vld [vmem:[#allocation31_spill] sm:$0xff] }
 0xc7d   :  { %v6041_v49 = vmul.f32 %v18088_v25, %v6040_v35  ;;  %v6111_v39 = vand.u32 2147483647, %v15408_v58  ;;  %v6128_v42 = vand.u32 2147483648, %v15430_v6  ;;  %v6086_v54 = vmul.f32 %v18092_v48, %v6085_v60  ;;  %v18093_v58 = vld [vmem:[#allocation108_spill] sm:$0xff] }
 0xc7e   :  { %vm6122_vm15 = vweird.f32 %v15430_v6  ;;  %v6110_v35 = vsel %vm6109_vm14, %v15471_v63, %v6106_v3  ;;  %v6114_v0 = vor.u32 1.1754944e-38, %v6113_v50  ;;  %v7255_v17 = vsub.f32 %v18093_v58, %v7223_v61  ;;  %v18098_v3 = vld [vmem:[#allocation33_spill] sm:$0xff] }
 0xc7f   :  { %vm6124_vm3 = vmor %vm6122_vm15, %vm6123_vm12  ;;  %vm6112_vm0 = vcmp.eq.f32.partialorder %v6111_v39, 8.507059e+37  ;;  %v6129_v18 = vor.u32 1.1754944e-38, %v6128_v42  ;;  %vm6127_vm6 = vcmp.eq.f32.partialorder %v6126_v34, 8.507059e+37  ;;  %v6158_v25 = vand.u32 2147483648, %v15483_v29  ;;  %v18100_v39 = vld [vmem:[#allocation32_spill] sm:$0xff] }
 0xc80   :  { %v15498_v22 = vpop.eup %9854  ;;  %v6156_v13 = vand.u32 2147483647, %v15483_v29  ;;  %v7254_v15 = vsub.f32 %v18096_v46, %v7222_v4  ;;  %v7228_v34 = vperm.slane %v15432_v12, 1 }
 0xc81   :  { %7336 = vperm.xlu1 %9437, %v15498_v22   ;;  %6174 = vperm.xlu2 %9435, %v5966_v47   ;;  %v15525_v32 = vpop.eup %9856  ;;  %v6120_v47 = vmul.f32 %v15485_v40, %v6119_v45  ;;  %v6159_v23 = vor.u32 1.1754944e-38, %v6158_v25 }
 0xc82   :  { %6184 = vperm.xlu0 %9436, %v5996_v37   ;;  %v15536_v20 = vpop.eup %9858  ;;  %v6148_v24 = vmul.f32 %v15525_v32, %v15483_v29  ;;  %v15554_v1 = vpop.xlane.xlu1 %7205  ;;  %vm6153_vm7 = vweird.f32 %v15525_v32  ;;  %vm6157_vm13 = vcmp.eq.f32.partialorder %v6156_v13, 8.507059e+37  ;;  %v7271_v61 = vmul.f32 1.442695, %v7254_v15 }
 0xc83   :  { %v15521_v36 = vpop.permute.xlu2 %3105  ;;  %v6121_v9 = vadd.f32 %v15485_v40, %v6120_v47  ;;  %vm6154_vm4 = vmor %vm6152_vm1, %vm6153_vm7  ;;  %v7226_v29 = vperm.slane %v15519_v10, 1 }
 0xc84   :  { %v6149_v41 = vsub.f32 1.0, %v6148_v24 }
 0xc85   :  { %v6125_v45 = vsel %vm6124_vm3, %v15485_v40, %v6121_v9  ;;  %v7273_v40 = vmul.f32 1.442695, %v7255_v17 }
 0xc86   :  { %v15527_v43 = vpop.permute.xlu0 %3100  ;;  %v6150_v62 = vmul.f32 %v15525_v32, %v6149_v41  ;;  %v6130_v6 = vsel %vm6127_vm6, %v6129_v18, %v6125_v45  ;;  %v18103_v45 = vld [vmem:[#allocation34_spill] sm:$0xff] }
 0xc87   :  { %v6131_v16 = vmul.f32 %v18095_v28, %v6130_v6  ;;  %9860 = vpow2.f32 %v7273_v40  ;;  %v3170_v42 = vmul.f32 %v15527_v43, %v18100_v39  ;;  %v3168_v17 = vmul.f32 %v15479_v44, %v18103_v45  ;;  %v18105_v43 = vld [vmem:[#allocation100_spill] sm:$0xff] }
 0xc88   :  { %v6151_v5 = vadd.f32 %v15525_v32, %v6150_v62  ;;  %v18102_v62 = vld [vmem:[#allocation111_spill] sm:$0xff]  ;;  %9862 = vpow2.f32 %v7271_v61  ;;  %v7258_v4 = vsub.f32 %v18105_v43, %v7226_v29  ;;  %v18106_v44 = vld [vmem:[#allocation124_spill] sm:$0xff]  ;;  %v7231_v61 = vperm.slane %v15554_v1, 0 }
 0xc89   :  { %7345 = vperm.xlu1 %9437, %v15536_v20   ;;  %6194 = vperm.xlu2 %9435, %v6026_v21   ;;  %v6115_v21 = vsel %vm6112_vm0, %v6114_v0, %v6110_v35  ;;  %v3185_v12 = vsel %vm875_vm5, %v3170_v42, 0.0 }
 0xc8a   :  { %6199 = vperm.xlu0 %9436, %v6041_v49   ;;  %v7225_v49 = vperm.slane %v15519_v10, 0  ;;  %v6116_v24 = vmul.f32 %v18094_v27, %v6115_v21  ;;  %v6155_v47 = vsel %vm6154_vm4, %v15525_v32, %v6151_v5  ;;  %v18101_v32 = vld [vmem:[#allocation35_spill] sm:$0xff]  ;;  %v7279_v15 = vmul.f32 1.442695, %v7258_v4 }
 0xc8b   :  { %v15556_v37 = vpop.permute.xlu2 %3120  ;;  %v6160_v9 = vsel %vm6157_vm13, %v6159_v23, %v6155_v47  ;;  %v7229_v47 = vperm.slane %v15434_v38, 0  ;;  %v18108_v23 = vld [vmem:[#allocation19_spill] sm:$0xff] }
 0xc8c   :  { %v7257_v41 = vsub.f32 %v18097_v53, %v7225_v49  ;;  %v6161_v0 = vmul.f32 %v18102_v62, %v6160_v9  ;;  %v3184_v49 = vsel %vm875_vm5, %v3168_v17, 0.0  ;;  %v18111_v38 = vld [vmem:[#allocation123_spill] sm:$0xff] }
 0xc8d   :  { %v15600_v21 = vpop.eup %9860  ;;  %v3186_v28 = vadd.f32 %v3185_v12, %v3184_v49  ;;  %v18116_v49 = vld [vmem:[#allocation45_spill] sm:$0xff] }
 0xc8e   :  { %v3111_v2 = vpop.permute.xlu0 %3110 }
 0xc91   :  { %6209 = vperm.xlu2 %9435, %v6071_v31   ;;  %v3171_v31 = vmul.f32 %v15521_v36, %v18099_v7  ;;  %v18110_v7 = vld [vmem:[#allocation39_spill] sm:$0xff] }
 0xc92   :  { %6214 = vperm.xlu0 %9436, %v6086_v54   ;;  %v7277_v54 = vmul.f32 1.442695, %v7257_v41  ;;  %v3174_v41 = vmul.f32 %v15556_v37, %v18108_v23  ;;  %v7261_v37 = vsub.f32 %v18111_v38, %v7229_v47 }
 0xc93   :  { %v3096_v55 = vpop.permute.xlu1 %3095  ;;  %v3136_v14 = vpop.permute.xlu2 %3135  ;;  %v3200_v6 = vsel %vm875_vm5, %v3171_v31, 0.0 }
 0xc94   :  { %v3169_v50 = vmul.f32 %v3096_v55, %v18098_v3  ;;  %v18104_v55 = vld [vmem:[#allocation36_spill] sm:$0xff]  ;;  %9864 = vpow2.f32 %v7277_v54  ;;  %v3177_v31 = vmul.f32 %v3136_v14, %v18110_v7 }
 0xc95   :  { %v3172_v18 = vmul.f32 %v3111_v2, %v18104_v55  ;;  %v7260_v2 = vsub.f32 %v18106_v44, %v7228_v34  ;;  %9866 = vpow2.f32 %v7279_v15  ;;  %v18112_v34 = vld [vmem:[#allocation103_spill] sm:$0xff]  ;;  %v18113_v55 = vld [vmem:[#allocation40_spill] sm:$0xff]  ;;  %v18117_v15 = vld [vmem:[#allocation42_spill] sm:$0xff] }
 0xc96   :  { %v3126_v63 = vpop.permute.xlu0 %3125  ;;  %v3199_v10 = vsel %vm875_vm5, %v3169_v50, 0.0  ;;  %v15615_v50 = vpop.eup %9862  ;;  %v7263_v14 = vsub.f32 %v18112_v34, %v7231_v61  ;;  %v3206_v17 = vsel %vm875_vm5, %v3177_v31, 0.0  ;;  %v18119_v31 = vld [vmem:[#allocation44_spill] sm:$0xff] }
 0xc97   :  { %v3201_v25 = vadd.f32 %v3200_v6, %v3199_v10  ;;  %v3187_v27 = vsel %vm875_vm5, %v3172_v18, 0.0  ;;  %v7283_v9 = vmul.f32 1.442695, %v7260_v2  ;;  %v18114_v10 = vld [vmem:[#allocation43_spill] sm:$0xff]  ;;  %v18115_v6 = vld [vmem:[#allocation38_spill] sm:$0xff] }
 0xc98   :  { %v3188_v29 = vadd.f32 %v3187_v27, %v3186_v28 }
 0xc99   :  { %6224 = vperm.xlu2 %9435, %v6116_v24   ;;  %v18107_v24 = vld [vmem:[#allocation37_spill] sm:$0xff]  ;;  %9868 = vpow2.f32 %v7283_v9 }
 0xc9a   :  { %6229 = vperm.xlu0 %9436, %v6131_v16   ;;  %v3175_v13 = vmul.f32 %v3126_v63, %v18107_v24  ;;  %v15620_v39 = vpop.eup %9864 }
 0xc9b   :  { %v3116_v60 = vpop.permute.xlu1 %3115  ;;  %v3151_v36 = vpop.permute.xlu2 %3150 }
 0xc9c   :  { %v3173_v48 = vmul.f32 %v3116_v60, %v18101_v32  ;;  %v18109_v60 = vld [vmem:[#allocation41_spill] sm:$0xff]  ;;  %v3204_v63 = vsel %vm875_vm5, %v3175_v13, 0.0  ;;  %v7289_v13 = vmul.f32 1.442695, %v7263_v14  ;;  %v3180_v47 = vmul.f32 %v3151_v36, %v18117_v15 }
 0xc9e   :  { %v3141_v35 = vpop.permute.xlu0 %3140  ;;  %v3202_v5 = vsel %vm875_vm5, %v3173_v48, 0.0  ;;  %v3189_v48 = vsel %vm875_vm5, %v3174_v41, 0.0  ;;  %v3195_v7 = vsel %vm875_vm5, %v3180_v47, 0.0 }
 0xc9f   :  { %v3203_v16 = vadd.f32 %v3202_v5, %v3201_v25  ;;  %v3178_v18 = vmul.f32 %v3141_v35, %v18113_v55  ;;  %v7285_v25 = vmul.f32 1.442695, %v7261_v37 }
 0xca1   :  { %6239 = vperm.xlu2 %9435, %v6161_v0   ;;  %v3205_v42 = vadd.f32 %v3204_v63, %v3203_v16  ;;  %v3190_v0 = vadd.f32 %v3189_v48, %v3188_v29  ;;  %v15635_v16 = vpop.eup %9866  ;;  %v3193_v35 = vsel %vm875_vm5, %v3178_v18, 0.0  ;;  %9870 = vpow2.f32 %v7285_v25 }
 0xca2   :  { %7324 = vperm.xlu0 %9436, %v15600_v21   ;;  %v15640_v41 = vpop.eup %9868  ;;  %9872 = vpow2.f32 %v7289_v13 }
 0xca3   :  { %v3131_v40 = vpop.permute.xlu1 %3130  ;;  %v3166_v62 = vpop.permute.xlu2 %3165  ;;  %v3207_v2 = vadd.f32 %v3206_v17, %v3205_v42 }
 0xca4   :  { %v3176_v3 = vmul.f32 %v3131_v40, %v18109_v60  ;;  %v7232_v40 = vperm.slane %v15554_v1, 1  ;;  %v3183_v27 = vmul.f32 %v3166_v62, %v18116_v49  ;;  %v18118_v1 = vld [vmem:[#allocation127_spill] sm:$0xff] }
 0xca6   :  { %v3156_v32 = vpop.permute.xlu0 %3155  ;;  %v3191_v54 = vsel %vm875_vm5, %v3176_v3, 0.0  ;;  %v7264_v9 = vsub.f32 %v18118_v1, %v7232_v40  ;;  %v3212_v61 = vsel %vm875_vm5, %v3183_v27, 0.0 }
 0xca7   :  { %v3181_v4 = vmul.f32 %v3156_v32, %v18114_v10  ;;  %v3192_v5 = vadd.f32 %v3191_v54, %v3190_v0  ;;  %v15649_v54 = vpop.eup %9870 }
 0xca8   :  { %v7291_v32 = vmul.f32 1.442695, %v7264_v9  ;;  %v15651_v14 = vpop.eup %9872 }
 0xca9   :  { %7321 = vperm.xlu2 %9435, %v15615_v50   ;;  %v3210_v23 = vsel %vm875_vm5, %v3181_v4, 0.0  ;;  %v3194_v60 = vadd.f32 %v3193_v35, %v3192_v5 }
 0xcaa   :  { %7330 = vperm.xlu0 %9436, %v15620_v39  }
 0xcab   :  { %v3146_v45 = vpop.permute.xlu1 %3145  ;;  %v3196_v42 = vadd.f32 %v3195_v7, %v3194_v60 }
 0xcac   :  { %v3179_v12 = vmul.f32 %v3146_v45, %v18115_v6 }
 0xcae   :  { %v3208_v24 = vsel %vm875_vm5, %v3179_v12, 0.0 }
 0xcaf   :  { %v3209_v28 = vadd.f32 %v3208_v24, %v3207_v2 }
 0xcb1   :  { %v3211_v3 = vadd.f32 %v3210_v23, %v3209_v28  ;;  %7333 = vperm.xlu2 %9435, %v15635_v16  }
 0xcb2   :  { %7339 = vperm.xlu0 %9436, %v15640_v41  }
 0xcb3   :  { %v3213_v29 = vadd.f32 %v3212_v61, %v3211_v3  ;;  %v3161_v36 = vpop.permute.xlu1 %3160 }
 0xcb4   :  { %v3182_v63 = vmul.f32 %v3161_v36, %v18119_v31 }
 0xcb5   :  { %9874 = vtanh.f32 %v3213_v29 }
 0xcb6   :  { %v3197_v37 = vsel %vm875_vm5, %v3182_v63, 0.0 }
 0xcb7   :  { %v3198_v48 = vadd.f32 %v3197_v37, %v3196_v42  ;;  %v18120_v42 = vld [vmem:[#allocation61_spill] sm:$0xff]  ;;  %v18121_v37 = vld [vmem:[#allocation56_spill] sm:$0xff] }
 0xcb9   :  { %9876 = vtanh.f32 %v3198_v48  ;;  %7342 = vperm.xlu2 %9435, %v15649_v54  }
 0xcba   :  { %9878 = vpow2.f32 %v7291_v32  ;;  %7348 = vperm.xlu0 %9436, %v15651_v14  }
 0xcbb   :  { %v9875_v62 = vpop.eup %9874  ;;  %v6170_v17 = vpop.permute.xlu1 %6169 }
 0xcbc   :  { %3217 = vst.msk [vmem:[#allocation13 + $0x8] sm:$0xff] %vm875_vm5, %v9875_v62  ;;  %v18122_v62 = vld [vmem:[#allocation60_spill] sm:$0xff] }
 0xcbf   :  { %v9877_v0 = vpop.eup %9876 }
 0xcc0   :  { %v15656_v45 = vpop.eup %9878  ;;  %3216 = vst.msk [vmem:[#allocation13] sm:$0xff] %vm875_vm5, %v9877_v0 }
 0xcc1   :  { %7351 = vperm.xlu2 %9435, %v15656_v45  }
 0xcc3   :  { %v6190_v10 = vpop.permute.xlu1 %6189 }
 0xccb   :  { %v6205_v5 = vpop.permute.xlu1 %6204 }
 0xcd1   :  { %v7212_v55 = vpop.xlane.xlu0 %7211 }
 0xcd2   :  { %v7235_v18 = vperm.slane %v7212_v55, 0  ;;  %v7236_v49 = vperm.slane %v7212_v55, 1 }
 0xcd3   :  { %v6220_v60 = vpop.permute.xlu1 %6219 }
 0xcd4   :  { %v7267_v4 = vsub.f32 %v15308_v56, %v7235_v18  ;;  %v7268_v15 = vsub.f32 %v15303_v51, %v7236_v49 }
 0xcd6   :  { %v7297_v6 = vmul.f32 1.442695, %v7267_v4  ;;  %v7299_v23 = vmul.f32 1.442695, %v7268_v15  ;;  %v18123_v4 = vld [vmem:[#allocation58_spill] sm:$0xff] }
 0xcd8   :  { %9880 = vpow2.f32 %v7297_v6 }
 0xcdb   :  { %v6235_v7 = vpop.permute.xlu1 %6234 }
 0xcdc   :  { %v7209_v12 = vpop.xlane.xlu2 %7208 }
 0xcdd   :  { %v7233_v2 = vperm.slane %v7209_v12, 0  ;;  %v7234_v25 = vperm.slane %v7209_v12, 1  ;;  %v18124_v12 = vld [vmem:[#allocation55_spill] sm:$0xff] }
 0xcde   :  { %v15661_v40 = vpop.eup %9880 }
 0xcdf   :  { %v7265_v27 = vsub.f32 %v15286_v26, %v7233_v2  ;;  %v7266_v24 = vsub.f32 %v15301_v19, %v7234_v25  ;;  %7360 = vperm.xlu2 %9435, %v15661_v40   ;;  %v6243_v2 = vmul.f32 %v6170_v17, %v18124_v12 }
 0xce1   :  { %v7293_v13 = vmul.f32 1.442695, %v7265_v27  ;;  %v7295_v28 = vmul.f32 1.442695, %v7266_v24 }
 0xce3   :  { %9882 = vpow2.f32 %v7293_v13  ;;  %v7319_v25 = vpop.permute.xlu1 %7318 }
 0xce4   :  { %9884 = vpow2.f32 %v7295_v28  ;;  %v6175_v47 = vpop.permute.xlu2 %6174  ;;  %v6165_v35 = vpop.permute.xlu0 %6164  ;;  %v18125_v28 = vld [vmem:[#allocation62_spill] sm:$0xff] }
 0xce5   :  { %9886 = vpow2.f32 %v7299_v23  ;;  %v6244_v32 = vmul.f32 %v6175_v47, %v18120_v42  ;;  %v6242_v48 = vmul.f32 %v6165_v35, %v18121_v37  ;;  %v6273_v23 = vsel %vm875_vm5, %v6243_v2, 0.0  ;;  %v18129_v2 = vld [vmem:[#allocation64_spill] sm:$0xff] }
 0xce7   :  { %v6259_v55 = vsel %vm875_vm5, %v6244_v32, 0.0  ;;  %v6258_v18 = vsel %vm875_vm5, %v6242_v48, 0.0  ;;  %v18127_v32 = vld [vmem:[#allocation59_spill] sm:$0xff]  ;;  %v18128_v48 = vld [vmem:[#allocation65_spill] sm:$0xff] }
 0xce8   :  { %v6260_v27 = vadd.f32 %v6259_v55, %v6258_v18  ;;  %v6250_v17 = vmul.f32 %v6205_v5, %v18128_v48 }
 0xce9   :  { %v15667_v3 = vpop.eup %9882 }
 0xcea   :  { %v15669_v9 = vpop.eup %9884  ;;  %7354 = vperm.xlu1 %9437, %v15667_v3   ;;  %v6265_v12 = vsel %vm875_vm5, %v6250_v17, 0.0 }
 0xceb   :  { %7357 = vperm.xlu0 %9436, %v15669_v9   ;;  %v15673_v36 = vpop.eup %9886 }
 0xcec   :  { %v6195_v61 = vpop.permute.xlu2 %6194  ;;  %v6180_v29 = vpop.permute.xlu0 %6179 }
 0xced   :  { %v6245_v6 = vmul.f32 %v6180_v29, %v18123_v4  ;;  %v6248_v15 = vmul.f32 %v6195_v61, %v18125_v28 }
 0xcef   :  { %v6274_v47 = vsel %vm875_vm5, %v6245_v6, 0.0 }
 0xcf0   :  { %v6275_v29 = vadd.f32 %v6274_v47, %v6273_v23  ;;  %v7328_v47 = vpop.permute.xlu1 %7327 }
 0xcf2   :  { %7363 = vperm.xlu1 %9437, %v15673_v36  }
 0xcf4   :  { %v6210_v31 = vpop.permute.xlu2 %6209  ;;  %v6185_v63 = vpop.permute.xlu0 %6184 }
 0xcf5   :  { %v6246_v0 = vmul.f32 %v6185_v63, %v18122_v62  ;;  %v18126_v63 = vld [vmem:[#allocation57_spill] sm:$0xff]  ;;  %v6263_v62 = vsel %vm875_vm5, %v6248_v15, 0.0  ;;  %v18132_v15 = vld [vmem:[#allocation70_spill] sm:$0xff] }
 0xcf6   :  { %v6247_v42 = vmul.f32 %v6190_v10, %v18126_v63  ;;  %v18130_v10 = vld [vmem:[#allocation68_spill] sm:$0xff] }
 0xcf7   :  { %v6261_v49 = vsel %vm875_vm5, %v6246_v0, 0.0 }
 0xcf8   :  { %v6262_v35 = vadd.f32 %v6261_v49, %v6260_v27  ;;  %v6276_v55 = vsel %vm875_vm5, %v6247_v42, 0.0  ;;  %v6251_v49 = vmul.f32 %v6210_v31, %v18129_v2 }
 0xcf9   :  { %v6277_v61 = vadd.f32 %v6276_v55, %v6275_v29 }
 0xcfa   :  { %v6264_v0 = vadd.f32 %v6263_v62, %v6262_v35  ;;  %v6256_v35 = vmul.f32 %v6235_v7, %v18132_v15  ;;  %v6280_v29 = vsel %vm875_vm5, %v6251_v49, 0.0  ;;  %v7365_v49 = vperm.slane %v7319_v25, %v18065_v59 }
 0xcfc   :  { %v6225_v24 = vpop.permute.xlu2 %6224  ;;  %v6200_v13 = vpop.permute.xlu0 %6199  ;;  %v6266_v23 = vadd.f32 %v6265_v12, %v6264_v0  ;;  %v18135_v12 = vld [vmem:[#allocation67_spill] sm:$0xff] }
 0xcfd   :  { %v6249_v37 = vmul.f32 %v6200_v13, %v18127_v32  ;;  %v6254_v27 = vmul.f32 %v6225_v24, %v18130_v10  ;;  %v18131_v13 = vld [vmem:[#allocation66_spill] sm:$0xff]  ;;  %v18133_v32 = vld [vmem:[#allocation63_spill] sm:$0xff]  ;;  %v6271_v24 = vsel %vm875_vm5, %v6256_v35, 0.0 }
 0xcff   :  { %v6278_v18 = vsel %vm875_vm5, %v6249_v37, 0.0  ;;  %v6253_v37 = vmul.f32 %v6220_v60, %v18133_v32  ;;  %v6269_v48 = vsel %vm875_vm5, %v6254_v27, 0.0  ;;  %v7337_v27 = vpop.permute.xlu1 %7336 }
 0xd00   :  { %v6279_v5 = vadd.f32 %v6278_v18, %v6277_v61  ;;  %v18134_v18 = vld [vmem:[#allocation69_spill] sm:$0xff] }
 0xd01   :  { %v6282_v0 = vsel %vm875_vm5, %v6253_v37, 0.0 }
 0xd02   :  { %v6281_v17 = vadd.f32 %v6280_v29, %v6279_v5 }
 0xd04   :  { %v6240_v4 = vpop.permute.xlu2 %6239  ;;  %v6215_v6 = vpop.permute.xlu0 %6214  ;;  %v6283_v60 = vadd.f32 %v6282_v0, %v6281_v17 }
 0xd05   :  { %v6252_v28 = vmul.f32 %v6215_v6, %v18131_v13  ;;  %v6257_v7 = vmul.f32 %v6240_v4, %v18134_v18 }
 0xd07   :  { %v6267_v63 = vsel %vm875_vm5, %v6252_v28, 0.0  ;;  %v6286_v28 = vsel %vm875_vm5, %v6257_v7, 0.0 }
 0xd08   :  { %v6268_v42 = vadd.f32 %v6267_v63, %v6266_v23 }
 0xd0a   :  { %v6270_v31 = vadd.f32 %v6269_v48, %v6268_v42  ;;  %v7368_v42 = vperm.slane %v7328_v47, %v18065_v59  ;;  %v7346_v48 = vpop.permute.xlu1 %7345 }
 0xd0c   :  { %v6272_v62 = vadd.f32 %v6271_v24, %v6270_v31  ;;  %v7322_v55 = vpop.permute.xlu2 %7321  ;;  %v6230_v6 = vpop.permute.xlu0 %6229  ;;  %v7374_v24 = vperm.slane %v7346_v48, %v18065_v59 }
 0xd0d   :  { %v7366_v61 = vperm.slane %v7322_v55, %v18065_v59  ;;  %v6255_v2 = vmul.f32 %v6230_v6, %v18135_v12  ;;  %v7371_v12 = vperm.slane %v7337_v27, %v18065_v59 }
 0xd0e   :  { %9888 = vtanh.f32 %v6272_v62 }
 0xd0f   :  { %v6284_v10 = vsel %vm875_vm5, %v6255_v2, 0.0  ;;  %v7381_v5 = vsel %vm1022_vm8, %v7366_v61, %v7365_v49 }
 0xd10   :  { %v6285_v13 = vadd.f32 %v6284_v10, %v6283_v60  ;;  %v7397_v63 = vsel %vm1039_vm9, %v7381_v5, 0.0 }
 0xd12   :  { %v6287_v23 = vadd.f32 %v6286_v28, %v6285_v13 }
 0xd14   :  { %v9889_v15 = vpop.eup %9888  ;;  %9890 = vtanh.f32 %v6287_v23  ;;  %v7325_v4 = vpop.permute.xlu0 %7324 }
 0xd15   :  { %v7334_v35 = vpop.permute.xlu2 %7333  ;;  %6291 = vst.msk [vmem:[#allocation13 + $0x10] sm:$0xff] %vm875_vm5, %v9889_v15  ;;  %v7367_v25 = vperm.slane %v7325_v4, %v18065_v59  ;;  %7398 = vadd.xlane.f32.xlu0 %v7397_v63 }
 0xd16   :  { %v7370_v47 = vperm.slane %v7334_v35, %v18065_v59 }
 0xd17   :  { %v7382_v32 = vsel %vm1022_vm8, %v7368_v42, %v7367_v25 }
 0xd18   :  { %v7400_v37 = vsel %vm1039_vm9, %v7382_v32, 0.0 }
 0xd19   :  { %7401 = vadd.xlane.f32.xlu2 %v7400_v37 }
 0xd1a   :  { %v9891_v29 = vpop.eup %9890 }
 0xd1b   :  { %6292 = vst.msk [vmem:[#allocation13 + $0x18] sm:$0xff] %vm875_vm5, %v9891_v29 }
 0xd1c   :  { %v7331_v31 = vpop.permute.xlu0 %7330 }
 0xd1d   :  { %v7343_v17 = vpop.permute.xlu2 %7342  ;;  %v7369_v55 = vperm.slane %v7331_v31, %v18065_v59 }
 0xd1e   :  { %v7373_v62 = vperm.slane %v7343_v17, %v18065_v59 }
 0xd1f   :  { %v7383_v6 = vsel %vm1022_vm8, %v7370_v47, %v7369_v55 }
 0xd20   :  { %v7385_v0 = vsel %vm1022_vm8, %v7374_v24, %v7373_v62  ;;  %v7403_v18 = vsel %vm1039_vm9, %v7383_v6, 0.0 }
 0xd21   :  { %v7409_v7 = vsel %vm1039_vm9, %v7385_v0, 0.0  ;;  %7404 = vadd.xlane.f32.xlu1 %v7403_v18 }
 0xd22   :  { %7410 = vadd.xlane.f32.xlu2 %v7409_v7 }
 0xd24   :  { %v7340_v61 = vpop.permute.xlu0 %7339 }
 0xd25   :  { %v7372_v2 = vperm.slane %v7340_v61, %v18065_v59  ;;  %v7352_v10 = vpop.permute.xlu2 %7351 }
 0xd26   :  { %v7376_v28 = vperm.slane %v7352_v10, %v18065_v59 }
 0xd27   :  { %v7384_v60 = vsel %vm1022_vm8, %v7372_v2, %v7371_v12 }
 0xd28   :  { %v7406_v49 = vsel %vm1039_vm9, %v7384_v60, 0.0 }
 0xd29   :  { %7407 = vadd.xlane.f32.xlu0 %v7406_v49 }
 0xd2c   :  { %v7349_v13 = vpop.permute.xlu0 %7348 }
 0xd2d   :  { %v7375_v5 = vperm.slane %v7349_v13, %v18065_v59 }
 0xd2f   :  { %v7386_v23 = vsel %vm1022_vm8, %v7376_v28, %v7375_v5 }
 0xd30   :  { %v7412_v15 = vsel %vm1039_vm9, %v7386_v23, 0.0 }
 0xd31   :  { %7413 = vadd.xlane.f32.xlu1 %v7412_v15 }
 0xd39   :  { %v7361_v32 = vpop.permute.xlu2 %7360 }
 0xd3a   :  { %v7379_v29 = vperm.slane %v7361_v32, %v18065_v59 }
 0xd5c   :  { %v7355_v4 = vpop.permute.xlu1 %7354 }
 0xd5d   :  { %v7358_v27 = vpop.permute.xlu0 %7357  ;;  %v7377_v35 = vperm.slane %v7355_v4, %v18065_v59 }
 0xd5e   :  { %v7378_v63 = vperm.slane %v7358_v27, %v18065_v59 }
 0xd60   :  { %v7387_v42 = vsel %vm1022_vm8, %v7378_v63, %v7377_v35 }
 0xd61   :  { %v7415_v25 = vsel %vm1039_vm9, %v7387_v42, 0.0 }
 0xd62   :  { %7416 = vadd.xlane.f32.xlu0 %v7415_v25 }
 0xd64   :  { %v7364_v37 = vpop.permute.xlu1 %7363 }
 0xd65   :  { %v7380_v48 = vperm.slane %v7364_v37, %v18065_v59 }
 0xd67   :  { %v7388_v17 = vsel %vm1022_vm8, %v7380_v48, %v7379_v29 }
 0xd68   :  { %v7418_v31 = vsel %vm1039_vm9, %v7388_v17, 0.0 }
 0xd69   :  { %7419 = vadd.xlane.f32.xlu2 %v7418_v31 }
 0xd88   :  { %v7399_v24 = vpop.xlane.xlu0 %7398 }
 0xd89   :  { %v7429_v47 = vperm.slane %v7399_v24, 0  ;;  %v7430_v62 = vperm.slane %v7399_v24, 1 }
 0xd8b   :  { %9892 = vrcp.f32 %v7429_v47  ;;  %v7470_v18 = vand.u32 2147483647, %v7429_v47  ;;  %v7472_v7 = vand.u32 2147483648, %v7429_v47  ;;  %v7485_v61 = vand.u32 2147483647, %v7430_v62 }
 0xd8c   :  { %9894 = vrcp.f32 %v7430_v62  ;;  %v7402_v55 = vpop.xlane.xlu2 %7401  ;;  %v7487_v12 = vand.u32 2147483648, %v7430_v62  ;;  %vm7466_vm10 = vweird.f32 %v7429_v47  ;;  %vm7481_vm2 = vweird.f32 %v7430_v62 }
 0xd8d   :  { %v15742_v6 = vperm.slane %v7402_v55, 0  ;;  %v15744_v0 = vperm.slane %v7402_v55, 1  ;;  %vm15749_vm11 = vcmp.eq.f32.partialorder %v7470_v18, 8.507059e+37  ;;  %v7473_v23 = vor.u32 1.1754944e-38, %v7472_v7 }
 0xd8e   :  { %vm15754_vm12 = vcmp.eq.f32.partialorder %v7485_v61, 8.507059e+37  ;;  %v7488_v4 = vor.u32 1.1754944e-38, %v7487_v12 }
 0xd8f   :  { %9896 = vrcp.f32 %v15742_v6  ;;  %v7502_v2 = vand.u32 2147483648, %v15742_v6  ;;  %v7500_v28 = vand.u32 2147483647, %v15742_v6  ;;  %vm7496_vm3 = vweird.f32 %v15742_v6 }
 0xd90   :  { %9898 = vrcp.f32 %v15744_v0  ;;  %vm7511_vm6 = vweird.f32 %v15744_v0  ;;  %v7515_v12 = vand.u32 2147483647, %v15744_v0 }
 0xd91   :  { %v9893_v60 = vpop.eup %9892  ;;  %v7503_v42 = vor.u32 1.1754944e-38, %v7502_v2  ;;  %vm15768_vm0 = vcmp.eq.f32.partialorder %v7500_v28, 8.507059e+37 }
 0xd92   :  { %v9895_v49 = vpop.eup %9894  ;;  %v7462_v10 = vmul.f32 %v9893_v60, %v7429_v47  ;;  %vm7467_vm14 = vweird.f32 %v9893_v60 }
 0xd93   :  { %v7477_v5 = vmul.f32 %v9895_v49, %v7430_v62  ;;  %vm7482_vm15 = vweird.f32 %v9895_v49  ;;  %vm7468_vm7 = vmor %vm7466_vm10, %vm7467_vm14 }
 0xd94   :  { %v7463_v27 = vsub.f32 1.0, %v7462_v10  ;;  %v7405_v63 = vpop.xlane.xlu1 %7404  ;;  %vm7483_vm4 = vmor %vm7481_vm2, %vm7482_vm15  ;;  %vm15812_vm2 = vcmp.eq.f32.partialorder %v7515_v12, 8.507059e+37 }
 0xd95   :  { %v7411_v35 = vpop.xlane.xlu2 %7410  ;;  %v9897_v25 = vpop.eup %9896  ;;  %v7478_v32 = vsub.f32 1.0, %v7477_v5  ;;  %v15763_v48 = vperm.slane %v7405_v63, 0  ;;  %v15766_v24 = vperm.slane %v7405_v63, 1  ;;  %v7517_v5 = vand.u32 2147483648, %v15744_v0 }
 0xd96   :  { %v15759_v37 = vperm.slane %v7411_v35, 0  ;;  %v15761_v29 = vperm.slane %v7411_v35, 1  ;;  %v9899_v17 = vpop.eup %9898  ;;  %v7492_v31 = vmul.f32 %v9897_v25, %v15742_v6  ;;  %v7464_v55 = vmul.f32 %v9893_v60, %v7463_v27 }
 0xd97   :  { %v7507_v7 = vmul.f32 %v9899_v17, %v15744_v0  ;;  %v7479_v61 = vmul.f32 %v9895_v49, %v7478_v32  ;;  %vm7497_vm1 = vweird.f32 %v9897_v25  ;;  %vm7512_vm13 = vweird.f32 %v9899_v17 }
 0xd98   :  { %9900 = vrcp.f32 %v15759_v37  ;;  %v7493_v2 = vsub.f32 1.0, %v7492_v31  ;;  %v7465_v10 = vadd.f32 %v9893_v60, %v7464_v55  ;;  %vm7498_vm10 = vmor %vm7496_vm3, %vm7497_vm1  ;;  %v7518_v6 = vor.u32 1.1754944e-38, %v7517_v5 }
 0xd99   :  { %9902 = vrcp.f32 %v15761_v29  ;;  %v7508_v27 = vsub.f32 1.0, %v7507_v7  ;;  %v7480_v28 = vadd.f32 %v9895_v49, %v7479_v61  ;;  %v7545_v7 = vand.u32 2147483647, %v15766_v24 }
 0xd9a   :  { %9904 = vrcp.f32 %v15763_v48  ;;  %v7469_v35 = vsel %vm7468_vm7, %v9893_v60, %v7465_v10  ;;  %v7494_v63 = vmul.f32 %v9897_v25, %v7493_v2  ;;  %v7547_v60 = vand.u32 2147483648, %v15766_v24 }
 0xd9b   :  { %9906 = vrcp.f32 %v15766_v24  ;;  %v7474_v32 = vsel %vm15749_vm11, %v7473_v23, %v7469_v35  ;;  %v7484_v31 = vsel %vm7483_vm4, %v9895_v49, %v7480_v28  ;;  %v7509_v55 = vmul.f32 %v9899_v17, %v7508_v27  ;;  %vm15808_vm11 = vmor %vm7511_vm6, %vm7512_vm13 }
 0xd9c   :  { %v7408_v51 = vpop.xlane.xlu0 %7407  ;;  %v7475_v47 = vmul.f32 %v15405_v33, %v7474_v32  ;;  %v7489_v61 = vsel %vm15754_vm12, %v7488_v4, %v7484_v31  ;;  %v7495_v19 = vadd.f32 %v9897_v25, %v7494_v63  ;;  %vm7541_vm12 = vweird.f32 %v15766_v24 }
 0xd9d   :  { %v15793_v2 = vperm.slane %v7408_v51, 0  ;;  %v15795_v10 = vperm.slane %v7408_v51, 1  ;;  %v7490_v49 = vmul.f32 %v15615_v50, %v7489_v61  ;;  %v7510_v13 = vadd.f32 %v9899_v17, %v7509_v55 }
 0xd9e   :  { %v15791_v62 = vpop.eup %9900  ;;  %7703 = vperm.xlu1 %9437, %v7475_v47   ;;  %v7499_v15 = vsel %vm7498_vm10, %v9897_v25, %v7495_v19  ;;  %vm15830_vm14 = vcmp.eq.f32.partialorder %v7545_v7, 8.507059e+37  ;;  %vm7526_vm3 = vweird.f32 %v15763_v48  ;;  %v7530_v61 = vand.u32 2147483647, %v15763_v48 }
 0xd9f   :  { %v15801_v33 = vpop.eup %9902  ;;  %v7582_v23 = vmul.f32 %v15791_v62, %v15759_v37  ;;  %9908 = vrcp.f32 %v15793_v2  ;;  %7708 = vperm.xlu0 %9436, %v7490_v49   ;;  %v7504_v19 = vsel %vm15768_vm0, %v7503_v42, %v7499_v15  ;;  %v7514_v0 = vsel %vm15808_vm11, %v9899_v17, %v7510_v13 }
 0xda0   :  { %v9905_v4 = vpop.eup %9904  ;;  %v7597_v27 = vmul.f32 %v15801_v33, %v15761_v29  ;;  %9910 = vrcp.f32 %v15795_v10  ;;  %v7505_v5 = vmul.f32 %v15600_v21, %v7504_v19  ;;  %v7519_v18 = vsel %vm15812_vm2, %v7518_v6, %v7514_v0 }
 0xda1   :  { %v9907_v25 = vpop.eup %9906  ;;  %v7583_v12 = vsub.f32 1.0, %v7582_v23  ;;  %v7522_v28 = vmul.f32 %v9905_v4, %v15763_v48  ;;  %v7548_v17 = vor.u32 1.1754944e-38, %v7547_v60  ;;  %v7520_v55 = vmul.f32 %v15453_v52, %v7519_v18 }
 0xda2   :  { %v7598_v35 = vsub.f32 1.0, %v7597_v27  ;;  %v7537_v63 = vmul.f32 %v9907_v25, %v15766_v24  ;;  %7713 = vperm.xlu2 %9435, %v7505_v5   ;;  %vm7542_vm15 = vweird.f32 %v9907_v25  ;;  %vm7527_vm0 = vweird.f32 %v9905_v4 }
 0xda3   :  { %v7584_v32 = vmul.f32 %v15791_v62, %v7583_v12  ;;  %v7523_v31 = vsub.f32 1.0, %v7522_v28  ;;  %v7532_v60 = vand.u32 2147483648, %v15763_v48  ;;  %vm7556_vm6 = vweird.f32 %v15793_v2  ;;  %vm7528_vm1 = vmor %vm7526_vm3, %vm7527_vm0 }
 0xda4   :  { %v15837_v21 = vmul.f32 %v15801_v33, %v7598_v35  ;;  %v7538_v47 = vsub.f32 1.0, %v7537_v63  ;;  %v7414_v49 = vpop.xlane.xlu1 %7413  ;;  %v7560_v51 = vand.u32 2147483647, %v15793_v2  ;;  %vm7531_vm7 = vcmp.eq.f32.partialorder %v7530_v61, 8.507059e+37  ;;  %vm7543_vm13 = vmor %vm7541_vm12, %vm7542_vm15 }
 0xda5   :  { %v7524_v7 = vmul.f32 %v9905_v4, %v7523_v31  ;;  %v9909_v13 = vpop.eup %9908  ;;  %v15843_v15 = vperm.slane %v7414_v49, 0  ;;  %v15845_v52 = vperm.slane %v7414_v49, 1  ;;  %v7533_v19 = vor.u32 1.1754944e-38, %v7532_v60 }
 0xda6   :  { %v7539_v23 = vmul.f32 %v9907_v25, %v7538_v47  ;;  %v15848_v50 = vpop.eup %9910  ;;  %v7552_v6 = vmul.f32 %v9909_v13, %v15793_v2  ;;  %vm7557_vm4 = vweird.f32 %v9909_v13  ;;  %v7562_v35 = vand.u32 2147483648, %v15793_v2 }
 0xda7   :  { %v7525_v27 = vadd.f32 %v9905_v4, %v7524_v7  ;;  %v7567_v0 = vmul.f32 %v15848_v50, %v15795_v10  ;;  %9912 = vrcp.f32 %v15843_v15  ;;  %7718 = vperm.xlu0 %9436, %v7520_v55   ;;  %v7585_v55 = vadd.f32 %v15791_v62, %v7584_v32 }
 0xda8   :  { %v7540_v12 = vadd.f32 %v9907_v25, %v7539_v23  ;;  %v7553_v28 = vsub.f32 1.0, %v7552_v6  ;;  %9914 = vrcp.f32 %v15845_v52  ;;  %vm15866_vm10 = vcmp.eq.f32.partialorder %v7560_v51, 8.507059e+37 }
 0xda9   :  { %v7529_v5 = vsel %vm7528_vm1, %v9905_v4, %v7525_v27  ;;  %v7568_v63 = vsub.f32 1.0, %v7567_v0  ;;  %vm7586_vm11 = vweird.f32 %v15759_v37  ;;  %vm7587_vm2 = vweird.f32 %v15791_v62 }
 0xdaa   :  { %v7544_v18 = vsel %vm7543_vm13, %v9907_v25, %v7540_v12  ;;  %v7534_v31 = vsel %vm7531_vm7, %v7533_v19, %v7529_v5  ;;  %v7554_v61 = vmul.f32 %v9909_v13, %v7553_v28  ;;  %v7590_v4 = vand.u32 2147483647, %v15759_v37  ;;  %vm15874_vm12 = vmor %vm7586_vm11, %vm7587_vm2 }
 0xdab   :  { %v7549_v48 = vsel %vm15830_vm14, %v7548_v17, %v7544_v18  ;;  %v7535_v47 = vmul.f32 %v15620_v39, %v7534_v31  ;;  %v7563_v32 = vor.u32 1.1754944e-38, %v7562_v35  ;;  %v7592_v39 = vand.u32 2147483648, %v15759_v37  ;;  %vm7558_vm14 = vmor %vm7556_vm6, %vm7557_vm4 }
 0xdac   :  { %v7550_v24 = vmul.f32 %v15635_v16, %v7549_v48  ;;  %v7555_v25 = vadd.f32 %v9909_v13, %v7554_v61  ;;  %v7569_v17 = vmul.f32 %v15848_v50, %v7568_v63  ;;  %v7589_v16 = vsel %vm15874_vm12, %v15791_v62, %v7585_v55 }
 0xdad   :  { %7723 = vperm.xlu1 %9437, %v7535_v47   ;;  %v15880_v49 = vpop.eup %9912  ;;  %vm7571_vm15 = vweird.f32 %v15795_v10  ;;  %vm7572_vm3 = vweird.f32 %v15848_v50  ;;  %v7575_v60 = vand.u32 2147483647, %v15795_v10  ;;  %v7593_v6 = vor.u32 1.1754944e-38, %v7592_v39 }
 0xdae   :  { %7728 = vperm.xlu2 %9435, %v7550_v24   ;;  %v9915_v37 = vpop.eup %9914  ;;  %v7612_v23 = vmul.f32 %v15880_v49, %v15843_v15  ;;  %v7559_v51 = vsel %vm7558_vm14, %v9909_v13, %v7555_v25  ;;  %v7570_v27 = vadd.f32 %v15848_v50, %v7569_v17  ;;  %vm7591_vm0 = vcmp.eq.f32.partialorder %v7590_v4, 8.507059e+37  ;;  %vm15897_vm6 = vmor %vm7571_vm15, %vm7572_vm3 }
 0xdaf   :  { %v7627_v2 = vmul.f32 %v9915_v37, %v15845_v52  ;;  %v7564_v19 = vsel %vm15866_vm10, %v7563_v32, %v7559_v51  ;;  %v7577_v0 = vand.u32 2147483648, %v15795_v10  ;;  %v7594_v5 = vsel %vm7591_vm0, %v7593_v6, %v7589_v16 }
 0xdb0   :  { %v7613_v12 = vsub.f32 1.0, %v7612_v23  ;;  %v7565_v28 = vmul.f32 %v15498_v22, %v7564_v19  ;;  %v7574_v13 = vsel %vm15897_vm6, %v15848_v50, %v7570_v27  ;;  %vm7576_vm7 = vcmp.eq.f32.partialorder %v7575_v60, 8.507059e+37 }
 0xdb1   :  { %v7628_v35 = vsub.f32 1.0, %v7627_v2  ;;  %v7578_v63 = vor.u32 1.1754944e-38, %v7577_v0  ;;  %v7600_v18 = vadd.f32 %v15801_v33, %v15837_v21  ;;  %vm7601_vm1 = vweird.f32 %v15761_v29 }
 0xdb2   :  { %v7614_v31 = vmul.f32 %v15880_v49, %v7613_v12  ;;  %7733 = vperm.xlu0 %9436, %v7565_v28   ;;  %vm7602_vm4 = vweird.f32 %v15801_v33  ;;  %v7605_v22 = vand.u32 2147483647, %v15761_v29  ;;  %v7595_v55 = vmul.f32 %v15649_v54, %v7594_v5 }
 0xdb3   :  { %v7629_v10 = vmul.f32 %v9915_v37, %v7628_v35  ;;  %v7579_v48 = vsel %vm7576_vm7, %v7578_v63, %v7574_v13  ;;  %vm15913_vm13 = vmor %vm7601_vm1, %vm7602_vm4  ;;  %v7607_v47 = vand.u32 2147483648, %v15761_v29  ;;  %vm7631_vm10 = vweird.f32 %v15845_v52 }
 0xdb4   :  { %v7580_v21 = vmul.f32 %v15640_v41, %v7579_v48  ;;  %v7604_v61 = vsel %vm15913_vm13, %v15801_v33, %v7600_v18  ;;  %vm7632_vm11 = vweird.f32 %v9915_v37  ;;  %v7635_v54 = vand.u32 2147483647, %v15845_v52 }
 0xdb5   :  { %v7608_v7 = vor.u32 1.1754944e-38, %v7607_v47  ;;  %v7630_v24 = vadd.f32 %v9915_v37, %v7629_v10  ;;  %v7637_v4 = vand.u32 2147483648, %v15845_v52  ;;  %vm7606_vm2 = vcmp.eq.f32.partialorder %v7605_v22, 8.507059e+37  ;;  %vm7633_vm12 = vmor %vm7631_vm10, %vm7632_vm11 }
 0xdb6   :  { %7743 = vperm.xlu2 %9435, %v7595_v55   ;;  %7738 = vperm.xlu1 %9437, %v7580_v21   ;;  %v7615_v29 = vadd.f32 %v15880_v49, %v7614_v31  ;;  %vm7616_vm14 = vweird.f32 %v15843_v15  ;;  %vm7617_vm15 = vweird.f32 %v15880_v49  ;;  %v7620_v32 = vand.u32 2147483647, %v15843_v15 }
 0xdb7   :  { %v7609_v41 = vsel %vm7606_vm2, %v7608_v7, %v7604_v61  ;;  %v7634_v33 = vsel %vm7633_vm12, %v9915_v37, %v7630_v24  ;;  %v7638_v25 = vor.u32 1.1754944e-38, %v7637_v4  ;;  %vm7636_vm3 = vcmp.eq.f32.partialorder %v7635_v54, 8.507059e+37  ;;  %vm7618_vm0 = vmor %vm7616_vm14, %vm7617_vm15 }
 0xdb8   :  { %v7610_v42 = vmul.f32 %v15536_v20, %v7609_v41  ;;  %v7622_v52 = vand.u32 2147483648, %v15843_v15  ;;  %v7619_v17 = vsel %vm7618_vm0, %v15880_v49, %v7615_v29  ;;  %vm7621_vm6 = vcmp.eq.f32.partialorder %v7620_v32, 8.507059e+37 }
 0xdb9   :  { %v7639_v39 = vsel %vm7636_vm3, %v7638_v25, %v7634_v33 }
 0xdba   :  { %7748 = vperm.xlu0 %9436, %v7610_v42   ;;  %v7640_v16 = vmul.f32 %v15656_v45, %v7639_v39  ;;  %v7623_v60 = vor.u32 1.1754944e-38, %v7622_v52 }
 0xdbc   :  { %v7624_v23 = vsel %vm7621_vm6, %v7623_v60, %v7619_v17 }
 0xdbd   :  { %v7625_v37 = vmul.f32 %v15651_v14, %v7624_v23 }
 0xdbe   :  { %7758 = vperm.xlu2 %9435, %v7640_v16  }
 0xdbf   :  { %7753 = vperm.xlu1 %9437, %v7625_v37  }
 0xdd5   :  { %v7417_v51 = vpop.xlane.xlu0 %7416 }
 0xdd6   :  { %v7441_v6 = vperm.slane %v7417_v51, 0  ;;  %v7442_v20 = vperm.slane %v7417_v51, 1 }
 0xdd8   :  { %9916 = vrcp.f32 %v7441_v6  ;;  %v7650_v28 = vand.u32 2147483647, %v7441_v6  ;;  %v7652_v5 = vand.u32 2147483648, %v7441_v6  ;;  %v7665_v13 = vand.u32 2147483647, %v7442_v20 }
 0xdd9   :  { %9918 = vrcp.f32 %v7442_v20  ;;  %v7667_v35 = vand.u32 2147483648, %v7442_v20  ;;  %vm7646_vm4 = vweird.f32 %v7441_v6  ;;  %vm7661_vm13 = vweird.f32 %v7442_v20 }
 0xdda   :  { %vm7651_vm11 = vcmp.eq.f32.partialorder %v7650_v28, 8.507059e+37  ;;  %v7653_v55 = vor.u32 1.1754944e-38, %v7652_v5  ;;  %vm7666_vm12 = vcmp.eq.f32.partialorder %v7665_v13, 8.507059e+37  ;;  %v18156_v28 = vld [vmem:[#allocation79_spill] sm:$0xff] }
 0xddb   :  { %v7668_v21 = vor.u32 1.1754944e-38, %v7667_v35  ;;  %v18158_v35 = vld [vmem:[#allocation86_spill] sm:$0xff] }
 0xddc   :  { %v7420_v27 = vpop.xlane.xlu2 %7419 }
 0xddd   :  { %v7443_v15 = vperm.slane %v7420_v27, 0  ;;  %v7444_v2 = vperm.slane %v7420_v27, 1 }
 0xdde   :  { %v9917_v19 = vpop.eup %9916 }
 0xddf   :  { %v9919_v49 = vpop.eup %9918  ;;  %v7642_v62 = vmul.f32 %v9917_v19, %v7441_v6  ;;  %9920 = vrcp.f32 %v7443_v15  ;;  %vm7647_vm7 = vweird.f32 %v9917_v19  ;;  %v7697_v54 = vand.u32 2147483648, %v7444_v2 }
 0xde0   :  { %v7657_v45 = vmul.f32 %v9919_v49, %v7442_v20  ;;  %9922 = vrcp.f32 %v7444_v2  ;;  %vm7662_vm1 = vweird.f32 %v9919_v49  ;;  %vm7648_vm10 = vmor %vm7646_vm4, %vm7647_vm7  ;;  %v7682_v33 = vand.u32 2147483648, %v7443_v15 }
 0xde1   :  { %v7643_v0 = vsub.f32 1.0, %v7642_v62  ;;  %vm7663_vm2 = vmor %vm7661_vm13, %vm7662_vm1  ;;  %v7680_v42 = vand.u32 2147483647, %v7443_v15  ;;  %v7695_v39 = vand.u32 2147483647, %v7444_v2  ;;  %vm7676_vm3 = vweird.f32 %v7443_v15 }
 0xde2   :  { %v7658_v12 = vsub.f32 1.0, %v7657_v45  ;;  %vm7691_vm0 = vweird.f32 %v7444_v2  ;;  %v7683_v60 = vor.u32 1.1754944e-38, %v7682_v33  ;;  %v18163_v33 = vld [vmem:[#allocation74_spill] sm:$0xff] }
 0xde3   :  { %v7644_v14 = vmul.f32 %v9917_v19, %v7643_v0  ;;  %vm7681_vm1 = vcmp.eq.f32.partialorder %v7680_v42, 8.507059e+37  ;;  %vm7696_vm4 = vcmp.eq.f32.partialorder %v7695_v39, 8.507059e+37  ;;  %v18164_v42 = vld [vmem:[#allocation29_spill] sm:$0xff]  ;;  %v18165_v39 = vld [vmem:[#allocation80_spill] sm:$0xff] }
 0xde4   :  { %v7659_v63 = vmul.f32 %v9919_v49, %v7658_v12 }
 0xde5   :  { %v9921_v18 = vpop.eup %9920  ;;  %v7645_v31 = vadd.f32 %v9917_v19, %v7644_v14  ;;  %v18157_v14 = vld [vmem:[#allocation81_spill] sm:$0xff] }
 0xde6   :  { %v9923_v22 = vpop.eup %9922  ;;  %v7672_v10 = vmul.f32 %v9921_v18, %v7443_v15  ;;  %v7660_v48 = vadd.f32 %v9919_v49, %v7659_v63  ;;  %vm7677_vm14 = vweird.f32 %v9921_v18 }
 0xde7   :  { %v7687_v50 = vmul.f32 %v9923_v22, %v7444_v2  ;;  %v7649_v47 = vsel %vm7648_vm10, %v9917_v19, %v7645_v31  ;;  %vm7692_vm15 = vweird.f32 %v9923_v22  ;;  %vm7678_vm6 = vmor %vm7676_vm3, %vm7677_vm14  ;;  %v18160_v31 = vld [vmem:[#allocation76_spill] sm:$0xff] }
 0xde8   :  { %v7673_v61 = vsub.f32 1.0, %v7672_v10  ;;  %v7654_v7 = vsel %vm7651_vm11, %v7653_v55, %v7649_v47  ;;  %v7664_v24 = vsel %vm7663_vm2, %v9919_v49, %v7660_v48  ;;  %vm7693_vm7 = vmor %vm7691_vm0, %vm7692_vm15  ;;  %v18161_v48 = vld [vmem:[#allocation121_spill] sm:$0xff] }
 0xde9   :  { %v7688_v4 = vsub.f32 1.0, %v7687_v50  ;;  %v7655_v29 = vmul.f32 %v15667_v3, %v7654_v7  ;;  %v7669_v41 = vsel %vm7666_vm12, %v7668_v21, %v7664_v24  ;;  %v7698_v3 = vor.u32 1.1754944e-38, %v7697_v54 }
 0xdea   :  { %v7674_v25 = vmul.f32 %v9921_v18, %v7673_v61  ;;  %v7670_v32 = vmul.f32 %v15669_v9, %v7669_v41 }
 0xdeb   :  { %v7689_v52 = vmul.f32 %v9923_v22, %v7688_v4  ;;  %7763 = vperm.xlu0 %9436, %v7655_v29   ;;  %v18162_v4 = vld [vmem:[#allocation120_spill] sm:$0xff] }
 0xdec   :  { %7768 = vperm.xlu1 %9437, %v7670_v32   ;;  %v7675_v17 = vadd.f32 %v9921_v18, %v7674_v25 }
 0xded   :  { %v7690_v16 = vadd.f32 %v9923_v22, %v7689_v52 }
 0xdee   :  { %v7679_v23 = vsel %vm7678_vm6, %v9921_v18, %v7675_v17 }
 0xdef   :  { %v7694_v37 = vsel %vm7693_vm7, %v9923_v22, %v7690_v16  ;;  %v7684_v9 = vsel %vm7681_vm1, %v7683_v60, %v7679_v23 }
 0xdf0   :  { %v7699_v51 = vsel %vm7696_vm4, %v7698_v3, %v7694_v37  ;;  %v7685_v6 = vmul.f32 %v15661_v40, %v7684_v9  ;;  %v18166_v3 = vld [vmem:[#allocation106_spill] sm:$0xff] }
 0xdf1   :  { %v7700_v20 = vmul.f32 %v15673_v36, %v7699_v51  ;;  %v18159_v36 = vld [vmem:[#allocation110_spill] sm:$0xff] }
 0xdf2   :  { %7773 = vperm.xlu2 %9435, %v7685_v6  }
 0xdf3   :  { %7778 = vperm.xlu0 %9436, %v7700_v20  }
 0xdfc   :  { %v7714_v27 = vpop.permute.xlu2 %7713 }
 0xdfd   :  { %v7783_v13 = vmul.f32 %v7714_v27, %v18157_v14 }
 0xdff   :  { %v7798_v55 = vsel %vm875_vm5, %v7783_v13, 0.0 }
 0xe08   :  { %v7729_v2 = vpop.permute.xlu2 %7728 }
 0xe09   :  { %v7786_v29 = vmul.f32 %v7729_v2, %v18162_v4 }
 0xe0b   :  { %v7815_v9 = vsel %vm875_vm5, %v7786_v29, 0.0 }
 0xe10   :  { %v7704_v19 = vpop.permute.xlu1 %7703  ;;  %v7744_v45 = vpop.permute.xlu2 %7743 }
 0xe11   :  { %v7709_v15 = vpop.permute.xlu0 %7708  ;;  %v7781_v5 = vmul.f32 %v7704_v19, %v18156_v28  ;;  %v7789_v25 = vmul.f32 %v7744_v45, %v18163_v33  ;;  %v18168_v45 = vld [vmem:[#allocation102_spill] sm:$0xff] }
 0xe12   :  { %v7782_v50 = vmul.f32 %v7709_v15, %v18161_v48 }
 0xe13   :  { %v7797_v40 = vsel %vm875_vm5, %v7781_v5, 0.0  ;;  %v7804_v51 = vsel %vm875_vm5, %v7789_v25, 0.0 }
 0xe14   :  { %v7799_v21 = vadd.f32 %v7798_v55, %v7797_v40  ;;  %v7812_v32 = vsel %vm875_vm5, %v7782_v50, 0.0 }
 0xe18   :  { %v7759_v10 = vpop.permute.xlu2 %7758 }
 0xe19   :  { %v7719_v62 = vpop.permute.xlu0 %7718 }
 0xe1a   :  { %v7784_v18 = vmul.f32 %v7719_v62, %v18159_v36 }
 0xe1c   :  { %v7813_v24 = vsel %vm875_vm5, %v7784_v18, 0.0 }
 0xe1d   :  { %v7814_v16 = vadd.f32 %v7813_v24, %v7812_v32 }
 0xe1f   :  { %v7724_v49 = vpop.permute.xlu1 %7723  ;;  %v7816_v27 = vadd.f32 %v7815_v9, %v7814_v16 }
 0xe20   :  { %v7785_v63 = vmul.f32 %v7724_v49, %v18158_v35  ;;  %v18167_v49 = vld [vmem:[#allocation105_spill] sm:$0xff] }
 0xe22   :  { %v7800_v47 = vsel %vm875_vm5, %v7785_v63, 0.0  ;;  %v18169_v63 = vld [vmem:[#allocation95_spill] sm:$0xff] }
 0xe23   :  { %v7801_v41 = vadd.f32 %v7800_v47, %v7799_v21  ;;  %v7792_v40 = vmul.f32 %v7759_v10, %v18169_v63 }
 0xe24   :  { %v7734_v0 = vpop.permute.xlu0 %7733 }
 0xe25   :  { %v7787_v22 = vmul.f32 %v7734_v0, %v18160_v31 }
 0xe27   :  { %v7802_v54 = vsel %vm875_vm5, %v7787_v22, 0.0  ;;  %v18170_v22 = vld [vmem:[#allocation104_spill] sm:$0xff] }
 0xe28   :  { %v7739_v12 = vpop.permute.xlu1 %7738  ;;  %v7803_v60 = vadd.f32 %v7802_v54, %v7801_v41  ;;  %v18171_v41 = vld [vmem:[#allocation109_spill] sm:$0xff] }
 0xe29   :  { %v7788_v52 = vmul.f32 %v7739_v12, %v18164_v42 }
 0xe2a   :  { %v7805_v15 = vadd.f32 %v7804_v51, %v7803_v60 }
 0xe2b   :  { %v7817_v6 = vsel %vm875_vm5, %v7788_v52, 0.0 }
 0xe2c   :  { %v7749_v61 = vpop.permute.xlu0 %7748  ;;  %v7818_v5 = vadd.f32 %v7817_v6, %v7816_v27 }
 0xe2d   :  { %v7790_v23 = vmul.f32 %v7749_v61, %v18166_v3 }
 0xe2f   :  { %v7819_v2 = vsel %vm875_vm5, %v7790_v23, 0.0 }
 0xe30   :  { %v7820_v50 = vadd.f32 %v7819_v2, %v7818_v5 }
 0xe31   :  { %v7754_v7 = vpop.permute.xlu1 %7753 }
 0xe32   :  { %v7791_v17 = vmul.f32 %v7754_v7, %v18165_v39  ;;  %v7821_v7 = vsel %vm875_vm5, %v7792_v40, 0.0 }
 0xe33   :  { %v7822_v54 = vadd.f32 %v7821_v7, %v7820_v50 }
 0xe34   :  { %v7806_v20 = vsel %vm875_vm5, %v7791_v17, 0.0 }
 0xe35   :  { %v7807_v13 = vadd.f32 %v7806_v20, %v7805_v15 }
 0xe4c   :  { %v7774_v37 = vpop.permute.xlu2 %7773 }
 0xe4d   :  { %v7795_v62 = vmul.f32 %v7774_v37, %v18167_v49 }
 0xe4f   :  { %v7810_v21 = vsel %vm875_vm5, %v7795_v62, 0.0 }
 0xe5d   :  { %v7764_v19 = vpop.permute.xlu0 %7763 }
 0xe5e   :  { %v7793_v0 = vmul.f32 %v7764_v19, %v18168_v45  ;;  %v7769_v12 = vpop.permute.xlu1 %7768 }
 0xe5f   :  { %v7794_v55 = vmul.f32 %v7769_v12, %v18170_v22 }
 0xe60   :  { %v7808_v18 = vsel %vm875_vm5, %v7793_v0, 0.0 }
 0xe61   :  { %v7809_v47 = vadd.f32 %v7808_v18, %v7807_v13  ;;  %v7823_v24 = vsel %vm875_vm5, %v7794_v55, 0.0 }
 0xe62   :  { %v7824_v32 = vadd.f32 %v7823_v24, %v7822_v54 }
 0xe63   :  { %v7811_v61 = vadd.f32 %v7810_v21, %v7809_v47 }
 0xe65   :  { %9924 = vtanh.f32 %v7811_v61  ;;  %v7779_v29 = vpop.permute.xlu0 %7778 }
 0xe66   :  { %v7796_v25 = vmul.f32 %v7779_v29, %v18171_v41 }
 0xe68   :  { %v7825_v10 = vsel %vm875_vm5, %v7796_v25, 0.0 }
 0xe69   :  { %v7826_v52 = vadd.f32 %v7825_v10, %v7824_v32 }
 0xe6b   :  { %v9925_v17 = vpop.eup %9924  ;;  %9926 = vtanh.f32 %v7826_v52 }
 0xe6c   :  { %v7831_v16 = vmul.f32 %v9925_v17, %v18157_v14  ;;  %v7829_v60 = vmul.f32 %v9925_v17, %v18156_v28  ;;  %v7833_v2 = vmul.f32 %v9925_v17, %v18158_v35  ;;  %v7837_v62 = vmul.f32 %v9925_v17, %v18163_v33 }
 0xe6d   :  { %v7835_v0 = vmul.f32 %v9925_v17, %v18160_v31  ;;  %v7839_v61 = vmul.f32 %v9925_v17, %v18165_v39  ;;  %v7843_v7 = vmul.f32 %v9925_v17, %v18167_v49  ;;  %v7841_v24 = vmul.f32 %v9925_v17, %v18168_v45 }
 0xe6e   :  { %v7851_v23 = vsel %vm875_vm5, %v7831_v16, 0.0  ;;  %v7845_v37 = vsel %vm875_vm5, %v7829_v60, 0.0  ;;  %v7857_v12 = vsel %vm875_vm5, %v7833_v2, 0.0  ;;  %v7869_v5 = vsel %vm875_vm5, %v7837_v62, 0.0 }
 0xe6f   :  { %7852 = vadd.xlane.f32.xlu0 %v7851_v23  ;;  %7846 = vadd.xlane.f32.xlu1 %v7845_v37  ;;  %v7863_v13 = vsel %vm875_vm5, %v7835_v0, 0.0  ;;  %v7875_v54 = vsel %vm875_vm5, %v7839_v61, 0.0  ;;  %v7887_v29 = vsel %vm875_vm5, %v7843_v7, 0.0  ;;  %v7881_v25 = vsel %vm875_vm5, %v7841_v24, 0.0 }
 0xe71   :  { %v9927_v9 = vpop.eup %9926 }
 0xe72   :  { %v7830_v51 = vmul.f32 %v9927_v9, %v18161_v48  ;;  %v7834_v6 = vmul.f32 %v9927_v9, %v18162_v4  ;;  %v7832_v20 = vmul.f32 %v9927_v9, %v18159_v36  ;;  %v7836_v40 = vmul.f32 %v9927_v9, %v18164_v42 }
 0xe73   :  { %v7840_v18 = vmul.f32 %v9927_v9, %v18169_v63  ;;  %v7838_v55 = vmul.f32 %v9927_v9, %v18166_v3  ;;  %v7842_v32 = vmul.f32 %v9927_v9, %v18170_v22  ;;  %v7844_v10 = vmul.f32 %v9927_v9, %v18171_v41 }
 0xe74   :  { %v7848_v27 = vsel %vm875_vm5, %v7830_v51, 0.0  ;;  %v7860_v15 = vsel %vm875_vm5, %v7834_v6, 0.0  ;;  %v7854_v19 = vsel %vm875_vm5, %v7832_v20, 0.0  ;;  %v7866_v50 = vsel %vm875_vm5, %v7836_v40, 0.0 }
 0xe75   :  { %7849 = vadd.xlane.f32.xlu2 %v7848_v27  ;;  %v7878_v47 = vsel %vm875_vm5, %v7840_v18, 0.0  ;;  %v7872_v21 = vsel %vm875_vm5, %v7838_v55, 0.0  ;;  %v7884_v52 = vsel %vm875_vm5, %v7842_v32, 0.0  ;;  %v7890_v16 = vsel %vm875_vm5, %v7844_v10, 0.0 }
 0xe77   :  { %7861 = vadd.xlane.f32.xlu0 %v7860_v15  ;;  %7855 = vadd.xlane.f32.xlu1 %v7854_v19 }
 0xe7d   :  { %7858 = vadd.xlane.f32.xlu2 %v7857_v12 }
 0xe7f   :  { %7870 = vadd.xlane.f32.xlu0 %v7869_v5  ;;  %7864 = vadd.xlane.f32.xlu1 %v7863_v13 }
 0xe85   :  { %7867 = vadd.xlane.f32.xlu2 %v7866_v50 }
 0xe87   :  { %7879 = vadd.xlane.f32.xlu0 %v7878_v47  ;;  %7873 = vadd.xlane.f32.xlu1 %v7872_v21 }
 0xe8d   :  { %7876 = vadd.xlane.f32.xlu2 %v7875_v54 }
 0xe8f   :  { %7888 = vadd.xlane.f32.xlu0 %v7887_v29  ;;  %7882 = vadd.xlane.f32.xlu1 %v7881_v25 }
 0xe95   :  { %7885 = vadd.xlane.f32.xlu2 %v7884_v52 }
 0xe97   :  { %7891 = vadd.xlane.f32.xlu1 %v7890_v16 }
 0xee2   :  { %v7853_v17 = vpop.xlane.xlu0 %7852  ;;  %v7847_v60 = vpop.xlane.xlu1 %7846 }
 0xee3   :  { %v16003_v23 = vadd.f32 %v7847_v60, %v18069_v11  ;;  %v16006_v51 = vadd.f32 %v7853_v17, %v18093_v58 }
 0xee5   :  { %18172 = vst [vmem:[#allocation99_spill] sm:$0xff] %v16006_v51  ;;  %v7925_v27 = vperm.slane %v16003_v23, %v18065_v59  ;;  %v7927_v11 = vperm.slane %v16006_v51, %v18065_v59 }
 0xee8   :  { %v7850_v37 = vpop.xlane.xlu2 %7849 }
 0xee9   :  { %v16009_v6 = vadd.f32 %v7850_v37, %v18096_v46 }
 0xeea   :  { %v7862_v20 = vpop.xlane.xlu0 %7861  ;;  %v7856_v9 = vpop.xlane.xlu1 %7855 }
 0xeeb   :  { %18173 = vst [vmem:[#allocation125_spill] sm:$0xff] %v16009_v6  ;;  %v7926_v15 = vperm.slane %v16009_v6, %v18065_v59  ;;  %v16016_v19 = vadd.f32 %v7856_v9, %v18071_v30  ;;  %v16025_v62 = vadd.f32 %v7862_v20, %v18105_v43 }
 0xeed   :  { %18174 = vst [vmem:[#allocation91_spill] sm:$0xff] %v16016_v19  ;;  %v7928_v58 = vperm.slane %v16016_v19, %v18065_v59  ;;  %v7941_v46 = vsel %vm1022_vm8, %v7926_v15, %v7925_v27  ;;  %v7930_v18 = vperm.slane %v16025_v62, %v18065_v59 }
 0xeee   :  { %v7957_v2 = vsel %vm1039_vm9, %v7941_v46, -inf  ;;  %18175 = vst [vmem:[#allocation89_spill] sm:$0xff] %v16025_v62 }
 0xeef   :  { %7958 = vmax.xlane.f32.xlu2 %v7957_v2  ;;  %v7942_v0 = vsel %vm1022_vm8, %v7928_v58, %v7927_v11  ;;  %v18185_v58 = vld [vmem:[#allocation126_spill] sm:$0xff] }
 0xef0   :  { %v7859_v12 = vpop.xlane.xlu2 %7858  ;;  %v7960_v30 = vsel %vm1039_vm9, %v7942_v0, -inf }
 0xef1   :  { %v16030_v5 = vadd.f32 %v7859_v12, %v18097_v53  ;;  %7961 = vmax.xlane.f32.xlu0 %v7960_v30  ;;  %v18187_v30 = vld [vmem:[#allocation128_spill] sm:$0xff] }
 0xef2   :  { %v7871_v13 = vpop.xlane.xlu0 %7870  ;;  %v7865_v40 = vpop.xlane.xlu1 %7864 }
 0xef3   :  { %18176 = vst [vmem:[#allocation51_spill] sm:$0xff] %v16030_v5  ;;  %v7929_v55 = vperm.slane %v16030_v5, %v18065_v59  ;;  %v16039_v47 = vadd.f32 %v7865_v40, %v18076_v57  ;;  %v16042_v53 = vadd.f32 %v7871_v13, %v18111_v38 }
 0xef5   :  { %v7943_v43 = vsel %vm1022_vm8, %v7930_v18, %v7929_v55  ;;  %18177 = vst [vmem:[#allocation115_spill] sm:$0xff] %v16039_v47  ;;  %v7931_v24 = vperm.slane %v16039_v47, %v18065_v59  ;;  %v7933_v25 = vperm.slane %v16042_v53, %v18065_v59 }
 0xef6   :  { %v7963_v50 = vsel %vm1039_vm9, %v7943_v43, -inf  ;;  %18178 = vst [vmem:[#allocation129_spill] sm:$0xff] %v16042_v53 }
 0xef7   :  { %7964 = vmax.xlane.f32.xlu1 %v7963_v50 }
 0xef8   :  { %v7868_v21 = vpop.xlane.xlu2 %7867 }
 0xef9   :  { %v16045_v61 = vadd.f32 %v7868_v21, %v18106_v44 }
 0xefa   :  { %v7874_v7 = vpop.xlane.xlu1 %7873  ;;  %v7880_v57 = vpop.xlane.xlu0 %7879 }
 0xefb   :  { %18179 = vst [vmem:[#allocation117_spill] sm:$0xff] %v16045_v61  ;;  %v7932_v54 = vperm.slane %v16045_v61, %v18065_v59  ;;  %v16052_v29 = vadd.f32 %v7874_v7, %v18082_v8  ;;  %v16061_v10 = vadd.f32 %v7880_v57, %v18118_v1 }
 0xefd   :  { %18180 = vst [vmem:[#allocation24_spill] sm:$0xff] %v16052_v29  ;;  %v7934_v38 = vperm.slane %v16052_v29, %v18065_v59  ;;  %v7944_v44 = vsel %vm1022_vm8, %v7932_v54, %v7931_v24  ;;  %v7936_v37 = vperm.slane %v16061_v10, %v18065_v59 }
 0xefe   :  { %v7966_v32 = vsel %vm1039_vm9, %v7944_v44, -inf  ;;  %18181 = vst [vmem:[#allocation114_spill] sm:$0xff] %v16061_v10 }
 0xeff   :  { %7967 = vmax.xlane.f32.xlu2 %v7966_v32  ;;  %v7945_v52 = vsel %vm1022_vm8, %v7934_v38, %v7933_v25 }
 0xf00   :  { %v7877_v16 = vpop.xlane.xlu2 %7876  ;;  %v7969_v8 = vsel %vm1039_vm9, %v7945_v52, -inf }
 0xf01   :  { %v16066_v17 = vadd.f32 %v7877_v16, %v18112_v34  ;;  %7970 = vmax.xlane.f32.xlu0 %v7969_v8 }
 0xf02   :  { %v7883_v60 = vpop.xlane.xlu1 %7882  ;;  %v7889_v9 = vpop.xlane.xlu0 %7888 }
 0xf03   :  { %18182 = vst [vmem:[#allocation113_spill] sm:$0xff] %v16066_v17  ;;  %v7935_v20 = vperm.slane %v16066_v17, %v18065_v59  ;;  %v16075_v15 = vadd.f32 %v7883_v60, %v15286_v26  ;;  %v16078_v34 = vadd.f32 %v7889_v9, %v15308_v56 }
 0xf05   :  { %v7946_v1 = vsel %vm1022_vm8, %v7936_v37, %v7935_v20  ;;  %18183 = vst [vmem:[#allocation88_spill] sm:$0xff] %v16075_v15  ;;  %v7937_v0 = vperm.slane %v16075_v15, %v18065_v59  ;;  %v7939_v26 = vperm.slane %v16078_v34, %v18065_v59 }
 0xf06   :  { %v7972_v27 = vsel %vm1039_vm9, %v7946_v1, -inf  ;;  %18184 = vst [vmem:[#allocation50_spill] sm:$0xff] %v16078_v34 }
 0xf07   :  { %7973 = vmax.xlane.f32.xlu1 %v7972_v27 }
 0xf08   :  { %v7886_v11 = vpop.xlane.xlu2 %7885 }
 0xf09   :  { %v16081_v46 = vadd.f32 %v7886_v11, %v18185_v58 }
 0xf0a   :  { %v7892_v2 = vpop.xlane.xlu1 %7891 }
 0xf0b   :  { %18186 = vst [vmem:[#allocation71_spill] sm:$0xff] %v16081_v46  ;;  %v7938_v12 = vperm.slane %v16081_v46, %v18065_v59  ;;  %v16088_v13 = vadd.f32 %v7892_v2, %v18187_v30 }
 0xf0d   :  { %18188 = vst [vmem:[#allocation130_spill] sm:$0xff] %v16088_v13  ;;  %v7940_v56 = vperm.slane %v16088_v13, %v18065_v59  ;;  %v7947_v40 = vsel %vm1022_vm8, %v7938_v12, %v7937_v0 }
 0xf0e   :  { %v7975_v18 = vsel %vm1039_vm9, %v7947_v40, -inf }
 0xf0f   :  { %7976 = vmax.xlane.f32.xlu2 %v7975_v18  ;;  %v7948_v55 = vsel %vm1022_vm8, %v7940_v56, %v7939_v26 }
 0xf10   :  { %v7978_v43 = vsel %vm1039_vm9, %v7948_v55, -inf }
 0xf11   :  { %7979 = vmax.xlane.f32.xlu0 %v7978_v43 }
 0xf62   :  { %v7959_v50 = vpop.xlane.xlu2 %7958 }
 0xf63   :  { %v7989_v21 = vperm.slane %v7959_v50, 0  ;;  %v7990_v7 = vperm.slane %v7959_v50, 1 }
 0xf64   :  { %v7962_v24 = vpop.xlane.xlu0 %7961 }
 0xf65   :  { %v8021_v54 = vsub.f32 %v16003_v23, %v7989_v21  ;;  %v8022_v57 = vsub.f32 %v16009_v6, %v7990_v7  ;;  %v7991_v25 = vperm.slane %v7962_v24, 0  ;;  %v7992_v38 = vperm.slane %v7962_v24, 1 }
 0xf67   :  { %v8037_v44 = vmul.f32 1.442695, %v8021_v54  ;;  %v8039_v32 = vmul.f32 1.442695, %v8022_v57  ;;  %v8023_v52 = vsub.f32 %v16006_v51, %v7991_v25  ;;  %v8024_v16 = vsub.f32 %v16016_v19, %v7992_v38 }
 0xf69   :  { %9928 = vpow2.f32 %v8037_v44  ;;  %v8041_v8 = vmul.f32 1.442695, %v8023_v52  ;;  %v8043_v1 = vmul.f32 1.442695, %v8024_v16 }
 0xf6a   :  { %9930 = vpow2.f32 %v8039_v32  ;;  %v7965_v60 = vpop.xlane.xlu1 %7964 }
 0xf6b   :  { %9932 = vpow2.f32 %v8041_v8  ;;  %v7993_v37 = vperm.slane %v7965_v60, 0  ;;  %v7994_v20 = vperm.slane %v7965_v60, 1 }
 0xf6c   :  { %9934 = vpow2.f32 %v8043_v1 }
 0xf6d   :  { %v8025_v9 = vsub.f32 %v16030_v5, %v7993_v37  ;;  %v8026_v27 = vsub.f32 %v16025_v62, %v7994_v20 }
 0xf6f   :  { %v16104_v11 = vpop.eup %9928  ;;  %v8045_v58 = vmul.f32 1.442695, %v8025_v9  ;;  %v8047_v2 = vmul.f32 1.442695, %v8026_v27 }
 0xf70   :  { %v16106_v0 = vpop.eup %9930  ;;  %8086 = vperm.xlu1 %9437, %v16104_v11  }
 0xf71   :  { %v16109_v12 = vpop.eup %9932  ;;  %8089 = vperm.xlu2 %9435, %v16106_v0   ;;  %9936 = vpow2.f32 %v8047_v2 }
 0xf72   :  { %v7968_v30 = vpop.xlane.xlu2 %7967  ;;  %8092 = vperm.xlu0 %9436, %v16109_v12   ;;  %9938 = vpow2.f32 %v8045_v58  ;;  %v16115_v21 = vpop.eup %9934 }
 0xf73   :  { %v7995_v26 = vperm.slane %v7968_v30, 0  ;;  %v7996_v56 = vperm.slane %v7968_v30, 1 }
 0xf74   :  { %v7971_v40 = vpop.xlane.xlu0 %7970 }
 0xf75   :  { %v8027_v18 = vsub.f32 %v16039_v47, %v7995_v26  ;;  %v8028_v55 = vsub.f32 %v16045_v61, %v7996_v56  ;;  %v7997_v43 = vperm.slane %v7971_v40, 0  ;;  %v7998_v50 = vperm.slane %v7971_v40, 1 }
 0xf77   :  { %v8049_v7 = vmul.f32 1.442695, %v8027_v18  ;;  %v8051_v24 = vmul.f32 1.442695, %v8028_v55  ;;  %v8029_v54 = vsub.f32 %v16042_v53, %v7997_v43  ;;  %v16118_v57 = vpop.eup %9936  ;;  %v8030_v38 = vsub.f32 %v16052_v29, %v7998_v50 }
 0xf78   :  { %8095 = vperm.xlu1 %9437, %v16115_v21   ;;  %v16121_v25 = vpop.eup %9938 }
 0xf79   :  { %9940 = vpow2.f32 %v8049_v7  ;;  %v8053_v44 = vmul.f32 1.442695, %v8029_v54  ;;  %8101 = vperm.xlu2 %9435, %v16118_v57   ;;  %v8055_v8 = vmul.f32 1.442695, %v8030_v38 }
 0xf7a   :  { %9942 = vpow2.f32 %v8051_v24  ;;  %8098 = vperm.xlu0 %9436, %v16121_v25   ;;  %v7974_v32 = vpop.xlane.xlu1 %7973 }
 0xf7b   :  { %9944 = vpow2.f32 %v8053_v44  ;;  %v7999_v52 = vperm.slane %v7974_v32, 0  ;;  %v8000_v16 = vperm.slane %v7974_v32, 1 }
 0xf7c   :  { %9946 = vpow2.f32 %v8055_v8 }
 0xf7d   :  { %v8031_v60 = vsub.f32 %v16066_v17, %v7999_v52  ;;  %v8032_v37 = vsub.f32 %v16061_v10, %v8000_v16 }
 0xf7f   :  { %v16128_v20 = vpop.eup %9940  ;;  %v8057_v1 = vmul.f32 1.442695, %v8031_v60  ;;  %v8059_v9 = vmul.f32 1.442695, %v8032_v37 }
 0xf80   :  { %v16130_v27 = vpop.eup %9942  ;;  %8104 = vperm.xlu1 %9437, %v16128_v20  }
 0xf81   :  { %v16133_v58 = vpop.eup %9944  ;;  %9948 = vpow2.f32 %v8057_v1 }
 0xf82   :  { %v7977_v2 = vpop.xlane.xlu2 %7976  ;;  %8110 = vperm.xlu2 %9435, %v16133_v58   ;;  %8107 = vperm.xlu0 %9436, %v16130_v27   ;;  %9950 = vpow2.f32 %v8059_v9  ;;  %v16139_v50 = vpop.eup %9946 }
 0xf83   :  { %v8001_v30 = vperm.slane %v7977_v2, 0  ;;  %v8002_v26 = vperm.slane %v7977_v2, 1 }
 0xf84   :  { %v7980_v56 = vpop.xlane.xlu0 %7979 }
 0xf85   :  { %v8033_v40 = vsub.f32 %v16075_v15, %v8001_v30  ;;  %v8034_v18 = vsub.f32 %v16081_v46, %v8002_v26  ;;  %v8003_v55 = vperm.slane %v7980_v56, 0  ;;  %v8004_v43 = vperm.slane %v7980_v56, 1 }
 0xf87   :  { %v8061_v7 = vmul.f32 1.442695, %v8033_v40  ;;  %v8063_v24 = vmul.f32 1.442695, %v8034_v18  ;;  %v8035_v54 = vsub.f32 %v16078_v34, %v8003_v55  ;;  %v16142_v38 = vpop.eup %9948  ;;  %v8036_v32 = vsub.f32 %v16088_v13, %v8004_v43 }
 0xf88   :  { %8113 = vperm.xlu1 %9437, %v16139_v50   ;;  %v16145_v44 = vpop.eup %9950 }
 0xf89   :  { %9952 = vpow2.f32 %v8061_v7  ;;  %v8065_v52 = vmul.f32 1.442695, %v8035_v54  ;;  %v8067_v16 = vmul.f32 1.442695, %v8036_v32 }
 0xf8a   :  { %9954 = vpow2.f32 %v8063_v24  ;;  %8119 = vperm.xlu2 %9435, %v16145_v44   ;;  %8116 = vperm.xlu0 %9436, %v16142_v38  }
 0xf8b   :  { %9956 = vpow2.f32 %v8065_v52 }
 0xf8c   :  { %9958 = vpow2.f32 %v8067_v16 }
 0xf8f   :  { %v16150_v8 = vpop.eup %9952 }
 0xf90   :  { %v16152_v60 = vpop.eup %9954  ;;  %8122 = vperm.xlu1 %9437, %v16150_v8  }
 0xf91   :  { %v16155_v37 = vpop.eup %9956 }
 0xf92   :  { %8128 = vperm.xlu2 %9435, %v16155_v37   ;;  %8125 = vperm.xlu0 %9436, %v16152_v60   ;;  %v16159_v1 = vpop.eup %9958 }
 0xf98   :  { %8131 = vperm.xlu1 %9437, %v16159_v1  }
 0xfcb   :  { %v8090_v9 = vpop.permute.xlu2 %8089 }
 0xfcc   :  { %v8134_v30 = vperm.slane %v8090_v9, %v18065_v59 }
 0xfd3   :  { %v8102_v55 = vpop.permute.xlu2 %8101 }
 0xfd4   :  { %v8138_v32 = vperm.slane %v8102_v55, %v18065_v59 }
 0xfe2   :  { %v8087_v2 = vpop.permute.xlu1 %8086 }
 0xfe3   :  { %v8133_v26 = vperm.slane %v8087_v2, %v18065_v59 }
 0xfe4   :  { %v8093_v56 = vpop.permute.xlu0 %8092 }
 0xfe5   :  { %v8149_v40 = vsel %vm1022_vm8, %v8134_v30, %v8133_v26  ;;  %v8135_v7 = vperm.slane %v8093_v56, %v18065_v59  ;;  %v8111_v30 = vpop.permute.xlu2 %8110 }
 0xfe6   :  { %v8165_v18 = vsel %vm1039_vm9, %v8149_v40, 0.0 }
 0xfe7   :  { %8166 = vadd.xlane.f32.xlu0 %v8165_v18 }
 0xfea   :  { %v8096_v43 = vpop.permute.xlu1 %8095 }
 0xfeb   :  { %v8136_v24 = vperm.slane %v8096_v43, %v18065_v59 }
 0xfec   :  { %v8099_v54 = vpop.permute.xlu0 %8098 }
 0xfed   :  { %v8137_v52 = vperm.slane %v8099_v54, %v18065_v59  ;;  %v8150_v16 = vsel %vm1022_vm8, %v8136_v24, %v8135_v7  ;;  %v8120_v7 = vpop.permute.xlu2 %8119 }
 0xfee   :  { %v8168_v9 = vsel %vm1039_vm9, %v8150_v16, 0.0  ;;  %v8141_v16 = vperm.slane %v8111_v30, %v18065_v59 }
 0xfef   :  { %8169 = vadd.xlane.f32.xlu2 %v8168_v9  ;;  %v8151_v2 = vsel %vm1022_vm8, %v8138_v32, %v8137_v52  ;;  %v8144_v9 = vperm.slane %v8120_v7, %v18065_v59 }
 0xff0   :  { %v8171_v26 = vsel %vm1039_vm9, %v8151_v2, 0.0 }
 0xff1   :  { %8172 = vadd.xlane.f32.xlu1 %v8171_v26 }
 0xff2   :  { %v8105_v40 = vpop.permute.xlu1 %8104 }
 0xff3   :  { %v8139_v18 = vperm.slane %v8105_v40, %v18065_v59 }
 0xff4   :  { %v8108_v56 = vpop.permute.xlu0 %8107 }
 0xff5   :  { %v8140_v43 = vperm.slane %v8108_v56, %v18065_v59 }
 0xff7   :  { %v8152_v55 = vsel %vm1022_vm8, %v8140_v43, %v8139_v18 }
 0xff8   :  { %v8174_v54 = vsel %vm1039_vm9, %v8152_v55, 0.0 }
 0xff9   :  { %8175 = vadd.xlane.f32.xlu0 %v8174_v54 }
 0xffa   :  { %v8114_v24 = vpop.permute.xlu1 %8113 }
 0xffb   :  { %v8142_v32 = vperm.slane %v8114_v24, %v18065_v59  ;;  %v8129_v24 = vpop.permute.xlu2 %8128 }
 0xffc   :  { %v8117_v52 = vpop.permute.xlu0 %8116 }
 0xffd   :  { %v8143_v2 = vperm.slane %v8117_v52, %v18065_v59  ;;  %v8153_v26 = vsel %vm1022_vm8, %v8142_v32, %v8141_v16  ;;  %v8147_v32 = vperm.slane %v8129_v24, %v18065_v59 }
 0xffe   :  { %v8177_v40 = vsel %vm1039_vm9, %v8153_v26, 0.0 }
 0xfff   :  { %8178 = vadd.xlane.f32.xlu2 %v8177_v40  ;;  %v8154_v56 = vsel %vm1022_vm8, %v8144_v9, %v8143_v2 }
0x1000   :  { %v8180_v18 = vsel %vm1039_vm9, %v8154_v56, 0.0 }
0x1001   :  { %8181 = vadd.xlane.f32.xlu1 %v8180_v18 }
0x1002   :  { %v8123_v43 = vpop.permute.xlu1 %8122 }
0x1003   :  { %v8145_v30 = vperm.slane %v8123_v43, %v18065_v59 }
0x1004   :  { %v8126_v55 = vpop.permute.xlu0 %8125 }
0x1005   :  { %v8146_v54 = vperm.slane %v8126_v55, %v18065_v59 }
0x1007   :  { %v8155_v7 = vsel %vm1022_vm8, %v8146_v54, %v8145_v30 }
0x1008   :  { %v8183_v52 = vsel %vm1039_vm9, %v8155_v7, 0.0 }
0x1009   :  { %8184 = vadd.xlane.f32.xlu0 %v8183_v52 }
0x100a   :  { %v8132_v16 = vpop.permute.xlu1 %8131 }
0x100b   :  { %v8148_v9 = vperm.slane %v8132_v16, %v18065_v59 }
0x100d   :  { %v8156_v2 = vsel %vm1022_vm8, %v8148_v9, %v8147_v32 }
0x100e   :  { %v8186_v26 = vsel %vm1039_vm9, %v8156_v2, 0.0 }
0x100f   :  { %8187 = vadd.xlane.f32.xlu2 %v8186_v26 }
0x105a   :  { %v8167_v40 = vpop.xlane.xlu0 %8166 }
0x105b   :  { %v8197_v56 = vperm.slane %v8167_v40, 0  ;;  %v8198_v18 = vperm.slane %v8167_v40, 1 }
0x105d   :  { %9960 = vrcp.f32 %v8197_v56  ;;  %v8238_v55 = vand.u32 2147483647, %v8197_v56  ;;  %v8240_v24 = vand.u32 2147483648, %v8197_v56  ;;  %vm8234_vm13 = vweird.f32 %v8197_v56 }
0x105e   :  { %9962 = vrcp.f32 %v8198_v18  ;;  %vm8249_vm10 = vweird.f32 %v8198_v18  ;;  %v8253_v32 = vand.u32 2147483647, %v8198_v18  ;;  %v8255_v34 = vand.u32 2147483648, %v8198_v18 }
0x105f   :  { %vm16204_vm11 = vcmp.eq.f32.partialorder %v8238_v55, 8.507059e+37  ;;  %v8241_v46 = vor.u32 1.1754944e-38, %v8240_v24 }
0x1060   :  { %vm16211_vm12 = vcmp.eq.f32.partialorder %v8253_v32, 8.507059e+37  ;;  %v8256_v24 = vor.u32 1.1754944e-38, %v8255_v34 }
0x1062   :  { %v8170_v43 = vpop.xlane.xlu2 %8169 }
0x1063   :  { %v9961_v30 = vpop.eup %9960  ;;  %v16194_v54 = vperm.slane %v8170_v43, 0  ;;  %v16196_v7 = vperm.slane %v8170_v43, 1 }
0x1064   :  { %v9963_v52 = vpop.eup %9962  ;;  %v8230_v16 = vmul.f32 %v9961_v30, %v8197_v56  ;;  %v8173_v13 = vpop.xlane.xlu1 %8172  ;;  %vm8235_vm2 = vweird.f32 %v9961_v30 }
0x1065   :  { %v8245_v9 = vmul.f32 %v9963_v52, %v8198_v18  ;;  %9964 = vrcp.f32 %v16194_v54  ;;  %v16199_v2 = vperm.slane %v8173_v13, 0  ;;  %v16201_v26 = vperm.slane %v8173_v13, 1  ;;  %vm16222_vm3 = vmor %vm8234_vm13, %vm8235_vm2 }
0x1066   :  { %v8231_v40 = vsub.f32 1.0, %v8230_v16  ;;  %9966 = vrcp.f32 %v16196_v7  ;;  %v8285_v29 = vand.u32 2147483648, %v16196_v7  ;;  %v8283_v55 = vand.u32 2147483647, %v16196_v7 }
0x1067   :  { %v8246_v15 = vsub.f32 1.0, %v8245_v9  ;;  %9968 = vrcp.f32 %v16199_v2  ;;  %v8268_v17 = vand.u32 2147483647, %v16194_v54  ;;  %v8270_v9 = vand.u32 2147483648, %v16194_v54 }
0x1068   :  { %v8232_v53 = vmul.f32 %v9961_v30, %v8231_v40  ;;  %9970 = vrcp.f32 %v16201_v26  ;;  %vm8250_vm14 = vweird.f32 %v9963_v52  ;;  %vm8264_vm15 = vweird.f32 %v16194_v54 }
0x1069   :  { %v8247_v16 = vmul.f32 %v9963_v52, %v8246_v15  ;;  %vm8279_vm0 = vweird.f32 %v16196_v7  ;;  %v16227_v15 = vor.u32 1.1754944e-38, %v8285_v29  ;;  %v16229_v61 = vor.u32 1.1754944e-38, %v8270_v9  ;;  %vm8251_vm7 = vmor %vm8249_vm10, %vm8250_vm14 }
0x106a   :  { %v8233_v10 = vadd.f32 %v9961_v30, %v8232_v53  ;;  %v8298_v53 = vand.u32 2147483647, %v16199_v2  ;;  %vm16249_vm1 = vcmp.eq.f32.partialorder %v8283_v55, 8.507059e+37  ;;  %vm16253_vm4 = vcmp.eq.f32.partialorder %v8268_v17, 8.507059e+37 }
0x106b   :  { %v16219_v40 = vpop.eup %9964  ;;  %v8248_v47 = vadd.f32 %v9963_v52, %v8247_v16  ;;  %v8300_v16 = vand.u32 2147483648, %v16199_v2  ;;  %vm8294_vm13 = vweird.f32 %v16199_v2 }
0x106c   :  { %v9967_v19 = vpop.eup %9966  ;;  %v8260_v34 = vmul.f32 %v16219_v40, %v16194_v54  ;;  %v8176_v51 = vpop.xlane.xlu0 %8175  ;;  %v8237_v56 = vsel %vm16222_vm3, %v9961_v30, %v8233_v10  ;;  %vm8265_vm6 = vweird.f32 %v16219_v40  ;;  %vm16271_vm10 = vcmp.eq.f32.partialorder %v8298_v53, 8.507059e+37 }
0x106d   :  { %v16238_v5 = vpop.eup %9968  ;;  %v8275_v29 = vmul.f32 %v9967_v19, %v16196_v7  ;;  %v16241_v9 = vperm.slane %v8176_v51, 0  ;;  %v16243_v62 = vperm.slane %v8176_v51, 1  ;;  %v8242_v59 = vsel %vm16204_vm11, %v8241_v46, %v8237_v56  ;;  %vm16289_vm3 = vmor %vm8264_vm15, %vm8265_vm6 }
0x106e   :  { %v16257_v32 = vpop.eup %9970  ;;  %v8261_v6 = vsub.f32 1.0, %v8260_v34  ;;  %v8290_v51 = vmul.f32 %v16238_v5, %v16199_v2  ;;  %v8243_v43 = vmul.f32 %v16104_v11, %v8242_v59  ;;  %v8252_v46 = vsel %vm8251_vm7, %v9963_v52, %v8248_v47 }
0x106f   :  { %v8276_v18 = vsub.f32 1.0, %v8275_v29  ;;  %v8305_v55 = vmul.f32 %v16257_v32, %v16201_v26  ;;  %9972 = vrcp.f32 %v16241_v9  ;;  %v8257_v17 = vsel %vm16211_vm12, %v8256_v24, %v8252_v46 }
0x1070   :  { %v8262_v56 = vmul.f32 %v16219_v40, %v8261_v6  ;;  %v8291_v34 = vsub.f32 1.0, %v8290_v51  ;;  %9974 = vrcp.f32 %v16243_v62  ;;  %8471 = vperm.xlu1 %9437, %v8243_v43   ;;  %v8258_v59 = vmul.f32 %v16106_v0, %v8257_v17 }
0x1071   :  { %vm8309_vm11 = vweird.f32 %v16201_v26  ;;  %v8277_v11 = vmul.f32 %v9967_v19, %v8276_v18  ;;  %v8306_v52 = vsub.f32 1.0, %v8305_v55  ;;  %vm8280_vm2 = vweird.f32 %v9967_v19 }
0x1072   :  { %vm8295_vm14 = vweird.f32 %v16238_v5  ;;  %v8292_v13 = vmul.f32 %v16238_v5, %v8291_v34  ;;  %8476 = vperm.xlu0 %9436, %v8258_v59   ;;  %v8179_v6 = vpop.xlane.xlu2 %8178  ;;  %v8263_v24 = vadd.f32 %v16219_v40, %v8262_v56  ;;  %v8301_v29 = vor.u32 1.1754944e-38, %v8300_v16  ;;  %vm8281_vm7 = vmor %vm8279_vm0, %vm8280_vm2 }
0x1073   :  { %vm8310_vm12 = vweird.f32 %v16257_v32  ;;  %v8307_v0 = vmul.f32 %v16257_v32, %v8306_v52  ;;  %v16281_v53 = vperm.slane %v8179_v6, 0  ;;  %v16283_v51 = vperm.slane %v8179_v6, 1  ;;  %vm8296_vm15 = vmor %vm8294_vm13, %vm8295_vm14 }
0x1074   :  { %v8278_v43 = vadd.f32 %v9967_v19, %v8277_v11  ;;  %v8182_v18 = vpop.xlane.xlu1 %8181  ;;  %v8267_v16 = vsel %vm16289_vm3, %v16219_v40, %v8263_v24  ;;  %v8293_v55 = vadd.f32 %v16238_v5, %v8292_v13  ;;  %v8313_v17 = vand.u32 2147483647, %v16201_v26  ;;  %vm8311_vm0 = vmor %vm8309_vm11, %vm8310_vm12 }
0x1075   :  { %v8315_v56 = vand.u32 2147483648, %v16201_v26  ;;  %v9973_v34 = vpop.eup %9972  ;;  %9976 = vrcp.f32 %v16281_v53  ;;  %v16302_v54 = vperm.slane %v8182_v18, 0  ;;  %v16304_v59 = vperm.slane %v8182_v18, 1 }
0x1076   :  { %v8282_v11 = vsel %vm8281_vm7, %v9967_v19, %v8278_v43  ;;  %v16306_v7 = vpop.eup %9974  ;;  %v8320_v52 = vmul.f32 %v9973_v34, %v16241_v9  ;;  %9978 = vrcp.f32 %v16283_v51  ;;  %v8272_v13 = vsel %vm16253_vm4, %v16229_v61, %v8267_v16 }
0x1077   :  { %v8287_v40 = vsel %vm16249_vm1, %v16227_v15, %v8282_v11  ;;  %v8335_v6 = vmul.f32 %v16306_v7, %v16243_v62  ;;  %9980 = vrcp.f32 %v16302_v54  ;;  %v8273_v24 = vmul.f32 %v16109_v12, %v8272_v13 }
0x1078   :  { %v8288_v19 = vmul.f32 %v16115_v21, %v8287_v40  ;;  %v8321_v10 = vsub.f32 1.0, %v8320_v52  ;;  %9982 = vrcp.f32 %v16304_v59  ;;  %v8297_v15 = vsel %vm8296_vm15, %v16238_v5, %v8293_v55 }
0x1079   :  { %v8308_v61 = vadd.f32 %v16257_v32, %v8307_v0  ;;  %v8336_v30 = vsub.f32 1.0, %v8335_v6  ;;  %8481 = vperm.xlu2 %9435, %v8273_v24   ;;  %v8302_v43 = vsel %vm16271_vm10, %v8301_v29, %v8297_v15  ;;  %vm8314_vm6 = vcmp.eq.f32.partialorder %v8313_v17, 8.507059e+37 }
0x107a   :  { %v8316_v12 = vor.u32 1.1754944e-38, %v8315_v56  ;;  %v8322_v21 = vmul.f32 %v9973_v34, %v8321_v10  ;;  %8486 = vperm.xlu0 %9436, %v8288_v19   ;;  %v8303_v2 = vmul.f32 %v16121_v25, %v8302_v43  ;;  %vm8324_vm1 = vweird.f32 %v16241_v9 }
0x107b   :  { %v8312_v5 = vsel %vm8311_vm0, %v16257_v32, %v8308_v61  ;;  %v16337_v0 = vpop.eup %9976  ;;  %v8337_v47 = vmul.f32 %v16306_v7, %v8336_v30  ;;  %vm8325_vm4 = vweird.f32 %v9973_v34  ;;  %v8328_v46 = vand.u32 2147483647, %v16241_v9 }
0x107c   :  { %v8317_v29 = vsel %vm8314_vm6, %v8316_v12, %v8312_v5  ;;  %v16341_v26 = vpop.eup %9978  ;;  %v8350_v18 = vmul.f32 %v16337_v0, %v16281_v53  ;;  %8491 = vperm.xlu1 %9437, %v8303_v2   ;;  %v8185_v16 = vpop.xlane.xlu0 %8184  ;;  %v8323_v32 = vadd.f32 %v9973_v34, %v8322_v21  ;;  %v8330_v55 = vand.u32 2147483648, %v16241_v9  ;;  %vm8326_vm13 = vmor %vm8324_vm1, %vm8325_vm4 }
0x107d   :  { %v8318_v25 = vmul.f32 %v16118_v57, %v8317_v29  ;;  %v16347_v17 = vpop.eup %9980  ;;  %v8365_v56 = vmul.f32 %v16341_v26, %v16283_v51  ;;  %v16351_v11 = vperm.slane %v8185_v16, 0  ;;  %v16353_v52 = vperm.slane %v8185_v16, 1 }
0x107e   :  { %vm8329_vm10 = vcmp.eq.f32.partialorder %v8328_v46, 8.507059e+37  ;;  %v16357_v40 = vpop.eup %9982  ;;  %v8351_v13 = vsub.f32 1.0, %v8350_v18  ;;  %v8380_v57 = vmul.f32 %v16347_v17, %v16302_v54  ;;  %v8327_v6 = vsel %vm8326_vm13, %v9973_v34, %v8323_v32 }
0x107f   :  { %v8331_v19 = vor.u32 1.1754944e-38, %v8330_v55  ;;  %v8366_v24 = vsub.f32 1.0, %v8365_v56  ;;  %v8395_v10 = vmul.f32 %v16357_v40, %v16304_v59  ;;  %9984 = vrcp.f32 %v16351_v11 }
0x1080   :  { %v8338_v15 = vadd.f32 %v16306_v7, %v8337_v47  ;;  %v8352_v9 = vmul.f32 %v16337_v0, %v8351_v13  ;;  %v8381_v61 = vsub.f32 1.0, %v8380_v57  ;;  %9986 = vrcp.f32 %v16353_v52 }
0x1081   :  { %v8332_v30 = vsel %vm8329_vm10, %v8331_v19, %v8327_v6  ;;  %v8367_v43 = vmul.f32 %v16341_v26, %v8366_v24  ;;  %v8396_v12 = vsub.f32 1.0, %v8395_v10  ;;  %8496 = vperm.xlu2 %9435, %v8318_v25   ;;  %vm8339_vm11 = vweird.f32 %v16243_v62 }
0x1082   :  { %v8333_v34 = vmul.f32 %v16128_v20, %v8332_v30  ;;  %v8188_v21 = vpop.xlane.xlu2 %8187  ;;  %vm8340_vm2 = vweird.f32 %v16306_v7  ;;  %v8343_v2 = vand.u32 2147483647, %v16243_v62  ;;  %v8345_v5 = vand.u32 2147483648, %v16243_v62 }
0x1083   :  { %v8382_v47 = vmul.f32 %v16347_v17, %v8381_v61  ;;  %v16374_v29 = vperm.slane %v8188_v21, 0  ;;  %v16376_v46 = vperm.slane %v8188_v21, 1  ;;  %vm8341_vm14 = vmor %vm8339_vm11, %vm8340_vm2  ;;  %v8353_v18 = vadd.f32 %v16337_v0, %v8352_v9 }
0x1084   :  { %8501 = vperm.xlu0 %9436, %v8333_v34   ;;  %v8342_v20 = vsel %vm8341_vm14, %v16306_v7, %v8338_v15  ;;  %vm8344_vm12 = vcmp.eq.f32.partialorder %v8343_v2, 8.507059e+37  ;;  %v8346_v16 = vor.u32 1.1754944e-38, %v8345_v5  ;;  %vm8354_vm3 = vweird.f32 %v16281_v53 }
0x1085   :  { %v16381_v25 = vpop.eup %9984  ;;  %9988 = vrcp.f32 %v16374_v29  ;;  %vm8355_vm7 = vweird.f32 %v16337_v0  ;;  %v8358_v62 = vand.u32 2147483647, %v16281_v53  ;;  %v8360_v32 = vand.u32 2147483648, %v16281_v53 }
0x1086   :  { %v16387_v55 = vpop.eup %9986  ;;  %v8410_v56 = vmul.f32 %v16381_v25, %v16351_v11  ;;  %9990 = vrcp.f32 %v16376_v46  ;;  %v8347_v7 = vsel %vm8344_vm12, %v8346_v16, %v8342_v20  ;;  %vm16392_vm15 = vmor %vm8354_vm3, %vm8355_vm7  ;;  %v8368_v57 = vadd.f32 %v16341_v26, %v8367_v43 }
0x1087   :  { %v8397_v6 = vmul.f32 %v16357_v40, %v8396_v12  ;;  %v8425_v19 = vmul.f32 %v16387_v55, %v16353_v52  ;;  %v8348_v53 = vmul.f32 %v16130_v27, %v8347_v7  ;;  %v8357_v24 = vsel %vm16392_vm15, %v16337_v0, %v8353_v18 }
0x1088   :  { %v8411_v10 = vsub.f32 1.0, %v8410_v56  ;;  %v8361_v15 = vor.u32 1.1754944e-38, %v8360_v32  ;;  %vm8369_vm0 = vweird.f32 %v16283_v51  ;;  %vm8370_vm6 = vweird.f32 %v16341_v26 }
0x1089   :  { %v8426_v9 = vsub.f32 1.0, %v8425_v19  ;;  %8506 = vperm.xlu1 %9437, %v8348_v53   ;;  %vm8359_vm1 = vcmp.eq.f32.partialorder %v8358_v62, 8.507059e+37  ;;  %vm16406_vm4 = vmor %vm8369_vm0, %vm8370_vm6  ;;  %v8373_v30 = vand.u32 2147483647, %v16283_v51  ;;  %v8375_v27 = vand.u32 2147483648, %v16283_v51 }
0x108a   :  { %v8412_v43 = vmul.f32 %v16381_v25, %v8411_v10  ;;  %v8362_v0 = vsel %vm8359_vm1, %v8361_v15, %v8357_v24  ;;  %v8372_v12 = vsel %vm16406_vm4, %v16341_v26, %v8368_v57  ;;  %v8383_v34 = vadd.f32 %v16347_v17, %v8382_v47 }
0x108b   :  { %v16417_v21 = vpop.eup %9988  ;;  %v8363_v2 = vmul.f32 %v16133_v58, %v8362_v0  ;;  %vm8374_vm13 = vcmp.eq.f32.partialorder %v8373_v30, 8.507059e+37  ;;  %v8376_v5 = vor.u32 1.1754944e-38, %v8375_v27  ;;  %vm8384_vm10 = vweird.f32 %v16302_v54 }
0x108c   :  { %v16421_v18 = vpop.eup %9990  ;;  %v8440_v51 = vmul.f32 %v16417_v21, %v16374_v29  ;;  %vm8385_vm11 = vweird.f32 %v16347_v17  ;;  %v8388_v20 = vand.u32 2147483647, %v16302_v54  ;;  %v8390_v26 = vand.u32 2147483648, %v16302_v54 }
0x108d   :  { %v8427_v47 = vmul.f32 %v16387_v55, %v8426_v9  ;;  %v8455_v58 = vmul.f32 %v16421_v18, %v16376_v46  ;;  %8511 = vperm.xlu2 %9435, %v8363_v2   ;;  %v8377_v16 = vsel %vm8374_vm13, %v8376_v5, %v8372_v12  ;;  %vm16431_vm2 = vmor %vm8384_vm10, %vm8385_vm11  ;;  %v8398_v32 = vadd.f32 %v16357_v40, %v8397_v6 }
0x108e   :  { %v8441_v56 = vsub.f32 1.0, %v8440_v51  ;;  %v8378_v7 = vmul.f32 %v16139_v50, %v8377_v16  ;;  %v8387_v54 = vsel %vm16431_vm2, %v16347_v17, %v8383_v34  ;;  %vm8399_vm14 = vweird.f32 %v16304_v59 }
0x108f   :  { %v8456_v13 = vsub.f32 1.0, %v8455_v58  ;;  %v8391_v57 = vor.u32 1.1754944e-38, %v8390_v26  ;;  %vm8400_vm12 = vweird.f32 %v16357_v40  ;;  %v8403_v19 = vand.u32 2147483647, %v16304_v59 }
0x1090   :  { %v8442_v53 = vmul.f32 %v16417_v21, %v8441_v56  ;;  %8516 = vperm.xlu0 %9436, %v8378_v7   ;;  %vm8389_vm3 = vcmp.eq.f32.partialorder %v8388_v20, 8.507059e+37  ;;  %vm16444_vm7 = vmor %vm8399_vm14, %vm8400_vm12  ;;  %v8405_v50 = vand.u32 2147483648, %v16304_v59  ;;  %v8413_v17 = vadd.f32 %v16381_v25, %v8412_v43 }
0x1091   :  { %v8457_v24 = vmul.f32 %v16421_v18, %v8456_v13  ;;  %v8392_v10 = vsel %vm8389_vm3, %v8391_v57, %v8387_v54  ;;  %v8402_v15 = vsel %vm16444_vm7, %v16357_v40, %v8398_v32  ;;  %vm8414_vm15 = vweird.f32 %v16351_v11 }
0x1092   :  { %v8393_v9 = vmul.f32 %v16142_v38, %v8392_v10  ;;  %v8406_v61 = vor.u32 1.1754944e-38, %v8405_v50  ;;  %vm8415_vm0 = vweird.f32 %v16381_v25  ;;  %v8418_v30 = vand.u32 2147483647, %v16351_v11 }
0x1093   :  { %vm8404_vm6 = vcmp.eq.f32.partialorder %v8403_v19, 8.507059e+37  ;;  %vm16458_vm1 = vmor %vm8414_vm15, %vm8415_vm0  ;;  %v8420_v27 = vand.u32 2147483648, %v16351_v11  ;;  %v8428_v43 = vadd.f32 %v16387_v55, %v8427_v47  ;;  %vm8430_vm4 = vweird.f32 %v16387_v55 }
0x1094   :  { %8521 = vperm.xlu1 %9437, %v8393_v9   ;;  %v8407_v40 = vsel %vm8404_vm6, %v8406_v61, %v8402_v15  ;;  %v8417_v38 = vsel %vm16458_vm1, %v16381_v25, %v8413_v17  ;;  %vm8429_vm13 = vweird.f32 %v16353_v52  ;;  %v8433_v0 = vand.u32 2147483647, %v16353_v52 }
0x1095   :  { %v8408_v12 = vmul.f32 %v16145_v44, %v8407_v40  ;;  %vm8419_vm10 = vcmp.eq.f32.partialorder %v8418_v30, 8.507059e+37  ;;  %v8421_v34 = vor.u32 1.1754944e-38, %v8420_v27  ;;  %vm16471_vm11 = vmor %vm8429_vm13, %vm8430_vm4  ;;  %v8435_v2 = vand.u32 2147483648, %v16353_v52 }
0x1096   :  { %v8432_v5 = vsel %vm16471_vm11, %v16387_v55, %v8428_v43  ;;  %v8443_v25 = vadd.f32 %v16417_v21, %v8442_v53  ;;  %vm8444_vm2 = vweird.f32 %v16374_v29  ;;  %vm8445_vm14 = vweird.f32 %v16417_v21 }
0x1097   :  { %8526 = vperm.xlu2 %9435, %v8408_v12   ;;  %v8422_v44 = vsel %vm8419_vm10, %v8421_v34, %v8417_v38  ;;  %v8436_v51 = vor.u32 1.1754944e-38, %v8435_v2  ;;  %vm16482_vm12 = vmor %vm8444_vm2, %vm8445_vm14  ;;  %v8448_v26 = vand.u32 2147483647, %v16374_v29  ;;  %v8450_v52 = vand.u32 2147483648, %v16374_v29 }
0x1098   :  { %v8423_v47 = vmul.f32 %v16150_v8, %v8422_v44  ;;  %vm8434_vm3 = vcmp.eq.f32.partialorder %v8433_v0, 8.507059e+37  ;;  %v8447_v55 = vsel %vm16482_vm12, %v16417_v21, %v8443_v25  ;;  %v8458_v58 = vadd.f32 %v16421_v18, %v8457_v24 }
0x1099   :  { %v8437_v16 = vsel %vm8434_vm3, %v8436_v51, %v8432_v5  ;;  %v8451_v62 = vor.u32 1.1754944e-38, %v8450_v52  ;;  %vm8459_vm7 = vweird.f32 %v16376_v46  ;;  %vm8460_vm15 = vweird.f32 %v16421_v18 }
0x109a   :  { %8531 = vperm.xlu0 %9436, %v8423_v47   ;;  %v8438_v32 = vmul.f32 %v16152_v60, %v8437_v16  ;;  %vm8449_vm0 = vcmp.eq.f32.partialorder %v8448_v26, 8.507059e+37  ;;  %vm8461_vm6 = vmor %vm8459_vm7, %vm8460_vm15  ;;  %v8463_v8 = vand.u32 2147483647, %v16376_v46  ;;  %v8465_v29 = vand.u32 2147483648, %v16376_v46 }
0x109b   :  { %v8452_v56 = vsel %vm8449_vm0, %v8451_v62, %v8447_v55  ;;  %v8462_v21 = vsel %vm8461_vm6, %v16421_v18, %v8458_v58 }
0x109c   :  { %8536 = vperm.xlu1 %9437, %v8438_v32   ;;  %v8453_v7 = vmul.f32 %v16155_v37, %v8452_v56  ;;  %v8466_v54 = vor.u32 1.1754944e-38, %v8465_v29  ;;  %vm8464_vm1 = vcmp.eq.f32.partialorder %v8463_v8, 8.507059e+37 }
0x109e   :  { %v8467_v13 = vsel %vm8464_vm1, %v8466_v54, %v8462_v21 }
0x109f   :  { %8541 = vperm.xlu2 %9435, %v8453_v7   ;;  %v8468_v57 = vmul.f32 %v16159_v1, %v8467_v13 }
0x10a2   :  { %8546 = vperm.xlu0 %9436, %v8468_v57  }
0x10d3   :  { %v8482_v60 = vpop.permute.xlu2 %8481 }
0x10d4   :  { %v8551_v37 = vmul.f32 %v8482_v60, %v18157_v14 }
0x10d6   :  { %v8566_v27 = vsel %vm875_vm5, %v8551_v37, 0.0 }
0x10db   :  { %v8497_v6 = vpop.permute.xlu2 %8496 }
0x10dc   :  { %v8554_v34 = vmul.f32 %v8497_v6, %v18162_v4 }
0x10de   :  { %v8583_v55 = vsel %vm875_vm5, %v8554_v34, 0.0 }
0x10e2   :  { %v8472_v53 = vpop.permute.xlu1 %8471 }
0x10e3   :  { %v8549_v18 = vmul.f32 %v8472_v53, %v18156_v28 }
0x10e4   :  { %v8477_v19 = vpop.permute.xlu0 %8476 }
0x10e5   :  { %v8565_v61 = vsel %vm875_vm5, %v8549_v18, 0.0  ;;  %v8550_v43 = vmul.f32 %v8477_v19, %v18161_v48 }
0x10e6   :  { %v8567_v38 = vadd.f32 %v8566_v27, %v8565_v61 }
0x10e7   :  { %v8512_v46 = vpop.permute.xlu2 %8511  ;;  %v8580_v5 = vsel %vm875_vm5, %v8550_v43, 0.0 }
0x10e8   :  { %v8557_v25 = vmul.f32 %v8512_v46, %v18163_v33 }
0x10ea   :  { %v8572_v58 = vsel %vm875_vm5, %v8557_v25, 0.0 }
0x10ec   :  { %v8487_v50 = vpop.permute.xlu0 %8486 }
0x10ed   :  { %v8552_v1 = vmul.f32 %v8487_v50, %v18159_v36 }
0x10ee   :  { %v8492_v17 = vpop.permute.xlu1 %8491 }
0x10ef   :  { %v8553_v15 = vmul.f32 %v8492_v17, %v18158_v35  ;;  %v8581_v0 = vsel %vm875_vm5, %v8552_v1, 0.0 }
0x10f0   :  { %v8582_v20 = vadd.f32 %v8581_v0, %v8580_v5 }
0x10f1   :  { %v8527_v9 = vpop.permute.xlu2 %8526  ;;  %v8568_v40 = vsel %vm875_vm5, %v8553_v15, 0.0 }
0x10f2   :  { %v8569_v11 = vadd.f32 %v8568_v40, %v8567_v38  ;;  %v8584_v32 = vadd.f32 %v8583_v55, %v8582_v20  ;;  %v8560_v60 = vmul.f32 %v8527_v9, %v18169_v63 }
0x10f6   :  { %v8502_v24 = vpop.permute.xlu0 %8501 }
0x10f7   :  { %v8555_v30 = vmul.f32 %v8502_v24, %v18160_v31  ;;  %v8589_v24 = vsel %vm875_vm5, %v8560_v60, 0.0 }
0x10f9   :  { %v8570_v12 = vsel %vm875_vm5, %v8555_v30, 0.0  ;;  %v8542_v47 = vpop.permute.xlu2 %8541 }
0x10fa   :  { %v8571_v26 = vadd.f32 %v8570_v12, %v8569_v11  ;;  %v8563_v56 = vmul.f32 %v8542_v47, %v18167_v49 }
0x10fb   :  { %v8507_v10 = vpop.permute.xlu1 %8506 }
0x10fc   :  { %v8556_v44 = vmul.f32 %v8507_v10, %v18164_v42  ;;  %v8573_v8 = vadd.f32 %v8572_v58, %v8571_v26  ;;  %v8578_v17 = vsel %vm875_vm5, %v8563_v56, 0.0 }
0x10fe   :  { %v8585_v16 = vsel %vm875_vm5, %v8556_v44, 0.0 }
0x10ff   :  { %v8586_v54 = vadd.f32 %v8585_v16, %v8584_v32 }
0x1102   :  { %v8517_v59 = vpop.permute.xlu0 %8516 }
0x1103   :  { %v8558_v52 = vmul.f32 %v8517_v59, %v18166_v3 }
0x1105   :  { %v8587_v21 = vsel %vm875_vm5, %v8558_v52, 0.0 }
0x1106   :  { %v8522_v2 = vpop.permute.xlu1 %8521  ;;  %v8588_v6 = vadd.f32 %v8587_v21, %v8586_v54 }
0x1107   :  { %v8559_v51 = vmul.f32 %v8522_v2, %v18165_v39 }
0x1108   :  { %v8590_v18 = vadd.f32 %v8589_v24, %v8588_v6 }
0x1109   :  { %v8574_v62 = vsel %vm875_vm5, %v8559_v51, 0.0 }
0x110a   :  { %v8575_v13 = vadd.f32 %v8574_v62, %v8573_v8 }
0x110c   :  { %v8532_v29 = vpop.permute.xlu0 %8531 }
0x110d   :  { %v8561_v7 = vmul.f32 %v8532_v29, %v18168_v45 }
0x110e   :  { %v8537_v57 = vpop.permute.xlu1 %8536 }
0x110f   :  { %v8576_v19 = vsel %vm875_vm5, %v8561_v7, 0.0  ;;  %v8562_v53 = vmul.f32 %v8537_v57, %v18170_v22 }
0x1110   :  { %v8577_v50 = vadd.f32 %v8576_v19, %v8575_v13 }
0x1111   :  { %v8591_v10 = vsel %vm875_vm5, %v8562_v53, 0.0 }
0x1112   :  { %v8579_v46 = vadd.f32 %v8578_v17, %v8577_v50  ;;  %v8592_v61 = vadd.f32 %v8591_v10, %v8590_v18 }
0x1114   :  { %9992 = vtanh.f32 %v8579_v46  ;;  %v8547_v37 = vpop.permute.xlu0 %8546  ;;  %v18217_v46 = vld [vmem:[#allocation125_spill] sm:$0xff] }
0x1115   :  { %v8564_v15 = vmul.f32 %v8547_v37, %v18171_v41  ;;  %v18218_v37 = vld [vmem:[#allocation48_spill] sm:$0xff] }
0x1117   :  { %v8593_v9 = vsel %vm875_vm5, %v8564_v15, 0.0 }
0x1118   :  { %v8594_v1 = vadd.f32 %v8593_v9, %v8592_v61  ;;  %v18219_v9 = vld [vmem:[#allocation89_spill] sm:$0xff] }
0x111a   :  { %v9993_v30 = vpop.eup %9992  ;;  %9994 = vtanh.f32 %v8594_v1 }
0x111b   :  { %v8599_v59 = vmul.f32 %v9993_v30, %v18157_v14  ;;  %v8597_v27 = vmul.f32 %v9993_v30, %v18156_v28  ;;  %v8601_v12 = vmul.f32 %v9993_v30, %v18158_v35  ;;  %v8605_v51 = vmul.f32 %v9993_v30, %v18163_v33 }
0x111c   :  { %v8603_v47 = vmul.f32 %v9993_v30, %v18160_v31  ;;  %v8607_v55 = vmul.f32 %v9993_v30, %v18165_v39  ;;  %v8611_v56 = vmul.f32 %v9993_v30, %v18167_v49  ;;  %v8609_v13 = vmul.f32 %v9993_v30, %v18168_v45  ;;  %v18220_v30 = vld [vmem:[#allocation51_spill] sm:$0xff] }
0x111d   :  { %v8619_v43 = vsel %vm875_vm5, %v8599_v59, 0.0  ;;  %v8613_v40 = vsel %vm875_vm5, %v8597_v27, 0.0  ;;  %v8625_v2 = vsel %vm875_vm5, %v8601_v12, 0.0  ;;  %v8637_v52 = vsel %vm875_vm5, %v8605_v51, 0.0 }
0x111e   :  { %8620 = vadd.xlane.f32.xlu0 %v8619_v43  ;;  %8614 = vadd.xlane.f32.xlu1 %v8613_v40  ;;  %v8631_v16 = vsel %vm875_vm5, %v8603_v47, 0.0  ;;  %v8643_v62 = vsel %vm875_vm5, %v8607_v55, 0.0  ;;  %v8655_v54 = vsel %vm875_vm5, %v8611_v56, 0.0  ;;  %v8649_v57 = vsel %vm875_vm5, %v8609_v13, 0.0  ;;  %v18223_v47 = vld [vmem:[#allocation117_spill] sm:$0xff] }
0x1120   :  { %v9995_v38 = vpop.eup %9994 }
0x1121   :  { %v8598_v0 = vmul.f32 %v9995_v38, %v18161_v48  ;;  %v8602_v34 = vmul.f32 %v9995_v38, %v18162_v4  ;;  %v8600_v25 = vmul.f32 %v9995_v38, %v18159_v36  ;;  %v8604_v44 = vmul.f32 %v9995_v38, %v18164_v42 }
0x1122   :  { %v8608_v58 = vmul.f32 %v9995_v38, %v18169_v63  ;;  %v8606_v8 = vmul.f32 %v9995_v38, %v18166_v3  ;;  %v8610_v29 = vmul.f32 %v9995_v38, %v18170_v22  ;;  %v8612_v60 = vmul.f32 %v9995_v38, %v18171_v41  ;;  %v18221_v38 = vld [vmem:[#allocation99_spill] sm:$0xff] }
0x1123   :  { %v8616_v11 = vsel %vm875_vm5, %v8598_v0, 0.0  ;;  %v8628_v5 = vsel %vm875_vm5, %v8602_v34, 0.0  ;;  %v8622_v20 = vsel %vm875_vm5, %v8600_v25, 0.0  ;;  %v8634_v26 = vsel %vm875_vm5, %v8604_v44, 0.0 }
0x1124   :  { %8617 = vadd.xlane.f32.xlu2 %v8616_v11  ;;  %v8646_v32 = vsel %vm875_vm5, %v8608_v58, 0.0  ;;  %v8640_v21 = vsel %vm875_vm5, %v8606_v8, 0.0  ;;  %v8652_v7 = vsel %vm875_vm5, %v8610_v29, 0.0  ;;  %v8658_v19 = vsel %vm875_vm5, %v8612_v60, 0.0 }
0x1126   :  { %8626 = vadd.xlane.f32.xlu1 %v8625_v2  ;;  %8629 = vadd.xlane.f32.xlu0 %v8628_v5  ;;  %v18222_v2 = vld [vmem:[#allocation91_spill] sm:$0xff] }
0x112c   :  { %8623 = vadd.xlane.f32.xlu2 %v8622_v20 }
0x112e   :  { %8635 = vadd.xlane.f32.xlu1 %v8634_v26  ;;  %8638 = vadd.xlane.f32.xlu0 %v8637_v52 }
0x1134   :  { %8632 = vadd.xlane.f32.xlu2 %v8631_v16  ;;  %v18224_v16 = vld [vmem:[#allocation115_spill] sm:$0xff] }
0x1136   :  { %8644 = vadd.xlane.f32.xlu1 %v8643_v62  ;;  %8647 = vadd.xlane.f32.xlu0 %v8646_v32 }
0x113c   :  { %8641 = vadd.xlane.f32.xlu2 %v8640_v21  ;;  %v18225_v21 = vld [vmem:[#allocation114_spill] sm:$0xff] }
0x113e   :  { %8653 = vadd.xlane.f32.xlu1 %v8652_v7  ;;  %8656 = vadd.xlane.f32.xlu0 %v8655_v54  ;;  %v18226_v54 = vld [vmem:[#allocation113_spill] sm:$0xff] }
0x1144   :  { %8650 = vadd.xlane.f32.xlu2 %v8649_v57 }
0x114c   :  { %8659 = vadd.xlane.f32.xlu2 %v8658_v19 }
0x1191   :  { %v8621_v53 = vpop.xlane.xlu0 %8620  ;;  %v8615_v6 = vpop.xlane.xlu1 %8614 }
0x1192   :  { %v16566_v50 = vadd.f32 %v8615_v6, %v16003_v23  ;;  %v16588_v0 = vadd.f32 %v8621_v53, %v18221_v38  ;;  %v18227_v6 = vld [vmem:[#allocation129_spill] sm:$0xff] }
0x1194   :  { %v8693_v15 = vperm.slane %v16566_v50, %v18218_v37  ;;  %v8695_v51 = vperm.slane %v16588_v0, %v18218_v37 }
0x1197   :  { %v8618_v17 = vpop.xlane.xlu2 %8617 }
0x1198   :  { %v16569_v24 = vadd.f32 %v8618_v17, %v18217_v46 }
0x1199   :  { %v8630_v10 = vpop.xlane.xlu0 %8629  ;;  %v8627_v18 = vpop.xlane.xlu1 %8626 }
0x119a   :  { %v8694_v61 = vperm.slane %v16569_v24, %v18218_v37  ;;  %v16576_v1 = vadd.f32 %v8630_v10, %v18219_v9  ;;  %v16579_v59 = vadd.f32 %v8627_v18, %v18220_v30 }
0x119c   :  { %v8698_v23 = vperm.slane %v16576_v1, %v18218_v37  ;;  %v8697_v27 = vperm.slane %v16579_v59, %v18218_v37  ;;  %v8709_v43 = vsel %vm1022_vm8, %v8694_v61, %v8693_v15  ;;  %v18228_v15 = vld [vmem:[#allocation24_spill] sm:$0xff] }
0x119d   :  { %v8725_v40 = vsel %vm1039_vm9, %v8709_v43, -inf }
0x119e   :  { %8726 = vmax.xlane.f32.xlu1 %v8725_v40  ;;  %v8711_v12 = vsel %vm1022_vm8, %v8698_v23, %v8697_v27  ;;  %v18229_v40 = vld [vmem:[#allocation71_spill] sm:$0xff] }
0x119f   :  { %v8624_v34 = vpop.xlane.xlu2 %8623  ;;  %v8731_v11 = vsel %vm1039_vm9, %v8711_v12, -inf }
0x11a0   :  { %v16593_v5 = vadd.f32 %v8624_v34, %v18222_v2  ;;  %8732 = vmax.xlane.f32.xlu2 %v8731_v11  ;;  %v18230_v34 = vld [vmem:[#allocation88_spill] sm:$0xff] }
0x11a1   :  { %v8639_v25 = vpop.xlane.xlu0 %8638  ;;  %v8636_v44 = vpop.xlane.xlu1 %8635 }
0x11a2   :  { %v8696_v20 = vperm.slane %v16593_v5, %v18218_v37  ;;  %v16602_v55 = vadd.f32 %v8636_v44, %v18223_v47  ;;  %v16624_v17 = vadd.f32 %v8639_v25, %v18227_v6 }
0x11a4   :  { %v8710_v26 = vsel %vm1022_vm8, %v8696_v20, %v8695_v51  ;;  %v8700_v29 = vperm.slane %v16602_v55, %v18218_v37  ;;  %v8701_v9 = vperm.slane %v16624_v17, %v18218_v37 }
0x11a5   :  { %v8728_v52 = vsel %vm1039_vm9, %v8710_v26, -inf  ;;  %v18231_v26 = vld [vmem:[#allocation50_spill] sm:$0xff] }
0x11a6   :  { %8729 = vmax.xlane.f32.xlu0 %v8728_v52 }
0x11a7   :  { %v8633_v58 = vpop.xlane.xlu2 %8632 }
0x11a8   :  { %v16605_v62 = vadd.f32 %v8633_v58, %v18224_v16  ;;  %v18232_v58 = vld [vmem:[#allocation130_spill] sm:$0xff] }
0x11a9   :  { %v8648_v32 = vpop.xlane.xlu0 %8647  ;;  %v8645_v8 = vpop.xlane.xlu1 %8644 }
0x11aa   :  { %v8699_v56 = vperm.slane %v16605_v62, %v18218_v37  ;;  %v16612_v7 = vadd.f32 %v8648_v32, %v18225_v21  ;;  %v16615_v13 = vadd.f32 %v8645_v8, %v18226_v54 }
0x11ac   :  { %v8704_v57 = vperm.slane %v16612_v7, %v18218_v37  ;;  %v8703_v60 = vperm.slane %v16615_v13, %v18218_v37  ;;  %v8712_v19 = vsel %vm1022_vm8, %v8700_v29, %v8699_v56 }
0x11ad   :  { %v8734_v53 = vsel %vm1039_vm9, %v8712_v19, -inf }
0x11ae   :  { %8735 = vmax.xlane.f32.xlu1 %v8734_v53  ;;  %v8714_v46 = vsel %vm1022_vm8, %v8704_v57, %v8703_v60 }
0x11af   :  { %v8642_v10 = vpop.xlane.xlu2 %8641  ;;  %v8740_v18 = vsel %vm1039_vm9, %v8714_v46, -inf }
0x11b0   :  { %v16629_v61 = vadd.f32 %v8642_v10, %v18228_v15  ;;  %8741 = vmax.xlane.f32.xlu2 %v8740_v18 }
0x11b1   :  { %v8654_v23 = vpop.xlane.xlu1 %8653  ;;  %v8657_v44 = vpop.xlane.xlu0 %8656 }
0x11b2   :  { %v8702_v30 = vperm.slane %v16629_v61, %v18218_v37  ;;  %v16638_v38 = vadd.f32 %v8654_v23, %v18229_v40  ;;  %v16650_v52 = vadd.f32 %v8657_v44, %v18231_v26 }
0x11b4   :  { %v8713_v27 = vsel %vm1022_vm8, %v8702_v30, %v8701_v9  ;;  %v8706_v2 = vperm.slane %v16638_v38, %v18218_v37  ;;  %v8707_v32 = vperm.slane %v16650_v52, %v18218_v37 }
0x11b5   :  { %v8737_v43 = vsel %vm1039_vm9, %v8713_v27, -inf }
0x11b6   :  { %8738 = vmax.xlane.f32.xlu0 %v8737_v43 }
0x11b7   :  { %v8651_v12 = vpop.xlane.xlu2 %8650 }
0x11b8   :  { %v16641_v11 = vadd.f32 %v8651_v12, %v18230_v34 }
0x11ba   :  { %v8705_v25 = vperm.slane %v16641_v11, %v18218_v37 }
0x11bc   :  { %v8715_v51 = vsel %vm1022_vm8, %v8706_v2, %v8705_v25 }
0x11bd   :  { %v8743_v20 = vsel %vm1039_vm9, %v8715_v51, -inf }
0x11be   :  { %8744 = vmax.xlane.f32.xlu1 %v8743_v20 }
0x11bf   :  { %v8660_v47 = vpop.xlane.xlu2 %8659 }
0x11c0   :  { %v16653_v16 = vadd.f32 %v8660_v47, %v18232_v58 }
0x11c2   :  { %v8708_v8 = vperm.slane %v16653_v16, %v18218_v37 }
0x11c4   :  { %v8716_v29 = vsel %vm1022_vm8, %v8708_v8, %v8707_v32 }
0x11c5   :  { %v8746_v56 = vsel %vm1039_vm9, %v8716_v29, -inf }
0x11c6   :  { %8747 = vmax.xlane.f32.xlu0 %v8746_v56 }
0x1211   :  { %v8727_v21 = vpop.xlane.xlu1 %8726 }
0x1212   :  { %v8757_v54 = vperm.slane %v8727_v21, 0  ;;  %v8758_v57 = vperm.slane %v8727_v21, 1 }
0x1213   :  { %v8733_v60 = vpop.xlane.xlu2 %8732 }
0x1214   :  { %v8789_v19 = vsub.f32 %v16566_v50, %v8757_v54  ;;  %v8790_v53 = vsub.f32 %v16569_v24, %v8758_v57  ;;  %v8762_v6 = vperm.slane %v8733_v60, 1  ;;  %v8761_v23 = vperm.slane %v8733_v60, 0 }
0x1216   :  { %v8805_v46 = vmul.f32 1.442695, %v8789_v19  ;;  %v8807_v10 = vmul.f32 1.442695, %v8790_v53  ;;  %v8794_v18 = vsub.f32 %v16576_v1, %v8762_v6  ;;  %v8793_v2 = vsub.f32 %v16579_v59, %v8761_v23 }
0x1218   :  { %9996 = vpow2.f32 %v8805_v46  ;;  %v8815_v27 = vmul.f32 1.442695, %v8794_v18 }
0x1219   :  { %9998 = vpow2.f32 %v8807_v10  ;;  %v8730_v15 = vpop.xlane.xlu0 %8729 }
0x121a   :  { %v8759_v9 = vperm.slane %v8730_v15, 0  ;;  %v8760_v30 = vperm.slane %v8730_v15, 1  ;;  %10000 = vpow2.f32 %v8815_v27 }
0x121c   :  { %v8791_v43 = vsub.f32 %v16588_v0, %v8759_v9  ;;  %v8792_v40 = vsub.f32 %v16593_v5, %v8760_v30  ;;  %v8813_v0 = vmul.f32 1.442695, %v8793_v2 }
0x121e   :  { %v16666_v12 = vpop.eup %9996  ;;  %v8809_v50 = vmul.f32 1.442695, %v8791_v43  ;;  %v8811_v24 = vmul.f32 1.442695, %v8792_v40 }
0x121f   :  { %v16668_v34 = vpop.eup %9998  ;;  %8854 = vperm.xlu2 %9435, %v16666_v12  }
0x1220   :  { %10002 = vpow2.f32 %v8809_v50  ;;  %8857 = vperm.xlu1 %9437, %v16668_v34   ;;  %v16674_v51 = vpop.eup %10000 }
0x1221   :  { %10004 = vpow2.f32 %v8811_v24  ;;  %v8736_v1 = vpop.xlane.xlu1 %8735 }
0x1222   :  { %v8763_v25 = vperm.slane %v8736_v1, 0  ;;  %v8764_v44 = vperm.slane %v8736_v1, 1  ;;  %10006 = vpow2.f32 %v8813_v0 }
0x1223   :  { %v8742_v58 = vpop.xlane.xlu2 %8741 }
0x1224   :  { %v8795_v5 = vsub.f32 %v16605_v62, %v8763_v25  ;;  %v8796_v59 = vsub.f32 %v16602_v55, %v8764_v44  ;;  %v8767_v62 = vperm.slane %v8742_v58, 0  ;;  %v8768_v21 = vperm.slane %v8742_v58, 1 }
0x1226   :  { %v16676_v20 = vpop.eup %10002  ;;  %v8817_v26 = vmul.f32 1.442695, %v8795_v5  ;;  %v8819_v56 = vmul.f32 1.442695, %v8796_v59  ;;  %v8799_v19 = vsub.f32 %v16615_v13, %v8767_v62  ;;  %v8800_v46 = vsub.f32 %v16612_v7, %v8768_v21 }
0x1227   :  { %v16678_v47 = vpop.eup %10004  ;;  %8860 = vperm.xlu0 %9436, %v16676_v20  }
0x1228   :  { %10008 = vpow2.f32 %v8817_v26  ;;  %8869 = vperm.xlu1 %9437, %v16674_v51   ;;  %8863 = vperm.xlu2 %9435, %v16678_v47   ;;  %v16686_v60 = vpop.eup %10006  ;;  %v8825_v10 = vmul.f32 1.442695, %v8799_v19  ;;  %v8827_v18 = vmul.f32 1.442695, %v8800_v46 }
0x1229   :  { %v8739_v32 = vpop.xlane.xlu0 %8738  ;;  %10010 = vpow2.f32 %v8819_v56 }
0x122a   :  { %v8765_v8 = vperm.slane %v8739_v32, 0  ;;  %v8766_v29 = vperm.slane %v8739_v32, 1 }
0x122c   :  { %v8797_v54 = vsub.f32 %v16624_v17, %v8765_v8  ;;  %v8798_v57 = vsub.f32 %v16629_v61, %v8766_v29 }
0x122e   :  { %v16688_v55 = vpop.eup %10008  ;;  %v8821_v53 = vmul.f32 1.442695, %v8797_v54  ;;  %v8823_v6 = vmul.f32 1.442695, %v8798_v57 }
0x122f   :  { %8866 = vperm.xlu0 %9436, %v16686_v60   ;;  %v16695_v30 = vpop.eup %10010 }
0x1230   :  { %10012 = vpow2.f32 %v8821_v53  ;;  %8872 = vperm.xlu2 %9435, %v16688_v55  }
0x1231   :  { %10014 = vpow2.f32 %v8823_v6  ;;  %v8745_v17 = vpop.xlane.xlu1 %8744 }
0x1232   :  { %v8769_v61 = vperm.slane %v8745_v17, 0  ;;  %v8770_v15 = vperm.slane %v8745_v17, 1  ;;  %10016 = vpow2.f32 %v8825_v10 }
0x1233   :  { %10018 = vpow2.f32 %v8827_v18 }
0x1234   :  { %v8801_v9 = vsub.f32 %v16641_v11, %v8769_v61  ;;  %v8802_v27 = vsub.f32 %v16638_v38, %v8770_v15 }
0x1236   :  { %v16697_v13 = vpop.eup %10012  ;;  %v8829_v23 = vmul.f32 1.442695, %v8801_v9  ;;  %v8831_v50 = vmul.f32 1.442695, %v8802_v27 }
0x1237   :  { %v16699_v7 = vpop.eup %10014  ;;  %8878 = vperm.xlu1 %9437, %v16697_v13   ;;  %8875 = vperm.xlu0 %9436, %v16695_v30  }
0x1238   :  { %10020 = vpow2.f32 %v8829_v23  ;;  %8881 = vperm.xlu2 %9435, %v16699_v7   ;;  %v16705_v24 = vpop.eup %10016 }
0x1239   :  { %v8748_v43 = vpop.xlane.xlu0 %8747  ;;  %v16709_v25 = vpop.eup %10018  ;;  %10022 = vpow2.f32 %v8831_v50 }
0x123a   :  { %v8771_v11 = vperm.slane %v8748_v43, 0  ;;  %v8772_v40 = vperm.slane %v8748_v43, 1 }
0x123c   :  { %v8803_v2 = vsub.f32 %v16650_v52, %v8771_v11  ;;  %v8804_v1 = vsub.f32 %v16653_v16, %v8772_v40 }
0x123e   :  { %v16711_v38 = vpop.eup %10020  ;;  %v8833_v0 = vmul.f32 1.442695, %v8803_v2  ;;  %v8835_v44 = vmul.f32 1.442695, %v8804_v1 }
0x123f   :  { %8887 = vperm.xlu1 %9437, %v16709_v25   ;;  %8884 = vperm.xlu0 %9436, %v16705_v24   ;;  %v16716_v5 = vpop.eup %10022 }
0x1240   :  { %10024 = vpow2.f32 %v8833_v0  ;;  %8890 = vperm.xlu2 %9435, %v16711_v38  }
0x1241   :  { %10026 = vpow2.f32 %v8835_v44 }
0x1246   :  { %v16718_v52 = vpop.eup %10024 }
0x1247   :  { %v16720_v16 = vpop.eup %10026  ;;  %8896 = vperm.xlu1 %9437, %v16718_v52   ;;  %8893 = vperm.xlu0 %9436, %v16716_v5  }
0x1248   :  { %8899 = vperm.xlu2 %9435, %v16720_v16  }
0x1279   :  { %v8855_v26 = vpop.permute.xlu2 %8854 }
0x127a   :  { %v8901_v32 = vperm.slane %v8855_v26, %v18218_v37 }
0x1282   :  { %v8864_v59 = vpop.permute.xlu2 %8863 }
0x1283   :  { %v8904_v54 = vperm.slane %v8864_v59, %v18218_v37 }
0x128a   :  { %v8873_v56 = vpop.permute.xlu2 %8872 }
0x128b   :  { %v8907_v27 = vperm.slane %v8873_v56, %v18218_v37 }
0x1292   :  { %v8858_v58 = vpop.permute.xlu1 %8857  ;;  %v8882_v61 = vpop.permute.xlu2 %8881 }
0x1293   :  { %v8902_v62 = vperm.slane %v8858_v58, %v18218_v37  ;;  %v8910_v43 = vperm.slane %v8882_v61, %v18218_v37 }
0x1295   :  { %v8917_v8 = vsel %vm1022_vm8, %v8902_v62, %v8901_v32 }
0x1296   :  { %v8933_v29 = vsel %vm1039_vm9, %v8917_v8, 0.0 }
0x1297   :  { %8934 = vadd.xlane.f32.xlu0 %v8933_v29 }
0x1299   :  { %v8861_v21 = vpop.permute.xlu0 %8860 }
0x129a   :  { %v8903_v57 = vperm.slane %v8861_v21, %v18218_v37  ;;  %v8870_v6 = vpop.permute.xlu1 %8869  ;;  %v8891_v1 = vpop.permute.xlu2 %8890 }
0x129b   :  { %v8906_v17 = vperm.slane %v8870_v6, %v18218_v37 }
0x129c   :  { %v8918_v19 = vsel %vm1022_vm8, %v8904_v54, %v8903_v57  ;;  %v8913_v54 = vperm.slane %v8891_v1, %v18218_v37 }
0x129d   :  { %v8936_v53 = vsel %vm1039_vm9, %v8918_v19, 0.0 }
0x129e   :  { %8937 = vadd.xlane.f32.xlu1 %v8936_v53 }
0x12a1   :  { %v8867_v46 = vpop.permute.xlu0 %8866 }
0x12a2   :  { %v8905_v10 = vperm.slane %v8867_v46, %v18218_v37  ;;  %v8900_v29 = vpop.permute.xlu2 %8899 }
0x12a3   :  { %v8916_v57 = vperm.slane %v8900_v29, %v18218_v37 }
0x12a4   :  { %v8919_v18 = vsel %vm1022_vm8, %v8906_v17, %v8905_v10 }
0x12a5   :  { %v8939_v15 = vsel %vm1039_vm9, %v8919_v18, 0.0 }
0x12a6   :  { %8940 = vadd.xlane.f32.xlu2 %v8939_v15 }
0x12a9   :  { %v8876_v9 = vpop.permute.xlu0 %8875  ;;  %v8879_v23 = vpop.permute.xlu1 %8878 }
0x12aa   :  { %v8908_v11 = vperm.slane %v8876_v9, %v18218_v37  ;;  %v8909_v40 = vperm.slane %v8879_v23, %v18218_v37 }
0x12ac   :  { %v8920_v50 = vsel %vm1022_vm8, %v8908_v11, %v8907_v27  ;;  %v8921_v2 = vsel %vm1022_vm8, %v8910_v43, %v8909_v40 }
0x12ad   :  { %v8942_v0 = vsel %vm1039_vm9, %v8920_v50, 0.0  ;;  %v8945_v44 = vsel %vm1039_vm9, %v8921_v2, 0.0 }
0x12ae   :  { %8943 = vadd.xlane.f32.xlu0 %v8942_v0  ;;  %8946 = vadd.xlane.f32.xlu1 %v8945_v44 }
0x12b1   :  { %v8885_v26 = vpop.permute.xlu0 %8884  ;;  %v8888_v59 = vpop.permute.xlu1 %8887 }
0x12b2   :  { %v8911_v58 = vperm.slane %v8885_v26, %v18218_v37  ;;  %v8912_v32 = vperm.slane %v8888_v59, %v18218_v37 }
0x12b4   :  { %v8922_v62 = vsel %vm1022_vm8, %v8912_v32, %v8911_v58 }
0x12b5   :  { %v8948_v8 = vsel %vm1039_vm9, %v8922_v62, 0.0 }
0x12b6   :  { %8949 = vadd.xlane.f32.xlu2 %v8948_v8 }
0x12b9   :  { %v8894_v56 = vpop.permute.xlu0 %8893  ;;  %v8897_v21 = vpop.permute.xlu1 %8896 }
0x12ba   :  { %v8914_v19 = vperm.slane %v8894_v56, %v18218_v37  ;;  %v8915_v53 = vperm.slane %v8897_v21, %v18218_v37 }
0x12bc   :  { %v8923_v6 = vsel %vm1022_vm8, %v8914_v19, %v8913_v54  ;;  %v8924_v46 = vsel %vm1022_vm8, %v8916_v57, %v8915_v53 }
0x12bd   :  { %v8951_v17 = vsel %vm1039_vm9, %v8923_v6, 0.0  ;;  %v8954_v10 = vsel %vm1039_vm9, %v8924_v46, 0.0 }
0x12be   :  { %8952 = vadd.xlane.f32.xlu0 %v8951_v17  ;;  %8955 = vadd.xlane.f32.xlu1 %v8954_v10 }
0x130a   :  { %v8935_v61 = vpop.xlane.xlu0 %8934 }
0x130b   :  { %v8965_v18 = vperm.slane %v8935_v61, 0  ;;  %v8966_v15 = vperm.slane %v8935_v61, 1 }
0x130d   :  { %10028 = vrcp.f32 %v8965_v18  ;;  %v9021_v43 = vand.u32 2147483647, %v8966_v15  ;;  %v9023_v50 = vand.u32 2147483648, %v8966_v15  ;;  %v9006_v2 = vand.u32 2147483647, %v8965_v18 }
0x130e   :  { %10030 = vrcp.f32 %v8966_v15  ;;  %v9008_v0 = vand.u32 2147483648, %v8965_v18  ;;  %vm9017_vm8 = vweird.f32 %v8966_v15  ;;  %vm9002_vm4 = vweird.f32 %v8965_v18 }
0x130f   :  { %vm16763_vm9 = vcmp.eq.f32.partialorder %v9021_v43, 8.507059e+37  ;;  %v9024_v32 = vor.u32 1.1754944e-38, %v9023_v50  ;;  %vm16767_vm10 = vcmp.eq.f32.partialorder %v9006_v2, 8.507059e+37 }
0x1310   :  { %v9009_v56 = vor.u32 1.1754944e-38, %v9008_v0 }
0x1311   :  { %v8938_v9 = vpop.xlane.xlu1 %8937 }
0x1312   :  { %v16757_v23 = vperm.slane %v8938_v9, 0  ;;  %v16759_v27 = vperm.slane %v8938_v9, 1 }
0x1313   :  { %v10029_v37 = vpop.eup %10028 }
0x1314   :  { %v10031_v11 = vpop.eup %10030  ;;  %v8998_v40 = vmul.f32 %v10029_v37, %v8965_v18  ;;  %10032 = vrcp.f32 %v16757_v23  ;;  %vm9003_vm13 = vweird.f32 %v10029_v37  ;;  %v9051_v21 = vand.u32 2147483647, %v16759_v27 }
0x1315   :  { %v9013_v1 = vmul.f32 %v10031_v11, %v8966_v15  ;;  %10034 = vrcp.f32 %v16759_v27  ;;  %vm9018_vm11 = vweird.f32 %v10031_v11  ;;  %v9053_v6 = vand.u32 2147483648, %v16759_v27  ;;  %vm9004_vm2 = vmor %vm9002_vm4, %vm9003_vm13 }
0x1316   :  { %v8999_v44 = vsub.f32 1.0, %v8998_v40  ;;  %vm9047_vm14 = vweird.f32 %v16759_v27  ;;  %vm9032_vm12 = vweird.f32 %v16757_v23  ;;  %v9036_v61 = vand.u32 2147483647, %v16757_v23  ;;  %vm9019_vm3 = vmor %vm9017_vm8, %vm9018_vm11 }
0x1317   :  { %v9014_v26 = vsub.f32 1.0, %v9013_v1  ;;  %v9038_v40 = vand.u32 2147483648, %v16757_v23  ;;  %vm16794_vm7 = vcmp.eq.f32.partialorder %v9051_v21, 8.507059e+37 }
0x1318   :  { %v9000_v58 = vmul.f32 %v10029_v37, %v8999_v44  ;;  %vm16804_vm0 = vcmp.eq.f32.partialorder %v9036_v61, 8.507059e+37 }
0x1319   :  { %v9015_v8 = vmul.f32 %v10031_v11, %v9014_v26  ;;  %v8941_v29 = vpop.xlane.xlu2 %8940 }
0x131a   :  { %v10033_v54 = vpop.eup %10032  ;;  %v16772_v57 = vperm.slane %v8941_v29, 0  ;;  %v16774_v19 = vperm.slane %v8941_v29, 1  ;;  %v9001_v53 = vadd.f32 %v10029_v37, %v9000_v58  ;;  %v9039_v29 = vor.u32 1.1754944e-38, %v9038_v40 }
0x131b   :  { %v16777_v46 = vpop.eup %10034  ;;  %v9028_v17 = vmul.f32 %v10033_v54, %v16757_v23  ;;  %v9016_v10 = vadd.f32 %v10031_v11, %v9015_v8  ;;  %vm9033_vm15 = vweird.f32 %v10033_v54 }
0x131c   :  { %v9043_v9 = vmul.f32 %v16777_v46, %v16759_v27  ;;  %10036 = vrcp.f32 %v16772_v57  ;;  %v9005_v43 = vsel %vm9004_vm2, %v10029_v37, %v9001_v53  ;;  %v9054_v37 = vor.u32 1.1754944e-38, %v9053_v6  ;;  %vm9034_vm8 = vmor %vm9032_vm12, %vm9033_vm15 }
0x131d   :  { %v9029_v50 = vsub.f32 1.0, %v9028_v17  ;;  %10038 = vrcp.f32 %v16774_v19  ;;  %v9020_v18 = vsel %vm9019_vm3, %v10031_v11, %v9016_v10  ;;  %v9010_v2 = vsel %vm16767_vm10, %v9009_v56, %v9005_v43 }
0x131e   :  { %v9044_v0 = vsub.f32 1.0, %v9043_v9  ;;  %v9025_v44 = vsel %vm16763_vm9, %v9024_v32, %v9020_v18  ;;  %v9011_v15 = vmul.f32 %v16666_v12, %v9010_v2  ;;  %v9066_v11 = vand.u32 2147483647, %v16772_v57 }
0x131f   :  { %v9030_v26 = vmul.f32 %v10033_v54, %v9029_v50  ;;  %v9026_v58 = vmul.f32 %v16668_v34, %v9025_v44  ;;  %v9068_v59 = vand.u32 2147483648, %v16772_v57  ;;  %vm9048_vm6 = vweird.f32 %v16777_v46 }
0x1320   :  { %v9045_v62 = vmul.f32 %v16777_v46, %v9044_v0  ;;  %9239 = vperm.xlu2 %9435, %v9011_v15   ;;  %vm9062_vm1 = vweird.f32 %v16772_v57  ;;  %v9081_v34 = vand.u32 2147483647, %v16774_v19  ;;  %vm9077_vm9 = vweird.f32 %v16774_v19  ;;  %vm9049_vm13 = vmor %vm9047_vm14, %vm9048_vm6 }
0x1321   :  { %9244 = vperm.xlu0 %9436, %v9026_v58   ;;  %v8944_v32 = vpop.xlane.xlu0 %8943  ;;  %v8947_v12 = vpop.xlane.xlu1 %8946  ;;  %v9031_v56 = vadd.f32 %v10033_v54, %v9030_v26  ;;  %v9083_v10 = vand.u32 2147483648, %v16774_v19  ;;  %vm16827_vm4 = vcmp.eq.f32.partialorder %v9066_v11, 8.507059e+37  ;;  %v9069_v0 = vor.u32 1.1754944e-38, %v9068_v59 }
0x1322   :  { %v10037_v21 = vpop.eup %10036  ;;  %v16812_v53 = vperm.slane %v8944_v32, 0  ;;  %v16814_v6 = vperm.slane %v8944_v32, 1  ;;  %v16816_v17 = vperm.slane %v8947_v12, 0  ;;  %v16824_v43 = vperm.slane %v8947_v12, 1 }
0x1323   :  { %v10039_v61 = vpop.eup %10038  ;;  %v9058_v9 = vmul.f32 %v10037_v21, %v16772_v57  ;;  %v9046_v40 = vadd.f32 %v16777_v46, %v9045_v62  ;;  %v9035_v50 = vsel %vm9034_vm8, %v10033_v54, %v9031_v56  ;;  %vm9063_vm10 = vweird.f32 %v10037_v21 }
0x1324   :  { %v9073_v2 = vmul.f32 %v10039_v61, %v16774_v19  ;;  %10040 = vrcp.f32 %v16812_v53  ;;  %v9040_v23 = vsel %vm16804_vm0, %v9039_v29, %v9035_v50  ;;  %vm9078_vm11 = vweird.f32 %v10039_v61  ;;  %vm9064_vm12 = vmor %vm9062_vm1, %vm9063_vm10 }
0x1325   :  { %v9059_v44 = vsub.f32 1.0, %v9058_v9  ;;  %10042 = vrcp.f32 %v16814_v6  ;;  %v9050_v54 = vsel %vm9049_vm13, %v16777_v46, %v9046_v40  ;;  %v9041_v15 = vmul.f32 %v16676_v20, %v9040_v23  ;;  %vm16869_vm3 = vmor %vm9077_vm9, %vm9078_vm11 }
0x1326   :  { %v9074_v26 = vsub.f32 1.0, %v9073_v2  ;;  %10044 = vrcp.f32 %v16816_v17  ;;  %v9055_v58 = vsel %vm16794_vm7, %v9054_v37, %v9050_v54  ;;  %vm16847_vm2 = vcmp.eq.f32.partialorder %v9081_v34, 8.507059e+37 }
0x1327   :  { %v9060_v27 = vmul.f32 %v10037_v21, %v9059_v44  ;;  %10046 = vrcp.f32 %v16824_v43  ;;  %v9056_v11 = vmul.f32 %v16678_v47, %v9055_v58  ;;  %9249 = vperm.xlu1 %9437, %v9041_v15   ;;  %v9084_v20 = vor.u32 1.1754944e-38, %v9083_v10 }
0x1328   :  { %v9075_v62 = vmul.f32 %v10039_v61, %v9074_v26  ;;  %v9113_v46 = vand.u32 2147483648, %v16814_v6  ;;  %v9111_v37 = vand.u32 2147483647, %v16814_v6  ;;  %vm9092_vm14 = vweird.f32 %v16812_v53 }
0x1329   :  { %9254 = vperm.xlu0 %9436, %v9056_v11   ;;  %v8950_v29 = vpop.xlane.xlu2 %8949  ;;  %v9061_v1 = vadd.f32 %v10037_v21, %v9060_v27  ;;  %v9096_v59 = vand.u32 2147483647, %v16812_v53  ;;  %v9098_v34 = vand.u32 2147483648, %v16812_v53  ;;  %vm9107_vm7 = vweird.f32 %v16814_v6 }
0x132a   :  { %v10041_v47 = vpop.eup %10040  ;;  %v16855_v32 = vperm.slane %v8950_v29, 0  ;;  %v16857_v12 = vperm.slane %v8950_v29, 1  ;;  %v9076_v56 = vadd.f32 %v10039_v61, %v9075_v62  ;;  %v9114_v2 = vor.u32 1.1754944e-38, %v9113_v46 }
0x132b   :  { %v16863_v10 = vpop.eup %10042  ;;  %v9088_v9 = vmul.f32 %v10041_v47, %v16812_v53  ;;  %v9065_v40 = vsel %vm9064_vm12, %v10037_v21, %v9061_v1  ;;  %vm9093_vm15 = vweird.f32 %v10041_v47  ;;  %vm16889_vm0 = vcmp.eq.f32.partialorder %v9111_v37, 8.507059e+37 }
0x132c   :  { %v16874_v57 = vpop.eup %10044  ;;  %v9103_v23 = vmul.f32 %v16863_v10, %v16814_v6  ;;  %10048 = vrcp.f32 %v16855_v32  ;;  %v9070_v21 = vsel %vm16827_vm4, %v9069_v0, %v9065_v40  ;;  %v9080_v19 = vsel %vm16869_vm3, %v10039_v61, %v9076_v56  ;;  %vm9094_vm4 = vmor %vm9092_vm14, %vm9093_vm15 }
0x132d   :  { %v16883_v44 = vpop.eup %10046  ;;  %v9089_v54 = vsub.f32 1.0, %v9088_v9  ;;  %v9118_v15 = vmul.f32 %v16874_v57, %v16816_v17  ;;  %10050 = vrcp.f32 %v16857_v12  ;;  %v9071_v26 = vmul.f32 %v16686_v60, %v9070_v21 }
0x132e   :  { %v9104_v27 = vsub.f32 1.0, %v9103_v23  ;;  %v9133_v18 = vmul.f32 %v16883_v44, %v16824_v43  ;;  %v9085_v61 = vsel %vm16847_vm2, %v9084_v20, %v9080_v19  ;;  %vm9108_vm6 = vweird.f32 %v16863_v10 }
0x132f   :  { %v9090_v0 = vmul.f32 %v10041_v47, %v9089_v54  ;;  %v9119_v11 = vsub.f32 1.0, %v9118_v15  ;;  %9259 = vperm.xlu2 %9435, %v9071_v26   ;;  %v9086_v62 = vmul.f32 %v16674_v51, %v9085_v61  ;;  %vm16899_vm1 = vcmp.eq.f32.partialorder %v9096_v59, 8.507059e+37  ;;  %vm9109_vm13 = vmor %vm9107_vm7, %vm9108_vm6 }
0x1330   :  { %v9105_v46 = vmul.f32 %v16863_v10, %v9104_v27  ;;  %v9134_v29 = vsub.f32 1.0, %v9133_v18  ;;  %v9099_v1 = vor.u32 1.1754944e-38, %v9098_v34  ;;  %vm9122_vm8 = vweird.f32 %v16816_v17 }
0x1331   :  { %v9120_v8 = vmul.f32 %v16874_v57, %v9119_v11  ;;  %9264 = vperm.xlu1 %9437, %v9086_v62   ;;  %v8953_v20 = vpop.xlane.xlu0 %8952  ;;  %v8956_v37 = vpop.xlane.xlu1 %8955  ;;  %v9091_v56 = vadd.f32 %v10041_v47, %v9090_v0  ;;  %vm9123_vm9 = vweird.f32 %v16874_v57  ;;  %v9126_v51 = vand.u32 2147483647, %v16816_v17 }
0x1332   :  { %v10049_v59 = vpop.eup %10048  ;;  %v9135_v9 = vmul.f32 %v16883_v44, %v9134_v29  ;;  %v16909_v40 = vperm.slane %v8953_v20, 0  ;;  %v16911_v50 = vperm.slane %v8953_v20, 1  ;;  %v16913_v34 = vperm.slane %v8956_v37, 0  ;;  %vm16941_vm10 = vmor %vm9122_vm8, %vm9123_vm9 }
0x1333   :  { %v16918_v23 = vpop.eup %10050  ;;  %v9148_v21 = vmul.f32 %v10049_v59, %v16855_v32  ;;  %v16921_v19 = vperm.slane %v8956_v37, 1  ;;  %v9106_v54 = vadd.f32 %v16863_v10, %v9105_v46  ;;  %v9095_v15 = vsel %vm9094_vm4, %v10041_v47, %v9091_v56 }
0x1334   :  { %v9163_v26 = vmul.f32 %v16918_v23, %v16857_v12  ;;  %10052 = vrcp.f32 %v16909_v40  ;;  %v9100_v53 = vsel %vm16899_vm1, %v9099_v1, %v9095_v15  ;;  %v9121_v27 = vadd.f32 %v16874_v57, %v9120_v8 }
0x1335   :  { %v9149_v18 = vsub.f32 1.0, %v9148_v21  ;;  %10054 = vrcp.f32 %v16911_v50  ;;  %v9110_v47 = vsel %vm9109_vm13, %v16863_v10, %v9106_v54  ;;  %v9101_v61 = vmul.f32 %v16688_v55, %v9100_v53 }
0x1336   :  { %v9164_v6 = vsub.f32 1.0, %v9163_v26  ;;  %10056 = vrcp.f32 %v16913_v34  ;;  %v9115_v11 = vsel %vm16889_vm0, %v9114_v2, %v9110_v47  ;;  %v9125_v10 = vsel %vm16941_vm10, %v16874_v57, %v9121_v27 }
0x1337   :  { %v9150_v62 = vmul.f32 %v10049_v59, %v9149_v18  ;;  %10058 = vrcp.f32 %v16921_v19  ;;  %v9116_v55 = vmul.f32 %v16695_v30, %v9115_v11  ;;  %9269 = vperm.xlu0 %9436, %v9101_v61   ;;  %vm16953_vm11 = vcmp.eq.f32.partialorder %v9126_v51, 8.507059e+37 }
0x1338   :  { %v9165_v46 = vmul.f32 %v16918_v23, %v9164_v6  ;;  %v9128_v29 = vand.u32 2147483648, %v16816_v17  ;;  %vm9152_vm2 = vweird.f32 %v16855_v32  ;;  %vm9153_vm14 = vweird.f32 %v10049_v59 }
0x1339   :  { %9274 = vperm.xlu2 %9435, %v9116_v55   ;;  %v9151_v2 = vadd.f32 %v10049_v59, %v9150_v62  ;;  %v9156_v57 = vand.u32 2147483647, %v16855_v32  ;;  %v9158_v58 = vand.u32 2147483648, %v16855_v32  ;;  %v9136_v30 = vadd.f32 %v16883_v44, %v9135_v9  ;;  %vm16965_vm12 = vmor %vm9152_vm2, %vm9153_vm14 }
0x133a   :  { %v16963_v1 = vpop.eup %10052  ;;  %v9129_v8 = vor.u32 1.1754944e-38, %v9128_v29  ;;  %vm9137_vm3 = vweird.f32 %v16824_v43  ;;  %vm9138_vm7 = vweird.f32 %v16883_v44  ;;  %v9141_v17 = vand.u32 2147483647, %v16824_v43 }
0x133b   :  { %v16972_v37 = vpop.eup %10054  ;;  %v9178_v32 = vmul.f32 %v16963_v1, %v16909_v40  ;;  %v9155_v56 = vsel %vm16965_vm12, %v10049_v59, %v9151_v2  ;;  %vm9157_vm15 = vcmp.eq.f32.partialorder %v9156_v57, 8.507059e+37  ;;  %v9159_v51 = vor.u32 1.1754944e-38, %v9158_v58  ;;  %vm16978_vm0 = vmor %vm9137_vm3, %vm9138_vm7 }
0x133c   :  { %v16982_v21 = vpop.eup %10056  ;;  %v9193_v54 = vmul.f32 %v16972_v37, %v16911_v50  ;;  %v9130_v15 = vsel %vm16953_vm11, %v9129_v8, %v9125_v10  ;;  %v9140_v26 = vsel %vm16978_vm0, %v16883_v44, %v9136_v30  ;;  %vm16991_vm6 = vcmp.eq.f32.partialorder %v9141_v17, 8.507059e+37 }
0x133d   :  { %v16995_v53 = vpop.eup %10058  ;;  %v9179_v27 = vsub.f32 1.0, %v9178_v32  ;;  %v9208_v18 = vmul.f32 %v16982_v21, %v16913_v34  ;;  %v9131_v47 = vmul.f32 %v16697_v13, %v9130_v15  ;;  %v9160_v61 = vsel %vm9157_vm15, %v9159_v51, %v9155_v56 }
0x133e   :  { %v9194_v0 = vsub.f32 1.0, %v9193_v54  ;;  %v9223_v6 = vmul.f32 %v16995_v53, %v16921_v19  ;;  %v9161_v11 = vmul.f32 %v16705_v24, %v9160_v61  ;;  %v9143_v44 = vand.u32 2147483648, %v16824_v43 }
0x133f   :  { %v9180_v10 = vmul.f32 %v16963_v1, %v9179_v27  ;;  %v9209_v62 = vsub.f32 1.0, %v9208_v18  ;;  %9279 = vperm.xlu1 %9437, %v9131_v47   ;;  %v9166_v55 = vadd.f32 %v16918_v23, %v9165_v46  ;;  %vm9167_vm1 = vweird.f32 %v16857_v12 }
0x1340   :  { %v9195_v60 = vmul.f32 %v16972_v37, %v9194_v0  ;;  %v9224_v13 = vsub.f32 1.0, %v9223_v6  ;;  %v9144_v29 = vor.u32 1.1754944e-38, %v9143_v44  ;;  %vm9168_vm8 = vweird.f32 %v16918_v23 }
0x1341   :  { %v9210_v2 = vmul.f32 %v16982_v21, %v9209_v62  ;;  %9289 = vperm.xlu2 %9435, %v9161_v11   ;;  %vm17010_vm9 = vmor %vm9167_vm1, %vm9168_vm8  ;;  %v9171_v43 = vand.u32 2147483647, %v16857_v12  ;;  %v9173_v57 = vand.u32 2147483648, %v16857_v12  ;;  %vm9197_vm4 = vweird.f32 %v16911_v50 }
0x1342   :  { %v9225_v46 = vmul.f32 %v16995_v53, %v9224_v13  ;;  %v9145_v58 = vsel %vm16991_vm6, %v9144_v29, %v9140_v26  ;;  %v9170_v30 = vsel %vm17010_vm9, %v16918_v23, %v9166_v55  ;;  %v9196_v8 = vadd.f32 %v16972_v37, %v9195_v60 }
0x1343   :  { %v9146_v20 = vmul.f32 %v16699_v7, %v9145_v58  ;;  %vm9172_vm13 = vcmp.eq.f32.partialorder %v9171_v43, 8.507059e+37  ;;  %v9174_v17 = vor.u32 1.1754944e-38, %v9173_v57  ;;  %vm9198_vm10 = vweird.f32 %v16972_v37 }
0x1344   :  { %vm17026_vm11 = vmor %vm9197_vm4, %vm9198_vm10  ;;  %v9201_v32 = vand.u32 2147483647, %v16911_v50  ;;  %v9203_v56 = vand.u32 2147483648, %v16911_v50  ;;  %v9181_v51 = vadd.f32 %v16963_v1, %v9180_v10  ;;  %vm9182_vm2 = vweird.f32 %v16909_v40 }
0x1345   :  { %9284 = vperm.xlu0 %9436, %v9146_v20   ;;  %v9175_v23 = vsel %vm9172_vm13, %v9174_v17, %v9170_v30  ;;  %v9200_v7 = vsel %vm17026_vm11, %v16972_v37, %v9196_v8  ;;  %vm9183_vm14 = vweird.f32 %v16963_v1  ;;  %v9186_v9 = vand.u32 2147483647, %v16909_v40 }
0x1346   :  { %v9176_v54 = vmul.f32 %v16709_v25, %v9175_v23  ;;  %v9204_v15 = vor.u32 1.1754944e-38, %v9203_v56  ;;  %vm17040_vm12 = vmor %vm9182_vm2, %vm9183_vm14  ;;  %v9188_v50 = vand.u32 2147483648, %v16909_v40  ;;  %vm9202_vm3 = vcmp.eq.f32.partialorder %v9201_v32, 8.507059e+37 }
0x1347   :  { %v9185_v59 = vsel %vm17040_vm12, %v16963_v1, %v9181_v51  ;;  %v9211_v37 = vadd.f32 %v16982_v21, %v9210_v2  ;;  %vm9212_vm7 = vweird.f32 %v16913_v34  ;;  %vm9213_vm15 = vweird.f32 %v16982_v21 }
0x1348   :  { %9294 = vperm.xlu1 %9437, %v9176_v54   ;;  %v9205_v27 = vsel %vm9202_vm3, %v9204_v15, %v9200_v7  ;;  %v9189_v18 = vor.u32 1.1754944e-38, %v9188_v50  ;;  %v9216_v25 = vand.u32 2147483647, %v16913_v34  ;;  %vm9187_vm0 = vcmp.eq.f32.partialorder %v9186_v9, 8.507059e+37  ;;  %vm17053_vm6 = vmor %vm9212_vm7, %vm9213_vm15 }
0x1349   :  { %v9206_v47 = vmul.f32 %v16716_v5, %v9205_v27  ;;  %v9218_v1 = vand.u32 2147483648, %v16913_v34  ;;  %v9226_v61 = vadd.f32 %v16995_v53, %v9225_v46  ;;  %v9215_v6 = vsel %vm17053_vm6, %v16982_v21, %v9211_v37 }
0x134a   :  { %v9190_v0 = vsel %vm9187_vm0, %v9189_v18, %v9185_v59  ;;  %vm9227_vm1 = vweird.f32 %v16921_v19  ;;  %vm9228_vm8 = vweird.f32 %v16995_v53  ;;  %v9231_v44 = vand.u32 2147483647, %v16921_v19 }
0x134b   :  { %9304 = vperm.xlu2 %9435, %v9206_v47   ;;  %v9191_v5 = vmul.f32 %v16711_v38, %v9190_v0  ;;  %v9219_v11 = vor.u32 1.1754944e-38, %v9218_v1  ;;  %v9233_v10 = vand.u32 2147483648, %v16921_v19  ;;  %vm9217_vm9 = vcmp.eq.f32.partialorder %v9216_v25, 8.507059e+37  ;;  %vm9229_vm4 = vmor %vm9227_vm1, %vm9228_vm8 }
0x134c   :  { %v9230_v62 = vsel %vm9229_vm4, %v16995_v53, %v9226_v61  ;;  %vm9232_vm13 = vcmp.eq.f32.partialorder %v9231_v44, 8.507059e+37 }
0x134d   :  { %9299 = vperm.xlu0 %9436, %v9191_v5   ;;  %v9220_v34 = vsel %vm9217_vm9, %v9219_v11, %v9215_v6  ;;  %v9234_v55 = vor.u32 1.1754944e-38, %v9233_v10 }
0x134e   :  { %v9221_v21 = vmul.f32 %v16718_v52, %v9220_v34 }
0x134f   :  { %v9235_v60 = vsel %vm9232_vm13, %v9234_v55, %v9230_v62 }
0x1350   :  { %9309 = vperm.xlu1 %9437, %v9221_v21   ;;  %v9236_v13 = vmul.f32 %v16720_v16, %v9235_v60 }
0x1355   :  { %9314 = vperm.xlu0 %9436, %v9236_v13  }
0x137a   :  { %v9240_v38 = vpop.permute.xlu2 %9239 }
0x137b   :  { %v9317_v53 = vmul.f32 %v9240_v38, %v18156_v28 }
0x137d   :  { %v9333_v8 = vsel %vm875_vm5, %v9317_v53, 0.0 }
0x1389   :  { %v9260_v24 = vpop.permute.xlu2 %9259 }
0x138a   :  { %v9321_v16 = vmul.f32 %v9260_v24, %v18158_v35 }
0x138c   :  { %v9336_v56 = vsel %vm875_vm5, %v9321_v16, 0.0 }
0x1393   :  { %v9245_v29 = vpop.permute.xlu0 %9244  ;;  %v9275_v46 = vpop.permute.xlu2 %9274 }
0x1394   :  { %v9318_v32 = vmul.f32 %v9245_v29, %v18161_v48  ;;  %v9324_v48 = vmul.f32 %v9275_v46, %v18164_v42 }
0x1396   :  { %v9348_v35 = vsel %vm875_vm5, %v9318_v32, 0.0  ;;  %v9353_v18 = vsel %vm875_vm5, %v9324_v48, 0.0 }
0x1399   :  { %v9250_v2 = vpop.permute.xlu1 %9249 }
0x139a   :  { %v9319_v57 = vmul.f32 %v9250_v2, %v18157_v14 }
0x139b   :  { %v9255_v19 = vpop.permute.xlu0 %9254  ;;  %v9290_v23 = vpop.permute.xlu2 %9289 }
0x139c   :  { %v9334_v52 = vsel %vm875_vm5, %v9319_v57, 0.0  ;;  %v9320_v20 = vmul.f32 %v9255_v19, %v18159_v36  ;;  %v9327_v59 = vmul.f32 %v9290_v23, %v18165_v39 }
0x139d   :  { %v9335_v12 = vadd.f32 %v9334_v52, %v9333_v8 }
0x139e   :  { %v9349_v28 = vsel %vm875_vm5, %v9320_v20, 0.0 }
0x139f   :  { %v9337_v7 = vadd.f32 %v9336_v56, %v9335_v12  ;;  %v9350_v54 = vadd.f32 %v9349_v28, %v9348_v35 }
0x13a3   :  { %v9265_v43 = vpop.permute.xlu1 %9264 }
0x13a4   :  { %v9322_v14 = vmul.f32 %v9265_v43, %v18162_v4 }
0x13a6   :  { %v9351_v36 = vsel %vm875_vm5, %v9322_v14, 0.0 }
0x13a7   :  { %v9352_v50 = vadd.f32 %v9351_v36, %v9350_v54 }
0x13a9   :  { %v9270_v58 = vpop.permute.xlu0 %9269  ;;  %v9354_v47 = vadd.f32 %v9353_v18, %v9352_v50 }
0x13aa   :  { %v9323_v17 = vmul.f32 %v9270_v58, %v18160_v31 }
0x13ac   :  { %v9338_v51 = vsel %vm875_vm5, %v9323_v17, 0.0 }
0x13ad   :  { %v9339_v15 = vadd.f32 %v9338_v51, %v9337_v7 }
0x13b1   :  { %v9280_v30 = vpop.permute.xlu1 %9279 }
0x13b2   :  { %v9325_v31 = vmul.f32 %v9280_v30, %v18163_v33  ;;  %v9342_v33 = vsel %vm875_vm5, %v9327_v59, 0.0 }
0x13b4   :  { %v9340_v37 = vsel %vm875_vm5, %v9325_v31, 0.0 }
0x13b5   :  { %v9341_v27 = vadd.f32 %v9340_v37, %v9339_v15 }
0x13b7   :  { %v9285_v9 = vpop.permute.xlu0 %9284  ;;  %v9343_v0 = vadd.f32 %v9342_v33, %v9341_v27 }
0x13b8   :  { %v9326_v4 = vmul.f32 %v9285_v9, %v18166_v3  ;;  %v9305_v3 = vpop.permute.xlu2 %9304 }
0x13b9   :  { %v9330_v44 = vmul.f32 %v9305_v3, %v18170_v22 }
0x13ba   :  { %v9295_v26 = vpop.permute.xlu1 %9294  ;;  %v9355_v25 = vsel %vm875_vm5, %v9326_v4, 0.0 }
0x13bb   :  { %v9328_v1 = vmul.f32 %v9295_v26, %v18169_v63  ;;  %v9356_v61 = vadd.f32 %v9355_v25, %v9354_v47 }
0x13bd   :  { %v9357_v10 = vsel %vm875_vm5, %v9328_v1, 0.0 }
0x13be   :  { %v9358_v34 = vadd.f32 %v9357_v10, %v9356_v61 }
0x13bf   :  { %v9300_v40 = vpop.permute.xlu0 %9299 }
0x13c0   :  { %v9329_v42 = vmul.f32 %v9300_v40, %v18168_v45  ;;  %v9359_v45 = vsel %vm875_vm5, %v9330_v44, 0.0 }
0x13c1   :  { %v9360_v60 = vadd.f32 %v9359_v45, %v9358_v34 }
0x13c2   :  { %v9344_v39 = vsel %vm875_vm5, %v9329_v42, 0.0  ;;  %v9310_v6 = vpop.permute.xlu1 %9309 }
0x13c3   :  { %v9345_v5 = vadd.f32 %v9344_v39, %v9343_v0  ;;  %v9331_v11 = vmul.f32 %v9310_v6, %v18167_v49 }
0x13c5   :  { %v9346_v62 = vsel %vm875_vm5, %v9331_v11, 0.0 }
0x13c6   :  { %v9347_v21 = vadd.f32 %v9346_v62, %v9345_v5 }
0x13c7   :  { %v9315_v63 = vpop.permute.xlu0 %9314 }
0x13c8   :  { %10060 = vtanh.f32 %v9347_v21  ;;  %v9332_v55 = vmul.f32 %v9315_v63, %v18171_v41 }
0x13ca   :  { %v9361_v13 = vsel %vm875_vm5, %v9332_v55, 0.0 }
0x13cb   :  { %v9362_v38 = vadd.f32 %v9361_v13, %v9360_v60 }
0x13cd   :  { %10062 = vtanh.f32 %v9362_v38 }
0x13ce   :  { %v10061_v49 = vpop.eup %10060 }
0x13cf   :  { %9366 = vst.msk [vmem:[#allocation13 + $0x20] sm:$0xff] %vm875_vm5, %v10061_v49 }
0x13d3   :  { %v10063_v22 = vpop.eup %10062 }
0x13d4   :  { %9367 = vst.msk [vmem:[#allocation13 + $0x28] sm:$0xff] %vm875_vm5, %v10063_v22 }
0x13d5   :  { %9380 = dma.vmem_to_hbm [thread:$0]  %s9373_s1, 768, %s9375_s11, [#allocation4], %s10243_s29, %s10243_s29, %s10244_s30  }
0x13d6   :  { %10240 = dma.done.wait [#allocation4], 768  }
0x13d7   :  { %10241 = vsyncadd [#allocation4], 4294966528 }
0x13d8   :  { %9385 = vsyncpa [#allocation3], 1 }
0x13d9   :  { %9386 = vsyncpa [#allocation6], 1 }
0x13da   :  { %9387 = vsyncpa [#allocation9], 1 }
0x13db   :  { %9388 = vsyncpa [#allocation12], 1 }
0x13dc   :  { %9389 = vsyncpa [#allocation4], 1 }

</bundles_post_ra>
